<compile_context>
chip_gen: v5e
topology: v5e:2x2
jax: 0.10.0
libtpu: 0.0.40
codegen_flags: <defaults>
</compile_context>

<pallas_src>
import functools

import jax
import jax.numpy as jnp
from jax.experimental import pallas as pl
from jax.experimental.pallas import tpu as pltpu


def _round_up(x, m):
    return (x + m - 1) // m * m


def _lstm_gate_update(gates, c, Hp):
    """PyTorch gate order [i, f, g, o]; each gate block is Hp (=multiple of 128) lanes."""
    i = jax.nn.sigmoid(gates[:, 0 * Hp:1 * Hp])
    f = jax.nn.sigmoid(gates[:, 1 * Hp:2 * Hp])
    g = jnp.tanh(gates[:, 2 * Hp:3 * Hp])
    o = jax.nn.sigmoid(gates[:, 3 * Hp:4 * Hp])
    c_new = f * c + i * g
    h_new = o * jnp.tanh(c_new)
    return h_new, c_new


def _lstm_kernel(T, Bp, Hp,
                 x_ref, wih0_ref, wstep_ref, b1_ref, wfc_ref, bfc_ref,
                 out_ref, xg_ref, hh_ref):
    cdt = wih0_ref.dtype  # compute dtype for MXU operands (bf16 by default)

    # Layer-0 input projection for ALL timesteps as one big matmul (M = T*Bp).
    # The layer-0 bias is folded in via the appended ones column / bias row.
    xg_ref[...] = jnp.dot(
        x_ref[...], wih0_ref[...],
        preferred_element_type=jnp.float32).astype(xg_ref.dtype)

    b1 = jnp.broadcast_to(b1_ref[...], (Bp, 4 * Hp))   # hoisted (no CSE in loop)
    hh_ref[...] = jnp.zeros_like(hh_ref)               # [h0(t) | h1(t-1)], starts 0

    def step(t, carry):
        rec0, c0, h1, c1 = carry
        # Layer 0 gates: precomputed input term + recurrent term produced at t-1.
        row = pl.multiple_of(t * Bp, 8)                 # sublane-aligned slice start
        g0 = xg_ref[pl.ds(row, Bp), :].astype(jnp.float32) + rec0
        h0, c0 = _lstm_gate_update(g0, c0, Hp)
        hh_ref[:, :Hp] = h0.astype(cdt)                 # h1 half still holds h1(t-1)

        # ONE fused K=2Hp matmul:
        #   cols [0, 4Hp)   -> layer-1 gates at t
        #   cols [4Hp, 8Hp) -> layer-0 recurrent term for t+1 (h0 @ whh0^T)
        big = jnp.dot(hh_ref[...], wstep_ref[...],
                      preferred_element_type=jnp.float32)
        g1 = big[:, :4 * Hp] + b1
        rec0 = big[:, 4 * Hp:]

        h1, c1 = _lstm_gate_update(g1, c1, Hp)
        hh_ref[:, Hp:] = h1.astype(cdt)
        return rec0, c0, h1, c1

    z4 = jnp.zeros((Bp, 4 * Hp), jnp.float32)
    z1 = jnp.zeros((Bp, Hp), jnp.float32)
    _, _, h1, _ = jax.lax.fori_loop(0, T, step, (z4, z1, z1, z1),
                                    unroll=min(T, 8))

    # FC head on the final top-layer hidden state; 128-lane-dense output store.
    out_ref[...] = (
        jnp.dot(h1.astype(cdt), wfc_ref[...], preferred_element_type=jnp.float32)
        + bfc_ref[...])


def _prep_params(params, H, Hp, output_size, out_pad, dtype):
    """Pad each gate block H->Hp, build the fused step weight, fold biases."""
    (wih0, whh0, bih0, bhh0, wih1, whh1, bih1, bhh1, wfc, bfc) = params

    def gate_pad_rows(w):  # (4H, K) -> (4Hp, K): zero-pad each gate block's outputs
        K = w.shape[1]
        return jnp.pad(w.reshape(4, H, K),
                       ((0, 0), (0, Hp - H), (0, 0))).reshape(4 * Hp, K)

    def gate_pad_vec(b):   # (4H,) -> (4Hp,)
        return jnp.pad(b.reshape(4, H), ((0, 0), (0, Hp - H))).reshape(4 * Hp)

    def pad_in(w):         # (4Hp, H) -> (4Hp, Hp): pad the input-feature dim
        return jnp.pad(w, ((0, 0), (0, Hp - H)))

    # Layer-0 input projection with the bias folded in as an extra input row
    # (pairs with the ones column appended to x): shape (D+1, 4Hp).
    b0 = (gate_pad_vec(bih0) + gate_pad_vec(bhh0)).reshape(1, 4 * Hp)
    wih0a = jnp.concatenate([gate_pad_rows(wih0).T, b0], axis=0).astype(dtype)

    whh0T = pad_in(gate_pad_rows(whh0)).T          # (Hp, 4Hp)
    wih1T = pad_in(gate_pad_rows(wih1)).T          # (Hp, 4Hp)
    whh1T = pad_in(gate_pad_rows(whh1)).T          # (Hp, 4Hp)
    # Fused per-step weight (2Hp, 8Hp); bottom-right is zero (h1 does not feed
    # layer-0's recurrence).
    wstep = jnp.concatenate(
        [jnp.concatenate([wih1T, whh0T], axis=1),
         jnp.concatenate([whh1T, jnp.zeros((Hp, 4 * Hp), jnp.float32)], axis=1)],
        axis=0).astype(dtype)                      # (2Hp, 8Hp)

    b1 = (gate_pad_vec(bih1) + gate_pad_vec(bhh1)).reshape(1, 4 * Hp).astype(jnp.float32)

    wfcT = jnp.zeros((Hp, out_pad), jnp.float32).at[:H, :output_size].set(wfc.T)
    wfcT = wfcT.astype(dtype)                      # (Hp, out_pad)
    bfcP = jnp.zeros((1, out_pad), jnp.float32).at[0, :output_size].set(bfc)
    return wih0a, wstep, b1, wfcT, bfcP


def lstm_forward(x, params, hidden_size, output_size, compute_dtype=jnp.bfloat16):
    """x: (B, T, D) float32 (PyTorch batch_first). Returns (B, output_size) float32."""
    B, T, D = x.shape
    H = hidden_size
    Hp = _round_up(H, 128)     # lane-aligned gate blocks
    Bp = _round_up(B, 8)       # sublane-aligned batch (aligned per-step xg slices)
    out_pad = 128              # lane-dense FC output block

    wih0a, wstep, b1, wfcT, bfcP = _prep_params(
        params, H, Hp, output_size, out_pad, compute_dtype)

    # Time-major, batch zero-padded, ones column appended for the folded layer-0
    # bias, flattened to one (T*Bp, D+1) MXU operand.
    xt = jnp.transpose(x, (1, 0, 2))                           # (T, B, D)
    xt = jnp.pad(xt, ((0, 0), (0, Bp - B), (0, 0)))            # (T, Bp, D)
    x2d = xt.reshape(T * Bp, D).astype(compute_dtype)
    x2d = jnp.concatenate([x2d, jnp.ones((T * Bp, 1), compute_dtype)], axis=-1)

    kernel = functools.partial(_lstm_kernel, T, Bp, Hp)
    vmem = pl.BlockSpec(memory_space=pltpu.MemorySpace.VMEM)

    # VMEM budget: inputs + output + scratches, with headroom, clamped so the
    # request is valid on all of v5e/v6e (128 MiB phys) and v7x (64 MiB phys).
    csize = jnp.dtype(compute_dtype).itemsize
    vmem_est = (x2d.size * csize + wih0a.size * csize + wstep.size * csize
                + b1.size * 4 + wfcT.size * csize + bfcP.size * 4
                + Bp * out_pad * 4
                + T * Bp * 4 * Hp * csize          # xg scratch
                + Bp * 2 * Hp * csize)             # hh scratch
    vmem_limit = int(min(max(4 * vmem_est, 16 * 1024 * 1024), 64 * 1024 * 1024))

    out = pl.pallas_call(
        kernel,
        out_shape=jax.ShapeDtypeStruct((Bp, out_pad), jnp.float32),
        in_specs=[vmem] * 6,
        out_specs=vmem,
        scratch_shapes=[
            pltpu.VMEM((T * Bp, 4 * Hp), compute_dtype),   # xg: batched input proj
            pltpu.VMEM((Bp, 2 * Hp), compute_dtype),       # hh = [h0 | h1]
        ],
        compiler_params=pltpu.CompilerParams(vmem_limit_bytes=vmem_limit),
    )(x2d, wih0a, wstep, b1, wfcT, bfcP)

    return out[:B, :output_size]


def lstm_reference(x, params, hidden_size):
    """Pure-JAX f32 reference matching torch.nn.LSTM(batch_first=True) + Linear."""
    (wih0, whh0, bih0, bhh0, wih1, whh1, bih1, bhh1, wfc, bfc) = params
    H = hidden_size
    B = x.shape[0]

    def cell(x_t, h, c, w_ih, w_hh, b_ih, b_hh):
        gates = x_t @ w_ih.T + h @ w_hh.T + b_ih + b_hh
        i = jax.nn.sigmoid(gates[:, 0 * H:1 * H])
        f = jax.nn.sigmoid(gates[:, 1 * H:2 * H])
        g = jnp.tanh(gates[:, 2 * H:3 * H])
        o = jax.nn.sigmoid(gates[:, 3 * H:4 * H])
        c_new = f * c + i * g
        h_new = o * jnp.tanh(c_new)
        return h_new, c_new

    def step(carry, x_t):
        h0, c0, h1, c1 = carry
        h0, c0 = cell(x_t, h0, c0, wih0, whh0, bih0, bhh0)
        h1, c1 = cell(h0, h1, c1, wih1, whh1, bih1, bhh1)
        return (h0, c0, h1, c1), h1

    z = jnp.zeros((B, H), jnp.float32)
    (_, _, h1, _), _ = jax.lax.scan(step, (z, z, z, z), jnp.transpose(x, (1, 0, 2)))
    return h1 @ wfc.T + bfc


def init_params(key, input_size, hidden_size, output_size):
    H = hidden_size
    k = 1.0 / jnp.sqrt(jnp.float32(H))
    keys = jax.random.split(key, 10)
    u = lambda kk, shape: jax.random.uniform(kk, shape, jnp.float32, -k, k)
    wih0 = u(keys[0], (4 * H, input_size))
    whh0 = u(keys[1], (4 * H, H))
    bih0 = u(keys[2], (4 * H,))
    bhh0 = u(keys[3], (4 * H,))
    wih1 = u(keys[4], (4 * H, H))
    whh1 = u(keys[5], (4 * H, H))
    bih1 = u(keys[6], (4 * H,))
    bhh1 = u(keys[7], (4 * H,))
    wfc = u(keys[8], (output_size, H))
    bfc = u(keys[9], (output_size,))
    return (wih0, whh0, bih0, bhh0, wih1, whh1, bih1, bhh1, wfc, bfc)


if __name__ == "__main__":
    # Shapes implied by the PyTorch module: x is (batch, seq, input_size),
    # hidden_size=50, num_layers=2, output_size=1.
    B, T, D = 2, 8, 16
    hidden_size = 50
    output_size = 1

    key = jax.random.PRNGKey(0)
    kx, kp = jax.random.split(key)
    x = jax.random.normal(kx, (B, T, D), jnp.float32)
    params = init_params(kp, D, hidden_size, output_size)

    ref = lstm_reference(x, params, hidden_size)

    # f32 path: tight structural-correctness check against the pure-JAX reference.
    out_f32 = jax.block_until_ready(
        lstm_forward(x, params, hidden_size, output_size, compute_dtype=jnp.float32))
    assert out_f32.shape == (B, output_size)
    assert jnp.allclose(out_f32, ref, rtol=1e-3, atol=1e-3), (out_f32, ref)

    # bf16 path (performance default): MXU-native weights + bf16 xg scratch,
    # f32 accumulation and f32 gate/state math.
    out_bf16 = jax.block_until_ready(
        lstm_forward(x, params, hidden_size, output_size, compute_dtype=jnp.bfloat16))
    assert out_bf16.shape == (B, output_size)
    assert jnp.allclose(out_bf16, ref, rtol=2e-2, atol=2e-2), (out_bf16, ref)

    print("KERNEL_OK")
</pallas_src>

<mosaic_0001>
module attributes {stable_mosaic.version = 11 : i64} {
  func.func @_lstm_kernel(%arg0: memref<64x17xf32, #tpu.memory_space<vmem>>, %arg1: memref<17x512xf32, #tpu.memory_space<vmem>>, %arg2: memref<256x1024xf32, #tpu.memory_space<vmem>>, %arg3: memref<1x512xf32, #tpu.memory_space<vmem>>, %arg4: memref<128x128xf32, #tpu.memory_space<vmem>>, %arg5: memref<1x128xf32, #tpu.memory_space<vmem>>, %arg6: memref<8x128xf32, #tpu.memory_space<vmem>>, %arg7: memref<64x512xf32, #tpu.memory_space<vmem>>, %arg8: memref<8x256xf32, #tpu.memory_space<vmem>>) attributes {dimension_semantics = [], scalar_prefetch = 0 : i64, scratch_operands = 2 : i64, tpu.core_type = #tpu.core_type<tc>} {
    %c0 = arith.constant 0 : index
    %c0_0 = arith.constant 0 : index
    %0 = vector.load %arg0[%c0, %c0_0] : memref<64x17xf32, #tpu.memory_space<vmem>>, vector<64x17xf32>
    %c0_1 = arith.constant 0 : index
    %c0_2 = arith.constant 0 : index
    %1 = vector.load %arg1[%c0_1, %c0_2] : memref<17x512xf32, #tpu.memory_space<vmem>>, vector<17x512xf32>
    %cst = arith.constant dense<0.000000e+00> : vector<64x512xf32>
    %2 = tpu.matmul %0, %1, %cst {dimension_numbers = #tpu.dot_dimension_numbers<[1], [0], [0], [1], [0, 0, 1, 1], [], []>} : vector<64x17xf32>, vector<17x512xf32>, vector<64x512xf32> -> vector<64x512xf32>
    %c0_3 = arith.constant 0 : index
    %c0_4 = arith.constant 0 : index
    %3 = vector.load %arg7[%c0_3, %c0_4] : memref<64x512xf32, #tpu.memory_space<vmem>>, vector<64x512xf32>
    tpu.vector_store %arg7[%c0_3, %c0_4], %2 {strides = array<i32>} : memref<64x512xf32, #tpu.memory_space<vmem>>, vector<64x512xf32>,
    %c0_5 = arith.constant 0 : index
    %c0_6 = arith.constant 0 : index
    %4 = vector.load %arg3[%c0_5, %c0_6] : memref<1x512xf32, #tpu.memory_space<vmem>>, vector<1x512xf32>
    %5 = vector.shape_cast %4 : vector<1x512xf32> to vector<1x512xf32>
    %6 = vector.broadcast %5 : vector<1x512xf32> to vector<8x512xf32>
    %cst_7 = arith.constant 0.000000e+00 : f32
    %7 = vector.broadcast %cst_7 : f32 to vector<8x256xf32>
    %c0_8 = arith.constant 0 : index
    %c0_9 = arith.constant 0 : index
    %8 = vector.load %arg8[%c0_8, %c0_9] : memref<8x256xf32, #tpu.memory_space<vmem>>, vector<8x256xf32>
    tpu.vector_store %arg8[%c0_8, %c0_9], %7 {strides = array<i32>} : memref<8x256xf32, #tpu.memory_space<vmem>>, vector<8x256xf32>,
    %cst_10 = arith.constant 0.000000e+00 : f32
    %9 = vector.broadcast %cst_10 : f32 to vector<8x512xf32>
    %cst_11 = arith.constant 0.000000e+00 : f32
    %10 = vector.broadcast %cst_11 : f32 to vector<8x128xf32>
    %c0_i32 = arith.constant 0 : i32
    %c8_i32 = arith.constant 8 : i32
    %11 = arith.muli %c0_i32, %c8_i32 : i32
    %12 = tpu.assume_multiple %11, 8 : i32
    %13 = arith.index_cast %12 : i32 to index
    %c0_12 = arith.constant 0 : index
    %14 = vector.load %arg7[%13, %c0_12] : memref<64x512xf32, #tpu.memory_space<vmem>>, vector<8x512xf32>
    %15 = arith.addf %14, %9 : vector<8x512xf32>
    %16 = vector.extract_strided_slice %15 {offsets = [0, 0], sizes = [8, 128], strides = [1, 1]} : vector<8x512xf32> to vector<8x128xf32>
    %17 = arith.negf %16 : vector<8x128xf32>
    %18 = math.exp %17 : vector<8x128xf32>
    %cst_13 = arith.constant 1.000000e+00 : f32
    %19 = vector.broadcast %cst_13 : f32 to vector<8x128xf32>
    %20 = arith.addf %19, %18 : vector<8x128xf32>
    %21 = arith.divf %19, %20 : vector<8x128xf32>
    %22 = vector.extract_strided_slice %15 {offsets = [0, 128], sizes = [8, 128], strides = [1, 1]} : vector<8x512xf32> to vector<8x128xf32>
    %23 = arith.negf %22 : vector<8x128xf32>
    %24 = math.exp %23 : vector<8x128xf32>
    %cst_14 = arith.constant 1.000000e+00 : f32
    %25 = vector.broadcast %cst_14 : f32 to vector<8x128xf32>
    %26 = arith.addf %25, %24 : vector<8x128xf32>
    %27 = arith.divf %25, %26 : vector<8x128xf32>
    %28 = vector.extract_strided_slice %15 {offsets = [0, 256], sizes = [8, 128], strides = [1, 1]} : vector<8x512xf32> to vector<8x128xf32>
    %29 = math.tanh %28 : vector<8x128xf32>
    %30 = vector.extract_strided_slice %15 {offsets = [0, 384], sizes = [8, 128], strides = [1, 1]} : vector<8x512xf32> to vector<8x128xf32>
    %31 = arith.negf %30 : vector<8x128xf32>
    %32 = math.exp %31 : vector<8x128xf32>
    %cst_15 = arith.constant 1.000000e+00 : f32
    %33 = vector.broadcast %cst_15 : f32 to vector<8x128xf32>
    %34 = arith.addf %33, %32 : vector<8x128xf32>
    %35 = arith.divf %33, %34 : vector<8x128xf32>
    %36 = arith.mulf %27, %10 : vector<8x128xf32>
    %37 = arith.mulf %21, %29 : vector<8x128xf32>
    %38 = arith.addf %36, %37 : vector<8x128xf32>
    %39 = math.tanh %38 : vector<8x128xf32>
    %40 = arith.mulf %35, %39 : vector<8x128xf32>
    %c0_16 = arith.constant 0 : index
    %c0_17 = arith.constant 0 : index
    %41 = vector.load %arg8[%c0_16, %c0_17] : memref<8x256xf32, #tpu.memory_space<vmem>>, vector<8x128xf32>
    tpu.vector_store %arg8[%c0_16, %c0_17], %40 {strides = array<i32>} : memref<8x256xf32, #tpu.memory_space<vmem>>, vector<8x128xf32>,
    %c0_18 = arith.constant 0 : index
    %c0_19 = arith.constant 0 : index
    %42 = vector.load %arg8[%c0_18, %c0_19] : memref<8x256xf32, #tpu.memory_space<vmem>>, vector<8x256xf32>
    %c0_20 = arith.constant 0 : index
    %c0_21 = arith.constant 0 : index
    %43 = vector.load %arg2[%c0_20, %c0_21] : memref<256x1024xf32, #tpu.memory_space<vmem>>, vector<256x1024xf32>
    %cst_22 = arith.constant dense<0.000000e+00> : vector<8x1024xf32>
    %44 = tpu.matmul %42, %43, %cst_22 {dimension_numbers = #tpu.dot_dimension_numbers<[1], [0], [0], [1], [0, 0, 1, 1], [], []>} : vector<8x256xf32>, vector<256x1024xf32>, vector<8x1024xf32> -> vector<8x1024xf32>
    %45 = vector.extract_strided_slice %44 {offsets = [0, 0], sizes = [8, 512], strides = [1, 1]} : vector<8x1024xf32> to vector<8x512xf32>
    %46 = arith.addf %45, %6 : vector<8x512xf32>
    %47 = vector.extract_strided_slice %44 {offsets = [0, 512], sizes = [8, 512], strides = [1, 1]} : vector<8x1024xf32> to vector<8x512xf32>
    %48 = vector.extract_strided_slice %46 {offsets = [0, 0], sizes = [8, 128], strides = [1, 1]} : vector<8x512xf32> to vector<8x128xf32>
    %49 = arith.negf %48 : vector<8x128xf32>
    %50 = math.exp %49 : vector<8x128xf32>
    %cst_23 = arith.constant 1.000000e+00 : f32
    %51 = vector.broadcast %cst_23 : f32 to vector<8x128xf32>
    %52 = arith.addf %51, %50 : vector<8x128xf32>
    %53 = arith.divf %51, %52 : vector<8x128xf32>
    %54 = vector.extract_strided_slice %46 {offsets = [0, 128], sizes = [8, 128], strides = [1, 1]} : vector<8x512xf32> to vector<8x128xf32>
    %55 = arith.negf %54 : vector<8x128xf32>
    %56 = math.exp %55 : vector<8x128xf32>
    %cst_24 = arith.constant 1.000000e+00 : f32
    %57 = vector.broadcast %cst_24 : f32 to vector<8x128xf32>
    %58 = arith.addf %57, %56 : vector<8x128xf32>
    %59 = arith.divf %57, %58 : vector<8x128xf32>
    %60 = vector.extract_strided_slice %46 {offsets = [0, 256], sizes = [8, 128], strides = [1, 1]} : vector<8x512xf32> to vector<8x128xf32>
    %61 = math.tanh %60 : vector<8x128xf32>
    %62 = vector.extract_strided_slice %46 {offsets = [0, 384], sizes = [8, 128], strides = [1, 1]} : vector<8x512xf32> to vector<8x128xf32>
    %63 = arith.negf %62 : vector<8x128xf32>
    %64 = math.exp %63 : vector<8x128xf32>
    %cst_25 = arith.constant 1.000000e+00 : f32
    %65 = vector.broadcast %cst_25 : f32 to vector<8x128xf32>
    %66 = arith.addf %65, %64 : vector<8x128xf32>
    %67 = arith.divf %65, %66 : vector<8x128xf32>
    %68 = arith.mulf %59, %10 : vector<8x128xf32>
    %69 = arith.mulf %53, %61 : vector<8x128xf32>
    %70 = arith.addf %68, %69 : vector<8x128xf32>
    %71 = math.tanh %70 : vector<8x128xf32>
    %72 = arith.mulf %67, %71 : vector<8x128xf32>
    %c0_26 = arith.constant 0 : index
    %c128 = arith.constant 128 : index
    %73 = vector.load %arg8[%c0_26, %c128] : memref<8x256xf32, #tpu.memory_space<vmem>>, vector<8x128xf32>
    tpu.vector_store %arg8[%c0_26, %c128], %72 {strides = array<i32>} : memref<8x256xf32, #tpu.memory_space<vmem>>, vector<8x128xf32>,
    %c1_i32 = arith.constant 1 : i32
    %c8_i32_27 = arith.constant 8 : i32
    %74 = arith.muli %c1_i32, %c8_i32_27 : i32
    %75 = tpu.assume_multiple %74, 8 : i32
    %76 = arith.index_cast %75 : i32 to index
    %c0_28 = arith.constant 0 : index
    %77 = vector.load %arg7[%76, %c0_28] : memref<64x512xf32, #tpu.memory_space<vmem>>, vector<8x512xf32>
    %78 = arith.addf %77, %47 : vector<8x512xf32>
    %79 = vector.extract_strided_slice %78 {offsets = [0, 0], sizes = [8, 128], strides = [1, 1]} : vector<8x512xf32> to vector<8x128xf32>
    %80 = arith.negf %79 : vector<8x128xf32>
    %81 = math.exp %80 : vector<8x128xf32>
    %cst_29 = arith.constant 1.000000e+00 : f32
    %82 = vector.broadcast %cst_29 : f32 to vector<8x128xf32>
    %83 = arith.addf %82, %81 : vector<8x128xf32>
    %84 = arith.divf %82, %83 : vector<8x128xf32>
    %85 = vector.extract_strided_slice %78 {offsets = [0, 128], sizes = [8, 128], strides = [1, 1]} : vector<8x512xf32> to vector<8x128xf32>
    %86 = arith.negf %85 : vector<8x128xf32>
    %87 = math.exp %86 : vector<8x128xf32>
    %cst_30 = arith.constant 1.000000e+00 : f32
    %88 = vector.broadcast %cst_30 : f32 to vector<8x128xf32>
    %89 = arith.addf %88, %87 : vector<8x128xf32>
    %90 = arith.divf %88, %89 : vector<8x128xf32>
    %91 = vector.extract_strided_slice %78 {offsets = [0, 256], sizes = [8, 128], strides = [1, 1]} : vector<8x512xf32> to vector<8x128xf32>
    %92 = math.tanh %91 : vector<8x128xf32>
    %93 = vector.extract_strided_slice %78 {offsets = [0, 384], sizes = [8, 128], strides = [1, 1]} : vector<8x512xf32> to vector<8x128xf32>
    %94 = arith.negf %93 : vector<8x128xf32>
    %95 = math.exp %94 : vector<8x128xf32>
    %cst_31 = arith.constant 1.000000e+00 : f32
    %96 = vector.broadcast %cst_31 : f32 to vector<8x128xf32>
    %97 = arith.addf %96, %95 : vector<8x128xf32>
    %98 = arith.divf %96, %97 : vector<8x128xf32>
    %99 = arith.mulf %90, %38 : vector<8x128xf32>
    %100 = arith.mulf %84, %92 : vector<8x128xf32>
    %101 = arith.addf %99, %100 : vector<8x128xf32>
    %102 = math.tanh %101 : vector<8x128xf32>
    %103 = arith.mulf %98, %102 : vector<8x128xf32>
    %c0_32 = arith.constant 0 : index
    %c0_33 = arith.constant 0 : index
    %104 = vector.load %arg8[%c0_32, %c0_33] : memref<8x256xf32, #tpu.memory_space<vmem>>, vector<8x128xf32>
    tpu.vector_store %arg8[%c0_32, %c0_33], %103 {strides = array<i32>} : memref<8x256xf32, #tpu.memory_space<vmem>>, vector<8x128xf32>,
    %c0_34 = arith.constant 0 : index
    %c0_35 = arith.constant 0 : index
    %105 = vector.load %arg8[%c0_34, %c0_35] : memref<8x256xf32, #tpu.memory_space<vmem>>, vector<8x256xf32>
    %c0_36 = arith.constant 0 : index
    %c0_37 = arith.constant 0 : index
    %106 = vector.load %arg2[%c0_36, %c0_37] : memref<256x1024xf32, #tpu.memory_space<vmem>>, vector<256x1024xf32>
    %cst_38 = arith.constant dense<0.000000e+00> : vector<8x1024xf32>
    %107 = tpu.matmul %105, %106, %cst_38 {dimension_numbers = #tpu.dot_dimension_numbers<[1], [0], [0], [1], [0, 0, 1, 1], [], []>} : vector<8x256xf32>, vector<256x1024xf32>, vector<8x1024xf32> -> vector<8x1024xf32>
    %108 = vector.extract_strided_slice %107 {offsets = [0, 0], sizes = [8, 512], strides = [1, 1]} : vector<8x1024xf32> to vector<8x512xf32>
    %109 = arith.addf %108, %6 : vector<8x512xf32>
    %110 = vector.extract_strided_slice %107 {offsets = [0, 512], sizes = [8, 512], strides = [1, 1]} : vector<8x1024xf32> to vector<8x512xf32>
    %111 = vector.extract_strided_slice %109 {offsets = [0, 0], sizes = [8, 128], strides = [1, 1]} : vector<8x512xf32> to vector<8x128xf32>
    %112 = arith.negf %111 : vector<8x128xf32>
    %113 = math.exp %112 : vector<8x128xf32>
    %cst_39 = arith.constant 1.000000e+00 : f32
    %114 = vector.broadcast %cst_39 : f32 to vector<8x128xf32>
    %115 = arith.addf %114, %113 : vector<8x128xf32>
    %116 = arith.divf %114, %115 : vector<8x128xf32>
    %117 = vector.extract_strided_slice %109 {offsets = [0, 128], sizes = [8, 128], strides = [1, 1]} : vector<8x512xf32> to vector<8x128xf32>
    %118 = arith.negf %117 : vector<8x128xf32>
    %119 = math.exp %118 : vector<8x128xf32>
    %cst_40 = arith.constant 1.000000e+00 : f32
    %120 = vector.broadcast %cst_40 : f32 to vector<8x128xf32>
    %121 = arith.addf %120, %119 : vector<8x128xf32>
    %122 = arith.divf %120, %121 : vector<8x128xf32>
    %123 = vector.extract_strided_slice %109 {offsets = [0, 256], sizes = [8, 128], strides = [1, 1]} : vector<8x512xf32> to vector<8x128xf32>
    %124 = math.tanh %123 : vector<8x128xf32>
    %125 = vector.extract_strided_slice %109 {offsets = [0, 384], sizes = [8, 128], strides = [1, 1]} : vector<8x512xf32> to vector<8x128xf32>
    %126 = arith.negf %125 : vector<8x128xf32>
    %127 = math.exp %126 : vector<8x128xf32>
    %cst_41 = arith.constant 1.000000e+00 : f32
    %128 = vector.broadcast %cst_41 : f32 to vector<8x128xf32>
    %129 = arith.addf %128, %127 : vector<8x128xf32>
    %130 = arith.divf %128, %129 : vector<8x128xf32>
    %131 = arith.mulf %122, %70 : vector<8x128xf32>
    %132 = arith.mulf %116, %124 : vector<8x128xf32>
    %133 = arith.addf %131, %132 : vector<8x128xf32>
    %134 = math.tanh %133 : vector<8x128xf32>
    %135 = arith.mulf %130, %134 : vector<8x128xf32>
    %c0_42 = arith.constant 0 : index
    %c128_43 = arith.constant 128 : index
    %136 = vector.load %arg8[%c0_42, %c128_43] : memref<8x256xf32, #tpu.memory_space<vmem>>, vector<8x128xf32>
    tpu.vector_store %arg8[%c0_42, %c128_43], %135 {strides = array<i32>} : memref<8x256xf32, #tpu.memory_space<vmem>>, vector<8x128xf32>,
    %c2_i32 = arith.constant 2 : i32
    %c8_i32_44 = arith.constant 8 : i32
    %137 = arith.muli %c2_i32, %c8_i32_44 : i32
    %138 = tpu.assume_multiple %137, 8 : i32
    %139 = arith.index_cast %138 : i32 to index
    %c0_45 = arith.constant 0 : index
    %140 = vector.load %arg7[%139, %c0_45] : memref<64x512xf32, #tpu.memory_space<vmem>>, vector<8x512xf32>
    %141 = arith.addf %140, %110 : vector<8x512xf32>
    %142 = vector.extract_strided_slice %141 {offsets = [0, 0], sizes = [8, 128], strides = [1, 1]} : vector<8x512xf32> to vector<8x128xf32>
    %143 = arith.negf %142 : vector<8x128xf32>
    %144 = math.exp %143 : vector<8x128xf32>
    %cst_46 = arith.constant 1.000000e+00 : f32
    %145 = vector.broadcast %cst_46 : f32 to vector<8x128xf32>
    %146 = arith.addf %145, %144 : vector<8x128xf32>
    %147 = arith.divf %145, %146 : vector<8x128xf32>
    %148 = vector.extract_strided_slice %141 {offsets = [0, 128], sizes = [8, 128], strides = [1, 1]} : vector<8x512xf32> to vector<8x128xf32>
    %149 = arith.negf %148 : vector<8x128xf32>
    %150 = math.exp %149 : vector<8x128xf32>
    %cst_47 = arith.constant 1.000000e+00 : f32
    %151 = vector.broadcast %cst_47 : f32 to vector<8x128xf32>
    %152 = arith.addf %151, %150 : vector<8x128xf32>
    %153 = arith.divf %151, %152 : vector<8x128xf32>
    %154 = vector.extract_strided_slice %141 {offsets = [0, 256], sizes = [8, 128], strides = [1, 1]} : vector<8x512xf32> to vector<8x128xf32>
    %155 = math.tanh %154 : vector<8x128xf32>
    %156 = vector.extract_strided_slice %141 {offsets = [0, 384], sizes = [8, 128], strides = [1, 1]} : vector<8x512xf32> to vector<8x128xf32>
    %157 = arith.negf %156 : vector<8x128xf32>
    %158 = math.exp %157 : vector<8x128xf32>
    %cst_48 = arith.constant 1.000000e+00 : f32
    %159 = vector.broadcast %cst_48 : f32 to vector<8x128xf32>
    %160 = arith.addf %159, %158 : vector<8x128xf32>
    %161 = arith.divf %159, %160 : vector<8x128xf32>
    %162 = arith.mulf %153, %101 : vector<8x128xf32>
    %163 = arith.mulf %147, %155 : vector<8x128xf32>
    %164 = arith.addf %162, %163 : vector<8x128xf32>
    %165 = math.tanh %164 : vector<8x128xf32>
    %166 = arith.mulf %161, %165 : vector<8x128xf32>
    %c0_49 = arith.constant 0 : index
    %c0_50 = arith.constant 0 : index
    %167 = vector.load %arg8[%c0_49, %c0_50] : memref<8x256xf32, #tpu.memory_space<vmem>>, vector<8x128xf32>
    tpu.vector_store %arg8[%c0_49, %c0_50], %166 {strides = array<i32>} : memref<8x256xf32, #tpu.memory_space<vmem>>, vector<8x128xf32>,
    %c0_51 = arith.constant 0 : index
    %c0_52 = arith.constant 0 : index
    %168 = vector.load %arg8[%c0_51, %c0_52] : memref<8x256xf32, #tpu.memory_space<vmem>>, vector<8x256xf32>
    %c0_53 = arith.constant 0 : index
    %c0_54 = arith.constant 0 : index
    %169 = vector.load %arg2[%c0_53, %c0_54] : memref<256x1024xf32, #tpu.memory_space<vmem>>, vector<256x1024xf32>
    %cst_55 = arith.constant dense<0.000000e+00> : vector<8x1024xf32>
    %170 = tpu.matmul %168, %169, %cst_55 {dimension_numbers = #tpu.dot_dimension_numbers<[1], [0], [0], [1], [0, 0, 1, 1], [], []>} : vector<8x256xf32>, vector<256x1024xf32>, vector<8x1024xf32> -> vector<8x1024xf32>
    %171 = vector.extract_strided_slice %170 {offsets = [0, 0], sizes = [8, 512], strides = [1, 1]} : vector<8x1024xf32> to vector<8x512xf32>
    %172 = arith.addf %171, %6 : vector<8x512xf32>
    %173 = vector.extract_strided_slice %170 {offsets = [0, 512], sizes = [8, 512], strides = [1, 1]} : vector<8x1024xf32> to vector<8x512xf32>
    %174 = vector.extract_strided_slice %172 {offsets = [0, 0], sizes = [8, 128], strides = [1, 1]} : vector<8x512xf32> to vector<8x128xf32>
    %175 = arith.negf %174 : vector<8x128xf32>
    %176 = math.exp %175 : vector<8x128xf32>
    %cst_56 = arith.constant 1.000000e+00 : f32
    %177 = vector.broadcast %cst_56 : f32 to vector<8x128xf32>
    %178 = arith.addf %177, %176 : vector<8x128xf32>
    %179 = arith.divf %177, %178 : vector<8x128xf32>
    %180 = vector.extract_strided_slice %172 {offsets = [0, 128], sizes = [8, 128], strides = [1, 1]} : vector<8x512xf32> to vector<8x128xf32>
    %181 = arith.negf %180 : vector<8x128xf32>
    %182 = math.exp %181 : vector<8x128xf32>
    %cst_57 = arith.constant 1.000000e+00 : f32
    %183 = vector.broadcast %cst_57 : f32 to vector<8x128xf32>
    %184 = arith.addf %183, %182 : vector<8x128xf32>
    %185 = arith.divf %183, %184 : vector<8x128xf32>
    %186 = vector.extract_strided_slice %172 {offsets = [0, 256], sizes = [8, 128], strides = [1, 1]} : vector<8x512xf32> to vector<8x128xf32>
    %187 = math.tanh %186 : vector<8x128xf32>
    %188 = vector.extract_strided_slice %172 {offsets = [0, 384], sizes = [8, 128], strides = [1, 1]} : vector<8x512xf32> to vector<8x128xf32>
    %189 = arith.negf %188 : vector<8x128xf32>
    %190 = math.exp %189 : vector<8x128xf32>
    %cst_58 = arith.constant 1.000000e+00 : f32
    %191 = vector.broadcast %cst_58 : f32 to vector<8x128xf32>
    %192 = arith.addf %191, %190 : vector<8x128xf32>
    %193 = arith.divf %191, %192 : vector<8x128xf32>
    %194 = arith.mulf %185, %133 : vector<8x128xf32>
    %195 = arith.mulf %179, %187 : vector<8x128xf32>
    %196 = arith.addf %194, %195 : vector<8x128xf32>
    %197 = math.tanh %196 : vector<8x128xf32>
    %198 = arith.mulf %193, %197 : vector<8x128xf32>
    %c0_59 = arith.constant 0 : index
    %c128_60 = arith.constant 128 : index
    %199 = vector.load %arg8[%c0_59, %c128_60] : memref<8x256xf32, #tpu.memory_space<vmem>>, vector<8x128xf32>
    tpu.vector_store %arg8[%c0_59, %c128_60], %198 {strides = array<i32>} : memref<8x256xf32, #tpu.memory_space<vmem>>, vector<8x128xf32>,
    %c3_i32 = arith.constant 3 : i32
    %c8_i32_61 = arith.constant 8 : i32
    %200 = arith.muli %c3_i32, %c8_i32_61 : i32
    %201 = tpu.assume_multiple %200, 8 : i32
    %202 = arith.index_cast %201 : i32 to index
    %c0_62 = arith.constant 0 : index
    %203 = vector.load %arg7[%202, %c0_62] : memref<64x512xf32, #tpu.memory_space<vmem>>, vector<8x512xf32>
    %204 = arith.addf %203, %173 : vector<8x512xf32>
    %205 = vector.extract_strided_slice %204 {offsets = [0, 0], sizes = [8, 128], strides = [1, 1]} : vector<8x512xf32> to vector<8x128xf32>
    %206 = arith.negf %205 : vector<8x128xf32>
    %207 = math.exp %206 : vector<8x128xf32>
    %cst_63 = arith.constant 1.000000e+00 : f32
    %208 = vector.broadcast %cst_63 : f32 to vector<8x128xf32>
    %209 = arith.addf %208, %207 : vector<8x128xf32>
    %210 = arith.divf %208, %209 : vector<8x128xf32>
    %211 = vector.extract_strided_slice %204 {offsets = [0, 128], sizes = [8, 128], strides = [1, 1]} : vector<8x512xf32> to vector<8x128xf32>
    %212 = arith.negf %211 : vector<8x128xf32>
    %213 = math.exp %212 : vector<8x128xf32>
    %cst_64 = arith.constant 1.000000e+00 : f32
    %214 = vector.broadcast %cst_64 : f32 to vector<8x128xf32>
    %215 = arith.addf %214, %213 : vector<8x128xf32>
    %216 = arith.divf %214, %215 : vector<8x128xf32>
    %217 = vector.extract_strided_slice %204 {offsets = [0, 256], sizes = [8, 128], strides = [1, 1]} : vector<8x512xf32> to vector<8x128xf32>
    %218 = math.tanh %217 : vector<8x128xf32>
    %219 = vector.extract_strided_slice %204 {offsets = [0, 384], sizes = [8, 128], strides = [1, 1]} : vector<8x512xf32> to vector<8x128xf32>
    %220 = arith.negf %219 : vector<8x128xf32>
    %221 = math.exp %220 : vector<8x128xf32>
    %cst_65 = arith.constant 1.000000e+00 : f32
    %222 = vector.broadcast %cst_65 : f32 to vector<8x128xf32>
    %223 = arith.addf %222, %221 : vector<8x128xf32>
    %224 = arith.divf %222, %223 : vector<8x128xf32>
    %225 = arith.mulf %216, %164 : vector<8x128xf32>
    %226 = arith.mulf %210, %218 : vector<8x128xf32>
    %227 = arith.addf %225, %226 : vector<8x128xf32>
    %228 = math.tanh %227 : vector<8x128xf32>
    %229 = arith.mulf %224, %228 : vector<8x128xf32>
    %c0_66 = arith.constant 0 : index
    %c0_67 = arith.constant 0 : index
    %230 = vector.load %arg8[%c0_66, %c0_67] : memref<8x256xf32, #tpu.memory_space<vmem>>, vector<8x128xf32>
    tpu.vector_store %arg8[%c0_66, %c0_67], %229 {strides = array<i32>} : memref<8x256xf32, #tpu.memory_space<vmem>>, vector<8x128xf32>,
    %c0_68 = arith.constant 0 : index
    %c0_69 = arith.constant 0 : index
    %231 = vector.load %arg8[%c0_68, %c0_69] : memref<8x256xf32, #tpu.memory_space<vmem>>, vector<8x256xf32>
    %c0_70 = arith.constant 0 : index
    %c0_71 = arith.constant 0 : index
    %232 = vector.load %arg2[%c0_70, %c0_71] : memref<256x1024xf32, #tpu.memory_space<vmem>>, vector<256x1024xf32>
    %cst_72 = arith.constant dense<0.000000e+00> : vector<8x1024xf32>
    %233 = tpu.matmul %231, %232, %cst_72 {dimension_numbers = #tpu.dot_dimension_numbers<[1], [0], [0], [1], [0, 0, 1, 1], [], []>} : vector<8x256xf32>, vector<256x1024xf32>, vector<8x1024xf32> -> vector<8x1024xf32>
    %234 = vector.extract_strided_slice %233 {offsets = [0, 0], sizes = [8, 512], strides = [1, 1]} : vector<8x1024xf32> to vector<8x512xf32>
    %235 = arith.addf %234, %6 : vector<8x512xf32>
    %236 = vector.extract_strided_slice %233 {offsets = [0, 512], sizes = [8, 512], strides = [1, 1]} : vector<8x1024xf32> to vector<8x512xf32>
    %237 = vector.extract_strided_slice %235 {offsets = [0, 0], sizes = [8, 128], strides = [1, 1]} : vector<8x512xf32> to vector<8x128xf32>
    %238 = arith.negf %237 : vector<8x128xf32>
    %239 = math.exp %238 : vector<8x128xf32>
    %cst_73 = arith.constant 1.000000e+00 : f32
    %240 = vector.broadcast %cst_73 : f32 to vector<8x128xf32>
    %241 = arith.addf %240, %239 : vector<8x128xf32>
    %242 = arith.divf %240, %241 : vector<8x128xf32>
    %243 = vector.extract_strided_slice %235 {offsets = [0, 128], sizes = [8, 128], strides = [1, 1]} : vector<8x512xf32> to vector<8x128xf32>
    %244 = arith.negf %243 : vector<8x128xf32>
    %245 = math.exp %244 : vector<8x128xf32>
    %cst_74 = arith.constant 1.000000e+00 : f32
    %246 = vector.broadcast %cst_74 : f32 to vector<8x128xf32>
    %247 = arith.addf %246, %245 : vector<8x128xf32>
    %248 = arith.divf %246, %247 : vector<8x128xf32>
    %249 = vector.extract_strided_slice %235 {offsets = [0, 256], sizes = [8, 128], strides = [1, 1]} : vector<8x512xf32> to vector<8x128xf32>
    %250 = math.tanh %249 : vector<8x128xf32>
    %251 = vector.extract_strided_slice %235 {offsets = [0, 384], sizes = [8, 128], strides = [1, 1]} : vector<8x512xf32> to vector<8x128xf32>
    %252 = arith.negf %251 : vector<8x128xf32>
    %253 = math.exp %252 : vector<8x128xf32>
    %cst_75 = arith.constant 1.000000e+00 : f32
    %254 = vector.broadcast %cst_75 : f32 to vector<8x128xf32>
    %255 = arith.addf %254, %253 : vector<8x128xf32>
    %256 = arith.divf %254, %255 : vector<8x128xf32>
    %257 = arith.mulf %248, %196 : vector<8x128xf32>
    %258 = arith.mulf %242, %250 : vector<8x128xf32>
    %259 = arith.addf %257, %258 : vector<8x128xf32>
    %260 = math.tanh %259 : vector<8x128xf32>
    %261 = arith.mulf %256, %260 : vector<8x128xf32>
    %c0_76 = arith.constant 0 : index
    %c128_77 = arith.constant 128 : index
    %262 = vector.load %arg8[%c0_76, %c128_77] : memref<8x256xf32, #tpu.memory_space<vmem>>, vector<8x128xf32>
    tpu.vector_store %arg8[%c0_76, %c128_77], %261 {strides = array<i32>} : memref<8x256xf32, #tpu.memory_space<vmem>>, vector<8x128xf32>,
    %c4_i32 = arith.constant 4 : i32
    %c8_i32_78 = arith.constant 8 : i32
    %263 = arith.muli %c4_i32, %c8_i32_78 : i32
    %264 = tpu.assume_multiple %263, 8 : i32
    %265 = arith.index_cast %264 : i32 to index
    %c0_79 = arith.constant 0 : index
    %266 = vector.load %arg7[%265, %c0_79] : memref<64x512xf32, #tpu.memory_space<vmem>>, vector<8x512xf32>
    %267 = arith.addf %266, %236 : vector<8x512xf32>
    %268 = vector.extract_strided_slice %267 {offsets = [0, 0], sizes = [8, 128], strides = [1, 1]} : vector<8x512xf32> to vector<8x128xf32>
    %269 = arith.negf %268 : vector<8x128xf32>
    %270 = math.exp %269 : vector<8x128xf32>
    %cst_80 = arith.constant 1.000000e+00 : f32
    %271 = vector.broadcast %cst_80 : f32 to vector<8x128xf32>
    %272 = arith.addf %271, %270 : vector<8x128xf32>
    %273 = arith.divf %271, %272 : vector<8x128xf32>
    %274 = vector.extract_strided_slice %267 {offsets = [0, 128], sizes = [8, 128], strides = [1, 1]} : vector<8x512xf32> to vector<8x128xf32>
    %275 = arith.negf %274 : vector<8x128xf32>
    %276 = math.exp %275 : vector<8x128xf32>
    %cst_81 = arith.constant 1.000000e+00 : f32
    %277 = vector.broadcast %cst_81 : f32 to vector<8x128xf32>
    %278 = arith.addf %277, %276 : vector<8x128xf32>
    %279 = arith.divf %277, %278 : vector<8x128xf32>
    %280 = vector.extract_strided_slice %267 {offsets = [0, 256], sizes = [8, 128], strides = [1, 1]} : vector<8x512xf32> to vector<8x128xf32>
    %281 = math.tanh %280 : vector<8x128xf32>
    %282 = vector.extract_strided_slice %267 {offsets = [0, 384], sizes = [8, 128], strides = [1, 1]} : vector<8x512xf32> to vector<8x128xf32>
    %283 = arith.negf %282 : vector<8x128xf32>
    %284 = math.exp %283 : vector<8x128xf32>
    %cst_82 = arith.constant 1.000000e+00 : f32
    %285 = vector.broadcast %cst_82 : f32 to vector<8x128xf32>
    %286 = arith.addf %285, %284 : vector<8x128xf32>
    %287 = arith.divf %285, %286 : vector<8x128xf32>
    %288 = arith.mulf %279, %227 : vector<8x128xf32>
    %289 = arith.mulf %273, %281 : vector<8x128xf32>
    %290 = arith.addf %288, %289 : vector<8x128xf32>
    %291 = math.tanh %290 : vector<8x128xf32>
    %292 = arith.mulf %287, %291 : vector<8x128xf32>
    %c0_83 = arith.constant 0 : index
    %c0_84 = arith.constant 0 : index
    %293 = vector.load %arg8[%c0_83, %c0_84] : memref<8x256xf32, #tpu.memory_space<vmem>>, vector<8x128xf32>
    tpu.vector_store %arg8[%c0_83, %c0_84], %292 {strides = array<i32>} : memref<8x256xf32, #tpu.memory_space<vmem>>, vector<8x128xf32>,
    %c0_85 = arith.constant 0 : index
    %c0_86 = arith.constant 0 : index
    %294 = vector.load %arg8[%c0_85, %c0_86] : memref<8x256xf32, #tpu.memory_space<vmem>>, vector<8x256xf32>
    %c0_87 = arith.constant 0 : index
    %c0_88 = arith.constant 0 : index
    %295 = vector.load %arg2[%c0_87, %c0_88] : memref<256x1024xf32, #tpu.memory_space<vmem>>, vector<256x1024xf32>
    %cst_89 = arith.constant dense<0.000000e+00> : vector<8x1024xf32>
    %296 = tpu.matmul %294, %295, %cst_89 {dimension_numbers = #tpu.dot_dimension_numbers<[1], [0], [0], [1], [0, 0, 1, 1], [], []>} : vector<8x256xf32>, vector<256x1024xf32>, vector<8x1024xf32> -> vector<8x1024xf32>
    %297 = vector.extract_strided_slice %296 {offsets = [0, 0], sizes = [8, 512], strides = [1, 1]} : vector<8x1024xf32> to vector<8x512xf32>
    %298 = arith.addf %297, %6 : vector<8x512xf32>
    %299 = vector.extract_strided_slice %296 {offsets = [0, 512], sizes = [8, 512], strides = [1, 1]} : vector<8x1024xf32> to vector<8x512xf32>
    %300 = vector.extract_strided_slice %298 {offsets = [0, 0], sizes = [8, 128], strides = [1, 1]} : vector<8x512xf32> to vector<8x128xf32>
    %301 = arith.negf %300 : vector<8x128xf32>
    %302 = math.exp %301 : vector<8x128xf32>
    %cst_90 = arith.constant 1.000000e+00 : f32
    %303 = vector.broadcast %cst_90 : f32 to vector<8x128xf32>
    %304 = arith.addf %303, %302 : vector<8x128xf32>
    %305 = arith.divf %303, %304 : vector<8x128xf32>
    %306 = vector.extract_strided_slice %298 {offsets = [0, 128], sizes = [8, 128], strides = [1, 1]} : vector<8x512xf32> to vector<8x128xf32>
    %307 = arith.negf %306 : vector<8x128xf32>
    %308 = math.exp %307 : vector<8x128xf32>
    %cst_91 = arith.constant 1.000000e+00 : f32
    %309 = vector.broadcast %cst_91 : f32 to vector<8x128xf32>
    %310 = arith.addf %309, %308 : vector<8x128xf32>
    %311 = arith.divf %309, %310 : vector<8x128xf32>
    %312 = vector.extract_strided_slice %298 {offsets = [0, 256], sizes = [8, 128], strides = [1, 1]} : vector<8x512xf32> to vector<8x128xf32>
    %313 = math.tanh %312 : vector<8x128xf32>
    %314 = vector.extract_strided_slice %298 {offsets = [0, 384], sizes = [8, 128], strides = [1, 1]} : vector<8x512xf32> to vector<8x128xf32>
    %315 = arith.negf %314 : vector<8x128xf32>
    %316 = math.exp %315 : vector<8x128xf32>
    %cst_92 = arith.constant 1.000000e+00 : f32
    %317 = vector.broadcast %cst_92 : f32 to vector<8x128xf32>
    %318 = arith.addf %317, %316 : vector<8x128xf32>
    %319 = arith.divf %317, %318 : vector<8x128xf32>
    %320 = arith.mulf %311, %259 : vector<8x128xf32>
    %321 = arith.mulf %305, %313 : vector<8x128xf32>
    %322 = arith.addf %320, %321 : vector<8x128xf32>
    %323 = math.tanh %322 : vector<8x128xf32>
    %324 = arith.mulf %319, %323 : vector<8x128xf32>
    %c0_93 = arith.constant 0 : index
    %c128_94 = arith.constant 128 : index
    %325 = vector.load %arg8[%c0_93, %c128_94] : memref<8x256xf32, #tpu.memory_space<vmem>>, vector<8x128xf32>
    tpu.vector_store %arg8[%c0_93, %c128_94], %324 {strides = array<i32>} : memref<8x256xf32, #tpu.memory_space<vmem>>, vector<8x128xf32>,
    %c5_i32 = arith.constant 5 : i32
    %c8_i32_95 = arith.constant 8 : i32
    %326 = arith.muli %c5_i32, %c8_i32_95 : i32
    %327 = tpu.assume_multiple %326, 8 : i32
    %328 = arith.index_cast %327 : i32 to index
    %c0_96 = arith.constant 0 : index
    %329 = vector.load %arg7[%328, %c0_96] : memref<64x512xf32, #tpu.memory_space<vmem>>, vector<8x512xf32>
    %330 = arith.addf %329, %299 : vector<8x512xf32>
    %331 = vector.extract_strided_slice %330 {offsets = [0, 0], sizes = [8, 128], strides = [1, 1]} : vector<8x512xf32> to vector<8x128xf32>
    %332 = arith.negf %331 : vector<8x128xf32>
    %333 = math.exp %332 : vector<8x128xf32>
    %cst_97 = arith.constant 1.000000e+00 : f32
    %334 = vector.broadcast %cst_97 : f32 to vector<8x128xf32>
    %335 = arith.addf %334, %333 : vector<8x128xf32>
    %336 = arith.divf %334, %335 : vector<8x128xf32>
    %337 = vector.extract_strided_slice %330 {offsets = [0, 128], sizes = [8, 128], strides = [1, 1]} : vector<8x512xf32> to vector<8x128xf32>
    %338 = arith.negf %337 : vector<8x128xf32>
    %339 = math.exp %338 : vector<8x128xf32>
    %cst_98 = arith.constant 1.000000e+00 : f32
    %340 = vector.broadcast %cst_98 : f32 to vector<8x128xf32>
    %341 = arith.addf %340, %339 : vector<8x128xf32>
    %342 = arith.divf %340, %341 : vector<8x128xf32>
    %343 = vector.extract_strided_slice %330 {offsets = [0, 256], sizes = [8, 128], strides = [1, 1]} : vector<8x512xf32> to vector<8x128xf32>
    %344 = math.tanh %343 : vector<8x128xf32>
    %345 = vector.extract_strided_slice %330 {offsets = [0, 384], sizes = [8, 128], strides = [1, 1]} : vector<8x512xf32> to vector<8x128xf32>
    %346 = arith.negf %345 : vector<8x128xf32>
    %347 = math.exp %346 : vector<8x128xf32>
    %cst_99 = arith.constant 1.000000e+00 : f32
    %348 = vector.broadcast %cst_99 : f32 to vector<8x128xf32>
    %349 = arith.addf %348, %347 : vector<8x128xf32>
    %350 = arith.divf %348, %349 : vector<8x128xf32>
    %351 = arith.mulf %342, %290 : vector<8x128xf32>
    %352 = arith.mulf %336, %344 : vector<8x128xf32>
    %353 = arith.addf %351, %352 : vector<8x128xf32>
    %354 = math.tanh %353 : vector<8x128xf32>
    %355 = arith.mulf %350, %354 : vector<8x128xf32>
    %c0_100 = arith.constant 0 : index
    %c0_101 = arith.constant 0 : index
    %356 = vector.load %arg8[%c0_100, %c0_101] : memref<8x256xf32, #tpu.memory_space<vmem>>, vector<8x128xf32>
    tpu.vector_store %arg8[%c0_100, %c0_101], %355 {strides = array<i32>} : memref<8x256xf32, #tpu.memory_space<vmem>>, vector<8x128xf32>,
    %c0_102 = arith.constant 0 : index
    %c0_103 = arith.constant 0 : index
    %357 = vector.load %arg8[%c0_102, %c0_103] : memref<8x256xf32, #tpu.memory_space<vmem>>, vector<8x256xf32>
    %c0_104 = arith.constant 0 : index
    %c0_105 = arith.constant 0 : index
    %358 = vector.load %arg2[%c0_104, %c0_105] : memref<256x1024xf32, #tpu.memory_space<vmem>>, vector<256x1024xf32>
    %cst_106 = arith.constant dense<0.000000e+00> : vector<8x1024xf32>
    %359 = tpu.matmul %357, %358, %cst_106 {dimension_numbers = #tpu.dot_dimension_numbers<[1], [0], [0], [1], [0, 0, 1, 1], [], []>} : vector<8x256xf32>, vector<256x1024xf32>, vector<8x1024xf32> -> vector<8x1024xf32>
    %360 = vector.extract_strided_slice %359 {offsets = [0, 0], sizes = [8, 512], strides = [1, 1]} : vector<8x1024xf32> to vector<8x512xf32>
    %361 = arith.addf %360, %6 : vector<8x512xf32>
    %362 = vector.extract_strided_slice %359 {offsets = [0, 512], sizes = [8, 512], strides = [1, 1]} : vector<8x1024xf32> to vector<8x512xf32>
    %363 = vector.extract_strided_slice %361 {offsets = [0, 0], sizes = [8, 128], strides = [1, 1]} : vector<8x512xf32> to vector<8x128xf32>
    %364 = arith.negf %363 : vector<8x128xf32>
    %365 = math.exp %364 : vector<8x128xf32>
    %cst_107 = arith.constant 1.000000e+00 : f32
    %366 = vector.broadcast %cst_107 : f32 to vector<8x128xf32>
    %367 = arith.addf %366, %365 : vector<8x128xf32>
    %368 = arith.divf %366, %367 : vector<8x128xf32>
    %369 = vector.extract_strided_slice %361 {offsets = [0, 128], sizes = [8, 128], strides = [1, 1]} : vector<8x512xf32> to vector<8x128xf32>
    %370 = arith.negf %369 : vector<8x128xf32>
    %371 = math.exp %370 : vector<8x128xf32>
    %cst_108 = arith.constant 1.000000e+00 : f32
    %372 = vector.broadcast %cst_108 : f32 to vector<8x128xf32>
    %373 = arith.addf %372, %371 : vector<8x128xf32>
    %374 = arith.divf %372, %373 : vector<8x128xf32>
    %375 = vector.extract_strided_slice %361 {offsets = [0, 256], sizes = [8, 128], strides = [1, 1]} : vector<8x512xf32> to vector<8x128xf32>
    %376 = math.tanh %375 : vector<8x128xf32>
    %377 = vector.extract_strided_slice %361 {offsets = [0, 384], sizes = [8, 128], strides = [1, 1]} : vector<8x512xf32> to vector<8x128xf32>
    %378 = arith.negf %377 : vector<8x128xf32>
    %379 = math.exp %378 : vector<8x128xf32>
    %cst_109 = arith.constant 1.000000e+00 : f32
    %380 = vector.broadcast %cst_109 : f32 to vector<8x128xf32>
    %381 = arith.addf %380, %379 : vector<8x128xf32>
    %382 = arith.divf %380, %381 : vector<8x128xf32>
    %383 = arith.mulf %374, %322 : vector<8x128xf32>
    %384 = arith.mulf %368, %376 : vector<8x128xf32>
    %385 = arith.addf %383, %384 : vector<8x128xf32>
    %386 = math.tanh %385 : vector<8x128xf32>
    %387 = arith.mulf %382, %386 : vector<8x128xf32>
    %c0_110 = arith.constant 0 : index
    %c128_111 = arith.constant 128 : index
    %388 = vector.load %arg8[%c0_110, %c128_111] : memref<8x256xf32, #tpu.memory_space<vmem>>, vector<8x128xf32>
    tpu.vector_store %arg8[%c0_110, %c128_111], %387 {strides = array<i32>} : memref<8x256xf32, #tpu.memory_space<vmem>>, vector<8x128xf32>,
    %c6_i32 = arith.constant 6 : i32
    %c8_i32_112 = arith.constant 8 : i32
    %389 = arith.muli %c6_i32, %c8_i32_112 : i32
    %390 = tpu.assume_multiple %389, 8 : i32
    %391 = arith.index_cast %390 : i32 to index
    %c0_113 = arith.constant 0 : index
    %392 = vector.load %arg7[%391, %c0_113] : memref<64x512xf32, #tpu.memory_space<vmem>>, vector<8x512xf32>
    %393 = arith.addf %392, %362 : vector<8x512xf32>
    %394 = vector.extract_strided_slice %393 {offsets = [0, 0], sizes = [8, 128], strides = [1, 1]} : vector<8x512xf32> to vector<8x128xf32>
    %395 = arith.negf %394 : vector<8x128xf32>
    %396 = math.exp %395 : vector<8x128xf32>
    %cst_114 = arith.constant 1.000000e+00 : f32
    %397 = vector.broadcast %cst_114 : f32 to vector<8x128xf32>
    %398 = arith.addf %397, %396 : vector<8x128xf32>
    %399 = arith.divf %397, %398 : vector<8x128xf32>
    %400 = vector.extract_strided_slice %393 {offsets = [0, 128], sizes = [8, 128], strides = [1, 1]} : vector<8x512xf32> to vector<8x128xf32>
    %401 = arith.negf %400 : vector<8x128xf32>
    %402 = math.exp %401 : vector<8x128xf32>
    %cst_115 = arith.constant 1.000000e+00 : f32
    %403 = vector.broadcast %cst_115 : f32 to vector<8x128xf32>
    %404 = arith.addf %403, %402 : vector<8x128xf32>
    %405 = arith.divf %403, %404 : vector<8x128xf32>
    %406 = vector.extract_strided_slice %393 {offsets = [0, 256], sizes = [8, 128], strides = [1, 1]} : vector<8x512xf32> to vector<8x128xf32>
    %407 = math.tanh %406 : vector<8x128xf32>
    %408 = vector.extract_strided_slice %393 {offsets = [0, 384], sizes = [8, 128], strides = [1, 1]} : vector<8x512xf32> to vector<8x128xf32>
    %409 = arith.negf %408 : vector<8x128xf32>
    %410 = math.exp %409 : vector<8x128xf32>
    %cst_116 = arith.constant 1.000000e+00 : f32
    %411 = vector.broadcast %cst_116 : f32 to vector<8x128xf32>
    %412 = arith.addf %411, %410 : vector<8x128xf32>
    %413 = arith.divf %411, %412 : vector<8x128xf32>
    %414 = arith.mulf %405, %353 : vector<8x128xf32>
    %415 = arith.mulf %399, %407 : vector<8x128xf32>
    %416 = arith.addf %414, %415 : vector<8x128xf32>
    %417 = math.tanh %416 : vector<8x128xf32>
    %418 = arith.mulf %413, %417 : vector<8x128xf32>
    %c0_117 = arith.constant 0 : index
    %c0_118 = arith.constant 0 : index
    %419 = vector.load %arg8[%c0_117, %c0_118] : memref<8x256xf32, #tpu.memory_space<vmem>>, vector<8x128xf32>
    tpu.vector_store %arg8[%c0_117, %c0_118], %418 {strides = array<i32>} : memref<8x256xf32, #tpu.memory_space<vmem>>, vector<8x128xf32>,
    %c0_119 = arith.constant 0 : index
    %c0_120 = arith.constant 0 : index
    %420 = vector.load %arg8[%c0_119, %c0_120] : memref<8x256xf32, #tpu.memory_space<vmem>>, vector<8x256xf32>
    %c0_121 = arith.constant 0 : index
    %c0_122 = arith.constant 0 : index
    %421 = vector.load %arg2[%c0_121, %c0_122] : memref<256x1024xf32, #tpu.memory_space<vmem>>, vector<256x1024xf32>
    %cst_123 = arith.constant dense<0.000000e+00> : vector<8x1024xf32>
    %422 = tpu.matmul %420, %421, %cst_123 {dimension_numbers = #tpu.dot_dimension_numbers<[1], [0], [0], [1], [0, 0, 1, 1], [], []>} : vector<8x256xf32>, vector<256x1024xf32>, vector<8x1024xf32> -> vector<8x1024xf32>
    %423 = vector.extract_strided_slice %422 {offsets = [0, 0], sizes = [8, 512], strides = [1, 1]} : vector<8x1024xf32> to vector<8x512xf32>
    %424 = arith.addf %423, %6 : vector<8x512xf32>
    %425 = vector.extract_strided_slice %422 {offsets = [0, 512], sizes = [8, 512], strides = [1, 1]} : vector<8x1024xf32> to vector<8x512xf32>
    %426 = vector.extract_strided_slice %424 {offsets = [0, 0], sizes = [8, 128], strides = [1, 1]} : vector<8x512xf32> to vector<8x128xf32>
    %427 = arith.negf %426 : vector<8x128xf32>
    %428 = math.exp %427 : vector<8x128xf32>
    %cst_124 = arith.constant 1.000000e+00 : f32
    %429 = vector.broadcast %cst_124 : f32 to vector<8x128xf32>
    %430 = arith.addf %429, %428 : vector<8x128xf32>
    %431 = arith.divf %429, %430 : vector<8x128xf32>
    %432 = vector.extract_strided_slice %424 {offsets = [0, 128], sizes = [8, 128], strides = [1, 1]} : vector<8x512xf32> to vector<8x128xf32>
    %433 = arith.negf %432 : vector<8x128xf32>
    %434 = math.exp %433 : vector<8x128xf32>
    %cst_125 = arith.constant 1.000000e+00 : f32
    %435 = vector.broadcast %cst_125 : f32 to vector<8x128xf32>
    %436 = arith.addf %435, %434 : vector<8x128xf32>
    %437 = arith.divf %435, %436 : vector<8x128xf32>
    %438 = vector.extract_strided_slice %424 {offsets = [0, 256], sizes = [8, 128], strides = [1, 1]} : vector<8x512xf32> to vector<8x128xf32>
    %439 = math.tanh %438 : vector<8x128xf32>
    %440 = vector.extract_strided_slice %424 {offsets = [0, 384], sizes = [8, 128], strides = [1, 1]} : vector<8x512xf32> to vector<8x128xf32>
    %441 = arith.negf %440 : vector<8x128xf32>
    %442 = math.exp %441 : vector<8x128xf32>
    %cst_126 = arith.constant 1.000000e+00 : f32
    %443 = vector.broadcast %cst_126 : f32 to vector<8x128xf32>
    %444 = arith.addf %443, %442 : vector<8x128xf32>
    %445 = arith.divf %443, %444 : vector<8x128xf32>
    %446 = arith.mulf %437, %385 : vector<8x128xf32>
    %447 = arith.mulf %431, %439 : vector<8x128xf32>
    %448 = arith.addf %446, %447 : vector<8x128xf32>
    %449 = math.tanh %448 : vector<8x128xf32>
    %450 = arith.mulf %445, %449 : vector<8x128xf32>
    %c0_127 = arith.constant 0 : index
    %c128_128 = arith.constant 128 : index
    %451 = vector.load %arg8[%c0_127, %c128_128] : memref<8x256xf32, #tpu.memory_space<vmem>>, vector<8x128xf32>
    tpu.vector_store %arg8[%c0_127, %c128_128], %450 {strides = array<i32>} : memref<8x256xf32, #tpu.memory_space<vmem>>, vector<8x128xf32>,
    %c7_i32 = arith.constant 7 : i32
    %c8_i32_129 = arith.constant 8 : i32
    %452 = arith.muli %c7_i32, %c8_i32_129 : i32
    %453 = tpu.assume_multiple %452, 8 : i32
    %454 = arith.index_cast %453 : i32 to index
    %c0_130 = arith.constant 0 : index
    %455 = vector.load %arg7[%454, %c0_130] : memref<64x512xf32, #tpu.memory_space<vmem>>, vector<8x512xf32>
    %456 = arith.addf %455, %425 : vector<8x512xf32>
    %457 = vector.extract_strided_slice %456 {offsets = [0, 0], sizes = [8, 128], strides = [1, 1]} : vector<8x512xf32> to vector<8x128xf32>
    %458 = arith.negf %457 : vector<8x128xf32>
    %459 = math.exp %458 : vector<8x128xf32>
    %cst_131 = arith.constant 1.000000e+00 : f32
    %460 = vector.broadcast %cst_131 : f32 to vector<8x128xf32>
    %461 = arith.addf %460, %459 : vector<8x128xf32>
    %462 = arith.divf %460, %461 : vector<8x128xf32>
    %463 = vector.extract_strided_slice %456 {offsets = [0, 128], sizes = [8, 128], strides = [1, 1]} : vector<8x512xf32> to vector<8x128xf32>
    %464 = arith.negf %463 : vector<8x128xf32>
    %465 = math.exp %464 : vector<8x128xf32>
    %cst_132 = arith.constant 1.000000e+00 : f32
    %466 = vector.broadcast %cst_132 : f32 to vector<8x128xf32>
    %467 = arith.addf %466, %465 : vector<8x128xf32>
    %468 = arith.divf %466, %467 : vector<8x128xf32>
    %469 = vector.extract_strided_slice %456 {offsets = [0, 256], sizes = [8, 128], strides = [1, 1]} : vector<8x512xf32> to vector<8x128xf32>
    %470 = math.tanh %469 : vector<8x128xf32>
    %471 = vector.extract_strided_slice %456 {offsets = [0, 384], sizes = [8, 128], strides = [1, 1]} : vector<8x512xf32> to vector<8x128xf32>
    %472 = arith.negf %471 : vector<8x128xf32>
    %473 = math.exp %472 : vector<8x128xf32>
    %cst_133 = arith.constant 1.000000e+00 : f32
    %474 = vector.broadcast %cst_133 : f32 to vector<8x128xf32>
    %475 = arith.addf %474, %473 : vector<8x128xf32>
    %476 = arith.divf %474, %475 : vector<8x128xf32>
    %477 = arith.mulf %468, %416 : vector<8x128xf32>
    %478 = arith.mulf %462, %470 : vector<8x128xf32>
    %479 = arith.addf %477, %478 : vector<8x128xf32>
    %480 = math.tanh %479 : vector<8x128xf32>
    %481 = arith.mulf %476, %480 : vector<8x128xf32>
    %c0_134 = arith.constant 0 : index
    %c0_135 = arith.constant 0 : index
    %482 = vector.load %arg8[%c0_134, %c0_135] : memref<8x256xf32, #tpu.memory_space<vmem>>, vector<8x128xf32>
    tpu.vector_store %arg8[%c0_134, %c0_135], %481 {strides = array<i32>} : memref<8x256xf32, #tpu.memory_space<vmem>>, vector<8x128xf32>,
    %c0_136 = arith.constant 0 : index
    %c0_137 = arith.constant 0 : index
    %483 = vector.load %arg8[%c0_136, %c0_137] : memref<8x256xf32, #tpu.memory_space<vmem>>, vector<8x256xf32>
    %c0_138 = arith.constant 0 : index
    %c0_139 = arith.constant 0 : index
    %484 = vector.load %arg2[%c0_138, %c0_139] : memref<256x1024xf32, #tpu.memory_space<vmem>>, vector<256x1024xf32>
    %cst_140 = arith.constant dense<0.000000e+00> : vector<8x1024xf32>
    %485 = tpu.matmul %483, %484, %cst_140 {dimension_numbers = #tpu.dot_dimension_numbers<[1], [0], [0], [1], [0, 0, 1, 1], [], []>} : vector<8x256xf32>, vector<256x1024xf32>, vector<8x1024xf32> -> vector<8x1024xf32>
    %486 = vector.extract_strided_slice %485 {offsets = [0, 0], sizes = [8, 512], strides = [1, 1]} : vector<8x1024xf32> to vector<8x512xf32>
    %487 = arith.addf %486, %6 : vector<8x512xf32>
    %488 = vector.extract_strided_slice %485 {offsets = [0, 512], sizes = [8, 512], strides = [1, 1]} : vector<8x1024xf32> to vector<8x512xf32>
    %489 = vector.extract_strided_slice %487 {offsets = [0, 0], sizes = [8, 128], strides = [1, 1]} : vector<8x512xf32> to vector<8x128xf32>
    %490 = arith.negf %489 : vector<8x128xf32>
    %491 = math.exp %490 : vector<8x128xf32>
    %cst_141 = arith.constant 1.000000e+00 : f32
    %492 = vector.broadcast %cst_141 : f32 to vector<8x128xf32>
    %493 = arith.addf %492, %491 : vector<8x128xf32>
    %494 = arith.divf %492, %493 : vector<8x128xf32>
    %495 = vector.extract_strided_slice %487 {offsets = [0, 128], sizes = [8, 128], strides = [1, 1]} : vector<8x512xf32> to vector<8x128xf32>
    %496 = arith.negf %495 : vector<8x128xf32>
    %497 = math.exp %496 : vector<8x128xf32>
    %cst_142 = arith.constant 1.000000e+00 : f32
    %498 = vector.broadcast %cst_142 : f32 to vector<8x128xf32>
    %499 = arith.addf %498, %497 : vector<8x128xf32>
    %500 = arith.divf %498, %499 : vector<8x128xf32>
    %501 = vector.extract_strided_slice %487 {offsets = [0, 256], sizes = [8, 128], strides = [1, 1]} : vector<8x512xf32> to vector<8x128xf32>
    %502 = math.tanh %501 : vector<8x128xf32>
    %503 = vector.extract_strided_slice %487 {offsets = [0, 384], sizes = [8, 128], strides = [1, 1]} : vector<8x512xf32> to vector<8x128xf32>
    %504 = arith.negf %503 : vector<8x128xf32>
    %505 = math.exp %504 : vector<8x128xf32>
    %cst_143 = arith.constant 1.000000e+00 : f32
    %506 = vector.broadcast %cst_143 : f32 to vector<8x128xf32>
    %507 = arith.addf %506, %505 : vector<8x128xf32>
    %508 = arith.divf %506, %507 : vector<8x128xf32>
    %509 = arith.mulf %500, %448 : vector<8x128xf32>
    %510 = arith.mulf %494, %502 : vector<8x128xf32>
    %511 = arith.addf %509, %510 : vector<8x128xf32>
    %512 = math.tanh %511 : vector<8x128xf32>
    %513 = arith.mulf %508, %512 : vector<8x128xf32>
    %c0_144 = arith.constant 0 : index
    %c128_145 = arith.constant 128 : index
    %514 = vector.load %arg8[%c0_144, %c128_145] : memref<8x256xf32, #tpu.memory_space<vmem>>, vector<8x128xf32>
    tpu.vector_store %arg8[%c0_144, %c128_145], %513 {strides = array<i32>} : memref<8x256xf32, #tpu.memory_space<vmem>>, vector<8x128xf32>,
    %c8_i32_146 = arith.constant 8 : i32
    %c0_147 = arith.constant 0 : index
    %c0_148 = arith.constant 0 : index
    %515 = vector.load %arg4[%c0_147, %c0_148] : memref<128x128xf32, #tpu.memory_space<vmem>>, vector<128x128xf32>
    %cst_149 = arith.constant dense<0.000000e+00> : vector<8x128xf32>
    %516 = tpu.matmul %513, %515, %cst_149 {dimension_numbers = #tpu.dot_dimension_numbers<[1], [0], [0], [1], [0, 0, 1, 1], [], []>} : vector<8x128xf32>, vector<128x128xf32>, vector<8x128xf32> -> vector<8x128xf32>
    %c0_150 = arith.constant 0 : index
    %c0_151 = arith.constant 0 : index
    %517 = vector.load %arg5[%c0_150, %c0_151] : memref<1x128xf32, #tpu.memory_space<vmem>>, vector<1x128xf32>
    %518 = vector.broadcast %517 : vector<1x128xf32> to vector<8x128xf32>
    %519 = arith.addf %516, %518 : vector<8x128xf32>
    %c0_152 = arith.constant 0 : index
    %c0_153 = arith.constant 0 : index
    %520 = vector.load %arg6[%c0_152, %c0_153] : memref<8x128xf32, #tpu.memory_space<vmem>>, vector<8x128xf32>
    tpu.vector_store %arg6[%c0_152, %c0_153], %519 {strides = array<i32>} : memref<8x128xf32, #tpu.memory_space<vmem>>, vector<8x128xf32>,
    return
  }
}

</mosaic_0001>

<bundles_post_ra>
// kernel: tpu_custom_call.1
= control target key start
LH: loop header
LB: loop body
LE: loop exit
PB: predicated region body
PF: predicated region fallthrough
CT: control target
= control target key end

     0   :  { %11 = vsyncpa [#allocation5], 0  ;;  %s7500_s0 = inlined_call_operand.vmem [shape: f32[64,17], index: 0, kind: input, shape index: {}]   ;;  %s7501_s1 = inlined_call_operand.hbm [shape: f32[17,512], index: 1, kind: input, shape index: {}]   ;;  %s7502_s2 = inlined_call_operand.hbm [shape: f32[256,1024], index: 2, kind: input, shape index: {}]   ;;  %s7503_s3 = inlined_call_operand.vmem [shape: f32[1,512], index: 3, kind: input, shape index: {}]   ;;  %s7504_s4 = inlined_call_operand.hbm [shape: f32[128,128], index: 4, kind: input, shape index: {}]   ;;  %s7505_s5 = inlined_call_operand.vmem [shape: f32[1,128], index: 5, kind: input, shape index: {}]   ;;  %s7506_s6 = inlined_call_operand.hbm [shape: f32[8,128], index: 6, kind: output, shape index: {}]  }
   0x1   :  { %12 = vsyncpa [#allocation8], 0  ;;  %s33_s23 = sshll.u32 %s7502_s2, 4  ;;  %s34_s23 = int_to_ptr.hbm [resolvable:$true] %s33_s23 }
   0x2   :  { %13 = vsyncpa [#allocation6], 0  ;;  %s6346_s24 = smov [#allocation7]   ;;  %s20_s28 = sshll.u32 %s7501_s1, 4  ;;  %s21_s28 = int_to_ptr.hbm [resolvable:$true] %s20_s28 }
   0x3   :  { %s35_s25 = sshll.u32 %s6346_s24, 4  ;;  %s6347_s29 = smov 1024   ;;  %s36_s25 = int_to_ptr.vmem [resolvable:$true] %s35_s25 }
   0x4   :  { %s6348_s30 = smov 64   ;;  %s6349_s7 = smov [#allocation4]  }
   0x5   :  { %41 = dma.hbm_to_vmem [thread:$0]  %s34_s23, 32768, %s36_s25, [#allocation8], %s6347_s29, %s6347_s29, %s6348_s30  }
   0x6   :  { %s22_s8 = sshll.u32 %s6349_s7, 4  ;;  %s6350_s9 = smov 512   ;;  %s23_s8 = int_to_ptr.vmem [resolvable:$true] %s22_s8 }
   0x7   :  { %s6351_s10 = smov 32   ;;  %s48_s12 = sshll.u32 %s7504_s4, 4  ;;  %s49_s12 = int_to_ptr.hbm [resolvable:$true] %s48_s12 }
   0x8   :  { %28 = dma.hbm_to_vmem [thread:$0]  %s21_s28, 1536, %s23_s8, [#allocation5], %s6350_s9, %s6350_s9, %s6351_s10  }
   0x9   :  { %s6352_s13 = smov [#allocation9]   ;;  %s6353_s15 = smov 128  }
   0xa   :  { %s50_s14 = sshll.u32 %s6352_s13, 4  ;;  %s6354_s1 = smov 8   ;;  %s51_s14 = int_to_ptr.vmem [resolvable:$true] %s50_s14 }
   0xb   :  { %56 = dma.hbm_to_vmem [thread:$0]  %s49_s12, 2048, %s51_s14, [#allocation8], %s6353_s15, %s6353_s15, %s6354_s1  }
   0xc   :  { %6340 = dma.done.wait [#allocation5], 1536  }
   0xd   :  { %6341 = vsyncadd [#allocation5], 4294965760 }
   0xe   :  { %6342 = dma.done.wait [#allocation8], 34816  }
   0xf   :  { %6343 = vsyncadd [#allocation8], 4294932480  ;;  %vm116_vm0 = vcmask 1040384   ;;  %v87_v0 = vld [vmem:[#allocation4 + $0x40] sm:$0x1]  ;;  %vm91_vm1 = vcmask 138240  }
  0x10   :  { %v83_v1 = vld [vmem:[#allocation4 + $0x20] sm:$0xff]  ;;  %5883 = vmatpush.msk.msra.mxu0 %vm116_vm0, %v87_v0  ;;  %5967 = vmatpush.msk.msra.mxu1 %vm116_vm0, %v87_v0  ;;  %v6411_v4 = vld [vmem:[%s7500_s0 + $0x28] sm:$0xff]  ;;  %v6416_v5 = vld [vmem:[%s7500_s0 + $0x38] sm:$0xff]  ;;  %s6356_s9 = smov [#allocation10]   ;;  %s5865_s12 = sshll.u32 %s7506_s6, 4  ;;  %s5866_s12 = int_to_ptr.hbm [resolvable:$true] %s5865_s12 }
  0x11   :  { %5969 = vmatpush.msk.msra.mxu3 %vm116_vm0, %v87_v0  ;;  %v79_v2 = vld [vmem:[#allocation4] sm:$0xff]  ;;  %5968 = vmatpush.msk.msra.mxu2 %vm116_vm0, %v87_v0  ;;  %v88_v6 = vld [vmem:[#allocation4 + $0x48] sm:$0x1]  ;;  %v90_v7 = vld [vmem:[#allocation4 + $0x58] sm:$0x1]  ;;  %s5863_s10 = sshll.u32 %s6356_s9, 4  ;;  %s5864_s10 = int_to_ptr.vmem [resolvable:$true] %s5863_s10 }
  0x12   :  { %143 = vmatpush.msra.mxu0 %v83_v1  ;;  %5970 = vmatpush.msra.mxu1 %v83_v1  ;;  %v71_v3 = vld [vmem:[%s7500_s0] sm:$0xff]  ;;  %v84_v9 = vld [vmem:[#allocation4 + $0x28] sm:$0xff]  ;;  %v86_v10 = vld [vmem:[#allocation4 + $0x38] sm:$0xff] }
  0x13   :  { %5972 = vmatpush.msra.mxu3 %v83_v1  ;;  %5971 = vmatpush.msra.mxu2 %v83_v1  ;;  %v534_v8 = vld [vmem:[#allocation7 + $0x3c0] sm:$0xff]  ;;  %v6428_v11 = vld [vmem:[%s7500_s0 + $0x30] sm:$0xff]  ;;  %v80_v13 = vld [vmem:[#allocation4 + $0x8] sm:$0xff] }
  0x14   :  { %144 = vmatpush.msra.mxu0 %v79_v2  ;;  %5973 = vmatpush.msra.mxu1 %v79_v2  ;;  %v526_v12 = vld [vmem:[#allocation7 + $0x380] sm:$0xff]  ;;  %v82_v14 = vld [vmem:[#allocation4 + $0x18] sm:$0xff]  ;;  %v89_v15 = vld [vmem:[#allocation4 + $0x50] sm:$0x1] }
  0x15   :  { %5975 = vmatpush.msra.mxu3 %v79_v2  ;;  %5884 = vmatmul.msk.f32.vlgmr.msra.gmra.mxu0 %vm91_vm1, %v71_v3  ;;  %v662_v16 = vld [vmem:[#allocation7 + $0x7c0] sm:$0xff]  ;;  %v663_v17 = vld [vmem:[#allocation7 + $0x7c8] sm:$0xff]  ;;  %v85_v19 = vld [vmem:[#allocation4 + $0x30] sm:$0xff] }
  0x16   :  { %5889 = vmatmul.msk.f32.vlgmr.msra.gmra.mxu1 %vm91_vm1, %v6411_v4  ;;  %5891 = vmatmul.msk.f32.vlgmr.msra.gmra.mxu3 %vm91_vm1, %v6416_v5  ;;  %v518_v18 = vld [vmem:[#allocation7 + $0x340] sm:$0xff]  ;;  %v655_v21 = vld [vmem:[#allocation7 + $0x788] sm:$0xff]  ;;  %v81_v23 = vld [vmem:[#allocation4 + $0x10] sm:$0xff] }
  0x17   :  { %5892 = vmatpush.msk.msrb.mxu1 %vm116_vm0, %v88_v6  ;;  %5910 = vmatpush.msk.msrb.mxu3 %vm116_vm0, %v90_v7  ;;  %v654_v20 = vld [vmem:[#allocation7 + $0x780] sm:$0xff]  ;;  %v647_v25 = vld [vmem:[#allocation7 + $0x748] sm:$0xff]  ;;  %v6446_v45 = vld [vmem:[%s7500_s0 + $0x10] sm:$0xff] }
  0x18   :  { %5974 = vmatpush.msra.mxu2 %v79_v2  ;;  %670 = vmatpush.msrb.mxu0 %v534_v8  ;;  %v510_v22 = vld [vmem:[#allocation7 + $0x300] sm:$0xff]  ;;  %v535_v26 = vld [vmem:[#allocation7 + $0x3c8] sm:$0xff]  ;;  %v6457_v62 = vld [vmem:[%s7500_s0 + $0x18] sm:$0xff] }
  0x19   :  { %184 = vmatpush.msrb.mxu1 %v84_v9  ;;  %266 = vmatpush.msrb.mxu3 %v86_v10  ;;  %v646_v24 = vld [vmem:[#allocation7 + $0x740] sm:$0xff]  ;;  %v639_v28 = vld [vmem:[#allocation7 + $0x708] sm:$0xff] }
  0x1a   :  { %5890 = vmatmul.msk.f32.vlgmr.msra.gmra.mxu2 %vm91_vm1, %v6428_v11  ;;  %671 = vmatpush.msrb.mxu0 %v526_v12  ;;  %v638_v27 = vld [vmem:[#allocation7 + $0x700] sm:$0xff]  ;;  %v527_v30 = vld [vmem:[#allocation7 + $0x388] sm:$0xff] }
  0x1b   :  { %185 = vmatpush.msrb.mxu1 %v80_v13  ;;  %267 = vmatpush.msrb.mxu3 %v82_v14  ;;  %v502_v29 = vld [vmem:[#allocation7 + $0x2c0] sm:$0xff]  ;;  %v72_v32 = vld [vmem:[%s7500_s0 + $0x8] sm:$0xff] }
  0x1c   :  { %5901 = vmatpush.msk.msrb.mxu2 %vm116_vm0, %v89_v15  ;;  %672 = vmatpush.msrb.mxu0 %v518_v18  ;;  %v630_v31 = vld [vmem:[#allocation7 + $0x6c0] sm:$0xff]  ;;  %v519_v33 = vld [vmem:[#allocation7 + $0x348] sm:$0xff] }
  0x1d   :  { %690 = vmatpush.msra.mxu1 %v662_v16  ;;  %730 = vmatpush.msra.mxu3 %v663_v17  ;;  %v631_v34 = vld [vmem:[#allocation7 + $0x6c8] sm:$0xff]  ;;  %v494_v35 = vld [vmem:[#allocation7 + $0x280] sm:$0xff] }
  0x1e   :  { %5893 = vmatmul.msk.f32.vlgmr.msrb.gmra.mxu1 %vm91_vm1, %v71_v3  ;;  %5911 = vmatmul.msk.f32.vlgmr.msrb.gmra.mxu3 %vm91_vm1, %v71_v3  ;;  %v622_v36 = vld [vmem:[#allocation7 + $0x680] sm:$0xff]  ;;  %v511_v37 = vld [vmem:[#allocation7 + $0x308] sm:$0xff] }
  0x1f   :  { %225 = vmatpush.msrb.mxu2 %v85_v19  ;;  %691 = vmatpush.msra.mxu1 %v654_v20  ;;  %v623_v38 = vld [vmem:[#allocation7 + $0x688] sm:$0xff]  ;;  %v486_v41 = vld [vmem:[#allocation7 + $0x240] sm:$0xff] }
  0x20   :  { %731 = vmatpush.msra.mxu3 %v655_v21  ;;  %673 = vmatpush.msrb.mxu0 %v510_v22  ;;  %v503_v39 = vld [vmem:[#allocation7 + $0x2c8] sm:$0xff]  ;;  %v614_v42 = vld [vmem:[#allocation7 + $0x640] sm:$0xff] }
  0x21   :  { %226 = vmatpush.msrb.mxu2 %v81_v23  ;;  %692 = vmatpush.msra.mxu1 %v646_v24  ;;  %v495_v40 = vld [vmem:[#allocation7 + $0x288] sm:$0xff]  ;;  %v478_v46 = vld [vmem:[#allocation7 + $0x200] sm:$0xff]  ;;  %v536_v23 = vld [vmem:[#allocation7 + $0x3d0] sm:$0xff] }
  0x22   :  { %5902 = vmatmul.msk.f32.vlgmr.msrb.gmra.mxu2 %vm91_vm1, %v71_v3  ;;  %732 = vmatpush.msra.mxu3 %v647_v25  ;;  %v487_v43 = vld [vmem:[#allocation7 + $0x248] sm:$0xff]  ;;  %v606_v47 = vld [vmem:[#allocation7 + $0x600] sm:$0xff]  ;;  %v664_v24 = vld [vmem:[#allocation7 + $0x7d0] sm:$0xff] }
  0x23   :  { %710 = vmatpush.msra.mxu2 %v535_v26  ;;  %693 = vmatpush.msra.mxu1 %v638_v27  ;;  %v615_v44 = vld [vmem:[#allocation7 + $0x648] sm:$0xff]  ;;  %v470_v50 = vld [vmem:[#allocation7 + $0x1c0] sm:$0xff]  ;;  %v537_v25 = vld [vmem:[#allocation7 + $0x3d8] sm:$0xff] }
  0x24   :  { %733 = vmatpush.msra.mxu3 %v639_v28  ;;  %674 = vmatpush.msrb.mxu0 %v502_v29  ;;  %v479_v48 = vld [vmem:[#allocation7 + $0x208] sm:$0xff]  ;;  %v598_v51 = vld [vmem:[#allocation7 + $0x5c0] sm:$0xff]  ;;  %v665_v26 = vld [vmem:[#allocation7 + $0x7d8] sm:$0xff] }
  0x25   :  { %711 = vmatpush.msra.mxu2 %v527_v30  ;;  %694 = vmatpush.msra.mxu1 %v630_v31  ;;  %v607_v49 = vld [vmem:[#allocation7 + $0x608] sm:$0xff]  ;;  %v462_v54 = vld [vmem:[#allocation7 + $0x180] sm:$0xff]  ;;  %v528_v27 = vld [vmem:[#allocation7 + $0x390] sm:$0xff] }
  0x26   :  { %5894 = vmatmul.msk.f32.gmra.mxu1 %vm91_vm1, %v72_v32  ;;  %5912 = vmatmul.msk.f32.gmra.mxu3 %vm91_vm1, %v72_v32  ;;  %v471_v52 = vld [vmem:[#allocation7 + $0x1c8] sm:$0xff]  ;;  %v590_v55 = vld [vmem:[#allocation7 + $0x580] sm:$0xff]  ;;  %v656_v28 = vld [vmem:[#allocation7 + $0x790] sm:$0xff] }
  0x27   :  { %712 = vmatpush.msra.mxu2 %v519_v33  ;;  %734 = vmatpush.msra.mxu3 %v631_v34  ;;  %v599_v53 = vld [vmem:[#allocation7 + $0x5c8] sm:$0xff]  ;;  %v454_v58 = vld [vmem:[#allocation7 + $0x140] sm:$0xff]  ;;  %v529_v29 = vld [vmem:[#allocation7 + $0x398] sm:$0xff] }
  0x28   :  { %675 = vmatpush.msrb.mxu0 %v494_v35  ;;  %695 = vmatpush.msra.mxu1 %v622_v36  ;;  %v463_v56 = vld [vmem:[#allocation7 + $0x188] sm:$0xff]  ;;  %v582_v59 = vld [vmem:[#allocation7 + $0x540] sm:$0xff]  ;;  %v657_v30 = vld [vmem:[#allocation7 + $0x798] sm:$0xff] }
  0x29   :  { %713 = vmatpush.msra.mxu2 %v511_v37  ;;  %735 = vmatpush.msra.mxu3 %v623_v38  ;;  %v591_v57 = vld [vmem:[#allocation7 + $0x588] sm:$0xff]  ;;  %v446_v63 = vld [vmem:[#allocation7 + $0x100] sm:$0xff]  ;;  %v520_v31 = vld [vmem:[#allocation7 + $0x350] sm:$0xff] }
  0x2a   :  { %5903 = vmatmul.msk.f32.gmra.mxu2 %vm91_vm1, %v72_v32  ;;  %5885 = vmatmul.msk.f32.gmra.mxu0 %vm91_vm1, %v72_v32  ;;  %v455_v60 = vld [vmem:[#allocation7 + $0x148] sm:$0xff]  ;;  %v574_v0 = vld [vmem:[#allocation7 + $0x500] sm:$0xff]  ;;  %v648_v32 = vld [vmem:[#allocation7 + $0x750] sm:$0xff] }
  0x2b   :  { %714 = vmatpush.msra.mxu2 %v503_v39  ;;  %676 = vmatpush.msrb.mxu0 %v486_v41  ;;  %v583_v61 = vld [vmem:[#allocation7 + $0x548] sm:$0xff]  ;;  %v438_v3 = vld [vmem:[#allocation7 + $0xc0] sm:$0xff]  ;;  %v521_v33 = vld [vmem:[#allocation7 + $0x358] sm:$0xff] }
  0x2c   :  { %696 = vmatpush.msra.mxu1 %v614_v42  ;;  %736 = vmatpush.msra.mxu3 %v615_v44  ;;  %v447_v1 = vld [vmem:[#allocation7 + $0x108] sm:$0xff]  ;;  %v566_v6 = vld [vmem:[#allocation7 + $0x4c0] sm:$0xff]  ;;  %v649_v34 = vld [vmem:[#allocation7 + $0x758] sm:$0xff] }
  0x2d   :  { %715 = vmatpush.msra.mxu2 %v495_v40  ;;  %677 = vmatpush.msrb.mxu0 %v478_v46  ;;  %v575_v2 = vld [vmem:[#allocation7 + $0x508] sm:$0xff]  ;;  %v430_v9 = vld [vmem:[#allocation7 + $0x80] sm:$0xff]  ;;  %v512_v35 = vld [vmem:[#allocation7 + $0x310] sm:$0xff] }
  0x2e   :  { %5895 = vmatmul.msk.f32.gmra.mxu1 %vm91_vm1, %v6446_v45  ;;  %5913 = vmatmul.msk.f32.gmra.mxu3 %vm91_vm1, %v6446_v45  ;;  %v439_v7 = vld [vmem:[#allocation7 + $0xc8] sm:$0xff]  ;;  %v558_v10 = vld [vmem:[#allocation7 + $0x480] sm:$0xff]  ;;  %v640_v36 = vld [vmem:[#allocation7 + $0x710] sm:$0xff] }
  0x2f   :  { %716 = vmatpush.msra.mxu2 %v487_v43  ;;  %697 = vmatpush.msra.mxu1 %v606_v47  ;;  %v567_v8 = vld [vmem:[#allocation7 + $0x4c8] sm:$0xff]  ;;  %v422_v14 = vld [vmem:[#allocation7 + $0x40] sm:$0xff]  ;;  %v513_v37 = vld [vmem:[#allocation7 + $0x318] sm:$0xff] }
  0x30   :  { %737 = vmatpush.msra.mxu3 %v607_v49  ;;  %678 = vmatpush.msrb.mxu0 %v470_v50  ;;  %v431_v12 = vld [vmem:[#allocation7 + $0x88] sm:$0xff]  ;;  %v550_v15 = vld [vmem:[#allocation7 + $0x440] sm:$0xff]  ;;  %v641_v38 = vld [vmem:[#allocation7 + $0x718] sm:$0xff] }
  0x31   :  { %717 = vmatpush.msra.mxu2 %v479_v48  ;;  %698 = vmatpush.msra.mxu1 %v598_v51  ;;  %v559_v13 = vld [vmem:[#allocation7 + $0x488] sm:$0xff]  ;;  %v6468_v18 = vld [vmem:[%s7500_s0 + $0x20] sm:$0xff]  ;;  %v504_v40 = vld [vmem:[#allocation7 + $0x2d0] sm:$0xff] }
  0x32   :  { %5904 = vmatmul.msk.f32.gmra.mxu2 %vm91_vm1, %v6446_v45  ;;  %738 = vmatpush.msra.mxu3 %v599_v53  ;;  %v423_v16 = vld [vmem:[#allocation7 + $0x48] sm:$0xff]  ;;  %v414_v19 = vld [vmem:[#allocation7] sm:$0xff]  ;;  %v632_v43 = vld [vmem:[#allocation7 + $0x6d0] sm:$0xff] }
  0x33   :  { %718 = vmatpush.msra.mxu2 %v471_v52  ;;  %679 = vmatpush.msrb.mxu0 %v462_v54  ;;  %v551_v17 = vld [vmem:[#allocation7 + $0x448] sm:$0xff]  ;;  %v542_v20 = vld [vmem:[#allocation7 + $0x400] sm:$0xff]  ;;  %v505_v44 = vld [vmem:[#allocation7 + $0x2d8] sm:$0xff] }
  0x34   :  { %699 = vmatpush.msra.mxu1 %v590_v55  ;;  %739 = vmatpush.msra.mxu3 %v591_v57  ;;  %v415_v21 = vld [vmem:[#allocation7 + $0x8] sm:$0xff]  ;;  %v633_v46 = vld [vmem:[#allocation7 + $0x6d8] sm:$0xff]  ;;  %v496_v47 = vld [vmem:[#allocation7 + $0x290] sm:$0xff] }
  0x35   :  { %719 = vmatpush.msra.mxu2 %v463_v56  ;;  %680 = vmatpush.msrb.mxu0 %v454_v58  ;;  %v543_v22 = vld [vmem:[#allocation7 + $0x408] sm:$0xff]  ;;  %v624_v48 = vld [vmem:[#allocation7 + $0x690] sm:$0xff]  ;;  %v497_v49 = vld [vmem:[#allocation7 + $0x298] sm:$0xff] }
  0x36   :  { %700 = vmatpush.msra.mxu1 %v582_v59  ;;  %740 = vmatpush.msra.mxu3 %v583_v61  ;;  %v488_v50 = vld [vmem:[#allocation7 + $0x250] sm:$0xff]  ;;  %v489_v52 = vld [vmem:[#allocation7 + $0x258] sm:$0xff] }
  0x37   :  { %720 = vmatpush.msra.mxu2 %v455_v60  ;;  %5896 = vmatmul.msk.f32.gmra.mxu1 %vm91_vm1, %v6457_v62  ;;  %v616_v51 = vld [vmem:[#allocation7 + $0x650] sm:$0xff]  ;;  %v617_v53 = vld [vmem:[#allocation7 + $0x658] sm:$0xff] }
  0x38   :  { %5914 = vmatmul.msk.f32.gmra.mxu3 %vm91_vm1, %v6457_v62  ;;  %681 = vmatpush.msrb.mxu0 %v446_v63  ;;  %v480_v54 = vld [vmem:[#allocation7 + $0x210] sm:$0xff]  ;;  %v481_v56 = vld [vmem:[#allocation7 + $0x218] sm:$0xff] }
  0x39   :  { %701 = vmatpush.msra.mxu1 %v574_v0  ;;  %721 = vmatpush.msra.mxu2 %v447_v1  ;;  %v609_v57 = vld [vmem:[#allocation7 + $0x618] sm:$0xff]  ;;  %v472_v63 = vld [vmem:[#allocation7 + $0x1d0] sm:$0xff] }
  0x3a   :  { %5905 = vmatmul.msk.f32.gmra.mxu2 %vm91_vm1, %v6457_v62  ;;  %741 = vmatpush.msra.mxu3 %v575_v2  ;;  %v600_v0 = vld [vmem:[#allocation7 + $0x5d0] sm:$0xff]  ;;  %v473_v1 = vld [vmem:[#allocation7 + $0x1d8] sm:$0xff] }
  0x3b   :  { %682 = vmatpush.msrb.mxu0 %v438_v3  ;;  %702 = vmatpush.msra.mxu1 %v566_v6  ;;  %v601_v2 = vld [vmem:[#allocation7 + $0x5d8] sm:$0xff]  ;;  %v464_v3 = vld [vmem:[#allocation7 + $0x190] sm:$0xff] }
  0x3c   :  { %722 = vmatpush.msra.mxu2 %v439_v7  ;;  %742 = vmatpush.msra.mxu3 %v567_v8  ;;  %v592_v6 = vld [vmem:[#allocation7 + $0x590] sm:$0xff]  ;;  %v465_v7 = vld [vmem:[#allocation7 + $0x198] sm:$0xff] }
  0x3d   :  { %683 = vmatpush.msrb.mxu0 %v430_v9  ;;  %703 = vmatpush.msra.mxu1 %v558_v10  ;;  %v456_v8 = vld [vmem:[#allocation7 + $0x150] sm:$0xff] }
  0x3e   :  { %723 = vmatpush.msra.mxu2 %v431_v12  ;;  %743 = vmatpush.msra.mxu3 %v559_v13  ;;  %v584_v10 = vld [vmem:[#allocation7 + $0x550] sm:$0xff]  ;;  %v457_v12 = vld [vmem:[#allocation7 + $0x158] sm:$0xff] }
  0x3f   :  { %684 = vmatpush.msrb.mxu0 %v422_v14  ;;  %704 = vmatpush.msra.mxu1 %v550_v15  ;;  %v585_v14 = vld [vmem:[#allocation7 + $0x558] sm:$0xff]  ;;  %v448_v15 = vld [vmem:[#allocation7 + $0x110] sm:$0xff] }
  0x40   :  { %724 = vmatpush.msra.mxu2 %v423_v16  ;;  %744 = vmatpush.msra.mxu3 %v551_v17  ;;  %v449_v17 = vld [vmem:[#allocation7 + $0x118] sm:$0xff] }
  0x41   :  { %5897 = vmatmul.msk.f32.gmra.mxu1 %vm91_vm1, %v6468_v18  ;;  %5915 = vmatmul.msk.f32.gmra.mxu3 %vm91_vm1, %v6468_v18 }
  0x42   :  { %5906 = vmatmul.msk.f32.gmra.mxu2 %vm91_vm1, %v6468_v18  ;;  %685 = vmatpush.msrb.mxu0 %v414_v19 }
  0x43   :  { %705 = vmatpush.msra.mxu1 %v542_v20  ;;  %725 = vmatpush.msra.mxu2 %v415_v21  ;;  %v577_v20 = vld [vmem:[#allocation7 + $0x518] sm:$0xff] }
  0x44   :  { %745 = vmatpush.msra.mxu3 %v543_v22  ;;  %750 = vmatpush.msra.mxu0 %v536_v23 }
  0x45   :  { %770 = vmatpush.msrb.mxu1 %v664_v24  ;;  %790 = vmatpush.msrb.mxu2 %v537_v25  ;;  %v440_v24 = vld [vmem:[#allocation7 + $0xd0] sm:$0xff] }
  0x46   :  { %810 = vmatpush.msrb.mxu3 %v665_v26  ;;  %751 = vmatpush.msra.mxu0 %v528_v27  ;;  %v568_v26 = vld [vmem:[#allocation7 + $0x4d0] sm:$0xff]  ;;  %v441_v27 = vld [vmem:[#allocation7 + $0xd8] sm:$0xff] }
  0x47   :  { %771 = vmatpush.msrb.mxu1 %v656_v28  ;;  %791 = vmatpush.msrb.mxu2 %v529_v29  ;;  %v569_v28 = vld [vmem:[#allocation7 + $0x4d8] sm:$0xff]  ;;  %v432_v29 = vld [vmem:[#allocation7 + $0x90] sm:$0xff] }
  0x48   :  { %811 = vmatpush.msrb.mxu3 %v657_v30  ;;  %752 = vmatpush.msra.mxu0 %v520_v31  ;;  %v560_v30 = vld [vmem:[#allocation7 + $0x490] sm:$0xff]  ;;  %v433_v31 = vld [vmem:[#allocation7 + $0x98] sm:$0xff] }
  0x49   :  { %772 = vmatpush.msrb.mxu1 %v648_v32  ;;  %792 = vmatpush.msrb.mxu2 %v521_v33  ;;  %v424_v33 = vld [vmem:[#allocation7 + $0x50] sm:$0xff] }
  0x4a   :  { %812 = vmatpush.msrb.mxu3 %v649_v34  ;;  %753 = vmatpush.msra.mxu0 %v512_v35 }
  0x4b   :  { %773 = vmatpush.msrb.mxu1 %v640_v36  ;;  %793 = vmatpush.msrb.mxu2 %v513_v37  ;;  %v552_v36 = vld [vmem:[#allocation7 + $0x450] sm:$0xff]  ;;  %v425_v37 = vld [vmem:[#allocation7 + $0x58] sm:$0xff] }
  0x4c   :  { %813 = vmatpush.msrb.mxu3 %v641_v38  ;;  %5886 = vmatmul.msk.f32.gmra.mxu0 %vm91_vm1, %v6446_v45  ;;  %v625_v45 = vld [vmem:[#allocation7 + $0x698] sm:$0xff] }
  0x4d   :  { %5898 = vmatmul.msk.f32.gmra.mxu1 %vm91_vm1, %v6411_v4  ;;  %5907 = vmatmul.msk.f32.gmra.mxu2 %vm91_vm1, %v6411_v4  ;;  %v553_v38 = vld [vmem:[#allocation7 + $0x458] sm:$0xff] }
  0x4e   :  { %5916 = vmatmul.msk.f32.gmra.mxu3 %vm91_vm1, %v6411_v4  ;;  %754 = vmatpush.msra.mxu0 %v504_v40  ;;  %v608_v4 = vld [vmem:[#allocation7 + $0x610] sm:$0xff] }
  0x4f   :  { %774 = vmatpush.msrb.mxu1 %v632_v43  ;;  %794 = vmatpush.msrb.mxu2 %v505_v44  ;;  %v544_v40 = vld [vmem:[#allocation7 + $0x410] sm:$0xff]  ;;  %v545_v44 = vld [vmem:[#allocation7 + $0x418] sm:$0xff] }
  0x50   :  { %814 = vmatpush.msrb.mxu3 %v633_v46  ;;  %755 = vmatpush.msra.mxu0 %v496_v47 }
  0x51   :  { %775 = vmatpush.msrb.mxu1 %v624_v48  ;;  %795 = vmatpush.msrb.mxu2 %v497_v49  ;;  %v666_v48 = vld [vmem:[#allocation7 + $0x7e0] sm:$0xff] }
  0x52   :  { %815 = vmatpush.msrb.mxu3 %v625_v45  ;;  %756 = vmatpush.msra.mxu0 %v488_v50  ;;  %v667_v45 = vld [vmem:[#allocation7 + $0x7e8] sm:$0xff] }
  0x53   :  { %776 = vmatpush.msrb.mxu1 %v616_v51  ;;  %796 = vmatpush.msrb.mxu2 %v489_v52  ;;  %v6355_v52 = vmov 0.0  }
  0x54   :  { %816 = vmatpush.msrb.mxu3 %v617_v53  ;;  %757 = vmatpush.msra.mxu0 %v480_v54  ;;  %v658_v53 = vld [vmem:[#allocation7 + $0x7a0] sm:$0xff] }
  0x55   :  { %777 = vmatpush.msrb.mxu1 %v608_v4  ;;  %797 = vmatpush.msrb.mxu2 %v481_v56  ;;  %v659_v56 = vld [vmem:[#allocation7 + $0x7a8] sm:$0xff] }
  0x56   :  { %817 = vmatpush.msrb.mxu3 %v609_v57  ;;  %5887 = vmatmul.msk.f32.gmra.mxu0 %vm91_vm1, %v6457_v62  ;;  %v593_v62 = vld [vmem:[#allocation7 + $0x598] sm:$0xff]  ;;  %v563_v4 = vld [vmem:[#allocation7 + $0x4a8] sm:$0xff] }
  0x57   :  { %5899 = vmatmul.msk.f32.gmra.mxu1 %vm91_vm1, %v6428_v11  ;;  %5908 = vmatmul.msk.f32.gmra.mxu2 %vm91_vm1, %v6428_v11 }
  0x58   :  { %5917 = vmatmul.msk.f32.gmra.mxu3 %vm91_vm1, %v6428_v11  ;;  %758 = vmatpush.msra.mxu0 %v472_v63  ;;  %v576_v11 = vld [vmem:[#allocation7 + $0x510] sm:$0xff] }
  0x59   :  { %778 = vmatpush.msrb.mxu1 %v600_v0  ;;  %798 = vmatpush.msrb.mxu2 %v473_v1  ;;  %v651_v1 = vld [vmem:[#allocation7 + $0x768] sm:$0xff] }
  0x5a   :  { %818 = vmatpush.msrb.mxu3 %v601_v2  ;;  %759 = vmatpush.msra.mxu0 %v464_v3  ;;  %v642_v3 = vld [vmem:[#allocation7 + $0x720] sm:$0xff] }
  0x5b   :  { %779 = vmatpush.msrb.mxu1 %v592_v6  ;;  %799 = vmatpush.msrb.mxu2 %v465_v7 }
  0x5c   :  { %819 = vmatpush.msrb.mxu3 %v593_v62  ;;  %760 = vmatpush.msra.mxu0 %v456_v8 }
  0x5d   :  { %780 = vmatpush.msrb.mxu1 %v584_v10  ;;  %800 = vmatpush.msrb.mxu2 %v457_v12  ;;  %v634_v12 = vld [vmem:[#allocation7 + $0x6e0] sm:$0xff] }
  0x5e   :  { %820 = vmatpush.msrb.mxu3 %v585_v14  ;;  %761 = vmatpush.msra.mxu0 %v448_v15  ;;  %v635_v15 = vld [vmem:[#allocation7 + $0x6e8] sm:$0xff] }
  0x5f   :  { %781 = vmatpush.msrb.mxu1 %v576_v11  ;;  %801 = vmatpush.msrb.mxu2 %v449_v17 }
  0x60   :  { %821 = vmatpush.msrb.mxu3 %v577_v20  ;;  %5888 = vmatmul.msk.f32.gmra.mxu0 %vm91_vm1, %v6468_v18  ;;  %v561_v18 = vld [vmem:[#allocation7 + $0x498] sm:$0xff]  ;;  %v627_v20 = vld [vmem:[#allocation7 + $0x6a8] sm:$0xff] }
  0x61   :  { %5900 = vmatmul.msk.f32.gmra.mxu1 %vm91_vm1, %v6416_v5  ;;  %5909 = vmatmul.msk.f32.gmra.mxu2 %vm91_vm1, %v6416_v5 }
  0x62   :  { %5918 = vmatmul.msk.f32.gmra.mxu3 %vm91_vm1, %v6416_v5  ;;  %762 = vmatpush.msra.mxu0 %v440_v24  ;;  %v416_v5 = vld [vmem:[#allocation7 + $0x10] sm:$0xff]  ;;  %v619_v24 = vld [vmem:[#allocation7 + $0x668] sm:$0xff] }
  0x63   :  { %782 = vmatpush.msrb.mxu1 %v568_v26  ;;  %802 = vmatpush.msrb.mxu2 %v441_v27  ;;  %v610_v26 = vld [vmem:[#allocation7 + $0x620] sm:$0xff] }
  0x64   :  { %822 = vmatpush.msrb.mxu3 %v569_v28  ;;  %763 = vmatpush.msra.mxu0 %v432_v29  ;;  %v611_v28 = vld [vmem:[#allocation7 + $0x628] sm:$0xff]  ;;  %v602_v29 = vld [vmem:[#allocation7 + $0x5e0] sm:$0xff] }
  0x65   :  { %783 = vmatpush.msrb.mxu1 %v560_v30  ;;  %803 = vmatpush.msrb.mxu2 %v433_v31  ;;  %v603_v31 = vld [vmem:[#allocation7 + $0x5e8] sm:$0xff] }
  0x66   :  { %823 = vmatpush.msrb.mxu3 %v561_v18  ;;  %764 = vmatpush.msra.mxu0 %v424_v33  ;;  %v594_v18 = vld [vmem:[#allocation7 + $0x5a0] sm:$0xff]  ;;  %v595_v33 = vld [vmem:[#allocation7 + $0x5a8] sm:$0xff] }
  0x67   :  { %784 = vmatpush.msrb.mxu1 %v552_v36  ;;  %804 = vmatpush.msrb.mxu2 %v425_v37 }
  0x68   :  { %824 = vmatpush.msrb.mxu3 %v553_v38  ;;  %765 = vmatpush.msra.mxu0 %v416_v5  ;;  %v539_v38 = vld [vmem:[#allocation7 + $0x3e8] sm:$0xff]  ;;  %v586_v5 = vld [vmem:[#allocation7 + $0x560] sm:$0xff] }
  0x69   :  { %785 = vmatpush.msrb.mxu1 %v544_v40  ;;  %v530_v40 = vld [vmem:[#allocation7 + $0x3a0] sm:$0xff] }
  0x6a   :  { %825 = vmatpush.msrb.mxu3 %v545_v44  ;;  %706 = vmatmul.f32.vlgmr.msra.gmra.mxu1 %v6355_v52  ;;  %v579_v44 = vld [vmem:[#allocation7 + $0x528] sm:$0xff] }
  0x6b   :  { %746 = vmatmul.f32.vlgmr.msra.gmra.mxu3 %v6355_v52  ;;  %850 = vmatpush.msra.mxu1 %v666_v48  ;;  %v570_v48 = vld [vmem:[#allocation7 + $0x4e0] sm:$0xff] }
  0x6c   :  { %890 = vmatpush.msra.mxu3 %v667_v45  ;;  %v514_v45 = vld [vmem:[#allocation7 + $0x320] sm:$0xff] }
  0x6d   :  { %851 = vmatpush.msra.mxu1 %v658_v53  ;;  %v507_v53 = vld [vmem:[#allocation7 + $0x2e8] sm:$0xff] }
  0x6e   :  { %891 = vmatpush.msra.mxu3 %v659_v56  ;;  %v498_v56 = vld [vmem:[#allocation7 + $0x2a0] sm:$0xff] }
  0x70   :  { %892 = vmatpush.msra.mxu3 %v651_v1  ;;  %v482_v1 = vld [vmem:[#allocation7 + $0x220] sm:$0xff] }
  0x72   :  { %786 = vmatmul.f32.vlgmr.msrb.gmra.mxu1 %v6355_v52 }
  0x73   :  { %826 = vmatmul.f32.vlgmr.msrb.gmra.mxu3 %v6355_v52 }
  0x92   :  { %v146_v39 = vpop.f32.mrf.mxu0 }
  0x93   :  { %v5919_v41 = vmul.f32 -1.442695, %v146_v39  ;;  %v6476_v42 = vpop.f32.mrf.mxu1 }
  0x95   :  { %5988 = vpow2.f32 %v5919_v41  ;;  %v417_v41 = vld [vmem:[#allocation7 + $0x18] sm:$0xff] }
  0x96   :  { %805 = vmatpush.msrb.mxu2 %v417_v41  ;;  %v531_v41 = vld [vmem:[#allocation7 + $0x3a8] sm:$0xff] }
  0x99   :  { %v6486_v55 = vpop.f32.mrf.mxu3 }
  0x9b   :  { %v5989_v58 = vpop.eup %5988  ;;  %v187_v59 = vpop.f32.mrf.mxu1 }
  0x9c   :  { %v6488_v60 = vadd.f32 1.0, %v5989_v58  ;;  %v5920_v61 = vmul.f32 -1.442695, %v187_v59 }
  0x9d   :  { %v6499_v16 = vpop.f32.mrf.mxu2 }
  0x9e   :  { %5990 = vrcp.f32 %v6488_v60  ;;  %vm357_vm2 = vweird.f32 %v6488_v60  ;;  %v363_v49 = vand.u32 2147483648, %v6488_v60  ;;  %v361_v51 = vand.u32 2147483647, %v6488_v60 }
  0x9f   :  { %5992 = vpow2.f32 %v5920_v61 }
  0xa0   :  { %v364_v0 = vor.u32 1.1754944e-38, %v363_v49  ;;  %vm362_vm7 = vcmp.eq.f32.partialorder %v361_v51, 8.507059e+37  ;;  %v571_v49 = vld [vmem:[#allocation7 + $0x4e8] sm:$0xff]  ;;  %v506_v51 = vld [vmem:[#allocation7 + $0x2e0] sm:$0xff] }
  0xa1   :  { %v269_v9 = vpop.f32.mrf.mxu3 }
  0xa2   :  { %v5921_v13 = vmul.f32 -1.442695, %v269_v9  ;;  %v643_v9 = vld [vmem:[#allocation7 + $0x728] sm:$0xff] }
  0xa3   :  { %893 = vmatpush.msra.mxu3 %v643_v9  ;;  %v467_v9 = vld [vmem:[#allocation7 + $0x1a8] sm:$0xff] }
  0xa4   :  { %v6501_v19 = vpop.eup %5990  ;;  %5994 = vpow2.f32 %v5921_v13 }
  0xa5   :  { %v5993_v21 = vpop.eup %5992  ;;  %v353_v22 = vmul.f32 %v6501_v19, %v6488_v60  ;;  %v228_v39 = vpop.f32.mrf.mxu2  ;;  %vm358_vm3 = vweird.f32 %v6501_v19  ;;  %v650_v60 = vld [vmem:[#allocation7 + $0x760] sm:$0xff]  ;;  %894 = vmatpush.msra.mxu3 %v635_v15  ;;  %v652_v15 = vld [vmem:[#allocation7 + $0x770] sm:$0xff] }
  0xa6   :  { %v6505_v23 = vadd.f32 1.0, %v5993_v21  ;;  %vm6532_vm4 = vmor %vm357_vm2, %vm358_vm3  ;;  %852 = vmatpush.msra.mxu1 %v650_v60  ;;  %v491_v60 = vld [vmem:[#allocation7 + $0x268] sm:$0xff] }
  0xa7   :  { %v354_v25 = vsub.f32 1.0, %v353_v22  ;;  %v618_v22 = vld [vmem:[#allocation7 + $0x660] sm:$0xff]  ;;  %895 = vmatpush.msra.mxu3 %v627_v20  ;;  %v644_v20 = vld [vmem:[#allocation7 + $0x730] sm:$0xff] }
  0xa8   :  { %5996 = vrcp.f32 %v6505_v23  ;;  %v382_v54 = vand.u32 2147483648, %v6505_v23  ;;  %v380_v61 = vand.u32 2147483647, %v6505_v23  ;;  %vm376_vm6 = vweird.f32 %v6505_v23  ;;  %853 = vmatpush.msra.mxu1 %v642_v3  ;;  %v474_v3 = vld [vmem:[#allocation7 + $0x1e0] sm:$0xff] }
  0xa9   :  { %v355_v35 = vmul.f32 %v6501_v19, %v354_v25  ;;  %896 = vmatpush.msra.mxu3 %v619_v24  ;;  %v443_v24 = vld [vmem:[#allocation7 + $0xe8] sm:$0xff] }
  0xaa   :  { %v5995_v32 = vpop.eup %5994  ;;  %v383_v7 = vor.u32 1.1754944e-38, %v382_v54  ;;  %vm381_vm9 = vcmp.eq.f32.partialorder %v380_v61, 8.507059e+37  ;;  %854 = vmatpush.msra.mxu1 %v634_v12  ;;  %v562_v54 = vld [vmem:[#allocation7 + $0x4a0] sm:$0xff]  ;;  %v661_v12 = vld [vmem:[#allocation7 + $0x7b8] sm:$0xff] }
  0xab   :  { %v6516_v34 = vadd.f32 1.0, %v5995_v32  ;;  %v356_v47 = vadd.f32 %v6501_v19, %v355_v35  ;;  %897 = vmatpush.msra.mxu3 %v611_v28  ;;  %v490_v61 = vld [vmem:[#allocation7 + $0x260] sm:$0xff]  ;;  %v435_v28 = vld [vmem:[#allocation7 + $0xa8] sm:$0xff] }
  0xad   :  { %5998 = vrcp.f32 %v6516_v34  ;;  %v360_v59 = vsel %vm6532_vm4, %v6501_v19, %v356_v47  ;;  %v626_v19 = vld [vmem:[#allocation7 + $0x6a0] sm:$0xff]  ;;  %v402_v25 = vand.u32 2147483648, %v6516_v34  ;;  %vm396_vm11 = vweird.f32 %v6516_v34  ;;  %898 = vmatpush.msra.mxu3 %v603_v31  ;;  %v523_v47 = vld [vmem:[#allocation7 + $0x368] sm:$0xff] }
  0xae   :  { %v5997_v43 = vpop.eup %5996  ;;  %6000 = vtanh.f32 %v228_v39  ;;  %v365_v8 = vsel %vm362_vm7, %v364_v0, %v360_v59  ;;  %855 = vmatpush.msra.mxu1 %v626_v19  ;;  %v400_v27 = vand.u32 2147483647, %v6516_v34  ;;  %v587_v39 = vld [vmem:[#allocation7 + $0x568] sm:$0xff]  ;;  %v426_v31 = vld [vmem:[#allocation7 + $0x60] sm:$0xff] }
  0xaf   :  { %v372_v46 = vmul.f32 %v5997_v43, %v6505_v23  ;;  %vm377_vm5 = vweird.f32 %v5997_v43  ;;  %v403_v32 = vor.u32 1.1754944e-38, %v402_v25  ;;  %899 = vmatpush.msra.mxu3 %v595_v33  ;;  %v555_v59 = vld [vmem:[#allocation7 + $0x468] sm:$0xff]  ;;  %v636_v25 = vld [vmem:[#allocation7 + $0x6f0] sm:$0xff]  ;;  %v621_v33 = vld [vmem:[#allocation7 + $0x678] sm:$0xff] }
  0xb0   :  { %vm378_vm8 = vmor %vm376_vm6, %vm377_vm5  ;;  %856 = vmatpush.msra.mxu1 %v618_v22  ;;  %vm401_vm13 = vcmp.eq.f32.partialorder %v400_v27, 8.507059e+37  ;;  %v547_v0 = vld [vmem:[#allocation7 + $0x428] sm:$0xff]  ;;  %v645_v22 = vld [vmem:[#allocation7 + $0x738] sm:$0xff] }
  0xb1   :  { %v373_v50 = vsub.f32 1.0, %v372_v46  ;;  %v522_v46 = vld [vmem:[#allocation7 + $0x360] sm:$0xff]  ;;  %900 = vmatpush.msra.mxu3 %v587_v39  ;;  %v451_v19 = vld [vmem:[#allocation7 + $0x128] sm:$0xff]  ;;  %v613_v39 = vld [vmem:[#allocation7 + $0x638] sm:$0xff] }
  0xb2   :  { %857 = vmatpush.msra.mxu1 %v610_v26  ;;  %v637_v26 = vld [vmem:[#allocation7 + $0x6f8] sm:$0xff]  ;;  %v434_v27 = vld [vmem:[#allocation7 + $0xa0] sm:$0xff] }
  0xb3   :  { %v6537_v57 = vpop.eup %5998  ;;  %v374_v58 = vmul.f32 %v5997_v43, %v373_v50  ;;  %v515_v50 = vld [vmem:[#allocation7 + $0x328] sm:$0xff]  ;;  %901 = vmatpush.msra.mxu3 %v579_v44  ;;  %v605_v44 = vld [vmem:[#allocation7 + $0x5f8] sm:$0xff] }
  0xb4   :  { %v392_v63 = vmul.f32 %v6537_v57, %v6516_v34  ;;  %v6001_v6 = vpop.eup %6000  ;;  %vm397_vm10 = vweird.f32 %v6537_v57  ;;  %858 = vmatpush.msra.mxu1 %v602_v29  ;;  %v538_v34 = vld [vmem:[#allocation7 + $0x3e0] sm:$0xff]  ;;  %v628_v29 = vld [vmem:[#allocation7 + $0x6b0] sm:$0xff] }
  0xb5   :  { %v375_v2 = vadd.f32 %v5997_v43, %v374_v58  ;;  %v407_v17 = vmul.f32 %v6001_v6, %v365_v8  ;;  %vm398_vm12 = vmor %vm396_vm11, %vm397_vm10  ;;  %902 = vmatpush.msra.mxu3 %v571_v49  ;;  %v554_v58 = vld [vmem:[#allocation7 + $0x460] sm:$0xff]  ;;  %v475_v6 = vld [vmem:[#allocation7 + $0x1e8] sm:$0xff] }
  0xb6   :  { %v393_v62 = vsub.f32 1.0, %v392_v63  ;;  %859 = vmatpush.msra.mxu1 %v594_v18  ;;  %v546_v63 = vld [vmem:[#allocation7 + $0x420] sm:$0xff]  ;;  %v620_v18 = vld [vmem:[#allocation7 + $0x670] sm:$0xff]  ;;  %v597_v49 = vld [vmem:[#allocation7 + $0x5b8] sm:$0xff] }
  0xb7   :  { %v379_v10 = vsel %vm378_vm8, %v5997_v43, %v375_v2  ;;  %v578_v43 = vld [vmem:[#allocation7 + $0x520] sm:$0xff]  ;;  %903 = vmatpush.msra.mxu3 %v563_v4  ;;  %v483_v2 = vld [vmem:[#allocation7 + $0x228] sm:$0xff]  ;;  %v509_v4 = vld [vmem:[#allocation7 + $0x2f8] sm:$0xff] }
  0xb8   :  { %v394_v13 = vmul.f32 %v6537_v57, %v393_v62  ;;  %v384_v14 = vsel %vm381_vm9, %v383_v7, %v379_v10  ;;  %860 = vmatpush.msra.mxu1 %v586_v5  ;;  %v668_v7 = vld [vmem:[#allocation7 + $0x7f0] sm:$0xff]  ;;  %v669_v62 = vld [vmem:[#allocation7 + $0x7f8] sm:$0xff]  ;;  %v466_v8 = vld [vmem:[#allocation7 + $0x1a0] sm:$0xff] }
  0xb9   :  { %v406_v11 = vmul.f32 0.0, %v384_v14  ;;  %904 = vmatpush.msra.mxu3 %v555_v59  ;;  %v660_v10 = vld [vmem:[#allocation7 + $0x7b0] sm:$0xff]  ;;  %v459_v14 = vld [vmem:[#allocation7 + $0x168] sm:$0xff]  ;;  %v501_v59 = vld [vmem:[#allocation7 + $0x2b8] sm:$0xff] }
  0xba   :  { %v395_v23 = vadd.f32 %v6537_v57, %v394_v13  ;;  %861 = vmatpush.msra.mxu1 %v578_v43  ;;  %v458_v13 = vld [vmem:[#allocation7 + $0x160] sm:$0xff]  ;;  %v612_v5 = vld [vmem:[#allocation7 + $0x630] sm:$0xff] }
  0xbb   :  { %v6550_v21 = vadd.f32 %v407_v17, %v406_v11  ;;  %905 = vmatpush.msra.mxu3 %v547_v0  ;;  %v653_v11 = vld [vmem:[#allocation7 + $0x778] sm:$0xff]  ;;  %v450_v17 = vld [vmem:[#allocation7 + $0x120] sm:$0xff]  ;;  %v604_v43 = vld [vmem:[#allocation7 + $0x5f0] sm:$0xff] }
  0xbc   :  { %v399_v30 = vsel %vm398_vm12, %v6537_v57, %v395_v23  ;;  %862 = vmatpush.msra.mxu1 %v570_v48  ;;  %v499_v57 = vld [vmem:[#allocation7 + $0x2a8] sm:$0xff]  ;;  %906 = vmatmul.f32.vlgmr.msra.gmra.mxu3 %v6355_v52  ;;  %v442_v23 = vld [vmem:[#allocation7 + $0xe0] sm:$0xff]  ;;  %v596_v48 = vld [vmem:[#allocation7 + $0x5b0] sm:$0xff] }
  0xbd   :  { %6002 = vtanh.f32 %v6550_v21  ;;  %v404_v36 = vsel %vm401_vm13, %v403_v32, %v399_v30  ;;  %970 = vmatpush.msrb.mxu3 %v669_v62  ;;  %v629_v30 = vld [vmem:[#allocation7 + $0x6b8] sm:$0xff]  ;;  %v427_v32 = vld [vmem:[#allocation7 + $0x68] sm:$0xff] }
  0xbe   :  { %863 = vmatpush.msra.mxu1 %v562_v54  ;;  %v508_v54 = vld [vmem:[#allocation7 + $0x2f0] sm:$0xff]  ;;  %v493_v0 = vld [vmem:[#allocation7 + $0x278] sm:$0xff] }
  0xbf   :  { %971 = vmatpush.msrb.mxu3 %v661_v12  ;;  %v557_v62 = vld [vmem:[#allocation7 + $0x478] sm:$0xff] }
  0xc0   :  { %864 = vmatpush.msra.mxu1 %v554_v58  ;;  %v500_v58 = vld [vmem:[#allocation7 + $0x2b0] sm:$0xff]  ;;  %v549_v12 = vld [vmem:[#allocation7 + $0x438] sm:$0xff] }
  0xc1   :  { %972 = vmatpush.msrb.mxu3 %v653_v11  ;;  %v461_v11 = vld [vmem:[#allocation7 + $0x178] sm:$0xff] }
  0xc2   :  { %865 = vmatpush.msra.mxu1 %v546_v63  ;;  %v492_v63 = vld [vmem:[#allocation7 + $0x270] sm:$0xff] }
  0xc3   :  { %v6003_v35 = vpop.eup %6002  ;;  %866 = vmatmul.f32.vlgmr.msra.gmra.mxu1 %v6355_v52  ;;  %973 = vmatpush.msrb.mxu3 %v645_v22  ;;  %v444_v22 = vld [vmem:[#allocation7 + $0xf0] sm:$0xff] }
  0xc4   :  { %v6559_v37 = vmul.f32 %v6003_v35, %v404_v36  ;;  %930 = vmatpush.msrb.mxu1 %v668_v7  ;;  %v418_v35 = vld [vmem:[#allocation7 + $0x20] sm:$0xff]  ;;  %v419_v36 = vld [vmem:[#allocation7 + $0x28] sm:$0xff]  ;;  %v556_v7 = vld [vmem:[#allocation7 + $0x470] sm:$0xff] }
  0xc5   :  { %974 = vmatpush.msrb.mxu3 %v637_v26  ;;  %v6573_v26 = vpop.f32.mrf.mxu3 }
  0xc6   :  { %686 = vmatmul.f32.vlgmr.msrb.gmra.mxu0 %v6559_v37  ;;  %726 = vmatmul.f32.vlgmr.msra.gmra.mxu2 %v6559_v37 }
  0xc7   :  { %830 = vmatpush.msrb.mxu0 %v538_v34  ;;  %870 = vmatpush.msra.mxu2 %v539_v38  ;;  %v540_v34 = vld [vmem:[#allocation7 + $0x3f0] sm:$0xff]  ;;  %v541_v38 = vld [vmem:[#allocation7 + $0x3f8] sm:$0xff] }
  0xc8   :  { %931 = vmatpush.msrb.mxu1 %v660_v10  ;;  %975 = vmatpush.msrb.mxu3 %v629_v30  ;;  %v548_v10 = vld [vmem:[#allocation7 + $0x430] sm:$0xff]  ;;  %v1383_v30 = vld [vmem:[#allocation7 + $0x7c0] sm:$0xff] }
  0xc9   :  { %831 = vmatpush.msrb.mxu0 %v530_v40  ;;  %871 = vmatpush.msra.mxu2 %v531_v41  ;;  %v532_v40 = vld [vmem:[#allocation7 + $0x3b0] sm:$0xff]  ;;  %v533_v41 = vld [vmem:[#allocation7 + $0x3b8] sm:$0xff] }
  0xca   :  { %932 = vmatpush.msrb.mxu1 %v652_v15  ;;  %976 = vmatpush.msrb.mxu3 %v621_v33  ;;  %v460_v15 = vld [vmem:[#allocation7 + $0x170] sm:$0xff]  ;;  %v1375_v33 = vld [vmem:[#allocation7 + $0x780] sm:$0xff] }
  0xcb   :  { %832 = vmatpush.msrb.mxu0 %v522_v46  ;;  %872 = vmatpush.msra.mxu2 %v523_v47  ;;  %v524_v46 = vld [vmem:[#allocation7 + $0x370] sm:$0xff]  ;;  %v525_v47 = vld [vmem:[#allocation7 + $0x378] sm:$0xff] }
  0xcc   :  { %933 = vmatpush.msrb.mxu1 %v644_v20  ;;  %977 = vmatpush.msrb.mxu3 %v613_v39  ;;  %v6571_v20 = vpop.f32.mrf.mxu1 }
  0xcd   :  { %833 = vmatpush.msrb.mxu0 %v514_v45  ;;  %873 = vmatpush.msra.mxu2 %v515_v50  ;;  %v516_v45 = vld [vmem:[#allocation7 + $0x330] sm:$0xff]  ;;  %v517_v50 = vld [vmem:[#allocation7 + $0x338] sm:$0xff]  ;;  %v6581_v39 = vpop.f32.mrf.mxu3 }
  0xce   :  { %766 = vmatmul.f32.vlgmr.msra.gmra.mxu0 %v6559_v37  ;;  %806 = vmatmul.f32.vlgmr.msrb.gmra.mxu2 %v6559_v37 }
  0xcf   :  { %834 = vmatpush.msrb.mxu0 %v506_v51  ;;  %874 = vmatpush.msra.mxu2 %v507_v53  ;;  %v588_v51 = vld [vmem:[#allocation7 + $0x570] sm:$0xff]  ;;  %v589_v53 = vld [vmem:[#allocation7 + $0x578] sm:$0xff] }
  0xd0   :  { %934 = vmatpush.msrb.mxu1 %v636_v25  ;;  %978 = vmatpush.msrb.mxu3 %v605_v44  ;;  %v437_v25 = vld [vmem:[#allocation7 + $0xb8] sm:$0xff] }
  0xd1   :  { %835 = vmatpush.msrb.mxu0 %v498_v56  ;;  %875 = vmatpush.msra.mxu2 %v499_v57  ;;  %v580_v56 = vld [vmem:[#allocation7 + $0x530] sm:$0xff]  ;;  %v581_v57 = vld [vmem:[#allocation7 + $0x538] sm:$0xff] }
  0xd2   :  { %935 = vmatpush.msrb.mxu1 %v628_v29  ;;  %979 = vmatpush.msrb.mxu3 %v597_v49  ;;  %v420_v29 = vld [vmem:[#allocation7 + $0x30] sm:$0xff] }
  0xd3   :  { %836 = vmatpush.msrb.mxu0 %v490_v61  ;;  %876 = vmatpush.msra.mxu2 %v491_v60  ;;  %v572_v61 = vld [vmem:[#allocation7 + $0x4f0] sm:$0xff]  ;;  %v573_v60 = vld [vmem:[#allocation7 + $0x4f8] sm:$0xff] }
  0xd4   :  { %936 = vmatpush.msrb.mxu1 %v620_v18  ;;  %980 = vmatpush.msrb.mxu3 %v589_v53  ;;  %v6577_v18 = vpop.f32.mrf.mxu1  ;;  %v1344_v53 = vld [vmem:[#allocation7 + $0x688] sm:$0xff] }
  0xd5   :  { %837 = vmatpush.msrb.mxu0 %v482_v1  ;;  %877 = vmatpush.msra.mxu2 %v483_v2  ;;  %v564_v1 = vld [vmem:[#allocation7 + $0x4b0] sm:$0xff]  ;;  %v565_v2 = vld [vmem:[#allocation7 + $0x4b8] sm:$0xff] }
  0xd6   :  { %937 = vmatpush.msrb.mxu1 %v612_v5  ;;  %981 = vmatpush.msrb.mxu3 %v581_v57  ;;  %v1360_v5 = vld [vmem:[#allocation7 + $0x708] sm:$0xff] }
  0xd7   :  { %838 = vmatpush.msrb.mxu0 %v474_v3  ;;  %878 = vmatpush.msra.mxu2 %v475_v6  ;;  %v484_v3 = vld [vmem:[#allocation7 + $0x230] sm:$0xff]  ;;  %v485_v6 = vld [vmem:[#allocation7 + $0x238] sm:$0xff] }
  0xd8   :  { %938 = vmatpush.msrb.mxu1 %v604_v43  ;;  %982 = vmatpush.msrb.mxu3 %v573_v60  ;;  %v1320_v60 = vld [vmem:[#allocation7 + $0x5c8] sm:$0xff] }
  0xd9   :  { %839 = vmatpush.msrb.mxu0 %v466_v8  ;;  %879 = vmatpush.msra.mxu2 %v467_v9  ;;  %v476_v8 = vld [vmem:[#allocation7 + $0x1f0] sm:$0xff]  ;;  %v477_v9 = vld [vmem:[#allocation7 + $0x1f8] sm:$0xff] }
  0xda   :  { %939 = vmatpush.msrb.mxu1 %v596_v48  ;;  %983 = vmatpush.msrb.mxu3 %v565_v2  ;;  %v6593_v48 = vpop.f32.mrf.mxu0 }
  0xdb   :  { %840 = vmatpush.msrb.mxu0 %v458_v13  ;;  %880 = vmatpush.msra.mxu2 %v459_v14  ;;  %v468_v13 = vld [vmem:[#allocation7 + $0x1b0] sm:$0xff]  ;;  %v469_v14 = vld [vmem:[#allocation7 + $0x1b8] sm:$0xff] }
  0xdc   :  { %940 = vmatpush.msrb.mxu1 %v588_v51  ;;  %984 = vmatpush.msrb.mxu3 %v557_v62  ;;  %v6585_v44 = vpop.f32.mrf.mxu1  ;;  %v1343_v51 = vld [vmem:[#allocation7 + $0x680] sm:$0xff] }
  0xdd   :  { %841 = vmatpush.msrb.mxu0 %v450_v17  ;;  %881 = vmatpush.msra.mxu2 %v451_v19  ;;  %v452_v17 = vld [vmem:[#allocation7 + $0x130] sm:$0xff]  ;;  %v453_v19 = vld [vmem:[#allocation7 + $0x138] sm:$0xff]  ;;  %v1295_v62 = vld [vmem:[#allocation7 + $0x500] sm:$0xff] }
  0xde   :  { %941 = vmatpush.msrb.mxu1 %v580_v56  ;;  %985 = vmatpush.msrb.mxu3 %v549_v12  ;;  %v1336_v56 = vld [vmem:[#allocation7 + $0x648] sm:$0xff] }
  0xdf   :  { %842 = vmatpush.msrb.mxu0 %v442_v23  ;;  %882 = vmatpush.msra.mxu2 %v443_v24  ;;  %v445_v23 = vld [vmem:[#allocation7 + $0xf8] sm:$0xff]  ;;  %v436_v24 = vld [vmem:[#allocation7 + $0xb0] sm:$0xff]  ;;  %v1288_v12 = vld [vmem:[#allocation7 + $0x4c8] sm:$0xff] }
  0xe0   :  { %942 = vmatpush.msrb.mxu1 %v572_v61  ;;  %986 = vmatmul.f32.vlgmr.msrb.gmra.mxu3 %v6355_v52  ;;  %v1319_v61 = vld [vmem:[#allocation7 + $0x5c0] sm:$0xff] }
  0xe1   :  { %843 = vmatpush.msrb.mxu0 %v434_v27  ;;  %883 = vmatpush.msra.mxu2 %v435_v28  ;;  %v428_v27 = vld [vmem:[#allocation7 + $0x70] sm:$0xff]  ;;  %v429_v28 = vld [vmem:[#allocation7 + $0x78] sm:$0xff] }
  0xe2   :  { %943 = vmatpush.msrb.mxu1 %v564_v1  ;;  %v1312_v1 = vld [vmem:[#allocation7 + $0x588] sm:$0xff] }
  0xe3   :  { %844 = vmatpush.msrb.mxu0 %v426_v31  ;;  %884 = vmatpush.msra.mxu2 %v427_v32  ;;  %v1384_v31 = vld [vmem:[#allocation7 + $0x7c8] sm:$0xff]  ;;  %v6575_v32 = vpop.f32.mrf.mxu2 }
  0xe4   :  { %944 = vmatpush.msrb.mxu1 %v556_v7  ;;  %1451 = vmatpush.msra.mxu3 %v1384_v31  ;;  %v1370_v31 = vld [vmem:[#allocation7 + $0x758] sm:$0xff] }
  0xe5   :  { %845 = vmatpush.msrb.mxu0 %v418_v35  ;;  %885 = vmatpush.msra.mxu2 %v419_v36  ;;  %v1376_v35 = vld [vmem:[#allocation7 + $0x788] sm:$0xff]  ;;  %v1367_v36 = vld [vmem:[#allocation7 + $0x740] sm:$0xff] }
  0xe6   :  { %846 = vmatmul.f32.vlgmr.msrb.gmra.mxu0 %v6559_v37  ;;  %886 = vmatmul.f32.vlgmr.msra.gmra.mxu2 %v6559_v37 }
  0xe7   :  { %910 = vmatpush.msra.mxu0 %v540_v34  ;;  %950 = vmatpush.msrb.mxu2 %v541_v38  ;;  %v1368_v34 = vld [vmem:[#allocation7 + $0x748] sm:$0xff]  ;;  %v1359_v38 = vld [vmem:[#allocation7 + $0x700] sm:$0xff] }
  0xe8   :  { %945 = vmatpush.msrb.mxu1 %v548_v10  ;;  %1452 = vmatpush.msra.mxu3 %v1376_v35  ;;  %v1287_v10 = vld [vmem:[#allocation7 + $0x4c0] sm:$0xff] }
  0xe9   :  { %911 = vmatpush.msra.mxu0 %v532_v40  ;;  %951 = vmatpush.msrb.mxu2 %v533_v41  ;;  %v1351_v40 = vld [vmem:[#allocation7 + $0x6c0] sm:$0xff]  ;;  %v1352_v41 = vld [vmem:[#allocation7 + $0x6c8] sm:$0xff] }
  0xea   :  { %946 = vmatmul.f32.vlgmr.msrb.gmra.mxu1 %v6355_v52  ;;  %v421_v52 = vld [vmem:[#allocation7 + $0x38] sm:$0xff]  ;;  %1453 = vmatpush.msra.mxu3 %v1368_v34  ;;  %v6626_v35 = vld [vmem:[%s7503_s3] sm:$0xf] }
  0xeb   :  { %912 = vmatpush.msra.mxu0 %v524_v46  ;;  %952 = vmatpush.msrb.mxu2 %v525_v47  ;;  %v6583_v43 = vpop.f32.mrf.mxu2  ;;  %v6591_v47 = vpop.f32.mrf.mxu1  ;;  %v1362_v34 = vld [vmem:[#allocation7 + $0x718] sm:$0xff] }
  0xec   :  { %1411 = vmatpush.msra.mxu1 %v1383_v30  ;;  %1454 = vmatpush.msra.mxu3 %v1360_v5  ;;  %v1369_v30 = vld [vmem:[#allocation7 + $0x750] sm:$0xff] }
  0xed   :  { %913 = vmatpush.msra.mxu0 %v516_v45  ;;  %953 = vmatpush.msrb.mxu2 %v517_v50  ;;  %v1353_v5 = vld [vmem:[#allocation7 + $0x6d0] sm:$0xff] }
  0xee   :  { %1412 = vmatpush.msra.mxu1 %v1375_v33  ;;  %1455 = vmatpush.msra.mxu3 %v1352_v41  ;;  %v6629_v41 = vperm.slane %v6626_v35, 0 }
  0xef   :  { %914 = vmatpush.msra.mxu0 %v508_v54  ;;  %954 = vmatpush.msrb.mxu2 %v509_v4  ;;  %v6601_v54 = vpop.f32.mrf.mxu0  ;;  %v1335_v4 = vld [vmem:[#allocation7 + $0x640] sm:$0xff] }
  0xf0   :  { %1413 = vmatpush.msra.mxu1 %v1367_v36  ;;  %1456 = vmatpush.msra.mxu3 %v1344_v53  ;;  %v1361_v36 = vld [vmem:[#allocation7 + $0x710] sm:$0xff] }
  0xf1   :  { %915 = vmatpush.msra.mxu0 %v500_v58  ;;  %955 = vmatpush.msrb.mxu2 %v501_v59  ;;  %v1327_v58 = vld [vmem:[#allocation7 + $0x600] sm:$0xff]  ;;  %v1328_v59 = vld [vmem:[#allocation7 + $0x608] sm:$0xff]  ;;  %v1345_v53 = vld [vmem:[#allocation7 + $0x690] sm:$0xff] }
  0xf2   :  { %1414 = vmatpush.msra.mxu1 %v1359_v38  ;;  %1457 = vmatpush.msra.mxu3 %v1336_v56 }
  0xf3   :  { %916 = vmatpush.msra.mxu0 %v492_v63  ;;  %956 = vmatpush.msrb.mxu2 %v493_v0  ;;  %v6589_v46 = vpop.f32.mrf.mxu2  ;;  %v6599_v50 = vpop.f32.mrf.mxu1  ;;  %v1311_v0 = vld [vmem:[#allocation7 + $0x580] sm:$0xff] }
  0xf4   :  { %1415 = vmatpush.msra.mxu1 %v1351_v40  ;;  %1458 = vmatpush.msra.mxu3 %v1328_v59  ;;  %v1354_v40 = vld [vmem:[#allocation7 + $0x6d8] sm:$0xff]  ;;  %v1337_v59 = vld [vmem:[#allocation7 + $0x650] sm:$0xff] }
  0xf5   :  { %917 = vmatpush.msra.mxu0 %v484_v3  ;;  %957 = vmatpush.msrb.mxu2 %v485_v6  ;;  %v1303_v3 = vld [vmem:[#allocation7 + $0x540] sm:$0xff]  ;;  %v1304_v6 = vld [vmem:[#allocation7 + $0x548] sm:$0xff] }
  0xf6   :  { %1416 = vmatpush.msra.mxu1 %v1343_v51  ;;  %1459 = vmatpush.msra.mxu3 %v1320_v60 }
  0xf7   :  { %918 = vmatpush.msra.mxu0 %v476_v8  ;;  %958 = vmatpush.msrb.mxu2 %v477_v9  ;;  %v6609_v7 = vpop.f32.mrf.mxu0  ;;  %v1296_v8 = vld [vmem:[#allocation7 + $0x508] sm:$0xff] }
  0xf8   :  { %1417 = vmatpush.msra.mxu1 %v1335_v4  ;;  %1460 = vmatpush.msra.mxu3 %v1312_v1  ;;  %v1346_v4 = vld [vmem:[#allocation7 + $0x698] sm:$0xff] }
  0xf9   :  { %919 = vmatpush.msra.mxu0 %v468_v13  ;;  %959 = vmatpush.msrb.mxu2 %v469_v14  ;;  %v1279_v13 = vld [vmem:[#allocation7 + $0x480] sm:$0xff]  ;;  %v1280_v14 = vld [vmem:[#allocation7 + $0x488] sm:$0xff]  ;;  %v1330_v1 = vld [vmem:[#allocation7 + $0x618] sm:$0xff] }
  0xfa   :  { %1418 = vmatpush.msra.mxu1 %v1327_v58  ;;  %1461 = vmatpush.msra.mxu3 %v1304_v6  ;;  %v6633_v6 = vperm.slane %v6626_v35, 1 }
  0xfb   :  { %920 = vmatpush.msra.mxu0 %v460_v15  ;;  %960 = vmatpush.msrb.mxu2 %v461_v11  ;;  %v6597_v45 = vpop.f32.mrf.mxu2  ;;  %v6607_v2 = vpop.f32.mrf.mxu1  ;;  %v1271_v11 = vld [vmem:[#allocation7 + $0x440] sm:$0xff] }
  0xfc   :  { %1419 = vmatpush.msra.mxu1 %v1319_v61  ;;  %1462 = vmatpush.msra.mxu3 %v1296_v8  ;;  %v1338_v61 = vld [vmem:[#allocation7 + $0x658] sm:$0xff]  ;;  %v1321_v8 = vld [vmem:[#allocation7 + $0x5d0] sm:$0xff] }
  0xfd   :  { %921 = vmatpush.msra.mxu0 %v452_v17  ;;  %961 = vmatpush.msrb.mxu2 %v453_v19  ;;  %v1272_v17 = vld [vmem:[#allocation7 + $0x448] sm:$0xff] }
  0xfe   :  { %1420 = vmatpush.msra.mxu1 %v1311_v0  ;;  %1463 = vmatpush.msra.mxu3 %v1288_v12  ;;  %v1329_v0 = vld [vmem:[#allocation7 + $0x610] sm:$0xff] }
  0xff   :  { %922 = vmatpush.msra.mxu0 %v444_v22  ;;  %962 = vmatpush.msrb.mxu2 %v445_v23  ;;  %v1263_v22 = vld [vmem:[#allocation7 + $0x400] sm:$0xff]  ;;  %v1264_v23 = vld [vmem:[#allocation7 + $0x408] sm:$0xff] }
 0x100   :  { %1421 = vmatpush.msra.mxu1 %v1303_v3  ;;  %1464 = vmatpush.msra.mxu3 %v1280_v14  ;;  %v1314_v14 = vld [vmem:[#allocation7 + $0x598] sm:$0xff] }
 0x101   :  { %923 = vmatpush.msra.mxu0 %v436_v24  ;;  %963 = vmatpush.msrb.mxu2 %v437_v25  ;;  %v6617_v24 = vpop.f32.mrf.mxu0  ;;  %v1385_v25 = vld [vmem:[#allocation7 + $0x7d0] sm:$0xff] }
 0x102   :  { %1422 = vmatpush.msra.mxu1 %v1295_v62  ;;  %1465 = vmatpush.msra.mxu3 %v1272_v17  ;;  %v1255_v17 = vld [vmem:[#allocation7 + $0x3c0] sm:$0xff] }
 0x103   :  { %924 = vmatpush.msra.mxu0 %v428_v27  ;;  %964 = vmatpush.msrb.mxu2 %v429_v28  ;;  %v6605_v63 = vpop.f32.mrf.mxu2  ;;  %v6615_v19 = vpop.f32.mrf.mxu1  ;;  %v1386_v27 = vld [vmem:[#allocation7 + $0x7d8] sm:$0xff] }
 0x104   :  { %1423 = vmatpush.msra.mxu1 %v1287_v10  ;;  %1466 = vmatpush.msra.mxu3 %v1264_v23  ;;  %v1322_v10 = vld [vmem:[#allocation7 + $0x5d8] sm:$0xff]  ;;  %v1305_v23 = vld [vmem:[#allocation7 + $0x550] sm:$0xff] }
 0x105   :  { %925 = vmatpush.msra.mxu0 %v420_v29  ;;  %965 = vmatpush.msrb.mxu2 %v421_v52  ;;  %v1377_v29 = vld [vmem:[#allocation7 + $0x790] sm:$0xff]  ;;  %v1378_v52 = vld [vmem:[#allocation7 + $0x798] sm:$0xff] }
 0x106   :  { %926 = vmatmul.f32.vlgmr.msra.gmra.mxu0 %v6559_v37  ;;  %966 = vmatmul.f32.vlgmr.msrb.gmra.mxu2 %v6559_v37  ;;  %v6587_v37 = vpop.f32.mrf.mxu3 }
 0x107   :  { %1424 = vmatpush.msra.mxu1 %v1279_v13  ;;  %1531 = vmatpush.msrb.mxu3 %v1386_v27  ;;  %v1313_v13 = vld [vmem:[#allocation7 + $0x590] sm:$0xff]  ;;  %v1306_v27 = vld [vmem:[#allocation7 + $0x558] sm:$0xff] }
 0x108   :  { %1391 = vmatpush.msrb.mxu0 %v1255_v17  ;;  %v1216_v17 = vld [vmem:[#allocation7 + $0x288] sm:$0xff] }
 0x109   :  { %1425 = vmatpush.msra.mxu1 %v1271_v11  ;;  %1532 = vmatpush.msrb.mxu3 %v1378_v52  ;;  %v1247_v52 = vld [vmem:[#allocation7 + $0x380] sm:$0xff] }
 0x10a   :  { %1392 = vmatpush.msrb.mxu0 %v1247_v52  ;;  %v1207_v52 = vld [vmem:[#allocation7 + $0x240] sm:$0xff] }
 0x10b   :  { %v6613_v15 = vpop.f32.mrf.mxu2  ;;  %1426 = vmatpush.msra.mxu1 %v1263_v22  ;;  %1533 = vmatpush.msrb.mxu3 %v1370_v31  ;;  %v707_v38 = vpop.f32.mrf.mxu1  ;;  %v1256_v22 = vld [vmem:[#allocation7 + $0x3c8] sm:$0xff]  ;;  %v1297_v31 = vld [vmem:[#allocation7 + $0x510] sm:$0xff] }
 0x10c   :  { %1431 = vmatpush.msra.mxu2 %v1256_v22  ;;  %v1265_v22 = vld [vmem:[#allocation7 + $0x410] sm:$0xff] }
 0x10d   :  { %1491 = vmatpush.msrb.mxu1 %v1385_v25  ;;  %1534 = vmatpush.msrb.mxu3 %v1362_v34  ;;  %v6637_v34 = vperm.slane %v6626_v35, 3 }
 0x10e   :  { %v6595_v49 = vpop.f32.mrf.mxu3 }
 0x10f   :  { %1492 = vmatpush.msrb.mxu1 %v1377_v29  ;;  %1535 = vmatpush.msrb.mxu3 %v1354_v40 }
 0x111   :  { %1493 = vmatpush.msrb.mxu1 %v1369_v30  ;;  %1536 = vmatpush.msrb.mxu3 %v1346_v4  ;;  %v1248_v30 = vld [vmem:[#allocation7 + $0x388] sm:$0xff]  ;;  %v1289_v4 = vld [vmem:[#allocation7 + $0x4d0] sm:$0xff] }
 0x112   :  { %1432 = vmatpush.msra.mxu2 %v1248_v30  ;;  %v1208_v30 = vld [vmem:[#allocation7 + $0x248] sm:$0xff] }
 0x113   :  { %v6621_v33 = vpop.f32.mrf.mxu2  ;;  %1494 = vmatpush.msrb.mxu1 %v1361_v36  ;;  %1537 = vmatpush.msrb.mxu3 %v1338_v61  ;;  %v1232_v61 = vld [vmem:[#allocation7 + $0x308] sm:$0xff] }
 0x115   :  { %1495 = vmatpush.msrb.mxu1 %v1353_v5  ;;  %1538 = vmatpush.msrb.mxu3 %v1330_v1  ;;  %v1282_v1 = vld [vmem:[#allocation7 + $0x498] sm:$0xff] }
 0x116   :  { %v6603_v57 = vpop.f32.mrf.mxu3 }
 0x117   :  { %1496 = vmatpush.msrb.mxu1 %v1345_v53  ;;  %1539 = vmatpush.msrb.mxu3 %v1322_v10  ;;  %v1240_v53 = vld [vmem:[#allocation7 + $0x348] sm:$0xff] }
 0x118   :  { %1433 = vmatpush.msra.mxu2 %v1240_v53 }
 0x119   :  { %1497 = vmatpush.msrb.mxu1 %v1337_v59  ;;  %1540 = vmatpush.msrb.mxu3 %v1314_v14  ;;  %v1231_v59 = vld [vmem:[#allocation7 + $0x300] sm:$0xff] }
 0x11a   :  { %1434 = vmatpush.msra.mxu2 %v1232_v61 }
 0x11b   :  { %1498 = vmatpush.msrb.mxu1 %v1329_v0  ;;  %1541 = vmatpush.msrb.mxu3 %v1306_v27  ;;  %v1266_v27 = vld [vmem:[#allocation7 + $0x418] sm:$0xff] }
 0x11d   :  { %1499 = vmatpush.msrb.mxu1 %v1321_v8  ;;  %v1273_v8 = vld [vmem:[#allocation7 + $0x450] sm:$0xff] }
 0x11e   :  { %v6611_v9 = vpop.f32.mrf.mxu3 }
 0x11f   :  { %1500 = vmatpush.msrb.mxu1 %v1313_v13  ;;  %v1274_v13 = vld [vmem:[#allocation7 + $0x458] sm:$0xff] }
 0x121   :  { %1501 = vmatpush.msrb.mxu1 %v1305_v23 }
 0x123   :  { %1502 = vmatpush.msrb.mxu1 %v1297_v31 }
 0x125   :  { %1503 = vmatpush.msrb.mxu1 %v1289_v4  ;;  %v1191_v4 = vld [vmem:[#allocation7 + $0x1c0] sm:$0xff] }
 0x126   :  { %v6619_v28 = vpop.f32.mrf.mxu3 }
 0x12e   :  { %v747_v58 = vpop.f32.mrf.mxu3 }
 0x136   :  { %v827_v29 = vpop.f32.mrf.mxu3 }
 0x143   :  { %v687_v51 = vpop.f32.mrf.mxu0 }
 0x144   :  { %v708_v56 = vadd.f32 %v707_v38, %v687_v51  ;;  %v1298_v38 = vld [vmem:[#allocation7 + $0x518] sm:$0xff]  ;;  %v1239_v51 = vld [vmem:[#allocation7 + $0x340] sm:$0xff] }
 0x145   :  { %1542 = vmatpush.msrb.mxu3 %v1298_v38  ;;  %1393 = vmatpush.msrb.mxu0 %v1239_v51  ;;  %v1200_v51 = vld [vmem:[#allocation7 + $0x208] sm:$0xff] }
 0x146   :  { %v990_v60 = vadd.f32 %v708_v56, %v6629_v41 }
 0x147   :  { %1394 = vmatpush.msrb.mxu0 %v1231_v59 }
 0x148   :  { %v5922_v3 = vmul.f32 -1.442695, %v990_v60  ;;  %v1281_v60 = vld [vmem:[#allocation7 + $0x490] sm:$0xff] }
 0x149   :  { %v727_v62 = vpop.f32.mrf.mxu2  ;;  %1504 = vmatpush.msrb.mxu1 %v1281_v60 }
 0x14a   :  { %6004 = vpow2.f32 %v5922_v3  ;;  %v748_v12 = vadd.f32 %v747_v58, %v727_v62  ;;  %v1290_v58 = vld [vmem:[#allocation7 + $0x4d8] sm:$0xff]  ;;  %v1223_v3 = vld [vmem:[#allocation7 + $0x2c0] sm:$0xff]  ;;  %v1224_v62 = vld [vmem:[#allocation7 + $0x2c8] sm:$0xff] }
 0x14b   :  { %1543 = vmatpush.msrb.mxu3 %v1290_v58  ;;  %1395 = vmatpush.msrb.mxu0 %v1223_v3  ;;  %v767_v23 = vpop.f32.mrf.mxu0 }
 0x14c   :  { %v991_v11 = vadd.f32 %v748_v12, %v6633_v6  ;;  %1435 = vmatpush.msra.mxu2 %v1224_v62  ;;  %1505 = vmatpush.msrb.mxu1 %v1273_v8 }
 0x14d   :  { %1544 = vmatpush.msrb.mxu3 %v1282_v1  ;;  %v1184_v1 = vld [vmem:[#allocation7 + $0x188] sm:$0xff] }
 0x14e   :  { %v5923_v25 = vmul.f32 -1.442695, %v991_v11  ;;  %v1215_v11 = vld [vmem:[#allocation7 + $0x280] sm:$0xff]  ;;  %1436 = vmatpush.msra.mxu2 %v1216_v17  ;;  %1506 = vmatpush.msrb.mxu1 %v1265_v22 }
 0x14f   :  { %1545 = vmatpush.msrb.mxu3 %v1274_v13  ;;  %1396 = vmatpush.msrb.mxu0 %v1215_v11  ;;  %v1176_v13 = vld [vmem:[#allocation7 + $0x148] sm:$0xff] }
 0x150   :  { %v6005_v36 = vpop.eup %6004  ;;  %6006 = vpow2.f32 %v5923_v25  ;;  %v787_v25 = vpop.f32.mrf.mxu1  ;;  %1437 = vmatpush.msra.mxu2 %v1208_v30  ;;  %v1168_v30 = vld [vmem:[#allocation7 + $0x108] sm:$0xff] }
 0x151   :  { %v6639_v5 = vadd.f32 1.0, %v6005_v36  ;;  %v807_v40 = vpop.f32.mrf.mxu2  ;;  %1546 = vmatpush.msrb.mxu3 %v1266_v27  ;;  %1397 = vmatpush.msrb.mxu0 %v1207_v52  ;;  %v6651_v36 = vperm.slane %v6626_v35, 2  ;;  %v788_v38 = vadd.f32 %v787_v25, %v767_v23  ;;  %v1183_v35 = vld [vmem:[#allocation7 + $0x180] sm:$0xff] }
 0x152   :  { %v828_v56 = vadd.f32 %v827_v29, %v807_v40  ;;  %v1199_v40 = vld [vmem:[#allocation7 + $0x200] sm:$0xff]  ;;  %1438 = vmatpush.msra.mxu2 %v1200_v51 }
 0x153   :  { %6008 = vrcp.f32 %v6639_v5  ;;  %1398 = vmatpush.msrb.mxu0 %v1199_v40  ;;  %v992_v60 = vadd.f32 %v788_v38, %v6651_v36  ;;  %v1009_v8 = vand.u32 2147483648, %v6639_v5  ;;  %vm1003_vm15 = vweird.f32 %v6639_v5  ;;  %v1167_v52 = vld [vmem:[#allocation7 + $0x100] sm:$0xff] }
 0x154   :  { %v993_v0 = vadd.f32 %v828_v56, %v6637_v34  ;;  %v1192_v56 = vld [vmem:[#allocation7 + $0x1c8] sm:$0xff]  ;;  %v1007_v17 = vand.u32 2147483647, %v6639_v5  ;;  %v1159_v51 = vld [vmem:[#allocation7 + $0xc0] sm:$0xff] }
 0x155   :  { %1399 = vmatpush.msrb.mxu0 %v1191_v4  ;;  %1439 = vmatpush.msra.mxu2 %v1192_v56  ;;  %v1010_v40 = vor.u32 1.1754944e-38, %v1009_v8 }
 0x156   :  { %v6007_v10 = vpop.eup %6006  ;;  %v5924_v12 = vmul.f32 -1.442695, %v993_v0  ;;  %vm1008_vm3 = vcmp.eq.f32.partialorder %v1007_v17, 8.507059e+37 }
 0x157   :  { %v6643_v14 = vadd.f32 1.0, %v6007_v10  ;;  %1400 = vmatpush.msrb.mxu0 %v1183_v35  ;;  %1440 = vmatpush.msra.mxu2 %v1184_v1  ;;  %v1152_v35 = vld [vmem:[#allocation7 + $0x88] sm:$0xff] }
 0x158   :  { %6010 = vpow2.f32 %v5924_v12  ;;  %v867_v10 = vpop.f32.mrf.mxu1  ;;  %v1175_v12 = vld [vmem:[#allocation7 + $0x140] sm:$0xff] }
 0x159   :  { %v6645_v29 = vpop.eup %6008  ;;  %6012 = vrcp.f32 %v6643_v14  ;;  %1401 = vmatpush.msrb.mxu0 %v1175_v12  ;;  %1441 = vmatpush.msra.mxu2 %v1176_v13  ;;  %v1028_v22 = vand.u32 2147483648, %v6643_v14  ;;  %v1026_v25 = vand.u32 2147483647, %v6643_v14  ;;  %vm1022_vm2 = vweird.f32 %v6643_v14  ;;  %v1143_v12 = vld [vmem:[#allocation7 + $0x40] sm:$0xff]  ;;  %v1144_v13 = vld [vmem:[#allocation7 + $0x48] sm:$0xff] }
 0x15a   :  { %v999_v31 = vmul.f32 %v6645_v29, %v6639_v5  ;;  %vm1004_vm14 = vweird.f32 %v6645_v29 }
 0x15b   :  { %vm6665_vm0 = vmor %vm1003_vm15, %vm1004_vm14  ;;  %1402 = vmatpush.msrb.mxu0 %v1167_v52  ;;  %1442 = vmatpush.msra.mxu2 %v1168_v30  ;;  %vm1027_vm5 = vcmp.eq.f32.partialorder %v1026_v25, 8.507059e+37  ;;  %v1136_v25 = vld [vmem:[#allocation7 + $0x8] sm:$0xff] }
 0x15c   :  { %v1000_v53 = vsub.f32 1.0, %v999_v31 }
 0x15d   :  { %1403 = vmatpush.msrb.mxu0 %v1159_v51 }
 0x15e   :  { %v6011_v58 = vpop.eup %6010  ;;  %v1001_v59 = vmul.f32 %v6645_v29, %v1000_v53  ;;  %v1160_v53 = vld [vmem:[#allocation7 + $0xc8] sm:$0xff] }
 0x15f   :  { %v6013_v61 = vpop.eup %6012  ;;  %v6655_v0 = vadd.f32 1.0, %v6011_v58  ;;  %1443 = vmatpush.msra.mxu2 %v1160_v53  ;;  %v1029_v58 = vor.u32 1.1754944e-38, %v1028_v22  ;;  %v1249_v53 = vld [vmem:[#allocation7 + $0x390] sm:$0xff] }
 0x160   :  { %v1018_v3 = vmul.f32 %v6013_v61, %v6643_v14  ;;  %v1002_v62 = vadd.f32 %v6645_v29, %v1001_v59  ;;  %vm1023_vm1 = vweird.f32 %v6013_v61 }
 0x161   :  { %6014 = vrcp.f32 %v6655_v0  ;;  %vm1024_vm4 = vmor %vm1022_vm2, %vm1023_vm1  ;;  %1444 = vmatpush.msra.mxu2 %v1152_v35  ;;  %vm1042_vm7 = vweird.f32 %v6655_v0 }
 0x162   :  { %v1019_v11 = vsub.f32 1.0, %v1018_v3  ;;  %6016 = vtanh.f32 %v992_v60  ;;  %v1006_v38 = vsel %vm6665_vm0, %v6645_v29, %v1002_v62  ;;  %v907_v29 = vpop.f32.mrf.mxu3  ;;  %v1151_v60 = vld [vmem:[#allocation7 + $0x80] sm:$0xff] }
 0x163   :  { %v847_v27 = vpop.f32.mrf.mxu0  ;;  %v1011_v59 = vsel %vm1008_vm3, %v1010_v40, %v1006_v38  ;;  %1404 = vmatpush.msrb.mxu0 %v1151_v60  ;;  %1445 = vmatpush.msra.mxu2 %v1144_v13  ;;  %v1258_v38 = vld [vmem:[#allocation7 + $0x3d8] sm:$0xff]  ;;  %v1048_v40 = vand.u32 2147483648, %v6655_v0  ;;  %v1388_v13 = vld [vmem:[#allocation7 + $0x7e8] sm:$0xff] }
 0x164   :  { %v1020_v31 = vmul.f32 %v6013_v61, %v1019_v11  ;;  %v868_v5 = vadd.f32 %v867_v10, %v847_v27 }
 0x165   :  { %1405 = vmatpush.msrb.mxu0 %v1143_v12  ;;  %1446 = vmatpush.msra.mxu2 %v1136_v25  ;;  %v1049_v35 = vor.u32 1.1754944e-38, %v1048_v40  ;;  %v1387_v12 = vld [vmem:[#allocation7 + $0x7e0] sm:$0xff]  ;;  %v1209_v25 = vld [vmem:[#allocation7 + $0x250] sm:$0xff]  ;;  %v1202_v40 = vld [vmem:[#allocation7 + $0x218] sm:$0xff] }
 0x166   :  { %v1021_v4 = vadd.f32 %v6013_v61, %v1020_v31  ;;  %v1065_v14 = vadd.f32 %v868_v5, %v6593_v48  ;;  %v1257_v31 = vld [vmem:[#allocation7 + $0x3d0] sm:$0xff] }
 0x167   :  { %v6674_v56 = vpop.eup %6014  ;;  %1511 = vmatpush.msrb.mxu2 %v1258_v38 }
 0x168   :  { %v1025_v1 = vsel %vm1024_vm4, %v6013_v61, %v1021_v4  ;;  %v1038_v3 = vmul.f32 %v6674_v56, %v6655_v0  ;;  %v6017_v62 = vpop.eup %6016  ;;  %v1135_v61 = vld [vmem:[#allocation7] sm:$0xff]  ;;  %v5925_v48 = vmul.f32 -1.442695, %v1065_v14  ;;  %vm1043_vm6 = vweird.f32 %v6674_v56  ;;  %v1250_v4 = vld [vmem:[#allocation7 + $0x398] sm:$0xff] }
 0x169   :  { %v1030_v8 = vsel %vm1027_vm5, %v1029_v58, %v1025_v1  ;;  %v887_v10 = vpop.f32.mrf.mxu2  ;;  %v1053_v17 = vmul.f32 %v6017_v62, %v1011_v59  ;;  %1406 = vmatpush.msrb.mxu0 %v1135_v61  ;;  %1512 = vmatpush.msrb.mxu2 %v1250_v4  ;;  %vm6690_vm8 = vmor %vm1042_vm7, %vm1043_vm6  ;;  %v1241_v59 = vld [vmem:[#allocation7 + $0x350] sm:$0xff]  ;;  %v1380_v61 = vld [vmem:[#allocation7 + $0x7a8] sm:$0xff] }
 0x16a   :  { %v1052_v11 = vmul.f32 0.0, %v1030_v8  ;;  %v1039_v22 = vsub.f32 1.0, %v1038_v3  ;;  %v908_v23 = vadd.f32 %v907_v29, %v887_v10  ;;  %v1242_v29 = vld [vmem:[#allocation7 + $0x358] sm:$0xff]  ;;  %v1233_v1 = vld [vmem:[#allocation7 + $0x310] sm:$0xff]  ;;  %v1355_v4 = vld [vmem:[#allocation7 + $0x6e0] sm:$0xff] }
 0x16b   :  { %1471 = vmatpush.msra.mxu0 %v1257_v31  ;;  %1513 = vmatpush.msrb.mxu2 %v1242_v29  ;;  %v1234_v3 = vld [vmem:[#allocation7 + $0x318] sm:$0xff]  ;;  %v1225_v62 = vld [vmem:[#allocation7 + $0x2d0] sm:$0xff]  ;;  %v1372_v31 = vld [vmem:[#allocation7 + $0x768] sm:$0xff] }
 0x16c   :  { %v6680_v27 = vadd.f32 %v1053_v17, %v1052_v11  ;;  %v1040_v52 = vmul.f32 %v6674_v56, %v1039_v22  ;;  %v1066_v30 = vadd.f32 %v908_v23, %v6571_v20  ;;  %v1046_v20 = vand.u32 2147483647, %v6655_v0  ;;  %v1226_v8 = vld [vmem:[#allocation7 + $0x2d8] sm:$0xff]  ;;  %v1217_v11 = vld [vmem:[#allocation7 + $0x290] sm:$0xff]  ;;  %v1379_v23 = vld [vmem:[#allocation7 + $0x7a0] sm:$0xff] }
 0x16d   :  { %1472 = vmatpush.msra.mxu0 %v1249_v53  ;;  %1514 = vmatpush.msrb.mxu2 %v1234_v3  ;;  %v1218_v17 = vld [vmem:[#allocation7 + $0x298] sm:$0xff]  ;;  %v1364_v53 = vld [vmem:[#allocation7 + $0x728] sm:$0xff]  ;;  %v1193_v58 = vld [vmem:[#allocation7 + $0x1d0] sm:$0xff] }
 0x16e   :  { %6018 = vtanh.f32 %v6680_v27  ;;  %v1041_v5 = vadd.f32 %v6674_v56, %v1040_v52  ;;  %v5926_v51 = vmul.f32 -1.442695, %v1066_v30  ;;  %vm1047_vm9 = vcmp.eq.f32.partialorder %v1046_v20, 8.507059e+37  ;;  %v1210_v52 = vld [vmem:[#allocation7 + $0x258] sm:$0xff]  ;;  %v1371_v30 = vld [vmem:[#allocation7 + $0x760] sm:$0xff]  ;;  %v1356_v20 = vld [vmem:[#allocation7 + $0x6e8] sm:$0xff] }
 0x16f   :  { %6020 = vpow2.f32 %v5925_v48  ;;  %1473 = vmatpush.msra.mxu0 %v1241_v59  ;;  %1515 = vmatpush.msrb.mxu2 %v1226_v8  ;;  %v1194_v59 = vld [vmem:[#allocation7 + $0x1d8] sm:$0xff]  ;;  %v1347_v29 = vld [vmem:[#allocation7 + $0x6a0] sm:$0xff] }
 0x170   :  { %v1045_v60 = vsel %vm6690_vm8, %v6674_v56, %v1041_v5  ;;  %6022 = vpow2.f32 %v5926_v51  ;;  %v1201_v5 = vld [vmem:[#allocation7 + $0x210] sm:$0xff]  ;;  %v1363_v51 = vld [vmem:[#allocation7 + $0x720] sm:$0xff] }
 0x171   :  { %1474 = vmatpush.msra.mxu0 %v1233_v1  ;;  %v1050_v14 = vsel %vm1047_vm9, %v1049_v35, %v1045_v60  ;;  %1516 = vmatpush.msrb.mxu2 %v1218_v17  ;;  %v1348_v60 = vld [vmem:[#allocation7 + $0x6a8] sm:$0xff]  ;;  %v1185_v35 = vld [vmem:[#allocation7 + $0x190] sm:$0xff]  ;;  %v1186_v1 = vld [vmem:[#allocation7 + $0x198] sm:$0xff] }
 0x172   :  { %v1339_v3 = vld [vmem:[#allocation7 + $0x660] sm:$0xff]  ;;  %v1170_v17 = vld [vmem:[#allocation7 + $0x118] sm:$0xff] }
 0x173   :  { %1475 = vmatpush.msra.mxu0 %v1225_v62  ;;  %1517 = vmatpush.msrb.mxu2 %v1210_v52  ;;  %v1178_v62 = vld [vmem:[#allocation7 + $0x158] sm:$0xff] }
 0x174   :  { %v6019_v0 = vpop.eup %6018  ;;  %v1162_v52 = vld [vmem:[#allocation7 + $0xd8] sm:$0xff] }
 0x175   :  { %v6697_v10 = vmul.f32 %v6019_v0, %v1050_v14  ;;  %v6021_v56 = vpop.eup %6020  ;;  %1476 = vmatpush.msra.mxu0 %v1217_v11  ;;  %1518 = vmatpush.msrb.mxu2 %v1202_v40  ;;  %v1340_v0 = vld [vmem:[#allocation7 + $0x668] sm:$0xff]  ;;  %v1177_v14 = vld [vmem:[#allocation7 + $0x150] sm:$0xff]  ;;  %v987_v40 = vpop.f32.mrf.mxu3 }
 0x176   :  { %v6023_v22 = vpop.eup %6022  ;;  %v6701_v48 = vadd.f32 1.0, %v6021_v56  ;;  %v1169_v11 = vld [vmem:[#allocation7 + $0x110] sm:$0xff] }
 0x177   :  { %1427 = vmatmul.f32.vlgmr.msra.gmra.mxu1 %v6697_v10  ;;  %1467 = vmatmul.f32.vlgmr.msra.gmra.mxu3 %v6697_v10  ;;  %v6703_v38 = vadd.f32 1.0, %v6023_v22  ;;  %v1323_v22 = vld [vmem:[#allocation7 + $0x5e0] sm:$0xff] }
 0x178   :  { %1571 = vmatpush.msra.mxu1 %v1387_v12  ;;  %1611 = vmatpush.msra.mxu3 %v1388_v13  ;;  %6024 = vrcp.f32 %v6701_v48  ;;  %v1331_v12 = vld [vmem:[#allocation7 + $0x620] sm:$0xff]  ;;  %v1332_v13 = vld [vmem:[#allocation7 + $0x628] sm:$0xff]  ;;  %vm1078_vm12 = vweird.f32 %v6701_v48 }
 0x179   :  { %1477 = vmatpush.msra.mxu0 %v1209_v25  ;;  %6026 = vrcp.f32 %v6703_v38  ;;  %1519 = vmatpush.msrb.mxu2 %v1194_v59  ;;  %v1161_v25 = vld [vmem:[#allocation7 + $0xd0] sm:$0xff]  ;;  %v1307_v59 = vld [vmem:[#allocation7 + $0x560] sm:$0xff]  ;;  %vm1097_vm13 = vweird.f32 %v6703_v38 }
 0x17a   :  { %1572 = vmatpush.msra.mxu1 %v1379_v23  ;;  %1612 = vmatpush.msra.mxu3 %v1380_v61  ;;  %v1324_v23 = vld [vmem:[#allocation7 + $0x5e8] sm:$0xff]  ;;  %v947_v61 = vpop.f32.mrf.mxu1 }
 0x17b   :  { %1478 = vmatpush.msra.mxu0 %v1201_v5  ;;  %1520 = vmatpush.msrb.mxu2 %v1186_v1  ;;  %v1145_v1 = vld [vmem:[#allocation7 + $0x50] sm:$0xff] }
 0x17c   :  { %1573 = vmatpush.msra.mxu1 %v1371_v30  ;;  %1613 = vmatpush.msra.mxu3 %v1372_v31 }
 0x17d   :  { %1479 = vmatpush.msra.mxu0 %v1193_v58  ;;  %1521 = vmatpush.msrb.mxu2 %v1178_v62  ;;  %v1299_v62 = vld [vmem:[#allocation7 + $0x520] sm:$0xff] }
 0x17e   :  { %1574 = vmatpush.msra.mxu1 %v1363_v51  ;;  %1614 = vmatpush.msra.mxu3 %v1364_v53  ;;  %v6709_v8 = vpop.eup %6024  ;;  %v1315_v51 = vld [vmem:[#allocation7 + $0x5a0] sm:$0xff]  ;;  %v1316_v53 = vld [vmem:[#allocation7 + $0x5a8] sm:$0xff] }
 0x17f   :  { %1507 = vmatmul.f32.vlgmr.msrb.gmra.mxu1 %v6697_v10  ;;  %1547 = vmatmul.f32.vlgmr.msrb.gmra.mxu3 %v6697_v10  ;;  %v6711_v56 = vpop.eup %6026  ;;  %v1074_v30 = vmul.f32 %v6709_v8, %v6701_v48  ;;  %vm1079_vm10 = vweird.f32 %v6709_v8 }
 0x180   :  { %1575 = vmatpush.msra.mxu1 %v1355_v4  ;;  %1615 = vmatpush.msra.mxu3 %v1356_v20  ;;  %v1093_v31 = vmul.f32 %v6711_v56, %v6703_v38  ;;  %v1153_v4 = vld [vmem:[#allocation7 + $0x90] sm:$0xff]  ;;  %v1154_v20 = vld [vmem:[#allocation7 + $0x98] sm:$0xff]  ;;  %vm1098_vm11 = vweird.f32 %v6711_v56  ;;  %vm6731_vm14 = vmor %vm1078_vm12, %vm1079_vm10 }
 0x181   :  { %1480 = vmatpush.msra.mxu0 %v1185_v35  ;;  %1522 = vmatpush.msrb.mxu2 %v1170_v17  ;;  %v1138_v17 = vld [vmem:[#allocation7 + $0x18] sm:$0xff]  ;;  %vm6739_vm15 = vmor %vm1097_vm13, %vm1098_vm11 }
 0x182   :  { %1576 = vmatpush.msra.mxu1 %v1347_v29  ;;  %1616 = vmatpush.msra.mxu3 %v1348_v60  ;;  %v1308_v29 = vld [vmem:[#allocation7 + $0x568] sm:$0xff] }
 0x183   :  { %1481 = vmatpush.msra.mxu0 %v1177_v14  ;;  %v927_v5 = vpop.f32.mrf.mxu0  ;;  %1523 = vmatpush.msrb.mxu2 %v1162_v52  ;;  %v1094_v14 = vsub.f32 1.0, %v1093_v31  ;;  %v1283_v31 = vld [vmem:[#allocation7 + $0x4a0] sm:$0xff] }
 0x184   :  { %1577 = vmatpush.msra.mxu1 %v1339_v3  ;;  %1617 = vmatpush.msra.mxu3 %v1340_v0  ;;  %v948_v60 = vadd.f32 %v947_v61, %v927_v5  ;;  %v1146_v3 = vld [vmem:[#allocation7 + $0x58] sm:$0xff]  ;;  %v1075_v0 = vsub.f32 1.0, %v1074_v30  ;;  %v1284_v5 = vld [vmem:[#allocation7 + $0x4a8] sm:$0xff] }
 0x185   :  { %1482 = vmatpush.msra.mxu0 %v1169_v11  ;;  %1524 = vmatpush.msrb.mxu2 %v1154_v20  ;;  %v1137_v11 = vld [vmem:[#allocation7 + $0x10] sm:$0xff]  ;;  %v1095_v52 = vmul.f32 %v6711_v56, %v1094_v14  ;;  %v1103_v20 = vand.u32 2147483648, %v6703_v38 }
 0x186   :  { %1578 = vmatpush.msra.mxu1 %v1331_v12  ;;  %1618 = vmatpush.msra.mxu3 %v1332_v13  ;;  %v1300_v12 = vld [vmem:[#allocation7 + $0x528] sm:$0xff]  ;;  %v1067_v61 = vadd.f32 %v948_v60, %v6575_v32  ;;  %v1076_v30 = vmul.f32 %v6709_v8, %v1075_v0  ;;  %v1101_v60 = vand.u32 2147483647, %v6703_v38 }
 0x187   :  { %1483 = vmatpush.msra.mxu0 %v1161_v25  ;;  %1525 = vmatpush.msrb.mxu2 %v1146_v3 }
 0x188   :  { %1579 = vmatpush.msra.mxu1 %v1323_v22  ;;  %1619 = vmatpush.msra.mxu3 %v1324_v23  ;;  %v1291_v22 = vld [vmem:[#allocation7 + $0x4e0] sm:$0xff]  ;;  %v1292_v23 = vld [vmem:[#allocation7 + $0x4e8] sm:$0xff]  ;;  %v1077_v32 = vadd.f32 %v6709_v8, %v1076_v30  ;;  %vm1102_vm1 = vcmp.eq.f32.partialorder %v1101_v60, 8.507059e+37 }
 0x189   :  { %v967_v58 = vpop.f32.mrf.mxu2  ;;  %1484 = vmatpush.msra.mxu0 %v1153_v4  ;;  %1526 = vmatpush.msrb.mxu2 %v1138_v17  ;;  %v1268_v4 = vld [vmem:[#allocation7 + $0x428] sm:$0xff] }
 0x18a   :  { %v988_v35 = vadd.f32 %v987_v40, %v967_v58  ;;  %1580 = vmatpush.msra.mxu1 %v1315_v51  ;;  %1620 = vmatpush.msra.mxu3 %v1316_v53  ;;  %v1276_v40 = vld [vmem:[#allocation7 + $0x468] sm:$0xff]  ;;  %v1096_v51 = vadd.f32 %v6711_v56, %v1095_v52  ;;  %v1267_v53 = vld [vmem:[#allocation7 + $0x420] sm:$0xff]  ;;  %v1084_v58 = vand.u32 2147483648, %v6701_v48  ;;  %v1081_v14 = vsel %vm6731_vm14, %v6709_v8, %v1077_v32  ;;  %v1373_v8 = vld [vmem:[#allocation7 + $0x770] sm:$0xff] }
 0x18b   :  { %1485 = vmatpush.msra.mxu0 %v1145_v1  ;;  %v1390_v1 = vld [vmem:[#allocation7 + $0x7f8] sm:$0xff]  ;;  %v1349_v32 = vld [vmem:[#allocation7 + $0x6b0] sm:$0xff] }
 0x18c   :  { %v1068_v13 = vadd.f32 %v988_v35, %v6573_v26  ;;  %1581 = vmatpush.msra.mxu1 %v1307_v59  ;;  %1621 = vmatpush.msra.mxu3 %v1308_v29  ;;  %v1275_v26 = vld [vmem:[#allocation7 + $0x460] sm:$0xff]  ;;  %v1082_v29 = vand.u32 2147483647, %v6701_v48  ;;  %v1389_v35 = vld [vmem:[#allocation7 + $0x7f0] sm:$0xff]  ;;  %v1100_v48 = vsel %vm6739_vm15, %v6711_v56, %v1096_v51  ;;  %v1085_v17 = vor.u32 1.1754944e-38, %v1084_v58  ;;  %v1366_v52 = vld [vmem:[#allocation7 + $0x738] sm:$0xff] }
 0x18d   :  { %1486 = vmatpush.msra.mxu0 %v1137_v11  ;;  %v1104_v11 = vor.u32 1.1754944e-38, %v1103_v20  ;;  %v1350_v51 = vld [vmem:[#allocation7 + $0x6b8] sm:$0xff]  ;;  %v1333_v59 = vld [vmem:[#allocation7 + $0x630] sm:$0xff] }
 0x18e   :  { %v5927_v25 = vmul.f32 -1.442695, %v1068_v13  ;;  %1582 = vmatpush.msra.mxu1 %v1299_v62  ;;  %1622 = vmatpush.msra.mxu3 %v1300_v12  ;;  %v1381_v62 = vld [vmem:[#allocation7 + $0x7b0] sm:$0xff]  ;;  %v1382_v12 = vld [vmem:[#allocation7 + $0x7b8] sm:$0xff]  ;;  %vm1083_vm0 = vcmp.eq.f32.partialorder %v1082_v29, 8.507059e+37 }
 0x18f   :  { %v1342_v20 = vld [vmem:[#allocation7 + $0x678] sm:$0xff] }
 0x190   :  { %6028 = vpow2.f32 %v5927_v25  ;;  %1583 = vmatpush.msra.mxu1 %v1291_v22  ;;  %1623 = vmatpush.msra.mxu3 %v1292_v23  ;;  %v1374_v22 = vld [vmem:[#allocation7 + $0x778] sm:$0xff]  ;;  %v1086_v23 = vsel %vm1083_vm0, %v1085_v17, %v1081_v14  ;;  %v1365_v25 = vld [vmem:[#allocation7 + $0x730] sm:$0xff] }
 0x191   :  { %6030 = vtanh.f32 %v1067_v61  ;;  %v1105_v61 = vsel %vm1102_vm1, %v1104_v11, %v1100_v48  ;;  %v1334_v29 = vld [vmem:[#allocation7 + $0x638] sm:$0xff]  ;;  %v1317_v48 = vld [vmem:[#allocation7 + $0x5b0] sm:$0xff] }
 0x192   :  { %1584 = vmatpush.msra.mxu1 %v1283_v31  ;;  %1624 = vmatpush.msra.mxu3 %v1284_v5  ;;  %v1127_v30 = vmul.f32 %v1105_v61, %v6550_v21  ;;  %v1357_v31 = vld [vmem:[#allocation7 + $0x6f0] sm:$0xff]  ;;  %v1358_v5 = vld [vmem:[#allocation7 + $0x6f8] sm:$0xff]  ;;  %v1251_v61 = vld [vmem:[#allocation7 + $0x3a0] sm:$0xff] }
 0x194   :  { %1585 = vmatpush.msra.mxu1 %v1275_v26  ;;  %1625 = vmatpush.msra.mxu3 %v1276_v40 }
 0x196   :  { %v6029_v3 = vpop.eup %6028  ;;  %1586 = vmatpush.msra.mxu1 %v1267_v53  ;;  %1626 = vmatpush.msra.mxu3 %v1268_v4  ;;  %v1341_v4 = vld [vmem:[#allocation7 + $0x670] sm:$0xff] }
 0x197   :  { %v1111_v38 = vadd.f32 1.0, %v6029_v3  ;;  %1587 = vmatmul.f32.vlgmr.msra.gmra.mxu1 %v6697_v10  ;;  %1627 = vmatmul.f32.vlgmr.msra.gmra.mxu3 %v6697_v10  ;;  %v6031_v13 = vpop.eup %6030  ;;  %v1326_v3 = vld [vmem:[#allocation7 + $0x5f8] sm:$0xff] }
 0x198   :  { %1651 = vmatpush.msrb.mxu1 %v1389_v35  ;;  %1691 = vmatpush.msrb.mxu3 %v1390_v1  ;;  %v1128_v56 = vmul.f32 %v6031_v13, %v1086_v23  ;;  %v1325_v1 = vld [vmem:[#allocation7 + $0x5f0] sm:$0xff] }
 0x199   :  { %6032 = vrcp.f32 %v1111_v38  ;;  %v1123_v21 = vand.u32 2147483648, %v1111_v38  ;;  %v1121_v35 = vand.u32 2147483647, %v1111_v38  ;;  %vm1117_vm3 = vweird.f32 %v1111_v38  ;;  %v1309_v23 = vld [vmem:[#allocation7 + $0x570] sm:$0xff] }
 0x19a   :  { %1652 = vmatpush.msrb.mxu1 %v1381_v62  ;;  %1692 = vmatpush.msrb.mxu3 %v1382_v12  ;;  %v6752_v40 = vadd.f32 %v1128_v56, %v1127_v30  ;;  %v1318_v62 = vld [vmem:[#allocation7 + $0x5b8] sm:$0xff]  ;;  %v1252_v56 = vld [vmem:[#allocation7 + $0x3a8] sm:$0xff]  ;;  %v1243_v30 = vld [vmem:[#allocation7 + $0x360] sm:$0xff] }
 0x19b   :  { %v1124_v14 = vor.u32 1.1754944e-38, %v1123_v21  ;;  %vm1122_vm5 = vcmp.eq.f32.partialorder %v1121_v35, 8.507059e+37  ;;  %v1277_v21 = vld [vmem:[#allocation7 + $0x470] sm:$0xff] }
 0x19c   :  { %1653 = vmatpush.msrb.mxu1 %v1373_v8  ;;  %1693 = vmatpush.msrb.mxu3 %v1374_v22  ;;  %6034 = vtanh.f32 %v6752_v40  ;;  %v1259_v8 = vld [vmem:[#allocation7 + $0x3e0] sm:$0xff]  ;;  %v1260_v22 = vld [vmem:[#allocation7 + $0x3e8] sm:$0xff]  ;;  %v1269_v35 = vld [vmem:[#allocation7 + $0x430] sm:$0xff] }
 0x19e   :  { %1654 = vmatpush.msrb.mxu1 %v1365_v25  ;;  %1694 = vmatpush.msrb.mxu3 %v1366_v52  ;;  %v1301_v25 = vld [vmem:[#allocation7 + $0x530] sm:$0xff]  ;;  %v1302_v52 = vld [vmem:[#allocation7 + $0x538] sm:$0xff] }
 0x19f   :  { %v6033_v26 = vpop.eup %6032 }
 0x1a0   :  { %v1113_v53 = vmul.f32 %v6033_v26, %v1111_v38  ;;  %1655 = vmatpush.msrb.mxu1 %v1357_v31  ;;  %1695 = vmatpush.msrb.mxu3 %v1358_v5  ;;  %vm1118_vm2 = vweird.f32 %v6033_v26  ;;  %v1310_v38 = vld [vmem:[#allocation7 + $0x578] sm:$0xff]  ;;  %v1244_v31 = vld [vmem:[#allocation7 + $0x368] sm:$0xff]  ;;  %v1293_v5 = vld [vmem:[#allocation7 + $0x4f0] sm:$0xff] }
 0x1a1   :  { %vm1119_vm4 = vmor %vm1117_vm3, %vm1118_vm2 }
 0x1a2   :  { %v1114_v58 = vsub.f32 1.0, %v1113_v53  ;;  %1656 = vmatpush.msrb.mxu1 %v1349_v32  ;;  %1696 = vmatpush.msrb.mxu3 %v1350_v51  ;;  %v6035_v13 = vpop.eup %6034  ;;  %v1235_v32 = vld [vmem:[#allocation7 + $0x320] sm:$0xff]  ;;  %v1236_v51 = vld [vmem:[#allocation7 + $0x328] sm:$0xff]  ;;  %v1285_v53 = vld [vmem:[#allocation7 + $0x4b0] sm:$0xff] }
 0x1a4   :  { %v1115_v60 = vmul.f32 %v6033_v26, %v1114_v58  ;;  %1657 = vmatpush.msrb.mxu1 %v1341_v4  ;;  %1697 = vmatpush.msrb.mxu3 %v1342_v20  ;;  %v1286_v4 = vld [vmem:[#allocation7 + $0x4b8] sm:$0xff]  ;;  %v1227_v20 = vld [vmem:[#allocation7 + $0x2e0] sm:$0xff]  ;;  %v1228_v58 = vld [vmem:[#allocation7 + $0x2e8] sm:$0xff] }
 0x1a6   :  { %v1116_v0 = vadd.f32 %v6033_v26, %v1115_v60  ;;  %1658 = vmatpush.msrb.mxu1 %v1333_v59  ;;  %1698 = vmatpush.msrb.mxu3 %v1334_v29  ;;  %v1278_v59 = vld [vmem:[#allocation7 + $0x478] sm:$0xff]  ;;  %v1219_v29 = vld [vmem:[#allocation7 + $0x2a0] sm:$0xff]  ;;  %v1220_v60 = vld [vmem:[#allocation7 + $0x2a8] sm:$0xff] }
 0x1a8   :  { %v1120_v12 = vsel %vm1119_vm4, %v6033_v26, %v1116_v0  ;;  %1659 = vmatpush.msrb.mxu1 %v1325_v1  ;;  %1699 = vmatpush.msrb.mxu3 %v1326_v3  ;;  %v1294_v26 = vld [vmem:[#allocation7 + $0x4f8] sm:$0xff]  ;;  %v1211_v3 = vld [vmem:[#allocation7 + $0x260] sm:$0xff]  ;;  %v1212_v0 = vld [vmem:[#allocation7 + $0x268] sm:$0xff] }
 0x1a9   :  { %v1125_v11 = vsel %vm1122_vm5, %v1124_v14, %v1120_v12  ;;  %v1270_v1 = vld [vmem:[#allocation7 + $0x438] sm:$0xff]  ;;  %v1203_v14 = vld [vmem:[#allocation7 + $0x220] sm:$0xff]  ;;  %v1196_v12 = vld [vmem:[#allocation7 + $0x1e8] sm:$0xff] }
 0x1aa   :  { %v6755_v17 = vmul.f32 %v6035_v13, %v1125_v11  ;;  %1660 = vmatpush.msrb.mxu1 %v1317_v48  ;;  %1700 = vmatpush.msrb.mxu3 %v1318_v62  ;;  %v1204_v48 = vld [vmem:[#allocation7 + $0x228] sm:$0xff]  ;;  %v1195_v62 = vld [vmem:[#allocation7 + $0x1e0] sm:$0xff] }
 0x1ab   :  { %v1187_v13 = vld [vmem:[#allocation7 + $0x1a0] sm:$0xff]  ;;  %v1188_v11 = vld [vmem:[#allocation7 + $0x1a8] sm:$0xff] }
 0x1ac   :  { %1407 = vmatmul.f32.vlgmr.msrb.gmra.mxu0 %v6755_v17  ;;  %1447 = vmatmul.f32.vlgmr.msra.gmra.mxu2 %v6755_v17 }
 0x1ad   :  { %1551 = vmatpush.msrb.mxu0 %v1259_v8  ;;  %1591 = vmatpush.msra.mxu2 %v1260_v22  ;;  %v1179_v8 = vld [vmem:[#allocation7 + $0x160] sm:$0xff]  ;;  %v1180_v22 = vld [vmem:[#allocation7 + $0x168] sm:$0xff] }
 0x1ae   :  { %1661 = vmatpush.msrb.mxu1 %v1309_v23  ;;  %1701 = vmatpush.msrb.mxu3 %v1310_v38  ;;  %v1171_v23 = vld [vmem:[#allocation7 + $0x120] sm:$0xff]  ;;  %v1172_v38 = vld [vmem:[#allocation7 + $0x128] sm:$0xff] }
 0x1af   :  { %1552 = vmatpush.msrb.mxu0 %v1251_v61  ;;  %1592 = vmatpush.msra.mxu2 %v1252_v56  ;;  %v1164_v61 = vld [vmem:[#allocation7 + $0xe8] sm:$0xff]  ;;  %v1155_v56 = vld [vmem:[#allocation7 + $0xa0] sm:$0xff] }
 0x1b0   :  { %1662 = vmatpush.msrb.mxu1 %v1301_v25  ;;  %1702 = vmatpush.msrb.mxu3 %v1302_v52  ;;  %v1156_v25 = vld [vmem:[#allocation7 + $0xa8] sm:$0xff]  ;;  %v1147_v52 = vld [vmem:[#allocation7 + $0x60] sm:$0xff] }
 0x1b1   :  { %1553 = vmatpush.msrb.mxu0 %v1243_v30  ;;  %1593 = vmatpush.msra.mxu2 %v1244_v31  ;;  %v1148_v30 = vld [vmem:[#allocation7 + $0x68] sm:$0xff]  ;;  %v1139_v31 = vld [vmem:[#allocation7 + $0x20] sm:$0xff] }
 0x1b2   :  { %1663 = vmatpush.msrb.mxu1 %v1293_v5  ;;  %1703 = vmatpush.msrb.mxu3 %v1294_v26  ;;  %v1140_v5 = vld [vmem:[#allocation7 + $0x28] sm:$0xff]  ;;  %v1261_v26 = vld [vmem:[#allocation7 + $0x3f0] sm:$0xff] }
 0x1b3   :  { %1554 = vmatpush.msrb.mxu0 %v1235_v32  ;;  %1594 = vmatpush.msra.mxu2 %v1236_v51  ;;  %v1262_v32 = vld [vmem:[#allocation7 + $0x3f8] sm:$0xff]  ;;  %v1253_v51 = vld [vmem:[#allocation7 + $0x3b0] sm:$0xff] }
 0x1b4   :  { %1664 = vmatpush.msrb.mxu1 %v1285_v53  ;;  %1704 = vmatpush.msrb.mxu3 %v1286_v4  ;;  %v1254_v53 = vld [vmem:[#allocation7 + $0x3b8] sm:$0xff]  ;;  %v1245_v4 = vld [vmem:[#allocation7 + $0x370] sm:$0xff] }
 0x1b5   :  { %1487 = vmatmul.f32.vlgmr.msra.gmra.mxu0 %v6755_v17  ;;  %1527 = vmatmul.f32.vlgmr.msrb.gmra.mxu2 %v6755_v17 }
 0x1b6   :  { %1555 = vmatpush.msrb.mxu0 %v1227_v20  ;;  %1595 = vmatpush.msra.mxu2 %v1228_v58  ;;  %v1246_v20 = vld [vmem:[#allocation7 + $0x378] sm:$0xff]  ;;  %v1237_v58 = vld [vmem:[#allocation7 + $0x330] sm:$0xff] }
 0x1b7   :  { %1665 = vmatpush.msrb.mxu1 %v1277_v21  ;;  %1705 = vmatpush.msrb.mxu3 %v1278_v59  ;;  %v1238_v21 = vld [vmem:[#allocation7 + $0x338] sm:$0xff]  ;;  %v1229_v59 = vld [vmem:[#allocation7 + $0x2f0] sm:$0xff] }
 0x1b8   :  { %1556 = vmatpush.msrb.mxu0 %v1219_v29  ;;  %1596 = vmatpush.msra.mxu2 %v1220_v60  ;;  %v1230_v29 = vld [vmem:[#allocation7 + $0x2f8] sm:$0xff]  ;;  %v1221_v60 = vld [vmem:[#allocation7 + $0x2b0] sm:$0xff] }
 0x1b9   :  { %1666 = vmatpush.msrb.mxu1 %v1269_v35  ;;  %1706 = vmatpush.msrb.mxu3 %v1270_v1  ;;  %v1222_v35 = vld [vmem:[#allocation7 + $0x2b8] sm:$0xff]  ;;  %v1213_v1 = vld [vmem:[#allocation7 + $0x270] sm:$0xff] }
 0x1ba   :  { %1667 = vmatmul.f32.vlgmr.msrb.gmra.mxu1 %v6697_v10  ;;  %1707 = vmatmul.f32.vlgmr.msrb.gmra.mxu3 %v6697_v10  ;;  %v1163_v10 = vld [vmem:[#allocation7 + $0xe0] sm:$0xff] }
 0x1bb   :  { %1557 = vmatpush.msrb.mxu0 %v1211_v3  ;;  %1597 = vmatpush.msra.mxu2 %v1212_v0  ;;  %v1214_v3 = vld [vmem:[#allocation7 + $0x278] sm:$0xff]  ;;  %v1205_v0 = vld [vmem:[#allocation7 + $0x230] sm:$0xff] }
 0x1bd   :  { %1558 = vmatpush.msrb.mxu0 %v1203_v14  ;;  %1598 = vmatpush.msra.mxu2 %v1204_v48  ;;  %v1206_v14 = vld [vmem:[#allocation7 + $0x238] sm:$0xff]  ;;  %v1197_v48 = vld [vmem:[#allocation7 + $0x1f0] sm:$0xff] }
 0x1bf   :  { %1559 = vmatpush.msrb.mxu0 %v1195_v62  ;;  %1599 = vmatpush.msra.mxu2 %v1196_v12  ;;  %v1198_v62 = vld [vmem:[#allocation7 + $0x1f8] sm:$0xff]  ;;  %v1189_v12 = vld [vmem:[#allocation7 + $0x1b0] sm:$0xff] }
 0x1c1   :  { %1560 = vmatpush.msrb.mxu0 %v1187_v13  ;;  %1600 = vmatpush.msra.mxu2 %v1188_v11  ;;  %v1190_v13 = vld [vmem:[#allocation7 + $0x1b8] sm:$0xff]  ;;  %v1181_v11 = vld [vmem:[#allocation7 + $0x170] sm:$0xff] }
 0x1c3   :  { %1561 = vmatpush.msrb.mxu0 %v1179_v8  ;;  %1601 = vmatpush.msra.mxu2 %v1180_v22  ;;  %v1182_v8 = vld [vmem:[#allocation7 + $0x178] sm:$0xff]  ;;  %v1173_v22 = vld [vmem:[#allocation7 + $0x130] sm:$0xff] }
 0x1c5   :  { %1562 = vmatpush.msrb.mxu0 %v1171_v23  ;;  %1602 = vmatpush.msra.mxu2 %v1172_v38  ;;  %v1174_v23 = vld [vmem:[#allocation7 + $0x138] sm:$0xff]  ;;  %v1165_v38 = vld [vmem:[#allocation7 + $0xf0] sm:$0xff] }
 0x1c7   :  { %1563 = vmatpush.msrb.mxu0 %v1163_v10  ;;  %1603 = vmatpush.msra.mxu2 %v1164_v61  ;;  %v1166_v10 = vld [vmem:[#allocation7 + $0xf8] sm:$0xff]  ;;  %v1157_v61 = vld [vmem:[#allocation7 + $0xb0] sm:$0xff] }
 0x1c9   :  { %1564 = vmatpush.msrb.mxu0 %v1155_v56  ;;  %1604 = vmatpush.msra.mxu2 %v1156_v25  ;;  %v1158_v56 = vld [vmem:[#allocation7 + $0xb8] sm:$0xff]  ;;  %v1149_v25 = vld [vmem:[#allocation7 + $0x70] sm:$0xff] }
 0x1cb   :  { %1565 = vmatpush.msrb.mxu0 %v1147_v52  ;;  %1605 = vmatpush.msra.mxu2 %v1148_v30  ;;  %v1150_v52 = vld [vmem:[#allocation7 + $0x78] sm:$0xff]  ;;  %v1141_v30 = vld [vmem:[#allocation7 + $0x30] sm:$0xff] }
 0x1cd   :  { %1566 = vmatpush.msrb.mxu0 %v1139_v31  ;;  %1606 = vmatpush.msra.mxu2 %v1140_v5  ;;  %v1142_v31 = vld [vmem:[#allocation7 + $0x38] sm:$0xff]  ;;  %v2104_v5 = vld [vmem:[#allocation7 + $0x7c0] sm:$0xff] }
 0x1ce   :  { %1567 = vmatmul.f32.vlgmr.msrb.gmra.mxu0 %v6755_v17  ;;  %1607 = vmatmul.f32.vlgmr.msra.gmra.mxu2 %v6755_v17 }
 0x1cf   :  { %1631 = vmatpush.msra.mxu0 %v1261_v26  ;;  %1671 = vmatpush.msrb.mxu2 %v1262_v32  ;;  %v2105_v26 = vld [vmem:[#allocation7 + $0x7c8] sm:$0xff]  ;;  %v2096_v32 = vld [vmem:[#allocation7 + $0x780] sm:$0xff] }
 0x1d0   :  { %2132 = vmatpush.msra.mxu1 %v2104_v5  ;;  %2172 = vmatpush.msra.mxu3 %v2105_v26  ;;  %v2098_v5 = vld [vmem:[#allocation7 + $0x790] sm:$0xff]  ;;  %v2099_v26 = vld [vmem:[#allocation7 + $0x798] sm:$0xff] }
 0x1d1   :  { %1632 = vmatpush.msra.mxu0 %v1253_v51  ;;  %1672 = vmatpush.msrb.mxu2 %v1254_v53  ;;  %v2097_v51 = vld [vmem:[#allocation7 + $0x788] sm:$0xff]  ;;  %v2088_v53 = vld [vmem:[#allocation7 + $0x740] sm:$0xff] }
 0x1d2   :  { %2133 = vmatpush.msra.mxu1 %v2096_v32  ;;  %2173 = vmatpush.msra.mxu3 %v2097_v51  ;;  %v2090_v32 = vld [vmem:[#allocation7 + $0x750] sm:$0xff]  ;;  %v2091_v51 = vld [vmem:[#allocation7 + $0x758] sm:$0xff] }
 0x1d3   :  { %1633 = vmatpush.msra.mxu0 %v1245_v4  ;;  %1673 = vmatpush.msrb.mxu2 %v1246_v20  ;;  %v2089_v4 = vld [vmem:[#allocation7 + $0x748] sm:$0xff]  ;;  %v2080_v20 = vld [vmem:[#allocation7 + $0x700] sm:$0xff] }
 0x1d4   :  { %2134 = vmatpush.msra.mxu1 %v2088_v53  ;;  %2174 = vmatpush.msra.mxu3 %v2089_v4  ;;  %v2082_v53 = vld [vmem:[#allocation7 + $0x710] sm:$0xff]  ;;  %v2083_v4 = vld [vmem:[#allocation7 + $0x718] sm:$0xff] }
 0x1d5   :  { %1634 = vmatpush.msra.mxu0 %v1237_v58  ;;  %1674 = vmatpush.msrb.mxu2 %v1238_v21  ;;  %v2081_v58 = vld [vmem:[#allocation7 + $0x708] sm:$0xff]  ;;  %v2072_v21 = vld [vmem:[#allocation7 + $0x6c0] sm:$0xff] }
 0x1d6   :  { %2135 = vmatpush.msra.mxu1 %v2080_v20  ;;  %2175 = vmatpush.msra.mxu3 %v2081_v58 }
 0x1d7   :  { %1635 = vmatpush.msra.mxu0 %v1229_v59  ;;  %1675 = vmatpush.msrb.mxu2 %v1230_v29  ;;  %v2073_v59 = vld [vmem:[#allocation7 + $0x6c8] sm:$0xff] }
 0x1d8   :  { %2136 = vmatpush.msra.mxu1 %v2072_v21  ;;  %2176 = vmatpush.msra.mxu3 %v2073_v59  ;;  %v2065_v29 = vld [vmem:[#allocation7 + $0x688] sm:$0xff]  ;;  %v2074_v21 = vld [vmem:[#allocation7 + $0x6d0] sm:$0xff]  ;;  %v2075_v59 = vld [vmem:[#allocation7 + $0x6d8] sm:$0xff] }
 0x1d9   :  { %1636 = vmatpush.msra.mxu0 %v1221_v60  ;;  %1676 = vmatpush.msrb.mxu2 %v1222_v35  ;;  %v2056_v60 = vld [vmem:[#allocation7 + $0x640] sm:$0xff]  ;;  %v2057_v35 = vld [vmem:[#allocation7 + $0x648] sm:$0xff] }
 0x1da   :  { %2177 = vmatpush.msra.mxu3 %v2065_v29  ;;  %v2066_v29 = vld [vmem:[#allocation7 + $0x690] sm:$0xff] }
 0x1db   :  { %1637 = vmatpush.msra.mxu0 %v1213_v1  ;;  %1677 = vmatpush.msrb.mxu2 %v1214_v3  ;;  %v2048_v1 = vld [vmem:[#allocation7 + $0x600] sm:$0xff]  ;;  %v2049_v3 = vld [vmem:[#allocation7 + $0x608] sm:$0xff] }
 0x1dc   :  { %2178 = vmatpush.msra.mxu3 %v2057_v35 }
 0x1dd   :  { %1638 = vmatpush.msra.mxu0 %v1205_v0  ;;  %1678 = vmatpush.msrb.mxu2 %v1206_v14  ;;  %v2040_v0 = vld [vmem:[#allocation7 + $0x5c0] sm:$0xff]  ;;  %v2041_v14 = vld [vmem:[#allocation7 + $0x5c8] sm:$0xff] }
 0x1de   :  { %2179 = vmatpush.msra.mxu3 %v2049_v3  ;;  %v2059_v3 = vld [vmem:[#allocation7 + $0x658] sm:$0xff] }
 0x1df   :  { %1639 = vmatpush.msra.mxu0 %v1197_v48  ;;  %1679 = vmatpush.msrb.mxu2 %v1198_v62  ;;  %v2032_v48 = vld [vmem:[#allocation7 + $0x580] sm:$0xff]  ;;  %v2033_v62 = vld [vmem:[#allocation7 + $0x588] sm:$0xff] }
 0x1e0   :  { %2180 = vmatpush.msra.mxu3 %v2041_v14 }
 0x1e1   :  { %1640 = vmatpush.msra.mxu0 %v1189_v12  ;;  %1680 = vmatpush.msrb.mxu2 %v1190_v13  ;;  %v2024_v12 = vld [vmem:[#allocation7 + $0x540] sm:$0xff]  ;;  %v2025_v13 = vld [vmem:[#allocation7 + $0x548] sm:$0xff] }
 0x1e2   :  { %2181 = vmatpush.msra.mxu3 %v2033_v62  ;;  %v2050_v62 = vld [vmem:[#allocation7 + $0x610] sm:$0xff] }
 0x1e3   :  { %1641 = vmatpush.msra.mxu0 %v1181_v11  ;;  %1681 = vmatpush.msrb.mxu2 %v1182_v8  ;;  %v2016_v11 = vld [vmem:[#allocation7 + $0x500] sm:$0xff]  ;;  %v2017_v8 = vld [vmem:[#allocation7 + $0x508] sm:$0xff] }
 0x1e4   :  { %2182 = vmatpush.msra.mxu3 %v2025_v13 }
 0x1e5   :  { %1642 = vmatpush.msra.mxu0 %v1173_v22  ;;  %1682 = vmatpush.msrb.mxu2 %v1174_v23  ;;  %v2008_v22 = vld [vmem:[#allocation7 + $0x4c0] sm:$0xff]  ;;  %v2009_v23 = vld [vmem:[#allocation7 + $0x4c8] sm:$0xff] }
 0x1e6   :  { %2183 = vmatpush.msra.mxu3 %v2017_v8  ;;  %v2043_v8 = vld [vmem:[#allocation7 + $0x5d8] sm:$0xff] }
 0x1e7   :  { %1643 = vmatpush.msra.mxu0 %v1165_v38  ;;  %1683 = vmatpush.msrb.mxu2 %v1166_v10  ;;  %v2000_v38 = vld [vmem:[#allocation7 + $0x480] sm:$0xff]  ;;  %v2001_v10 = vld [vmem:[#allocation7 + $0x488] sm:$0xff] }
 0x1e8   :  { %2184 = vmatpush.msra.mxu3 %v2009_v23  ;;  %v2034_v23 = vld [vmem:[#allocation7 + $0x590] sm:$0xff] }
 0x1e9   :  { %1644 = vmatpush.msra.mxu0 %v1157_v61  ;;  %1684 = vmatpush.msrb.mxu2 %v1158_v56  ;;  %v1992_v61 = vld [vmem:[#allocation7 + $0x440] sm:$0xff]  ;;  %v1993_v56 = vld [vmem:[#allocation7 + $0x448] sm:$0xff] }
 0x1ea   :  { %2185 = vmatpush.msra.mxu3 %v2001_v10 }
 0x1eb   :  { %1645 = vmatpush.msra.mxu0 %v1149_v25  ;;  %1685 = vmatpush.msrb.mxu2 %v1150_v52  ;;  %v1984_v25 = vld [vmem:[#allocation7 + $0x400] sm:$0xff]  ;;  %v1985_v52 = vld [vmem:[#allocation7 + $0x408] sm:$0xff] }
 0x1ec   :  { %2186 = vmatpush.msra.mxu3 %v1993_v56  ;;  %v1977_v56 = vld [vmem:[#allocation7 + $0x3c8] sm:$0xff] }
 0x1ed   :  { %1646 = vmatpush.msra.mxu0 %v1141_v30  ;;  %1686 = vmatpush.msrb.mxu2 %v1142_v31  ;;  %v2106_v30 = vld [vmem:[#allocation7 + $0x7d0] sm:$0xff]  ;;  %v2107_v31 = vld [vmem:[#allocation7 + $0x7d8] sm:$0xff] }
 0x1ee   :  { %1647 = vmatmul.f32.vlgmr.msra.gmra.mxu0 %v6755_v17  ;;  %1687 = vmatmul.f32.vlgmr.msrb.gmra.mxu2 %v6755_v17  ;;  %v2064_v17 = vld [vmem:[#allocation7 + $0x680] sm:$0xff] }
 0x1ef   :  { %2137 = vmatpush.msra.mxu1 %v2064_v17  ;;  %2187 = vmatpush.msra.mxu3 %v1985_v52 }
 0x1f0   :  { %2152 = vmatpush.msra.mxu2 %v1977_v56 }
 0x1f1   :  { %2138 = vmatpush.msra.mxu1 %v2056_v60  ;;  %2252 = vmatpush.msrb.mxu3 %v2107_v31  ;;  %v2067_v60 = vld [vmem:[#allocation7 + $0x698] sm:$0xff] }
 0x1f3   :  { %2139 = vmatpush.msra.mxu1 %v2048_v1  ;;  %2253 = vmatpush.msrb.mxu3 %v2099_v26  ;;  %v2058_v1 = vld [vmem:[#allocation7 + $0x650] sm:$0xff]  ;;  %v1969_v26 = vld [vmem:[#allocation7 + $0x388] sm:$0xff] }
 0x1f4   :  { %v1428_v20 = vpop.f32.mrf.mxu1  ;;  %2153 = vmatpush.msra.mxu2 %v1969_v26 }
 0x1f5   :  { %2140 = vmatpush.msra.mxu1 %v2040_v0  ;;  %2254 = vmatpush.msrb.mxu3 %v2091_v51 }
 0x1f7   :  { %2141 = vmatpush.msra.mxu1 %v2032_v48  ;;  %2255 = vmatpush.msrb.mxu3 %v2083_v4 }
 0x1f9   :  { %2142 = vmatpush.msra.mxu1 %v2024_v12  ;;  %2256 = vmatpush.msrb.mxu3 %v2075_v59  ;;  %v2051_v12 = vld [vmem:[#allocation7 + $0x618] sm:$0xff] }
 0x1fa   :  { %v1468_v14 = vpop.f32.mrf.mxu3 }
 0x1fb   :  { %2143 = vmatpush.msra.mxu1 %v2016_v11  ;;  %2257 = vmatpush.msrb.mxu3 %v2067_v60  ;;  %v2042_v11 = vld [vmem:[#allocation7 + $0x5d0] sm:$0xff]  ;;  %v1953_v60 = vld [vmem:[#allocation7 + $0x308] sm:$0xff] }
 0x1fd   :  { %2144 = vmatpush.msra.mxu1 %v2008_v22  ;;  %2258 = vmatpush.msrb.mxu3 %v2059_v3 }
 0x1ff   :  { %2145 = vmatpush.msra.mxu1 %v2000_v38  ;;  %2259 = vmatpush.msrb.mxu3 %v2051_v12  ;;  %v2035_v38 = vld [vmem:[#allocation7 + $0x598] sm:$0xff]  ;;  %v1945_v12 = vld [vmem:[#allocation7 + $0x2c8] sm:$0xff] }
 0x201   :  { %2146 = vmatpush.msra.mxu1 %v1992_v61  ;;  %2260 = vmatpush.msrb.mxu3 %v2043_v8  ;;  %v1976_v61 = vld [vmem:[#allocation7 + $0x3c0] sm:$0xff]  ;;  %v1995_v8 = vld [vmem:[#allocation7 + $0x458] sm:$0xff] }
 0x202   :  { %2112 = vmatpush.msrb.mxu0 %v1976_v61  ;;  %v1548_v4 = vpop.f32.mrf.mxu3  ;;  %v1986_v61 = vld [vmem:[#allocation7 + $0x410] sm:$0xff] }
 0x203   :  { %2147 = vmatpush.msra.mxu1 %v1984_v25  ;;  %2261 = vmatpush.msrb.mxu3 %v2035_v38  ;;  %v2026_v25 = vld [vmem:[#allocation7 + $0x550] sm:$0xff]  ;;  %v1936_v38 = vld [vmem:[#allocation7 + $0x280] sm:$0xff] }
 0x205   :  { %2212 = vmatpush.msrb.mxu1 %v2106_v30  ;;  %v2027_v30 = vld [vmem:[#allocation7 + $0x558] sm:$0xff] }
 0x206   :  { %2262 = vmatpush.msrb.mxu3 %v2027_v30  ;;  %v1928_v30 = vld [vmem:[#allocation7 + $0x240] sm:$0xff] }
 0x207   :  { %2213 = vmatpush.msrb.mxu1 %v2098_v5  ;;  %v1968_v5 = vld [vmem:[#allocation7 + $0x380] sm:$0xff] }
 0x208   :  { %2113 = vmatpush.msrb.mxu0 %v1968_v5  ;;  %v1929_v5 = vld [vmem:[#allocation7 + $0x248] sm:$0xff] }
 0x209   :  { %2214 = vmatpush.msrb.mxu1 %v2090_v32  ;;  %v2018_v32 = vld [vmem:[#allocation7 + $0x510] sm:$0xff] }
 0x20b   :  { %2215 = vmatpush.msrb.mxu1 %v2082_v53  ;;  %v2019_v53 = vld [vmem:[#allocation7 + $0x518] sm:$0xff] }
 0x20c   :  { %2263 = vmatpush.msrb.mxu3 %v2019_v53 }
 0x20d   :  { %2216 = vmatpush.msrb.mxu1 %v2074_v21  ;;  %v2010_v21 = vld [vmem:[#allocation7 + $0x4d0] sm:$0xff] }
 0x20f   :  { %2217 = vmatpush.msrb.mxu1 %v2066_v29  ;;  %v1952_v29 = vld [vmem:[#allocation7 + $0x300] sm:$0xff] }
 0x211   :  { %2218 = vmatpush.msrb.mxu1 %v2058_v1 }
 0x213   :  { %2219 = vmatpush.msrb.mxu1 %v2050_v62  ;;  %v1944_v62 = vld [vmem:[#allocation7 + $0x2c0] sm:$0xff] }
 0x215   :  { %2220 = vmatpush.msrb.mxu1 %v2042_v11 }
 0x217   :  { %2221 = vmatpush.msrb.mxu1 %v2034_v23  ;;  %v1508_v23 = vpop.f32.mrf.mxu1 }
 0x219   :  { %2222 = vmatpush.msrb.mxu1 %v2026_v25 }
 0x21b   :  { %2223 = vmatpush.msrb.mxu1 %v2018_v32  ;;  %v1920_v32 = vld [vmem:[#allocation7 + $0x200] sm:$0xff] }
 0x21d   :  { %2224 = vmatpush.msrb.mxu1 %v2010_v21  ;;  %v1913_v21 = vld [vmem:[#allocation7 + $0x1c8] sm:$0xff] }
 0x229   :  { %v1408_v58 = vpop.f32.mrf.mxu0 }
 0x22a   :  { %v1429_v17 = vadd.f32 %v1428_v20, %v1408_v58  ;;  %v1960_v20 = vld [vmem:[#allocation7 + $0x340] sm:$0xff]  ;;  %v1961_v58 = vld [vmem:[#allocation7 + $0x348] sm:$0xff] }
 0x22b   :  { %2114 = vmatpush.msrb.mxu0 %v1960_v20  ;;  %2154 = vmatpush.msra.mxu2 %v1961_v58  ;;  %v1912_v58 = vld [vmem:[#allocation7 + $0x1c0] sm:$0xff] }
 0x22c   :  { %v1711_v35 = vadd.f32 %v1429_v17, %v6629_v41  ;;  %v2011_v17 = vld [vmem:[#allocation7 + $0x4d8] sm:$0xff] }
 0x22d   :  { %2264 = vmatpush.msrb.mxu3 %v2011_v17  ;;  %2115 = vmatpush.msrb.mxu0 %v1952_v29 }
 0x22e   :  { %v5928_v0 = vmul.f32 -1.442695, %v1711_v35  ;;  %v2002_v35 = vld [vmem:[#allocation7 + $0x490] sm:$0xff]  ;;  %2155 = vmatpush.msra.mxu2 %v1953_v60 }
 0x22f   :  { %v1448_v48 = vpop.f32.mrf.mxu2  ;;  %2225 = vmatpush.msrb.mxu1 %v2002_v35  ;;  %2116 = vmatpush.msrb.mxu0 %v1944_v62 }
 0x230   :  { %6036 = vpow2.f32 %v5928_v0  ;;  %v1469_v13 = vadd.f32 %v1468_v14, %v1448_v48  ;;  %v2003_v0 = vld [vmem:[#allocation7 + $0x498] sm:$0xff]  ;;  %2156 = vmatpush.msra.mxu2 %v1945_v12 }
 0x231   :  { %2265 = vmatpush.msrb.mxu3 %v2003_v0  ;;  %2117 = vmatpush.msrb.mxu0 %v1936_v38  ;;  %v1905_v0 = vld [vmem:[#allocation7 + $0x188] sm:$0xff] }
 0x232   :  { %v1712_v22 = vadd.f32 %v1469_v13, %v6633_v6  ;;  %v1488_v48 = vpop.f32.mrf.mxu0  ;;  %v1994_v13 = vld [vmem:[#allocation7 + $0x450] sm:$0xff] }
 0x233   :  { %2226 = vmatpush.msrb.mxu1 %v1994_v13  ;;  %2266 = vmatpush.msrb.mxu3 %v1995_v8  ;;  %v1509_v25 = vadd.f32 %v1508_v23, %v1488_v48  ;;  %v1896_v13 = vld [vmem:[#allocation7 + $0x140] sm:$0xff] }
 0x234   :  { %v5929_v10 = vmul.f32 -1.442695, %v1712_v22  ;;  %2118 = vmatpush.msrb.mxu0 %v1928_v30 }
 0x235   :  { %2227 = vmatpush.msrb.mxu1 %v1986_v61  ;;  %v1713_v53 = vadd.f32 %v1509_v25, %v6651_v36  ;;  %v1889_v25 = vld [vmem:[#allocation7 + $0x108] sm:$0xff] }
 0x236   :  { %v6037_v52 = vpop.eup %6036  ;;  %6038 = vpow2.f32 %v5929_v10  ;;  %v1937_v10 = vld [vmem:[#allocation7 + $0x288] sm:$0xff]  ;;  %2119 = vmatpush.msrb.mxu0 %v1920_v32 }
 0x237   :  { %v6769_v31 = vadd.f32 1.0, %v6037_v52  ;;  %2157 = vmatpush.msra.mxu2 %v1937_v10  ;;  %v1987_v52 = vld [vmem:[#allocation7 + $0x418] sm:$0xff]  ;;  %v1588_v10 = vpop.f32.mrf.mxu1  ;;  %v1881_v32 = vld [vmem:[#allocation7 + $0xc8] sm:$0xff] }
 0x238   :  { %v1528_v51 = vpop.f32.mrf.mxu2  ;;  %2267 = vmatpush.msrb.mxu3 %v1987_v52  ;;  %2120 = vmatpush.msrb.mxu0 %v1912_v58 }
 0x239   :  { %6040 = vrcp.f32 %v6769_v31  ;;  %v1549_v59 = vadd.f32 %v1548_v4, %v1528_v51  ;;  %2158 = vmatpush.msra.mxu2 %v1929_v5  ;;  %v1921_v51 = vld [vmem:[#allocation7 + $0x208] sm:$0xff]  ;;  %v1730_v60 = vand.u32 2147483648, %v6769_v31  ;;  %vm1724_vm7 = vweird.f32 %v6769_v31 }
 0x23a   :  { %v1728_v35 = vand.u32 2147483647, %v6769_v31 }
 0x23b   :  { %v1714_v3 = vadd.f32 %v1549_v59, %v6637_v34  ;;  %2159 = vmatpush.msra.mxu2 %v1921_v51  ;;  %v1731_v23 = vor.u32 1.1754944e-38, %v1730_v60 }
 0x23c   :  { %v6039_v1 = vpop.eup %6038  ;;  %vm1729_vm10 = vcmp.eq.f32.partialorder %v1728_v35, 8.507059e+37  ;;  %v1628_v35 = vpop.f32.mrf.mxu3 }
 0x23d   :  { %v6773_v14 = vadd.f32 1.0, %v6039_v1  ;;  %v5930_v11 = vmul.f32 -1.442695, %v1714_v3  ;;  %2160 = vmatpush.msra.mxu2 %v1913_v21  ;;  %v1904_v3 = vld [vmem:[#allocation7 + $0x180] sm:$0xff] }
 0x23e   :  { %2121 = vmatpush.msrb.mxu0 %v1904_v3 }
 0x23f   :  { %v6775_v22 = vpop.eup %6040  ;;  %6042 = vrcp.f32 %v6773_v14  ;;  %2161 = vmatpush.msra.mxu2 %v1905_v0  ;;  %v1749_v12 = vand.u32 2147483648, %v6773_v14  ;;  %v1747_v38 = vand.u32 2147483647, %v6773_v14  ;;  %vm1743_vm11 = vweird.f32 %v6773_v14  ;;  %v1864_v0 = vld [vmem:[#allocation7 + $0x40] sm:$0xff] }
 0x240   :  { %v1720_v56 = vmul.f32 %v6775_v22, %v6769_v31  ;;  %6044 = vpow2.f32 %v5930_v11  ;;  %vm1725_vm6 = vweird.f32 %v6775_v22  ;;  %v1897_v11 = vld [vmem:[#allocation7 + $0x148] sm:$0xff]  ;;  %2122 = vmatpush.msrb.mxu0 %v1896_v13 }
 0x241   :  { %vm6792_vm8 = vmor %vm1724_vm7, %vm1725_vm6  ;;  %6046 = vtanh.f32 %v1713_v53  ;;  %2162 = vmatpush.msra.mxu2 %v1897_v11  ;;  %v1750_v5 = vor.u32 1.1754944e-38, %v1749_v12  ;;  %vm1748_vm13 = vcmp.eq.f32.partialorder %v1747_v38, 8.507059e+37  ;;  %v1857_v13 = vld [vmem:[#allocation7 + $0x8] sm:$0xff]  ;;  %v1979_v38 = vld [vmem:[#allocation7 + $0x3d8] sm:$0xff] }
 0x242   :  { %v1721_v26 = vsub.f32 1.0, %v1720_v56  ;;  %v1888_v56 = vld [vmem:[#allocation7 + $0x100] sm:$0xff] }
 0x243   :  { %2123 = vmatpush.msrb.mxu0 %v1888_v56  ;;  %2163 = vmatpush.msra.mxu2 %v1889_v25  ;;  %v1970_v25 = vld [vmem:[#allocation7 + $0x390] sm:$0xff] }
 0x244   :  { %v1722_v4 = vmul.f32 %v6775_v22, %v1721_v26  ;;  %v1880_v26 = vld [vmem:[#allocation7 + $0xc0] sm:$0xff] }
 0x245   :  { %v6043_v20 = vpop.eup %6042  ;;  %2124 = vmatpush.msrb.mxu0 %v1880_v26  ;;  %2164 = vmatpush.msra.mxu2 %v1881_v32 }
 0x246   :  { %v6045_v59 = vpop.eup %6044  ;;  %v1739_v17 = vmul.f32 %v6043_v20, %v6773_v14  ;;  %v1723_v29 = vadd.f32 %v6775_v22, %v1722_v4  ;;  %vm1744_vm9 = vweird.f32 %v6043_v20  ;;  %v1873_v14 = vld [vmem:[#allocation7 + $0x88] sm:$0xff] }
 0x247   :  { %v6788_v1 = vadd.f32 1.0, %v6045_v59  ;;  %vm1745_vm12 = vmor %vm1743_vm11, %vm1744_vm9  ;;  %v6047_v51 = vpop.eup %6046  ;;  %v1872_v59 = vld [vmem:[#allocation7 + $0x80] sm:$0xff]  ;;  %2165 = vmatpush.msra.mxu2 %v1873_v14 }
 0x248   :  { %v1740_v48 = vsub.f32 1.0, %v1739_v17  ;;  %v1727_v31 = vsel %vm6792_vm8, %v6775_v22, %v1723_v29  ;;  %2125 = vmatpush.msrb.mxu0 %v1872_v59  ;;  %v1946_v59 = vld [vmem:[#allocation7 + $0x2d0] sm:$0xff]  ;;  %v2100_v14 = vld [vmem:[#allocation7 + $0x7a0] sm:$0xff] }
 0x249   :  { %6048 = vrcp.f32 %v6788_v1  ;;  %v1732_v52 = vsel %vm1729_vm10, %v1731_v23, %v1727_v31  ;;  %v1769_v31 = vand.u32 2147483648, %v6788_v1  ;;  %v1978_v23 = vld [vmem:[#allocation7 + $0x3d0] sm:$0xff]  ;;  %vm1763_vm15 = vweird.f32 %v6788_v1 }
 0x24a   :  { %v1741_v8 = vmul.f32 %v6043_v20, %v1740_v48  ;;  %v1774_v21 = vmul.f32 %v6047_v51, %v1732_v52  ;;  %2126 = vmatpush.msrb.mxu0 %v1864_v0  ;;  %v1971_v52 = vld [vmem:[#allocation7 + $0x398] sm:$0xff]  ;;  %v1954_v51 = vld [vmem:[#allocation7 + $0x310] sm:$0xff]  ;;  %v2092_v0 = vld [vmem:[#allocation7 + $0x760] sm:$0xff] }
 0x24b   :  { %v1568_v61 = vpop.f32.mrf.mxu0 }
 0x24c   :  { %v1742_v22 = vadd.f32 %v6043_v20, %v1741_v8  ;;  %v1589_v30 = vadd.f32 %v1588_v10, %v1568_v61  ;;  %v1767_v10 = vand.u32 2147483647, %v6788_v1 }
 0x24e   :  { %v1746_v53 = vsel %vm1745_vm12, %v6043_v20, %v1742_v22  ;;  %v1786_v60 = vadd.f32 %v1589_v30, %v6601_v54  ;;  %v1865_v20 = vld [vmem:[#allocation7 + $0x48] sm:$0xff]  ;;  %v1962_v30 = vld [vmem:[#allocation7 + $0x350] sm:$0xff]  ;;  %vm1768_vm1 = vcmp.eq.f32.partialorder %v1767_v10, 8.507059e+37  ;;  %v2068_v10 = vld [vmem:[#allocation7 + $0x6a0] sm:$0xff] }
 0x24f   :  { %v6049_v4 = vpop.eup %6048  ;;  %v1751_v58 = vsel %vm1748_vm13, %v1750_v5, %v1746_v53  ;;  %2166 = vmatpush.msra.mxu2 %v1865_v20  ;;  %v1963_v5 = vld [vmem:[#allocation7 + $0x358] sm:$0xff]  ;;  %v2093_v20 = vld [vmem:[#allocation7 + $0x768] sm:$0xff] }
 0x250   :  { %v1773_v17 = vmul.f32 %v1751_v58, %v6680_v27  ;;  %v1759_v29 = vmul.f32 %v6049_v4, %v6788_v1  ;;  %vm1764_vm14 = vweird.f32 %v6049_v4  ;;  %v1856_v27 = vld [vmem:[#allocation7] sm:$0xff]  ;;  %v5931_v11 = vmul.f32 -1.442695, %v1786_v60  ;;  %v1955_v1 = vld [vmem:[#allocation7 + $0x318] sm:$0xff]  ;;  %v1938_v60 = vld [vmem:[#allocation7 + $0x290] sm:$0xff] }
 0x251   :  { %v1608_v3 = vpop.f32.mrf.mxu2  ;;  %2127 = vmatpush.msrb.mxu0 %v1856_v27  ;;  %2167 = vmatpush.msra.mxu2 %v1857_v13  ;;  %vm1765_vm0 = vmor %vm1763_vm15, %vm1764_vm14  ;;  %v2108_v58 = vld [vmem:[#allocation7 + $0x7e0] sm:$0xff]  ;;  %v2085_v13 = vld [vmem:[#allocation7 + $0x728] sm:$0xff] }
 0x252   :  { %v6807_v48 = vadd.f32 %v1774_v21, %v1773_v17  ;;  %v1760_v62 = vsub.f32 1.0, %v1759_v29  ;;  %v1629_v12 = vadd.f32 %v1628_v35, %v1608_v3  ;;  %v2109_v21 = vld [vmem:[#allocation7 + $0x7e8] sm:$0xff]  ;;  %v1939_v35 = vld [vmem:[#allocation7 + $0x298] sm:$0xff]  ;;  %v2084_v27 = vld [vmem:[#allocation7 + $0x720] sm:$0xff] }
 0x253   :  { %2192 = vmatpush.msra.mxu0 %v1978_v23  ;;  %2232 = vmatpush.msrb.mxu2 %v1979_v38  ;;  %v2101_v17 = vld [vmem:[#allocation7 + $0x7a8] sm:$0xff]  ;;  %v1922_v23 = vld [vmem:[#allocation7 + $0x210] sm:$0xff]  ;;  %v1923_v38 = vld [vmem:[#allocation7 + $0x218] sm:$0xff] }
 0x254   :  { %6050 = vtanh.f32 %v6807_v48  ;;  %v1761_v54 = vmul.f32 %v6049_v4, %v1760_v62  ;;  %v1787_v8 = vadd.f32 %v1629_v12, %v6577_v18  ;;  %v1770_v18 = vor.u32 1.1754944e-38, %v1769_v31  ;;  %v1930_v62 = vld [vmem:[#allocation7 + $0x250] sm:$0xff]  ;;  %v1931_v12 = vld [vmem:[#allocation7 + $0x258] sm:$0xff] }
 0x255   :  { %2193 = vmatpush.msra.mxu0 %v1970_v25  ;;  %2233 = vmatpush.msrb.mxu2 %v1971_v52  ;;  %6052 = vpow2.f32 %v5931_v11  ;;  %v2076_v11 = vld [vmem:[#allocation7 + $0x6e0] sm:$0xff]  ;;  %v1915_v25 = vld [vmem:[#allocation7 + $0x1d8] sm:$0xff] }
 0x256   :  { %v1762_v61 = vadd.f32 %v6049_v4, %v1761_v54  ;;  %v5932_v56 = vmul.f32 -1.442695, %v1787_v8  ;;  %v2077_v8 = vld [vmem:[#allocation7 + $0x6e8] sm:$0xff]  ;;  %v2060_v52 = vld [vmem:[#allocation7 + $0x660] sm:$0xff] }
 0x257   :  { %2194 = vmatpush.msra.mxu0 %v1962_v30  ;;  %2234 = vmatpush.msrb.mxu2 %v1963_v5  ;;  %v1907_v30 = vld [vmem:[#allocation7 + $0x198] sm:$0xff]  ;;  %v2052_v5 = vld [vmem:[#allocation7 + $0x620] sm:$0xff] }
 0x258   :  { %v1766_v22 = vsel %vm1765_vm0, %v6049_v4, %v1762_v61  ;;  %6054 = vpow2.f32 %v5932_v56  ;;  %v1947_v4 = vld [vmem:[#allocation7 + $0x2d8] sm:$0xff]  ;;  %v2069_v61 = vld [vmem:[#allocation7 + $0x6a8] sm:$0xff]  ;;  %v1914_v56 = vld [vmem:[#allocation7 + $0x1d0] sm:$0xff] }
 0x259   :  { %v1771_v32 = vsel %vm1768_vm1, %v1770_v18, %v1766_v22  ;;  %2195 = vmatpush.msra.mxu0 %v1954_v51  ;;  %2235 = vmatpush.msrb.mxu2 %v1955_v1  ;;  %v2061_v22 = vld [vmem:[#allocation7 + $0x668] sm:$0xff]  ;;  %v1906_v18 = vld [vmem:[#allocation7 + $0x190] sm:$0xff]  ;;  %v1899_v51 = vld [vmem:[#allocation7 + $0x158] sm:$0xff] }
 0x25a   :  { %v6051_v26 = vpop.eup %6050 }
 0x25b   :  { %v6815_v53 = vmul.f32 %v6051_v26, %v1771_v32  ;;  %v6053_v29 = vpop.eup %6052  ;;  %2196 = vmatpush.msra.mxu0 %v1946_v59  ;;  %2236 = vmatpush.msrb.mxu2 %v1947_v4  ;;  %v2053_v26 = vld [vmem:[#allocation7 + $0x628] sm:$0xff]  ;;  %v1898_v32 = vld [vmem:[#allocation7 + $0x150] sm:$0xff] }
 0x25c   :  { %v6819_v31 = vadd.f32 1.0, %v6053_v29  ;;  %v1890_v4 = vld [vmem:[#allocation7 + $0x110] sm:$0xff]  ;;  %v2037_v29 = vld [vmem:[#allocation7 + $0x5a8] sm:$0xff] }
 0x25d   :  { %2148 = vmatmul.f32.vlgmr.msra.gmra.mxu1 %v6815_v53  ;;  %2188 = vmatmul.f32.vlgmr.msra.gmra.mxu3 %v6815_v53 }
 0x25e   :  { %2292 = vmatpush.msra.mxu1 %v2108_v58  ;;  %2332 = vmatpush.msra.mxu3 %v2109_v21  ;;  %v6055_v3 = vpop.eup %6054  ;;  %6056 = vrcp.f32 %v6819_v31  ;;  %v2044_v58 = vld [vmem:[#allocation7 + $0x5e0] sm:$0xff]  ;;  %v2045_v21 = vld [vmem:[#allocation7 + $0x5e8] sm:$0xff]  ;;  %vm1799_vm4 = vweird.f32 %v6819_v31 }
 0x25f   :  { %2197 = vmatpush.msra.mxu0 %v1938_v60  ;;  %2237 = vmatpush.msrb.mxu2 %v1939_v35  ;;  %v6821_v54 = vadd.f32 1.0, %v6055_v3  ;;  %v1882_v60 = vld [vmem:[#allocation7 + $0xd0] sm:$0xff]  ;;  %v1883_v35 = vld [vmem:[#allocation7 + $0xd8] sm:$0xff] }
 0x260   :  { %2293 = vmatpush.msra.mxu1 %v2100_v14  ;;  %2333 = vmatpush.msra.mxu3 %v2101_v17  ;;  %v1891_v14 = vld [vmem:[#allocation7 + $0x118] sm:$0xff]  ;;  %v2036_v17 = vld [vmem:[#allocation7 + $0x5a0] sm:$0xff] }
 0x261   :  { %2198 = vmatpush.msra.mxu0 %v1930_v62  ;;  %2238 = vmatpush.msrb.mxu2 %v1931_v12  ;;  %6058 = vrcp.f32 %v6821_v54  ;;  %v2028_v62 = vld [vmem:[#allocation7 + $0x560] sm:$0xff]  ;;  %v2029_v12 = vld [vmem:[#allocation7 + $0x568] sm:$0xff]  ;;  %vm1818_vm5 = vweird.f32 %v6821_v54 }
 0x262   :  { %2294 = vmatpush.msra.mxu1 %v2092_v0  ;;  %2334 = vmatpush.msra.mxu3 %v2093_v20 }
 0x263   :  { %2199 = vmatpush.msra.mxu0 %v1922_v23  ;;  %2239 = vmatpush.msrb.mxu2 %v1923_v38  ;;  %v2020_v38 = vld [vmem:[#allocation7 + $0x520] sm:$0xff] }
 0x264   :  { %2295 = vmatpush.msra.mxu1 %v2084_v27  ;;  %2335 = vmatpush.msra.mxu3 %v2085_v13  ;;  %v6827_v1 = vpop.eup %6056  ;;  %v1668_v27 = vpop.f32.mrf.mxu1  ;;  %v1874_v13 = vld [vmem:[#allocation7 + $0x90] sm:$0xff] }
 0x265   :  { %2228 = vmatmul.f32.vlgmr.msrb.gmra.mxu1 %v6815_v53  ;;  %2268 = vmatmul.f32.vlgmr.msrb.gmra.mxu3 %v6815_v53  ;;  %v1795_v3 = vmul.f32 %v6827_v1, %v6819_v31  ;;  %vm1800_vm2 = vweird.f32 %v6827_v1 }
 0x266   :  { %2296 = vmatpush.msra.mxu1 %v2076_v11  ;;  %2336 = vmatpush.msra.mxu3 %v2077_v8  ;;  %v1875_v11 = vld [vmem:[#allocation7 + $0x98] sm:$0xff]  ;;  %v1708_v8 = vpop.f32.mrf.mxu3  ;;  %vm6849_vm6 = vmor %vm1799_vm4, %vm1800_vm2 }
 0x267   :  { %2200 = vmatpush.msra.mxu0 %v1914_v56  ;;  %2240 = vmatpush.msrb.mxu2 %v1915_v25  ;;  %v6829_v59 = vpop.eup %6058  ;;  %v1866_v25 = vld [vmem:[#allocation7 + $0x50] sm:$0xff] }
 0x268   :  { %2297 = vmatpush.msra.mxu1 %v2068_v10  ;;  %2337 = vmatpush.msra.mxu3 %v2069_v61  ;;  %v1814_v0 = vmul.f32 %v6829_v59, %v6821_v54  ;;  %v2021_v10 = vld [vmem:[#allocation7 + $0x528] sm:$0xff]  ;;  %vm1819_vm3 = vweird.f32 %v6829_v59 }
 0x269   :  { %2201 = vmatpush.msra.mxu0 %v1906_v18  ;;  %2241 = vmatpush.msrb.mxu2 %v1907_v30  ;;  %v2012_v30 = vld [vmem:[#allocation7 + $0x4e0] sm:$0xff]  ;;  %vm6859_vm7 = vmor %vm1818_vm5, %vm1819_vm3 }
 0x26a   :  { %2298 = vmatpush.msra.mxu1 %v2060_v52  ;;  %2338 = vmatpush.msra.mxu3 %v2061_v22  ;;  %v1867_v52 = vld [vmem:[#allocation7 + $0x58] sm:$0xff]  ;;  %v1796_v22 = vsub.f32 1.0, %v1795_v3  ;;  %v1815_v18 = vsub.f32 1.0, %v1814_v0  ;;  %v1989_v3 = vld [vmem:[#allocation7 + $0x428] sm:$0xff] }
 0x26b   :  { %2202 = vmatpush.msra.mxu0 %v1898_v32  ;;  %2242 = vmatpush.msrb.mxu2 %v1899_v51  ;;  %v1648_v20 = vpop.f32.mrf.mxu0  ;;  %v1858_v32 = vld [vmem:[#allocation7 + $0x10] sm:$0xff]  ;;  %v1859_v51 = vld [vmem:[#allocation7 + $0x18] sm:$0xff] }
 0x26c   :  { %2299 = vmatpush.msra.mxu1 %v2052_v5  ;;  %2339 = vmatpush.msra.mxu3 %v2053_v26  ;;  %v1669_v61 = vadd.f32 %v1668_v27, %v1648_v20  ;;  %v2013_v5 = vld [vmem:[#allocation7 + $0x4e8] sm:$0xff]  ;;  %v2110_v20 = vld [vmem:[#allocation7 + $0x7f0] sm:$0xff]  ;;  %v1805_v27 = vand.u32 2147483648, %v6819_v31 }
 0x26d   :  { %2203 = vmatpush.msra.mxu0 %v1890_v4  ;;  %2243 = vmatpush.msrb.mxu2 %v1891_v14 }
 0x26e   :  { %2300 = vmatpush.msra.mxu1 %v2044_v58  ;;  %2340 = vmatpush.msra.mxu3 %v2045_v21  ;;  %v2004_v58 = vld [vmem:[#allocation7 + $0x4a0] sm:$0xff]  ;;  %v2005_v21 = vld [vmem:[#allocation7 + $0x4a8] sm:$0xff]  ;;  %v1788_v4 = vadd.f32 %v1669_v61, %v6583_v43 }
 0x26f   :  { %2204 = vmatpush.msra.mxu0 %v1882_v60  ;;  %2244 = vmatpush.msrb.mxu2 %v1883_v35  ;;  %v1996_v60 = vld [vmem:[#allocation7 + $0x460] sm:$0xff]  ;;  %v1997_v35 = vld [vmem:[#allocation7 + $0x468] sm:$0xff] }
 0x270   :  { %2301 = vmatpush.msra.mxu1 %v2036_v17  ;;  %2341 = vmatpush.msra.mxu3 %v2037_v29  ;;  %v1816_v17 = vmul.f32 %v6829_v59, %v1815_v18  ;;  %v1797_v29 = vmul.f32 %v6827_v1, %v1796_v22 }
 0x271   :  { %v1688_v23 = vpop.f32.mrf.mxu2  ;;  %2205 = vmatpush.msra.mxu0 %v1874_v13  ;;  %2245 = vmatpush.msrb.mxu2 %v1875_v11  ;;  %v1803_v11 = vand.u32 2147483647, %v6819_v31  ;;  %v2038_v13 = vld [vmem:[#allocation7 + $0x5b0] sm:$0xff] }
 0x272   :  { %v1709_v56 = vadd.f32 %v1708_v8, %v1688_v23  ;;  %2302 = vmatpush.msra.mxu1 %v2028_v62  ;;  %2342 = vmatpush.msra.mxu3 %v2029_v12  ;;  %v1798_v43 = vadd.f32 %v6827_v1, %v1797_v29  ;;  %v1817_v0 = vadd.f32 %v6829_v59, %v1816_v17  ;;  %v2111_v62 = vld [vmem:[#allocation7 + $0x7f8] sm:$0xff]  ;;  %v1824_v12 = vand.u32 2147483648, %v6821_v54  ;;  %v2102_v23 = vld [vmem:[#allocation7 + $0x7b0] sm:$0xff] }
 0x273   :  { %2206 = vmatpush.msra.mxu0 %v1866_v25  ;;  %2246 = vmatpush.msrb.mxu2 %v1867_v52  ;;  %v1822_v8 = vand.u32 2147483647, %v6821_v54  ;;  %v2094_v25 = vld [vmem:[#allocation7 + $0x770] sm:$0xff]  ;;  %v2095_v52 = vld [vmem:[#allocation7 + $0x778] sm:$0xff]  ;;  %vm1804_vm8 = vcmp.eq.f32.partialorder %v1803_v11, 8.507059e+37 }
 0x274   :  { %v1789_v26 = vadd.f32 %v1709_v56, %v6581_v39  ;;  %2303 = vmatpush.msra.mxu1 %v2020_v38  ;;  %2343 = vmatpush.msra.mxu3 %v2021_v10  ;;  %v1988_v39 = vld [vmem:[#allocation7 + $0x420] sm:$0xff]  ;;  %v2103_v38 = vld [vmem:[#allocation7 + $0x7b8] sm:$0xff]  ;;  %v1802_v31 = vsel %vm6849_vm6, %v6827_v1, %v1798_v43  ;;  %v1821_v54 = vsel %vm6859_vm7, %v6829_v59, %v1817_v0  ;;  %v1825_v18 = vor.u32 1.1754944e-38, %v1824_v12 }
 0x275   :  { %2207 = vmatpush.msra.mxu0 %v1858_v32  ;;  %2247 = vmatpush.msrb.mxu2 %v1859_v51  ;;  %vm1823_vm9 = vcmp.eq.f32.partialorder %v1822_v8, 8.507059e+37  ;;  %v2079_v59 = vld [vmem:[#allocation7 + $0x6f8] sm:$0xff] }
 0x276   :  { %v5933_v14 = vmul.f32 -1.442695, %v1789_v26  ;;  %2304 = vmatpush.msra.mxu1 %v2012_v30  ;;  %2344 = vmatpush.msra.mxu3 %v2013_v5  ;;  %v1806_v30 = vor.u32 1.1754944e-38, %v1805_v27  ;;  %v2086_v5 = vld [vmem:[#allocation7 + $0x730] sm:$0xff]  ;;  %v2087_v26 = vld [vmem:[#allocation7 + $0x738] sm:$0xff]  ;;  %v1826_v51 = vsel %vm1823_vm9, %v1825_v18, %v1821_v54 }
 0x277   :  { %v2055_v43 = vld [vmem:[#allocation7 + $0x638] sm:$0xff]  ;;  %v2022_v18 = vld [vmem:[#allocation7 + $0x530] sm:$0xff] }
 0x278   :  { %6060 = vpow2.f32 %v5933_v14  ;;  %2305 = vmatpush.msra.mxu1 %v2004_v58  ;;  %2345 = vmatpush.msra.mxu3 %v2005_v21  ;;  %v1807_v32 = vsel %vm1804_vm8, %v1806_v30, %v1802_v31  ;;  %v2078_v58 = vld [vmem:[#allocation7 + $0x6f0] sm:$0xff]  ;;  %v1848_v21 = vmul.f32 %v1826_v51, %v6752_v40  ;;  %v2071_v14 = vld [vmem:[#allocation7 + $0x6b8] sm:$0xff]  ;;  %v1972_v30 = vld [vmem:[#allocation7 + $0x3a0] sm:$0xff] }
 0x279   :  { %6062 = vtanh.f32 %v1788_v4  ;;  %v2070_v4 = vld [vmem:[#allocation7 + $0x6b0] sm:$0xff]  ;;  %v2039_v11 = vld [vmem:[#allocation7 + $0x5b8] sm:$0xff]  ;;  %v1964_v51 = vld [vmem:[#allocation7 + $0x360] sm:$0xff] }
 0x27a   :  { %2306 = vmatpush.msra.mxu1 %v1996_v60  ;;  %2346 = vmatpush.msra.mxu3 %v1997_v35  ;;  %v2062_v60 = vld [vmem:[#allocation7 + $0x670] sm:$0xff]  ;;  %v2063_v35 = vld [vmem:[#allocation7 + $0x678] sm:$0xff] }
 0x27c   :  { %2307 = vmatpush.msra.mxu1 %v1988_v39  ;;  %2347 = vmatpush.msra.mxu3 %v1989_v3  ;;  %v2054_v3 = vld [vmem:[#allocation7 + $0x630] sm:$0xff] }
 0x27d   :  { %2308 = vmatmul.f32.vlgmr.msra.gmra.mxu1 %v6815_v53  ;;  %2348 = vmatmul.f32.vlgmr.msra.gmra.mxu3 %v6815_v53 }
 0x27e   :  { %v6061_v10 = vpop.eup %6060  ;;  %2372 = vmatpush.msrb.mxu1 %v2110_v20  ;;  %2412 = vmatpush.msrb.mxu3 %v2111_v62  ;;  %v2046_v20 = vld [vmem:[#allocation7 + $0x5f0] sm:$0xff]  ;;  %v2047_v62 = vld [vmem:[#allocation7 + $0x5f8] sm:$0xff] }
 0x27f   :  { %v1832_v56 = vadd.f32 1.0, %v6061_v10  ;;  %v6063_v22 = vpop.eup %6062  ;;  %v2031_v10 = vld [vmem:[#allocation7 + $0x578] sm:$0xff] }
 0x280   :  { %2373 = vmatpush.msrb.mxu1 %v2102_v23  ;;  %2413 = vmatpush.msrb.mxu3 %v2103_v38  ;;  %v1849_v1 = vmul.f32 %v6063_v22, %v1807_v32  ;;  %v2030_v38 = vld [vmem:[#allocation7 + $0x570] sm:$0xff]  ;;  %v1981_v22 = vld [vmem:[#allocation7 + $0x3e8] sm:$0xff]  ;;  %v2015_v32 = vld [vmem:[#allocation7 + $0x4f8] sm:$0xff] }
 0x281   :  { %6064 = vrcp.f32 %v1832_v56  ;;  %v1844_v40 = vand.u32 2147483648, %v1832_v56  ;;  %v1842_v27 = vand.u32 2147483647, %v1832_v56  ;;  %vm1838_vm11 = vweird.f32 %v1832_v56 }
 0x282   :  { %2374 = vmatpush.msrb.mxu1 %v2094_v25  ;;  %2414 = vmatpush.msrb.mxu3 %v2095_v52  ;;  %v6870_v29 = vadd.f32 %v1849_v1, %v1848_v21  ;;  %v1980_v52 = vld [vmem:[#allocation7 + $0x3e0] sm:$0xff]  ;;  %v1965_v1 = vld [vmem:[#allocation7 + $0x368] sm:$0xff] }
 0x283   :  { %v1845_v23 = vor.u32 1.1754944e-38, %v1844_v40  ;;  %vm1843_vm13 = vcmp.eq.f32.partialorder %v1842_v27, 8.507059e+37  ;;  %v1956_v21 = vld [vmem:[#allocation7 + $0x320] sm:$0xff] }
 0x284   :  { %2375 = vmatpush.msrb.mxu1 %v2086_v5  ;;  %2415 = vmatpush.msrb.mxu3 %v2087_v26  ;;  %6066 = vtanh.f32 %v6870_v29  ;;  %v1973_v5 = vld [vmem:[#allocation7 + $0x3a8] sm:$0xff]  ;;  %v2014_v26 = vld [vmem:[#allocation7 + $0x4f0] sm:$0xff]  ;;  %v1932_v40 = vld [vmem:[#allocation7 + $0x260] sm:$0xff] }
 0x285   :  { %v1916_v27 = vld [vmem:[#allocation7 + $0x1e0] sm:$0xff] }
 0x286   :  { %2376 = vmatpush.msrb.mxu1 %v2078_v58  ;;  %2416 = vmatpush.msrb.mxu3 %v2079_v59  ;;  %v2006_v58 = vld [vmem:[#allocation7 + $0x4b0] sm:$0xff]  ;;  %v2007_v59 = vld [vmem:[#allocation7 + $0x4b8] sm:$0xff] }
 0x287   :  { %v6065_v17 = vpop.eup %6064 }
 0x288   :  { %v1834_v39 = vmul.f32 %v6065_v17, %v1832_v56  ;;  %2377 = vmatpush.msrb.mxu1 %v2070_v4  ;;  %2417 = vmatpush.msrb.mxu3 %v2071_v14  ;;  %vm1839_vm10 = vweird.f32 %v6065_v17  ;;  %v2023_v56 = vld [vmem:[#allocation7 + $0x538] sm:$0xff]  ;;  %v1957_v4 = vld [vmem:[#allocation7 + $0x328] sm:$0xff]  ;;  %v1948_v14 = vld [vmem:[#allocation7 + $0x2e0] sm:$0xff] }
 0x289   :  { %vm1840_vm12 = vmor %vm1838_vm11, %vm1839_vm10 }
 0x28a   :  { %v1835_v0 = vsub.f32 1.0, %v1834_v39  ;;  %2378 = vmatpush.msrb.mxu1 %v2062_v60  ;;  %2418 = vmatpush.msrb.mxu3 %v2063_v35  ;;  %v6067_v31 = vpop.eup %6066  ;;  %v1998_v60 = vld [vmem:[#allocation7 + $0x470] sm:$0xff]  ;;  %v1999_v35 = vld [vmem:[#allocation7 + $0x478] sm:$0xff]  ;;  %v1940_v39 = vld [vmem:[#allocation7 + $0x2a0] sm:$0xff] }
 0x28c   :  { %v1836_v12 = vmul.f32 %v6065_v17, %v1835_v0  ;;  %2379 = vmatpush.msrb.mxu1 %v2054_v3  ;;  %2419 = vmatpush.msrb.mxu3 %v2055_v43  ;;  %v1941_v3 = vld [vmem:[#allocation7 + $0x2a8] sm:$0xff]  ;;  %v1990_v43 = vld [vmem:[#allocation7 + $0x430] sm:$0xff]  ;;  %v1991_v0 = vld [vmem:[#allocation7 + $0x438] sm:$0xff] }
 0x28e   :  { %v1837_v8 = vadd.f32 %v6065_v17, %v1836_v12  ;;  %2380 = vmatpush.msrb.mxu1 %v2046_v20  ;;  %2420 = vmatpush.msrb.mxu3 %v2047_v62  ;;  %v1933_v20 = vld [vmem:[#allocation7 + $0x268] sm:$0xff]  ;;  %v1924_v62 = vld [vmem:[#allocation7 + $0x220] sm:$0xff] }
 0x28f   :  { %v1925_v12 = vld [vmem:[#allocation7 + $0x228] sm:$0xff] }
 0x290   :  { %v1841_v61 = vsel %vm1840_vm12, %v6065_v17, %v1837_v8  ;;  %2381 = vmatpush.msrb.mxu1 %v2038_v13  ;;  %2421 = vmatpush.msrb.mxu3 %v2039_v11  ;;  %v1949_v17 = vld [vmem:[#allocation7 + $0x2e8] sm:$0xff]  ;;  %v1908_v11 = vld [vmem:[#allocation7 + $0x1a0] sm:$0xff] }
 0x291   :  { %v1846_v54 = vsel %vm1843_vm13, %v1845_v23, %v1841_v61  ;;  %v1917_v13 = vld [vmem:[#allocation7 + $0x1e8] sm:$0xff]  ;;  %v1900_v23 = vld [vmem:[#allocation7 + $0x160] sm:$0xff] }
 0x292   :  { %v6873_v25 = vmul.f32 %v6067_v31, %v1846_v54  ;;  %2382 = vmatpush.msrb.mxu1 %v2030_v38  ;;  %2422 = vmatpush.msrb.mxu3 %v2031_v10  ;;  %v1909_v8 = vld [vmem:[#allocation7 + $0x1a8] sm:$0xff]  ;;  %v1892_v10 = vld [vmem:[#allocation7 + $0x120] sm:$0xff] }
 0x293   :  { %v1901_v38 = vld [vmem:[#allocation7 + $0x168] sm:$0xff]  ;;  %v1876_v54 = vld [vmem:[#allocation7 + $0xa0] sm:$0xff] }
 0x294   :  { %2128 = vmatmul.f32.vlgmr.msrb.gmra.mxu0 %v6873_v25  ;;  %2168 = vmatmul.f32.vlgmr.msra.gmra.mxu2 %v6873_v25  ;;  %v1893_v61 = vld [vmem:[#allocation7 + $0x128] sm:$0xff] }
 0x295   :  { %2272 = vmatpush.msrb.mxu0 %v1980_v52  ;;  %2312 = vmatpush.msra.mxu2 %v1981_v22  ;;  %v1885_v31 = vld [vmem:[#allocation7 + $0xe8] sm:$0xff]  ;;  %v1868_v22 = vld [vmem:[#allocation7 + $0x60] sm:$0xff] }
 0x296   :  { %2383 = vmatpush.msrb.mxu1 %v2022_v18  ;;  %2423 = vmatpush.msrb.mxu3 %v2023_v56  ;;  %v1877_v52 = vld [vmem:[#allocation7 + $0xa8] sm:$0xff]  ;;  %v1860_v56 = vld [vmem:[#allocation7 + $0x20] sm:$0xff] }
 0x297   :  { %2273 = vmatpush.msrb.mxu0 %v1972_v30  ;;  %2313 = vmatpush.msra.mxu2 %v1973_v5  ;;  %v1869_v18 = vld [vmem:[#allocation7 + $0x68] sm:$0xff]  ;;  %v1982_v5 = vld [vmem:[#allocation7 + $0x3f0] sm:$0xff] }
 0x298   :  { %2384 = vmatpush.msrb.mxu1 %v2014_v26  ;;  %2424 = vmatpush.msrb.mxu3 %v2015_v32  ;;  %v1861_v30 = vld [vmem:[#allocation7 + $0x28] sm:$0xff]  ;;  %v1983_v26 = vld [vmem:[#allocation7 + $0x3f8] sm:$0xff]  ;;  %v1974_v32 = vld [vmem:[#allocation7 + $0x3b0] sm:$0xff] }
 0x299   :  { %2274 = vmatpush.msrb.mxu0 %v1964_v51  ;;  %2314 = vmatpush.msra.mxu2 %v1965_v1  ;;  %v1975_v51 = vld [vmem:[#allocation7 + $0x3b8] sm:$0xff]  ;;  %v1966_v1 = vld [vmem:[#allocation7 + $0x370] sm:$0xff] }
 0x29a   :  { %2385 = vmatpush.msrb.mxu1 %v2006_v58  ;;  %2425 = vmatpush.msrb.mxu3 %v2007_v59  ;;  %v1967_v58 = vld [vmem:[#allocation7 + $0x378] sm:$0xff]  ;;  %v1958_v59 = vld [vmem:[#allocation7 + $0x330] sm:$0xff] }
 0x29b   :  { %2275 = vmatpush.msrb.mxu0 %v1956_v21  ;;  %2315 = vmatpush.msra.mxu2 %v1957_v4  ;;  %v1959_v21 = vld [vmem:[#allocation7 + $0x338] sm:$0xff]  ;;  %v1950_v4 = vld [vmem:[#allocation7 + $0x2f0] sm:$0xff] }
 0x29c   :  { %2208 = vmatmul.f32.vlgmr.msra.gmra.mxu0 %v6873_v25  ;;  %2248 = vmatmul.f32.vlgmr.msrb.gmra.mxu2 %v6873_v25 }
 0x29d   :  { %2276 = vmatpush.msrb.mxu0 %v1948_v14  ;;  %2316 = vmatpush.msra.mxu2 %v1949_v17  ;;  %v1951_v14 = vld [vmem:[#allocation7 + $0x2f8] sm:$0xff]  ;;  %v1942_v17 = vld [vmem:[#allocation7 + $0x2b0] sm:$0xff] }
 0x29e   :  { %2386 = vmatpush.msrb.mxu1 %v1998_v60  ;;  %2426 = vmatpush.msrb.mxu3 %v1999_v35  ;;  %v1943_v60 = vld [vmem:[#allocation7 + $0x2b8] sm:$0xff]  ;;  %v1934_v35 = vld [vmem:[#allocation7 + $0x270] sm:$0xff] }
 0x29f   :  { %2277 = vmatpush.msrb.mxu0 %v1940_v39  ;;  %2317 = vmatpush.msra.mxu2 %v1941_v3  ;;  %v1935_v39 = vld [vmem:[#allocation7 + $0x278] sm:$0xff]  ;;  %v1926_v3 = vld [vmem:[#allocation7 + $0x230] sm:$0xff] }
 0x2a0   :  { %2387 = vmatpush.msrb.mxu1 %v1990_v43  ;;  %2427 = vmatpush.msrb.mxu3 %v1991_v0  ;;  %v1927_v43 = vld [vmem:[#allocation7 + $0x238] sm:$0xff]  ;;  %v1918_v0 = vld [vmem:[#allocation7 + $0x1f0] sm:$0xff] }
 0x2a1   :  { %2388 = vmatmul.f32.vlgmr.msrb.gmra.mxu1 %v6815_v53  ;;  %2428 = vmatmul.f32.vlgmr.msrb.gmra.mxu3 %v6815_v53  ;;  %v1884_v53 = vld [vmem:[#allocation7 + $0xe0] sm:$0xff] }
 0x2a2   :  { %2278 = vmatpush.msrb.mxu0 %v1932_v40  ;;  %2318 = vmatpush.msra.mxu2 %v1933_v20  ;;  %v1919_v40 = vld [vmem:[#allocation7 + $0x1f8] sm:$0xff]  ;;  %v1910_v20 = vld [vmem:[#allocation7 + $0x1b0] sm:$0xff] }
 0x2a4   :  { %2279 = vmatpush.msrb.mxu0 %v1924_v62  ;;  %2319 = vmatpush.msra.mxu2 %v1925_v12  ;;  %v1911_v62 = vld [vmem:[#allocation7 + $0x1b8] sm:$0xff]  ;;  %v1902_v12 = vld [vmem:[#allocation7 + $0x170] sm:$0xff] }
 0x2a6   :  { %2280 = vmatpush.msrb.mxu0 %v1916_v27  ;;  %2320 = vmatpush.msra.mxu2 %v1917_v13  ;;  %v1903_v27 = vld [vmem:[#allocation7 + $0x178] sm:$0xff]  ;;  %v1894_v13 = vld [vmem:[#allocation7 + $0x130] sm:$0xff] }
 0x2a8   :  { %2281 = vmatpush.msrb.mxu0 %v1908_v11  ;;  %2321 = vmatpush.msra.mxu2 %v1909_v8  ;;  %v1895_v11 = vld [vmem:[#allocation7 + $0x138] sm:$0xff]  ;;  %v1886_v8 = vld [vmem:[#allocation7 + $0xf0] sm:$0xff] }
 0x2aa   :  { %2282 = vmatpush.msrb.mxu0 %v1900_v23  ;;  %2322 = vmatpush.msra.mxu2 %v1901_v38  ;;  %v1887_v23 = vld [vmem:[#allocation7 + $0xf8] sm:$0xff]  ;;  %v1878_v38 = vld [vmem:[#allocation7 + $0xb0] sm:$0xff] }
 0x2ac   :  { %2283 = vmatpush.msrb.mxu0 %v1892_v10  ;;  %2323 = vmatpush.msra.mxu2 %v1893_v61  ;;  %v1879_v10 = vld [vmem:[#allocation7 + $0xb8] sm:$0xff]  ;;  %v1870_v61 = vld [vmem:[#allocation7 + $0x70] sm:$0xff] }
 0x2ae   :  { %2284 = vmatpush.msrb.mxu0 %v1884_v53  ;;  %2324 = vmatpush.msra.mxu2 %v1885_v31  ;;  %v1871_v53 = vld [vmem:[#allocation7 + $0x78] sm:$0xff]  ;;  %v1862_v31 = vld [vmem:[#allocation7 + $0x30] sm:$0xff] }
 0x2b0   :  { %2285 = vmatpush.msrb.mxu0 %v1876_v54  ;;  %2325 = vmatpush.msra.mxu2 %v1877_v52  ;;  %v1863_v54 = vld [vmem:[#allocation7 + $0x38] sm:$0xff]  ;;  %v2825_v52 = vld [vmem:[#allocation7 + $0x7c0] sm:$0xff] }
 0x2b1   :  { %2853 = vmatpush.msra.mxu1 %v2825_v52  ;;  %v2803_v52 = vld [vmem:[#allocation7 + $0x710] sm:$0xff] }
 0x2b2   :  { %2286 = vmatpush.msrb.mxu0 %v1868_v22  ;;  %2326 = vmatpush.msra.mxu2 %v1869_v18  ;;  %v2826_v22 = vld [vmem:[#allocation7 + $0x7c8] sm:$0xff]  ;;  %v2817_v18 = vld [vmem:[#allocation7 + $0x780] sm:$0xff] }
 0x2b3   :  { %2893 = vmatpush.msra.mxu3 %v2826_v22  ;;  %2854 = vmatpush.msra.mxu1 %v2817_v18  ;;  %v2804_v22 = vld [vmem:[#allocation7 + $0x718] sm:$0xff]  ;;  %v2795_v18 = vld [vmem:[#allocation7 + $0x6d0] sm:$0xff] }
 0x2b4   :  { %2287 = vmatpush.msrb.mxu0 %v1860_v56  ;;  %2327 = vmatpush.msra.mxu2 %v1861_v30  ;;  %v2818_v56 = vld [vmem:[#allocation7 + $0x788] sm:$0xff]  ;;  %v2809_v30 = vld [vmem:[#allocation7 + $0x740] sm:$0xff] }
 0x2b5   :  { %2288 = vmatmul.f32.vlgmr.msrb.gmra.mxu0 %v6873_v25  ;;  %2328 = vmatmul.f32.vlgmr.msra.gmra.mxu2 %v6873_v25 }
 0x2b6   :  { %2352 = vmatpush.msra.mxu0 %v1982_v5  ;;  %2392 = vmatpush.msrb.mxu2 %v1983_v26  ;;  %v2810_v5 = vld [vmem:[#allocation7 + $0x748] sm:$0xff]  ;;  %v2801_v26 = vld [vmem:[#allocation7 + $0x700] sm:$0xff] }
 0x2b7   :  { %2894 = vmatpush.msra.mxu3 %v2818_v56  ;;  %2855 = vmatpush.msra.mxu1 %v2809_v30  ;;  %v2796_v56 = vld [vmem:[#allocation7 + $0x6d8] sm:$0xff] }
 0x2b8   :  { %2353 = vmatpush.msra.mxu0 %v1974_v32  ;;  %2393 = vmatpush.msrb.mxu2 %v1975_v51  ;;  %v2802_v32 = vld [vmem:[#allocation7 + $0x708] sm:$0xff]  ;;  %v2793_v51 = vld [vmem:[#allocation7 + $0x6c0] sm:$0xff] }
 0x2b9   :  { %2895 = vmatpush.msra.mxu3 %v2810_v5  ;;  %2856 = vmatpush.msra.mxu1 %v2801_v26 }
 0x2ba   :  { %2354 = vmatpush.msra.mxu0 %v1966_v1  ;;  %2394 = vmatpush.msrb.mxu2 %v1967_v58  ;;  %v2794_v1 = vld [vmem:[#allocation7 + $0x6c8] sm:$0xff] }
 0x2bb   :  { %2896 = vmatpush.msra.mxu3 %v2802_v32  ;;  %2857 = vmatpush.msra.mxu1 %v2793_v51  ;;  %v2786_v58 = vld [vmem:[#allocation7 + $0x688] sm:$0xff]  ;;  %v2787_v32 = vld [vmem:[#allocation7 + $0x690] sm:$0xff]  ;;  %v2788_v51 = vld [vmem:[#allocation7 + $0x698] sm:$0xff] }
 0x2bc   :  { %2355 = vmatpush.msra.mxu0 %v1958_v59  ;;  %2395 = vmatpush.msrb.mxu2 %v1959_v21  ;;  %v2777_v59 = vld [vmem:[#allocation7 + $0x640] sm:$0xff]  ;;  %v2778_v21 = vld [vmem:[#allocation7 + $0x648] sm:$0xff] }
 0x2bd   :  { %2897 = vmatpush.msra.mxu3 %v2794_v1 }
 0x2be   :  { %2356 = vmatpush.msra.mxu0 %v1950_v4  ;;  %2396 = vmatpush.msrb.mxu2 %v1951_v14  ;;  %v2769_v4 = vld [vmem:[#allocation7 + $0x600] sm:$0xff]  ;;  %v2770_v14 = vld [vmem:[#allocation7 + $0x608] sm:$0xff] }
 0x2bf   :  { %2898 = vmatpush.msra.mxu3 %v2786_v58  ;;  %v2780_v58 = vld [vmem:[#allocation7 + $0x658] sm:$0xff] }
 0x2c0   :  { %2357 = vmatpush.msra.mxu0 %v1942_v17  ;;  %2397 = vmatpush.msrb.mxu2 %v1943_v60  ;;  %v2761_v17 = vld [vmem:[#allocation7 + $0x5c0] sm:$0xff]  ;;  %v2762_v60 = vld [vmem:[#allocation7 + $0x5c8] sm:$0xff] }
 0x2c1   :  { %2899 = vmatpush.msra.mxu3 %v2778_v21 }
 0x2c2   :  { %2358 = vmatpush.msra.mxu0 %v1934_v35  ;;  %2398 = vmatpush.msrb.mxu2 %v1935_v39  ;;  %v2753_v35 = vld [vmem:[#allocation7 + $0x580] sm:$0xff]  ;;  %v2754_v39 = vld [vmem:[#allocation7 + $0x588] sm:$0xff] }
 0x2c3   :  { %2900 = vmatpush.msra.mxu3 %v2770_v14  ;;  %v2772_v14 = vld [vmem:[#allocation7 + $0x618] sm:$0xff] }
 0x2c4   :  { %2359 = vmatpush.msra.mxu0 %v1926_v3  ;;  %2399 = vmatpush.msrb.mxu2 %v1927_v43  ;;  %v2745_v3 = vld [vmem:[#allocation7 + $0x540] sm:$0xff]  ;;  %v2746_v43 = vld [vmem:[#allocation7 + $0x548] sm:$0xff] }
 0x2c5   :  { %2901 = vmatpush.msra.mxu3 %v2762_v60 }
 0x2c6   :  { %2360 = vmatpush.msra.mxu0 %v1918_v0  ;;  %2400 = vmatpush.msrb.mxu2 %v1919_v40  ;;  %v2737_v0 = vld [vmem:[#allocation7 + $0x500] sm:$0xff]  ;;  %v2738_v40 = vld [vmem:[#allocation7 + $0x508] sm:$0xff] }
 0x2c7   :  { %2902 = vmatpush.msra.mxu3 %v2754_v39  ;;  %v2764_v39 = vld [vmem:[#allocation7 + $0x5d8] sm:$0xff] }
 0x2c8   :  { %2361 = vmatpush.msra.mxu0 %v1910_v20  ;;  %2401 = vmatpush.msrb.mxu2 %v1911_v62  ;;  %v2729_v20 = vld [vmem:[#allocation7 + $0x4c0] sm:$0xff]  ;;  %v2730_v62 = vld [vmem:[#allocation7 + $0x4c8] sm:$0xff] }
 0x2c9   :  { %2903 = vmatpush.msra.mxu3 %v2746_v43  ;;  %v2755_v43 = vld [vmem:[#allocation7 + $0x590] sm:$0xff] }
 0x2ca   :  { %2362 = vmatpush.msra.mxu0 %v1902_v12  ;;  %2402 = vmatpush.msrb.mxu2 %v1903_v27  ;;  %v2721_v12 = vld [vmem:[#allocation7 + $0x480] sm:$0xff]  ;;  %v2722_v27 = vld [vmem:[#allocation7 + $0x488] sm:$0xff] }
 0x2cb   :  { %2904 = vmatpush.msra.mxu3 %v2738_v40 }
 0x2cc   :  { %2363 = vmatpush.msra.mxu0 %v1894_v13  ;;  %2403 = vmatpush.msrb.mxu2 %v1895_v11  ;;  %v2713_v13 = vld [vmem:[#allocation7 + $0x440] sm:$0xff]  ;;  %v2714_v11 = vld [vmem:[#allocation7 + $0x448] sm:$0xff] }
 0x2cd   :  { %2905 = vmatpush.msra.mxu3 %v2730_v62  ;;  %v2698_v62 = vld [vmem:[#allocation7 + $0x3c8] sm:$0xff] }
 0x2ce   :  { %2364 = vmatpush.msra.mxu0 %v1886_v8  ;;  %2404 = vmatpush.msrb.mxu2 %v1887_v23  ;;  %v2705_v8 = vld [vmem:[#allocation7 + $0x400] sm:$0xff]  ;;  %v2706_v23 = vld [vmem:[#allocation7 + $0x408] sm:$0xff] }
 0x2cf   :  { %2906 = vmatpush.msra.mxu3 %v2722_v27  ;;  %v2748_v27 = vld [vmem:[#allocation7 + $0x558] sm:$0xff] }
 0x2d0   :  { %2365 = vmatpush.msra.mxu0 %v1878_v38  ;;  %2405 = vmatpush.msrb.mxu2 %v1879_v10  ;;  %v2827_v38 = vld [vmem:[#allocation7 + $0x7d0] sm:$0xff]  ;;  %v2828_v10 = vld [vmem:[#allocation7 + $0x7d8] sm:$0xff] }
 0x2d1   :  { %2907 = vmatpush.msra.mxu3 %v2714_v11  ;;  %v2689_v11 = vld [vmem:[#allocation7 + $0x380] sm:$0xff] }
 0x2d2   :  { %2366 = vmatpush.msra.mxu0 %v1870_v61  ;;  %2406 = vmatpush.msrb.mxu2 %v1871_v53  ;;  %v2819_v61 = vld [vmem:[#allocation7 + $0x790] sm:$0xff]  ;;  %v2820_v53 = vld [vmem:[#allocation7 + $0x798] sm:$0xff] }
 0x2d3   :  { %2908 = vmatpush.msra.mxu3 %v2706_v23  ;;  %v2739_v23 = vld [vmem:[#allocation7 + $0x510] sm:$0xff] }
 0x2d4   :  { %2367 = vmatpush.msra.mxu0 %v1862_v31  ;;  %2407 = vmatpush.msrb.mxu2 %v1863_v54  ;;  %v2811_v31 = vld [vmem:[#allocation7 + $0x750] sm:$0xff]  ;;  %v2812_v54 = vld [vmem:[#allocation7 + $0x758] sm:$0xff] }
 0x2d5   :  { %2368 = vmatmul.f32.vlgmr.msra.gmra.mxu0 %v6873_v25  ;;  %2408 = vmatmul.f32.vlgmr.msrb.gmra.mxu2 %v6873_v25  ;;  %v2785_v25 = vld [vmem:[#allocation7 + $0x680] sm:$0xff] }
 0x2d6   :  { %2858 = vmatpush.msra.mxu1 %v2785_v25  ;;  %2973 = vmatpush.msrb.mxu3 %v2828_v10  ;;  %v2779_v25 = vld [vmem:[#allocation7 + $0x650] sm:$0xff] }
 0x2d7   :  { %2873 = vmatpush.msra.mxu2 %v2698_v62 }
 0x2d8   :  { %2859 = vmatpush.msra.mxu1 %v2777_v59  ;;  %2974 = vmatpush.msrb.mxu3 %v2820_v53  ;;  %v2740_v53 = vld [vmem:[#allocation7 + $0x518] sm:$0xff] }
 0x2da   :  { %2860 = vmatpush.msra.mxu1 %v2769_v4  ;;  %2975 = vmatpush.msrb.mxu3 %v2812_v54  ;;  %v2149_v30 = vpop.f32.mrf.mxu1  ;;  %v2771_v4 = vld [vmem:[#allocation7 + $0x610] sm:$0xff]  ;;  %v2681_v54 = vld [vmem:[#allocation7 + $0x340] sm:$0xff] }
 0x2dc   :  { %2861 = vmatpush.msra.mxu1 %v2761_v17  ;;  %2976 = vmatpush.msrb.mxu3 %v2804_v22  ;;  %v2731_v22 = vld [vmem:[#allocation7 + $0x4d0] sm:$0xff] }
 0x2de   :  { %2862 = vmatpush.msra.mxu1 %v2753_v35  ;;  %2977 = vmatpush.msrb.mxu3 %v2796_v56  ;;  %v2763_v35 = vld [vmem:[#allocation7 + $0x5d0] sm:$0xff] }
 0x2e0   :  { %2863 = vmatpush.msra.mxu1 %v2745_v3  ;;  %2978 = vmatpush.msrb.mxu3 %v2788_v51  ;;  %v2189_v59 = vpop.f32.mrf.mxu3 }
 0x2e2   :  { %2864 = vmatpush.msra.mxu1 %v2737_v0  ;;  %2979 = vmatpush.msrb.mxu3 %v2780_v58  ;;  %v2756_v0 = vld [vmem:[#allocation7 + $0x598] sm:$0xff]  ;;  %v2666_v58 = vld [vmem:[#allocation7 + $0x2c8] sm:$0xff] }
 0x2e4   :  { %2865 = vmatpush.msra.mxu1 %v2729_v20  ;;  %2980 = vmatpush.msrb.mxu3 %v2772_v14  ;;  %v2697_v20 = vld [vmem:[#allocation7 + $0x3c0] sm:$0xff] }
 0x2e5   :  { %2833 = vmatpush.msrb.mxu0 %v2697_v20  ;;  %v2650_v20 = vld [vmem:[#allocation7 + $0x248] sm:$0xff] }
 0x2e6   :  { %2866 = vmatpush.msra.mxu1 %v2721_v12  ;;  %2981 = vmatpush.msrb.mxu3 %v2764_v39  ;;  %v2747_v12 = vld [vmem:[#allocation7 + $0x550] sm:$0xff] }
 0x2e7   :  { %2834 = vmatpush.msrb.mxu0 %v2689_v11 }
 0x2e8   :  { %2867 = vmatpush.msra.mxu1 %v2713_v13  ;;  %2982 = vmatpush.msrb.mxu3 %v2756_v0 }
 0x2e9   :  { %2835 = vmatpush.msrb.mxu0 %v2681_v54 }
 0x2ea   :  { %2868 = vmatpush.msra.mxu1 %v2705_v8  ;;  %2983 = vmatpush.msrb.mxu3 %v2748_v27  ;;  %v2690_v8 = vld [vmem:[#allocation7 + $0x388] sm:$0xff]  ;;  %v2641_v27 = vld [vmem:[#allocation7 + $0x200] sm:$0xff] }
 0x2eb   :  { %2874 = vmatpush.msra.mxu2 %v2690_v8 }
 0x2ec   :  { %2933 = vmatpush.msrb.mxu1 %v2827_v38  ;;  %v2269_v38 = vpop.f32.mrf.mxu3  ;;  %2984 = vmatpush.msrb.mxu3 %v2740_v53 }
 0x2ee   :  { %2934 = vmatpush.msrb.mxu1 %v2819_v61 }
 0x2f0   :  { %2935 = vmatpush.msrb.mxu1 %v2811_v31 }
 0x2f2   :  { %2936 = vmatpush.msrb.mxu1 %v2803_v52  ;;  %v2682_v52 = vld [vmem:[#allocation7 + $0x348] sm:$0xff] }
 0x2f3   :  { %2875 = vmatpush.msra.mxu2 %v2682_v52 }
 0x2f4   :  { %2937 = vmatpush.msrb.mxu1 %v2795_v18  ;;  %v2732_v18 = vld [vmem:[#allocation7 + $0x4d8] sm:$0xff] }
 0x2f5   :  { %2985 = vmatpush.msrb.mxu3 %v2732_v18  ;;  %v2626_v18 = vld [vmem:[#allocation7 + $0x188] sm:$0xff] }
 0x2f6   :  { %2938 = vmatpush.msrb.mxu1 %v2787_v32  ;;  %v2724_v32 = vld [vmem:[#allocation7 + $0x498] sm:$0xff] }
 0x2f7   :  { %2986 = vmatpush.msrb.mxu3 %v2724_v32  ;;  %v2618_v32 = vld [vmem:[#allocation7 + $0x148] sm:$0xff] }
 0x2f8   :  { %2939 = vmatpush.msrb.mxu1 %v2779_v25  ;;  %v2665_v25 = vld [vmem:[#allocation7 + $0x2c0] sm:$0xff] }
 0x2fa   :  { %2940 = vmatpush.msrb.mxu1 %v2771_v4  ;;  %v2716_v4 = vld [vmem:[#allocation7 + $0x458] sm:$0xff] }
 0x2fb   :  { %2987 = vmatpush.msrb.mxu3 %v2716_v4 }
 0x2fc   :  { %2941 = vmatpush.msrb.mxu1 %v2763_v35  ;;  %v2707_v35 = vld [vmem:[#allocation7 + $0x410] sm:$0xff] }
 0x2fe   :  { %2942 = vmatpush.msrb.mxu1 %v2755_v43  ;;  %v2229_v43 = vpop.f32.mrf.mxu1 }
 0x300   :  { %2943 = vmatpush.msrb.mxu1 %v2747_v12 }
 0x302   :  { %2944 = vmatpush.msrb.mxu1 %v2739_v23  ;;  %v2633_v23 = vld [vmem:[#allocation7 + $0x1c0] sm:$0xff] }
 0x304   :  { %2945 = vmatpush.msrb.mxu1 %v2731_v22  ;;  %v2625_v22 = vld [vmem:[#allocation7 + $0x180] sm:$0xff] }
 0x311   :  { %v2129_v5 = vpop.f32.mrf.mxu0 }
 0x312   :  { %v2150_v26 = vadd.f32 %v2149_v30, %v2129_v5  ;;  %v2673_v30 = vld [vmem:[#allocation7 + $0x300] sm:$0xff]  ;;  %v2674_v5 = vld [vmem:[#allocation7 + $0x308] sm:$0xff] }
 0x313   :  { %2836 = vmatpush.msrb.mxu0 %v2673_v30  ;;  %2876 = vmatpush.msra.mxu2 %v2674_v5 }
 0x314   :  { %v2432_v1 = vadd.f32 %v2150_v26, %v6629_v41  ;;  %v2723_v26 = vld [vmem:[#allocation7 + $0x490] sm:$0xff] }
 0x315   :  { %2946 = vmatpush.msrb.mxu1 %v2723_v26  ;;  %2837 = vmatpush.msrb.mxu0 %v2665_v25  ;;  %v2617_v26 = vld [vmem:[#allocation7 + $0x140] sm:$0xff]  ;;  %v2309_v25 = vpop.f32.mrf.mxu1 }
 0x316   :  { %v5934_v21 = vmul.f32 -1.442695, %v2432_v1  ;;  %2877 = vmatpush.msra.mxu2 %v2666_v58 }
 0x317   :  { %v2169_v17 = vpop.f32.mrf.mxu2 }
 0x318   :  { %6068 = vpow2.f32 %v5934_v21  ;;  %v2190_v60 = vadd.f32 %v2189_v59, %v2169_v17  ;;  %v2715_v59 = vld [vmem:[#allocation7 + $0x450] sm:$0xff]  ;;  %v2657_v17 = vld [vmem:[#allocation7 + $0x280] sm:$0xff] }
 0x319   :  { %v2209_v14 = vpop.f32.mrf.mxu0  ;;  %2947 = vmatpush.msrb.mxu1 %v2715_v59  ;;  %2838 = vmatpush.msrb.mxu0 %v2657_v17  ;;  %v2610_v17 = vld [vmem:[#allocation7 + $0x108] sm:$0xff] }
 0x31a   :  { %v2433_v3 = vadd.f32 %v2190_v60, %v6633_v6  ;;  %v2658_v60 = vld [vmem:[#allocation7 + $0x288] sm:$0xff]  ;;  %v2230_v62 = vadd.f32 %v2229_v43, %v2209_v14  ;;  %v2609_v14 = vld [vmem:[#allocation7 + $0x100] sm:$0xff] }
 0x31b   :  { %2878 = vmatpush.msra.mxu2 %v2658_v60  ;;  %2948 = vmatpush.msrb.mxu1 %v2707_v35  ;;  %v2601_v43 = vld [vmem:[#allocation7 + $0xc0] sm:$0xff] }
 0x31c   :  { %v5935_v40 = vmul.f32 -1.442695, %v2433_v3  ;;  %v2708_v3 = vld [vmem:[#allocation7 + $0x418] sm:$0xff]  ;;  %v2434_v53 = vadd.f32 %v2230_v62, %v6651_v36 }
 0x31d   :  { %2988 = vmatpush.msrb.mxu3 %v2708_v3  ;;  %2879 = vmatpush.msra.mxu2 %v2650_v20 }
 0x31e   :  { %v6069_v13 = vpop.eup %6068  ;;  %6070 = vpow2.f32 %v5935_v40  ;;  %v2649_v40 = vld [vmem:[#allocation7 + $0x240] sm:$0xff] }
 0x31f   :  { %v6887_v10 = vadd.f32 1.0, %v6069_v13  ;;  %v2249_v61 = vpop.f32.mrf.mxu2  ;;  %2839 = vmatpush.msrb.mxu0 %v2649_v40  ;;  %v2642_v13 = vld [vmem:[#allocation7 + $0x208] sm:$0xff] }
 0x320   :  { %v2270_v31 = vadd.f32 %v2269_v38, %v2249_v61  ;;  %2880 = vmatpush.msra.mxu2 %v2642_v13  ;;  %v2634_v38 = vld [vmem:[#allocation7 + $0x1c8] sm:$0xff] }
 0x321   :  { %6072 = vrcp.f32 %v6887_v10  ;;  %2840 = vmatpush.msrb.mxu0 %v2641_v27  ;;  %vm2445_vm15 = vweird.f32 %v6887_v10  ;;  %v2449_v5 = vand.u32 2147483647, %v6887_v10  ;;  %v2593_v27 = vld [vmem:[#allocation7 + $0x80] sm:$0xff]  ;;  %v2594_v13 = vld [vmem:[#allocation7 + $0x88] sm:$0xff] }
 0x322   :  { %v2435_v56 = vadd.f32 %v2270_v31, %v6637_v34  ;;  %2881 = vmatpush.msra.mxu2 %v2634_v38 }
 0x323   :  { %2841 = vmatpush.msrb.mxu0 %v2633_v23  ;;  %vm2450_vm3 = vcmp.eq.f32.partialorder %v2449_v5, 8.507059e+37  ;;  %v2349_v23 = vpop.f32.mrf.mxu3  ;;  %v2577_v5 = vld [vmem:[#allocation7] sm:$0xff] }
 0x324   :  { %v6071_v51 = vpop.eup %6070  ;;  %v5936_v1 = vmul.f32 -1.442695, %v2435_v56  ;;  %v2451_v56 = vand.u32 2147483648, %v6887_v10  ;;  %2882 = vmatpush.msra.mxu2 %v2626_v18 }
 0x325   :  { %v6891_v21 = vadd.f32 1.0, %v6071_v51  ;;  %2842 = vmatpush.msrb.mxu0 %v2625_v22  ;;  %v2585_v22 = vld [vmem:[#allocation7 + $0x40] sm:$0xff] }
 0x326   :  { %6074 = vpow2.f32 %v5936_v1  ;;  %2883 = vmatpush.msra.mxu2 %v2618_v32  ;;  %v2452_v60 = vor.u32 1.1754944e-38, %v2451_v56 }
 0x327   :  { %v6893_v39 = vpop.eup %6072  ;;  %6076 = vrcp.f32 %v6891_v21  ;;  %v2470_v51 = vand.u32 2147483648, %v6891_v21  ;;  %2843 = vmatpush.msrb.mxu0 %v2617_v26  ;;  %vm2464_vm2 = vweird.f32 %v6891_v21  ;;  %v2578_v26 = vld [vmem:[#allocation7 + $0x8] sm:$0xff] }
 0x328   :  { %v2441_v0 = vmul.f32 %v6893_v39, %v6887_v10  ;;  %vm2446_vm14 = vweird.f32 %v6893_v39  ;;  %v2468_v10 = vand.u32 2147483647, %v6891_v21  ;;  %2884 = vmatpush.msra.mxu2 %v2610_v17  ;;  %v2683_v17 = vld [vmem:[#allocation7 + $0x350] sm:$0xff] }
 0x329   :  { %vm6910_vm0 = vmor %vm2445_vm15, %vm2446_vm14  ;;  %2844 = vmatpush.msrb.mxu0 %v2609_v14 }
 0x32a   :  { %v2442_v12 = vsub.f32 1.0, %v2441_v0  ;;  %v2602_v0 = vld [vmem:[#allocation7 + $0xc8] sm:$0xff]  ;;  %vm2469_vm5 = vcmp.eq.f32.partialorder %v2468_v10, 8.507059e+37  ;;  %v2691_v10 = vld [vmem:[#allocation7 + $0x390] sm:$0xff] }
 0x32b   :  { %2845 = vmatpush.msrb.mxu0 %v2601_v43  ;;  %2885 = vmatpush.msra.mxu2 %v2602_v0 }
 0x32c   :  { %v6075_v11 = vpop.eup %6074  ;;  %v2443_v8 = vmul.f32 %v6893_v39, %v2442_v12 }
 0x32d   :  { %v6077_v61 = vpop.eup %6076  ;;  %v6900_v31 = vadd.f32 1.0, %v6075_v11  ;;  %2846 = vmatpush.msrb.mxu0 %v2593_v27  ;;  %2886 = vmatpush.msra.mxu2 %v2594_v13  ;;  %v2821_v27 = vld [vmem:[#allocation7 + $0x7a0] sm:$0xff] }
 0x32e   :  { %v2460_v54 = vmul.f32 %v6077_v61, %v6891_v21  ;;  %v2444_v52 = vadd.f32 %v6893_v39, %v2443_v8  ;;  %vm2465_vm1 = vweird.f32 %v6077_v61 }
 0x32f   :  { %6078 = vrcp.f32 %v6900_v31  ;;  %vm2466_vm4 = vmor %vm2464_vm2, %vm2465_vm1  ;;  %2847 = vmatpush.msrb.mxu0 %v2585_v22  ;;  %vm2484_vm7 = vweird.f32 %v6900_v31 }
 0x330   :  { %v2461_v30 = vsub.f32 1.0, %v2460_v54  ;;  %6080 = vtanh.f32 %v2434_v53  ;;  %v2448_v59 = vsel %vm6910_vm0, %v6893_v39, %v2444_v52  ;;  %v2471_v39 = vor.u32 1.1754944e-38, %v2470_v51  ;;  %v2700_v51 = vld [vmem:[#allocation7 + $0x3d8] sm:$0xff] }
 0x331   :  { %v2453_v20 = vsel %vm2450_vm3, %v2452_v60, %v2448_v59  ;;  %2848 = vmatpush.msrb.mxu0 %v2577_v5  ;;  %v2684_v60 = vld [vmem:[#allocation7 + $0x358] sm:$0xff]  ;;  %v2643_v5 = vld [vmem:[#allocation7 + $0x210] sm:$0xff] }
 0x332   :  { %v2462_v58 = vmul.f32 %v6077_v61, %v2461_v30  ;;  %v2289_v4 = vpop.f32.mrf.mxu0 }
 0x333   :  { %v2310_v35 = vadd.f32 %v2309_v25, %v2289_v4  ;;  %v2490_v25 = vand.u32 2147483648, %v6900_v31  ;;  %v2692_v4 = vld [vmem:[#allocation7 + $0x398] sm:$0xff] }
 0x334   :  { %v2463_v3 = vadd.f32 %v6077_v61, %v2462_v58  ;;  %v2488_v58 = vand.u32 2147483647, %v6900_v31 }
 0x335   :  { %v6919_v40 = vpop.eup %6078  ;;  %v2507_v8 = vadd.f32 %v2310_v35, %v6609_v7  ;;  %v2491_v35 = vor.u32 1.1754944e-38, %v2490_v25  ;;  %v2790_v25 = vld [vmem:[#allocation7 + $0x6a8] sm:$0xff] }
 0x336   :  { %v2467_v62 = vsel %vm2466_vm4, %v6077_v61, %v2463_v3  ;;  %v2480_v12 = vmul.f32 %v6919_v40, %v6900_v31  ;;  %v6081_v21 = vpop.eup %6080  ;;  %v2586_v61 = vld [vmem:[#allocation7 + $0x48] sm:$0xff]  ;;  %vm2485_vm6 = vweird.f32 %v6919_v40  ;;  %vm2489_vm9 = vcmp.eq.f32.partialorder %v2488_v58, 8.507059e+37  ;;  %v2675_v31 = vld [vmem:[#allocation7 + $0x310] sm:$0xff]  ;;  %v2676_v3 = vld [vmem:[#allocation7 + $0x318] sm:$0xff] }
 0x337   :  { %v2472_v11 = vsel %vm2469_vm5, %v2471_v39, %v2467_v62  ;;  %v2495_v53 = vmul.f32 %v6081_v21, %v2453_v20  ;;  %2887 = vmatpush.msra.mxu2 %v2586_v61  ;;  %v5937_v7 = vmul.f32 -1.442695, %v2507_v8  ;;  %vm6938_vm8 = vmor %vm2484_vm7, %vm2485_vm6  ;;  %v2829_v39 = vld [vmem:[#allocation7 + $0x7e0] sm:$0xff]  ;;  %v2830_v62 = vld [vmem:[#allocation7 + $0x7e8] sm:$0xff] }
 0x338   :  { %v2494_v38 = vmul.f32 %v2472_v11, %v6807_v48  ;;  %v2481_v54 = vsub.f32 1.0, %v2480_v12  ;;  %v2329_v52 = vpop.f32.mrf.mxu2  ;;  %v2699_v48 = vld [vmem:[#allocation7 + $0x3d0] sm:$0xff]  ;;  %v2822_v21 = vld [vmem:[#allocation7 + $0x7a8] sm:$0xff]  ;;  %v2660_v8 = vld [vmem:[#allocation7 + $0x298] sm:$0xff] }
 0x339   :  { %v2350_v18 = vadd.f32 %v2349_v23, %v2329_v52  ;;  %2888 = vmatpush.msra.mxu2 %v2578_v26  ;;  %2913 = vmatpush.msra.mxu0 %v2699_v48  ;;  %v2667_v12 = vld [vmem:[#allocation7 + $0x2d0] sm:$0xff]  ;;  %v2652_v52 = vld [vmem:[#allocation7 + $0x258] sm:$0xff]  ;;  %v2805_v61 = vld [vmem:[#allocation7 + $0x720] sm:$0xff] }
 0x33a   :  { %v6926_v56 = vadd.f32 %v2495_v53, %v2494_v38  ;;  %v2482_v30 = vmul.f32 %v6919_v40, %v2481_v54  ;;  %v2659_v11 = vld [vmem:[#allocation7 + $0x290] sm:$0xff]  ;;  %v2813_v38 = vld [vmem:[#allocation7 + $0x760] sm:$0xff]  ;;  %v2814_v53 = vld [vmem:[#allocation7 + $0x768] sm:$0xff] }
 0x33b   :  { %v2508_v32 = vadd.f32 %v2350_v18, %v6585_v44  ;;  %2953 = vmatpush.msrb.mxu2 %v2700_v51  ;;  %2914 = vmatpush.msra.mxu0 %v2691_v10  ;;  %v2651_v54 = vld [vmem:[#allocation7 + $0x250] sm:$0xff]  ;;  %v2644_v26 = vld [vmem:[#allocation7 + $0x218] sm:$0xff]  ;;  %v2781_v10 = vld [vmem:[#allocation7 + $0x660] sm:$0xff] }
 0x33c   :  { %6082 = vtanh.f32 %v6926_v56  ;;  %v2483_v1 = vadd.f32 %v6919_v40, %v2482_v30  ;;  %v2806_v30 = vld [vmem:[#allocation7 + $0x728] sm:$0xff]  ;;  %v2635_v48 = vld [vmem:[#allocation7 + $0x1d0] sm:$0xff]  ;;  %v2636_v51 = vld [vmem:[#allocation7 + $0x1d8] sm:$0xff] }
 0x33d   :  { %v5938_v59 = vmul.f32 -1.442695, %v2508_v32  ;;  %2954 = vmatpush.msrb.mxu2 %v2692_v4  ;;  %6084 = vpow2.f32 %v5937_v7  ;;  %2915 = vmatpush.msra.mxu0 %v2683_v17  ;;  %v2797_v7 = vld [vmem:[#allocation7 + $0x6e0] sm:$0xff]  ;;  %v2798_v32 = vld [vmem:[#allocation7 + $0x6e8] sm:$0xff]  ;;  %v2627_v58 = vld [vmem:[#allocation7 + $0x190] sm:$0xff] }
 0x33e   :  { %v2487_v14 = vsel %vm6938_vm8, %v6919_v40, %v2483_v1  ;;  %v2668_v40 = vld [vmem:[#allocation7 + $0x2d8] sm:$0xff]  ;;  %v2789_v1 = vld [vmem:[#allocation7 + $0x6a0] sm:$0xff]  ;;  %v2782_v4 = vld [vmem:[#allocation7 + $0x668] sm:$0xff] }
 0x33f   :  { %6086 = vpow2.f32 %v5938_v59  ;;  %2955 = vmatpush.msrb.mxu2 %v2684_v60  ;;  %v2492_v0 = vsel %vm2489_vm9, %v2491_v35, %v2487_v14  ;;  %2916 = vmatpush.msra.mxu0 %v2675_v31  ;;  %v2628_v59 = vld [vmem:[#allocation7 + $0x198] sm:$0xff]  ;;  %v2619_v44 = vld [vmem:[#allocation7 + $0x150] sm:$0xff]  ;;  %v2773_v17 = vld [vmem:[#allocation7 + $0x620] sm:$0xff] }
 0x340   :  { %v2620_v14 = vld [vmem:[#allocation7 + $0x158] sm:$0xff]  ;;  %v2774_v60 = vld [vmem:[#allocation7 + $0x628] sm:$0xff]  ;;  %v2611_v31 = vld [vmem:[#allocation7 + $0x110] sm:$0xff] }
 0x341   :  { %2956 = vmatpush.msrb.mxu2 %v2676_v3  ;;  %2917 = vmatpush.msra.mxu0 %v2667_v12  ;;  %v2612_v3 = vld [vmem:[#allocation7 + $0x118] sm:$0xff] }
 0x342   :  { %v6083_v43 = vpop.eup %6082  ;;  %v2604_v12 = vld [vmem:[#allocation7 + $0xd8] sm:$0xff] }
 0x343   :  { %v6945_v20 = vmul.f32 %v6083_v43, %v2492_v0  ;;  %2957 = vmatpush.msrb.mxu2 %v2668_v40  ;;  %v6085_v13 = vpop.eup %6084  ;;  %2918 = vmatpush.msra.mxu0 %v2659_v11  ;;  %v2765_v0 = vld [vmem:[#allocation7 + $0x5e0] sm:$0xff] }
 0x344   :  { %v6949_v22 = vadd.f32 1.0, %v6085_v13  ;;  %v2757_v40 = vld [vmem:[#allocation7 + $0x5a0] sm:$0xff] }
 0x345   :  { %2869 = vmatmul.f32.vlgmr.msra.gmra.mxu1 %v6945_v20  ;;  %2909 = vmatmul.f32.vlgmr.msra.gmra.mxu3 %v6945_v20  ;;  %v6087_v23 = vpop.eup %6086 }
 0x346   :  { %3013 = vmatpush.msra.mxu1 %v2829_v39  ;;  %3053 = vmatpush.msra.mxu3 %v2830_v62  ;;  %v6951_v18 = vadd.f32 1.0, %v6087_v23  ;;  %6088 = vrcp.f32 %v6949_v22  ;;  %v2766_v39 = vld [vmem:[#allocation7 + $0x5e8] sm:$0xff]  ;;  %v2603_v62 = vld [vmem:[#allocation7 + $0xd0] sm:$0xff]  ;;  %v2596_v23 = vld [vmem:[#allocation7 + $0x98] sm:$0xff]  ;;  %vm2520_vm12 = vweird.f32 %v6949_v22 }
 0x347   :  { %2958 = vmatpush.msrb.mxu2 %v2660_v8  ;;  %2919 = vmatpush.msra.mxu0 %v2651_v54  ;;  %v2595_v8 = vld [vmem:[#allocation7 + $0x90] sm:$0xff]  ;;  %v2750_v54 = vld [vmem:[#allocation7 + $0x568] sm:$0xff] }
 0x348   :  { %3014 = vmatpush.msra.mxu1 %v2821_v27  ;;  %3054 = vmatpush.msra.mxu3 %v2822_v21  ;;  %6090 = vrcp.f32 %v6951_v18  ;;  %v2758_v27 = vld [vmem:[#allocation7 + $0x5a8] sm:$0xff]  ;;  %vm2539_vm13 = vweird.f32 %v6951_v18 }
 0x349   :  { %2959 = vmatpush.msrb.mxu2 %v2652_v52  ;;  %2920 = vmatpush.msra.mxu0 %v2643_v5  ;;  %v2429_v52 = vpop.f32.mrf.mxu3  ;;  %v2588_v5 = vld [vmem:[#allocation7 + $0x58] sm:$0xff] }
 0x34a   :  { %3015 = vmatpush.msra.mxu1 %v2813_v38  ;;  %3055 = vmatpush.msra.mxu3 %v2814_v53  ;;  %v2389_v38 = vpop.f32.mrf.mxu1  ;;  %v2749_v53 = vld [vmem:[#allocation7 + $0x560] sm:$0xff] }
 0x34b   :  { %2960 = vmatpush.msrb.mxu2 %v2644_v26  ;;  %2921 = vmatpush.msra.mxu0 %v2635_v48  ;;  %v2742_v48 = vld [vmem:[#allocation7 + $0x528] sm:$0xff] }
 0x34c   :  { %3016 = vmatpush.msra.mxu1 %v2805_v61  ;;  %3056 = vmatpush.msra.mxu3 %v2806_v30  ;;  %v6957_v35 = vpop.eup %6088  ;;  %v2587_v30 = vld [vmem:[#allocation7 + $0x50] sm:$0xff] }
 0x34d   :  { %2949 = vmatmul.f32.vlgmr.msrb.gmra.mxu1 %v6945_v20  ;;  %2989 = vmatmul.f32.vlgmr.msrb.gmra.mxu3 %v6945_v20  ;;  %v2516_v13 = vmul.f32 %v6957_v35, %v6949_v22  ;;  %vm2521_vm10 = vweird.f32 %v6957_v35 }
 0x34e   :  { %3017 = vmatpush.msra.mxu1 %v2797_v7  ;;  %3057 = vmatpush.msra.mxu3 %v2798_v32  ;;  %v6959_v43 = vpop.eup %6090  ;;  %v2741_v32 = vld [vmem:[#allocation7 + $0x520] sm:$0xff]  ;;  %vm6979_vm14 = vmor %vm2520_vm12, %vm2521_vm10 }
 0x34f   :  { %2961 = vmatpush.msrb.mxu2 %v2636_v51  ;;  %2922 = vmatpush.msra.mxu0 %v2627_v58  ;;  %v2535_v21 = vmul.f32 %v6959_v43, %v6951_v18  ;;  %v2517_v51 = vsub.f32 1.0, %v2516_v13  ;;  %v2580_v58 = vld [vmem:[#allocation7 + $0x18] sm:$0xff]  ;;  %vm2540_vm11 = vweird.f32 %v6959_v43  ;;  %v2831_v13 = vld [vmem:[#allocation7 + $0x7f0] sm:$0xff] }
 0x350   :  { %3018 = vmatpush.msra.mxu1 %v2789_v1  ;;  %3058 = vmatpush.msra.mxu3 %v2790_v25  ;;  %v2579_v25 = vld [vmem:[#allocation7 + $0x10] sm:$0xff]  ;;  %vm6987_vm15 = vmor %vm2539_vm13, %vm2540_vm11 }
 0x351   :  { %2962 = vmatpush.msrb.mxu2 %v2628_v59  ;;  %2923 = vmatpush.msra.mxu0 %v2619_v44  ;;  %v2536_v1 = vsub.f32 1.0, %v2535_v21  ;;  %v2832_v21 = vld [vmem:[#allocation7 + $0x7f8] sm:$0xff] }
 0x352   :  { %3019 = vmatpush.msra.mxu1 %v2781_v10  ;;  %3059 = vmatpush.msra.mxu3 %v2782_v4  ;;  %v2369_v11 = vpop.f32.mrf.mxu0  ;;  %v2733_v10 = vld [vmem:[#allocation7 + $0x4e0] sm:$0xff]  ;;  %v2734_v4 = vld [vmem:[#allocation7 + $0x4e8] sm:$0xff] }
 0x353   :  { %2963 = vmatpush.msrb.mxu2 %v2620_v14  ;;  %2924 = vmatpush.msra.mxu0 %v2611_v31  ;;  %v2390_v26 = vadd.f32 %v2389_v38, %v2369_v11  ;;  %v2537_v31 = vmul.f32 %v6959_v43, %v2536_v1  ;;  %v2808_v1 = vld [vmem:[#allocation7 + $0x738] sm:$0xff] }
 0x354   :  { %3020 = vmatpush.msra.mxu1 %v2773_v17  ;;  %3060 = vmatpush.msra.mxu3 %v2774_v60  ;;  %v2725_v17 = vld [vmem:[#allocation7 + $0x4a0] sm:$0xff]  ;;  %v2726_v60 = vld [vmem:[#allocation7 + $0x4a8] sm:$0xff] }
 0x355   :  { %2964 = vmatpush.msrb.mxu2 %v2612_v3  ;;  %2925 = vmatpush.msra.mxu0 %v2603_v62  ;;  %v2509_v44 = vadd.f32 %v2390_v26, %v6589_v46  ;;  %v2518_v3 = vmul.f32 %v6957_v35, %v2517_v51  ;;  %v2709_v46 = vld [vmem:[#allocation7 + $0x420] sm:$0xff] }
 0x356   :  { %3021 = vmatpush.msra.mxu1 %v2765_v0  ;;  %3061 = vmatpush.msra.mxu3 %v2766_v39  ;;  %v2718_v0 = vld [vmem:[#allocation7 + $0x468] sm:$0xff] }
 0x357   :  { %2965 = vmatpush.msrb.mxu2 %v2604_v12  ;;  %2926 = vmatpush.msra.mxu0 %v2595_v8  ;;  %v2710_v39 = vld [vmem:[#allocation7 + $0x428] sm:$0xff]  ;;  %v2519_v62 = vadd.f32 %v6957_v35, %v2518_v3  ;;  %v2538_v12 = vadd.f32 %v6959_v43, %v2537_v31  ;;  %v2524_v8 = vand.u32 2147483647, %v6949_v22  ;;  %v2784_v31 = vld [vmem:[#allocation7 + $0x678] sm:$0xff] }
 0x358   :  { %v2409_v61 = vpop.f32.mrf.mxu2  ;;  %3022 = vmatpush.msra.mxu1 %v2757_v40  ;;  %3062 = vmatpush.msra.mxu3 %v2758_v27  ;;  %v2545_v40 = vand.u32 2147483648, %v6951_v18  ;;  %v2526_v27 = vand.u32 2147483648, %v6949_v22 }
 0x359   :  { %v2430_v7 = vadd.f32 %v2429_v52, %v2409_v61  ;;  %2966 = vmatpush.msrb.mxu2 %v2596_v23  ;;  %2927 = vmatpush.msra.mxu0 %v2587_v30  ;;  %v2543_v23 = vand.u32 2147483647, %v6951_v18  ;;  %v2824_v52 = vld [vmem:[#allocation7 + $0x7b8] sm:$0xff]  ;;  %v2523_v22 = vsel %vm6979_vm14, %v6957_v35, %v2519_v62  ;;  %v2542_v18 = vsel %vm6987_vm15, %v6959_v43, %v2538_v12  ;;  %v2807_v35 = vld [vmem:[#allocation7 + $0x730] sm:$0xff] }
 0x35a   :  { %3023 = vmatpush.msra.mxu1 %v2749_v53  ;;  %3063 = vmatpush.msra.mxu3 %v2750_v54  ;;  %v2823_v54 = vld [vmem:[#allocation7 + $0x7b0] sm:$0xff]  ;;  %v2527_v26 = vor.u32 1.1754944e-38, %v2526_v27  ;;  %vm2525_vm0 = vcmp.eq.f32.partialorder %v2524_v8, 8.507059e+37  ;;  %v2768_v12 = vld [vmem:[#allocation7 + $0x5f8] sm:$0xff] }
 0x35b   :  { %v2510_v59 = vadd.f32 %v2430_v7, %v6587_v37  ;;  %2967 = vmatpush.msrb.mxu2 %v2588_v5  ;;  %2928 = vmatpush.msra.mxu0 %v2579_v25  ;;  %v2717_v37 = vld [vmem:[#allocation7 + $0x460] sm:$0xff]  ;;  %v2546_v5 = vor.u32 1.1754944e-38, %v2545_v40  ;;  %v2815_v7 = vld [vmem:[#allocation7 + $0x770] sm:$0xff]  ;;  %vm2544_vm1 = vcmp.eq.f32.partialorder %v2543_v23, 8.507059e+37  ;;  %v2752_v23 = vld [vmem:[#allocation7 + $0x578] sm:$0xff] }
 0x35c   :  { %3024 = vmatpush.msra.mxu1 %v2741_v32  ;;  %3064 = vmatpush.msra.mxu3 %v2742_v48  ;;  %v2816_v32 = vld [vmem:[#allocation7 + $0x778] sm:$0xff]  ;;  %v2528_v48 = vsel %vm2525_vm0, %v2527_v26, %v2523_v22  ;;  %v2799_v43 = vld [vmem:[#allocation7 + $0x6f0] sm:$0xff]  ;;  %v2702_v22 = vld [vmem:[#allocation7 + $0x3e8] sm:$0xff] }
 0x35d   :  { %v5939_v14 = vmul.f32 -1.442695, %v2510_v59  ;;  %2968 = vmatpush.msrb.mxu2 %v2580_v58  ;;  %v2547_v51 = vsel %vm2544_vm1, %v2546_v5, %v2542_v18  ;;  %v2800_v58 = vld [vmem:[#allocation7 + $0x6f8] sm:$0xff]  ;;  %v2767_v62 = vld [vmem:[#allocation7 + $0x5f0] sm:$0xff]  ;;  %v2694_v5 = vld [vmem:[#allocation7 + $0x3a8] sm:$0xff] }
 0x35e   :  { %3025 = vmatpush.msra.mxu1 %v2733_v10  ;;  %3065 = vmatpush.msra.mxu3 %v2734_v4  ;;  %v2569_v59 = vmul.f32 %v2547_v51, %v6870_v29  ;;  %v2791_v10 = vld [vmem:[#allocation7 + $0x6b0] sm:$0xff]  ;;  %v2792_v4 = vld [vmem:[#allocation7 + $0x6b8] sm:$0xff] }
 0x35f   :  { %6092 = vpow2.f32 %v5939_v14  ;;  %v2759_v27 = vld [vmem:[#allocation7 + $0x5b0] sm:$0xff] }
 0x360   :  { %3026 = vmatpush.msra.mxu1 %v2725_v17  ;;  %3066 = vmatpush.msra.mxu3 %v2726_v60  ;;  %6094 = vtanh.f32 %v2509_v44  ;;  %v2783_v60 = vld [vmem:[#allocation7 + $0x670] sm:$0xff] }
 0x361   :  { %v2751_v8 = vld [vmem:[#allocation7 + $0x570] sm:$0xff] }
 0x362   :  { %3027 = vmatpush.msra.mxu1 %v2717_v37  ;;  %3067 = vmatpush.msra.mxu3 %v2718_v0  ;;  %v2775_v37 = vld [vmem:[#allocation7 + $0x630] sm:$0xff]  ;;  %v2776_v0 = vld [vmem:[#allocation7 + $0x638] sm:$0xff] }
 0x363   :  { %v2743_v18 = vld [vmem:[#allocation7 + $0x530] sm:$0xff] }
 0x364   :  { %3028 = vmatpush.msra.mxu1 %v2709_v46  ;;  %3068 = vmatpush.msra.mxu3 %v2710_v39  ;;  %v2735_v26 = vld [vmem:[#allocation7 + $0x4f0] sm:$0xff] }
 0x365   :  { %v6093_v38 = vpop.eup %6092  ;;  %3029 = vmatmul.f32.vlgmr.msra.gmra.mxu1 %v6945_v20  ;;  %3069 = vmatmul.f32.vlgmr.msra.gmra.mxu3 %v6945_v20  ;;  %v2727_v51 = vld [vmem:[#allocation7 + $0x4b0] sm:$0xff] }
 0x366   :  { %v2553_v61 = vadd.f32 1.0, %v6093_v38  ;;  %3093 = vmatpush.msrb.mxu1 %v2831_v13  ;;  %3133 = vmatpush.msrb.mxu3 %v2832_v21  ;;  %v6095_v30 = vpop.eup %6094  ;;  %v2760_v13 = vld [vmem:[#allocation7 + $0x5b8] sm:$0xff] }
 0x367   :  { %v2570_v25 = vmul.f32 %v6095_v30, %v2528_v48  ;;  %v2693_v30 = vld [vmem:[#allocation7 + $0x3a0] sm:$0xff]  ;;  %v2686_v48 = vld [vmem:[#allocation7 + $0x368] sm:$0xff] }
 0x368   :  { %6096 = vrcp.f32 %v2553_v61  ;;  %3094 = vmatpush.msrb.mxu1 %v2823_v54  ;;  %3134 = vmatpush.msrb.mxu3 %v2824_v52  ;;  %v2565_v29 = vand.u32 2147483648, %v2553_v61  ;;  %v2563_v39 = vand.u32 2147483647, %v2553_v61  ;;  %vm2559_vm3 = vweird.f32 %v2553_v61  ;;  %v2701_v52 = vld [vmem:[#allocation7 + $0x3e0] sm:$0xff] }
 0x369   :  { %v7000_v14 = vadd.f32 %v2570_v25, %v2569_v59  ;;  %v2678_v25 = vld [vmem:[#allocation7 + $0x328] sm:$0xff]  ;;  %v2719_v59 = vld [vmem:[#allocation7 + $0x470] sm:$0xff] }
 0x36a   :  { %3095 = vmatpush.msrb.mxu1 %v2815_v7  ;;  %3135 = vmatpush.msrb.mxu3 %v2816_v32  ;;  %v2566_v21 = vor.u32 1.1754944e-38, %v2565_v29  ;;  %vm2564_vm5 = vcmp.eq.f32.partialorder %v2563_v39, 8.507059e+37  ;;  %v2736_v7 = vld [vmem:[#allocation7 + $0x4f8] sm:$0xff]  ;;  %v2685_v32 = vld [vmem:[#allocation7 + $0x360] sm:$0xff] }
 0x36b   :  { %6098 = vtanh.f32 %v7000_v14  ;;  %v2637_v29 = vld [vmem:[#allocation7 + $0x1e0] sm:$0xff] }
 0x36c   :  { %3096 = vmatpush.msrb.mxu1 %v2807_v35  ;;  %3136 = vmatpush.msrb.mxu3 %v2808_v1  ;;  %v2728_v35 = vld [vmem:[#allocation7 + $0x4b8] sm:$0xff]  ;;  %v2677_v1 = vld [vmem:[#allocation7 + $0x320] sm:$0xff] }
 0x36d   :  { %v2629_v39 = vld [vmem:[#allocation7 + $0x1a0] sm:$0xff] }
 0x36e   :  { %v6097_v44 = vpop.eup %6096  ;;  %3097 = vmatpush.msrb.mxu1 %v2799_v43  ;;  %3137 = vmatpush.msrb.mxu3 %v2800_v58  ;;  %v2669_v43 = vld [vmem:[#allocation7 + $0x2e0] sm:$0xff]  ;;  %v2670_v58 = vld [vmem:[#allocation7 + $0x2e8] sm:$0xff] }
 0x36f   :  { %v2555_v17 = vmul.f32 %v6097_v44, %v2553_v61  ;;  %vm2560_vm2 = vweird.f32 %v6097_v44  ;;  %v2744_v61 = vld [vmem:[#allocation7 + $0x538] sm:$0xff] }
 0x370   :  { %3098 = vmatpush.msrb.mxu1 %v2791_v10  ;;  %3138 = vmatpush.msrb.mxu3 %v2792_v4  ;;  %vm2561_vm4 = vmor %vm2559_vm3, %vm2560_vm2  ;;  %v2720_v10 = vld [vmem:[#allocation7 + $0x478] sm:$0xff]  ;;  %v2661_v4 = vld [vmem:[#allocation7 + $0x2a0] sm:$0xff] }
 0x371   :  { %v2556_v3 = vsub.f32 1.0, %v2555_v17  ;;  %v6099_v38 = vpop.eup %6098  ;;  %v2711_v17 = vld [vmem:[#allocation7 + $0x430] sm:$0xff] }
 0x372   :  { %3099 = vmatpush.msrb.mxu1 %v2783_v60  ;;  %3139 = vmatpush.msrb.mxu3 %v2784_v31  ;;  %v2712_v60 = vld [vmem:[#allocation7 + $0x438] sm:$0xff]  ;;  %v2653_v31 = vld [vmem:[#allocation7 + $0x260] sm:$0xff] }
 0x373   :  { %v2557_v46 = vmul.f32 %v6097_v44, %v2556_v3  ;;  %v2654_v3 = vld [vmem:[#allocation7 + $0x268] sm:$0xff] }
 0x374   :  { %3100 = vmatpush.msrb.mxu1 %v2775_v37  ;;  %3140 = vmatpush.msrb.mxu3 %v2776_v0  ;;  %v2645_v37 = vld [vmem:[#allocation7 + $0x220] sm:$0xff]  ;;  %v2646_v0 = vld [vmem:[#allocation7 + $0x228] sm:$0xff] }
 0x375   :  { %v2558_v40 = vadd.f32 %v6097_v44, %v2557_v46  ;;  %v2638_v46 = vld [vmem:[#allocation7 + $0x1e8] sm:$0xff] }
 0x376   :  { %3101 = vmatpush.msrb.mxu1 %v2767_v62  ;;  %3141 = vmatpush.msrb.mxu3 %v2768_v12  ;;  %v2630_v62 = vld [vmem:[#allocation7 + $0x1a8] sm:$0xff]  ;;  %v2621_v12 = vld [vmem:[#allocation7 + $0x160] sm:$0xff] }
 0x377   :  { %v2562_v11 = vsel %vm2561_vm4, %v6097_v44, %v2558_v40  ;;  %v2662_v44 = vld [vmem:[#allocation7 + $0x2a8] sm:$0xff] }
 0x378   :  { %v2567_v53 = vsel %vm2564_vm5, %v2566_v21, %v2562_v11  ;;  %3102 = vmatpush.msrb.mxu1 %v2759_v27  ;;  %3142 = vmatpush.msrb.mxu3 %v2760_v13  ;;  %v2622_v40 = vld [vmem:[#allocation7 + $0x168] sm:$0xff]  ;;  %v2613_v27 = vld [vmem:[#allocation7 + $0x120] sm:$0xff] }
 0x379   :  { %v7003_v54 = vmul.f32 %v6099_v38, %v2567_v53  ;;  %v2614_v13 = vld [vmem:[#allocation7 + $0x128] sm:$0xff]  ;;  %v2597_v11 = vld [vmem:[#allocation7 + $0xa0] sm:$0xff] }
 0x37a   :  { %3103 = vmatpush.msrb.mxu1 %v2751_v8  ;;  %3143 = vmatpush.msrb.mxu3 %v2752_v23  ;;  %v2606_v21 = vld [vmem:[#allocation7 + $0xe8] sm:$0xff]  ;;  %v2589_v23 = vld [vmem:[#allocation7 + $0x60] sm:$0xff] }
 0x37b   :  { %2849 = vmatmul.f32.vlgmr.msrb.gmra.mxu0 %v7003_v54  ;;  %2889 = vmatmul.f32.vlgmr.msra.gmra.mxu2 %v7003_v54  ;;  %v2598_v8 = vld [vmem:[#allocation7 + $0xa8] sm:$0xff]  ;;  %v2581_v53 = vld [vmem:[#allocation7 + $0x20] sm:$0xff] }
 0x37c   :  { %2993 = vmatpush.msrb.mxu0 %v2701_v52  ;;  %3033 = vmatpush.msra.mxu2 %v2702_v22  ;;  %v2590_v38 = vld [vmem:[#allocation7 + $0x68] sm:$0xff]  ;;  %v2703_v22 = vld [vmem:[#allocation7 + $0x3f0] sm:$0xff] }
 0x37d   :  { %3104 = vmatpush.msrb.mxu1 %v2743_v18  ;;  %3144 = vmatpush.msrb.mxu3 %v2744_v61  ;;  %v2582_v52 = vld [vmem:[#allocation7 + $0x28] sm:$0xff]  ;;  %v2704_v18 = vld [vmem:[#allocation7 + $0x3f8] sm:$0xff]  ;;  %v2695_v61 = vld [vmem:[#allocation7 + $0x3b0] sm:$0xff] }
 0x37e   :  { %2994 = vmatpush.msrb.mxu0 %v2693_v30  ;;  %3034 = vmatpush.msra.mxu2 %v2694_v5  ;;  %v2696_v30 = vld [vmem:[#allocation7 + $0x3b8] sm:$0xff]  ;;  %v2687_v5 = vld [vmem:[#allocation7 + $0x370] sm:$0xff] }
 0x37f   :  { %3105 = vmatpush.msrb.mxu1 %v2735_v26  ;;  %3145 = vmatpush.msrb.mxu3 %v2736_v7  ;;  %v2688_v26 = vld [vmem:[#allocation7 + $0x378] sm:$0xff]  ;;  %v2679_v7 = vld [vmem:[#allocation7 + $0x330] sm:$0xff] }
 0x380   :  { %2995 = vmatpush.msrb.mxu0 %v2685_v32  ;;  %3035 = vmatpush.msra.mxu2 %v2686_v48  ;;  %v2680_v32 = vld [vmem:[#allocation7 + $0x338] sm:$0xff]  ;;  %v2671_v48 = vld [vmem:[#allocation7 + $0x2f0] sm:$0xff] }
 0x381   :  { %3106 = vmatpush.msrb.mxu1 %v2727_v51  ;;  %3146 = vmatpush.msrb.mxu3 %v2728_v35  ;;  %v2672_v51 = vld [vmem:[#allocation7 + $0x2f8] sm:$0xff]  ;;  %v2663_v35 = vld [vmem:[#allocation7 + $0x2b0] sm:$0xff] }
 0x382   :  { %2996 = vmatpush.msrb.mxu0 %v2677_v1  ;;  %3036 = vmatpush.msra.mxu2 %v2678_v25  ;;  %v2664_v1 = vld [vmem:[#allocation7 + $0x2b8] sm:$0xff]  ;;  %v2655_v25 = vld [vmem:[#allocation7 + $0x270] sm:$0xff] }
 0x383   :  { %2929 = vmatmul.f32.vlgmr.msra.gmra.mxu0 %v7003_v54  ;;  %2969 = vmatmul.f32.vlgmr.msrb.gmra.mxu2 %v7003_v54 }
 0x384   :  { %2997 = vmatpush.msrb.mxu0 %v2669_v43  ;;  %3037 = vmatpush.msra.mxu2 %v2670_v58  ;;  %v2656_v43 = vld [vmem:[#allocation7 + $0x278] sm:$0xff]  ;;  %v2647_v58 = vld [vmem:[#allocation7 + $0x230] sm:$0xff] }
 0x385   :  { %3107 = vmatpush.msrb.mxu1 %v2719_v59  ;;  %3147 = vmatpush.msrb.mxu3 %v2720_v10  ;;  %v2648_v59 = vld [vmem:[#allocation7 + $0x238] sm:$0xff]  ;;  %v2639_v10 = vld [vmem:[#allocation7 + $0x1f0] sm:$0xff] }
 0x386   :  { %2998 = vmatpush.msrb.mxu0 %v2661_v4  ;;  %3038 = vmatpush.msra.mxu2 %v2662_v44  ;;  %v2640_v4 = vld [vmem:[#allocation7 + $0x1f8] sm:$0xff]  ;;  %v2631_v44 = vld [vmem:[#allocation7 + $0x1b0] sm:$0xff] }
 0x387   :  { %3108 = vmatpush.msrb.mxu1 %v2711_v17  ;;  %3148 = vmatpush.msrb.mxu3 %v2712_v60  ;;  %v2632_v17 = vld [vmem:[#allocation7 + $0x1b8] sm:$0xff]  ;;  %v2623_v60 = vld [vmem:[#allocation7 + $0x170] sm:$0xff] }
 0x388   :  { %3109 = vmatmul.f32.vlgmr.msrb.gmra.mxu1 %v6945_v20  ;;  %3149 = vmatmul.f32.vlgmr.msrb.gmra.mxu3 %v6945_v20  ;;  %v2605_v20 = vld [vmem:[#allocation7 + $0xe0] sm:$0xff] }
 0x389   :  { %2999 = vmatpush.msrb.mxu0 %v2653_v31  ;;  %3039 = vmatpush.msra.mxu2 %v2654_v3  ;;  %v2624_v31 = vld [vmem:[#allocation7 + $0x178] sm:$0xff]  ;;  %v2615_v3 = vld [vmem:[#allocation7 + $0x130] sm:$0xff] }
 0x38b   :  { %3000 = vmatpush.msrb.mxu0 %v2645_v37  ;;  %3040 = vmatpush.msra.mxu2 %v2646_v0  ;;  %v2616_v37 = vld [vmem:[#allocation7 + $0x138] sm:$0xff]  ;;  %v2607_v0 = vld [vmem:[#allocation7 + $0xf0] sm:$0xff] }
 0x38d   :  { %3001 = vmatpush.msrb.mxu0 %v2637_v29  ;;  %3041 = vmatpush.msra.mxu2 %v2638_v46  ;;  %v2608_v29 = vld [vmem:[#allocation7 + $0xf8] sm:$0xff]  ;;  %v2599_v46 = vld [vmem:[#allocation7 + $0xb0] sm:$0xff] }
 0x38f   :  { %3002 = vmatpush.msrb.mxu0 %v2629_v39  ;;  %3042 = vmatpush.msra.mxu2 %v2630_v62  ;;  %v2600_v39 = vld [vmem:[#allocation7 + $0xb8] sm:$0xff]  ;;  %v2591_v62 = vld [vmem:[#allocation7 + $0x70] sm:$0xff] }
 0x391   :  { %3003 = vmatpush.msrb.mxu0 %v2621_v12  ;;  %3043 = vmatpush.msra.mxu2 %v2622_v40  ;;  %v2592_v12 = vld [vmem:[#allocation7 + $0x78] sm:$0xff]  ;;  %v2583_v40 = vld [vmem:[#allocation7 + $0x30] sm:$0xff] }
 0x393   :  { %3004 = vmatpush.msrb.mxu0 %v2613_v27  ;;  %3044 = vmatpush.msra.mxu2 %v2614_v13  ;;  %v2584_v27 = vld [vmem:[#allocation7 + $0x38] sm:$0xff]  ;;  %v3546_v13 = vld [vmem:[#allocation7 + $0x7c0] sm:$0xff] }
 0x394   :  { %3574 = vmatpush.msra.mxu1 %v3546_v13 }
 0x395   :  { %3005 = vmatpush.msrb.mxu0 %v2605_v20  ;;  %3045 = vmatpush.msra.mxu2 %v2606_v21  ;;  %v3547_v20 = vld [vmem:[#allocation7 + $0x7c8] sm:$0xff]  ;;  %v3538_v21 = vld [vmem:[#allocation7 + $0x780] sm:$0xff] }
 0x396   :  { %3614 = vmatpush.msra.mxu3 %v3547_v20  ;;  %3575 = vmatpush.msra.mxu1 %v3538_v21 }
 0x397   :  { %3006 = vmatpush.msrb.mxu0 %v2597_v11  ;;  %3046 = vmatpush.msra.mxu2 %v2598_v8  ;;  %v3539_v11 = vld [vmem:[#allocation7 + $0x788] sm:$0xff]  ;;  %v3530_v8 = vld [vmem:[#allocation7 + $0x740] sm:$0xff] }
 0x398   :  { %3615 = vmatpush.msra.mxu3 %v3539_v11  ;;  %3576 = vmatpush.msra.mxu1 %v3530_v8  ;;  %v3508_v11 = vld [vmem:[#allocation7 + $0x690] sm:$0xff]  ;;  %v3509_v8 = vld [vmem:[#allocation7 + $0x698] sm:$0xff] }
 0x399   :  { %3007 = vmatpush.msrb.mxu0 %v2589_v23  ;;  %3047 = vmatpush.msra.mxu2 %v2590_v38  ;;  %v3531_v23 = vld [vmem:[#allocation7 + $0x748] sm:$0xff]  ;;  %v3522_v38 = vld [vmem:[#allocation7 + $0x700] sm:$0xff] }
 0x39a   :  { %3616 = vmatpush.msra.mxu3 %v3531_v23  ;;  %3577 = vmatpush.msra.mxu1 %v3522_v38  ;;  %v3500_v38 = vld [vmem:[#allocation7 + $0x650] sm:$0xff] }
 0x39b   :  { %3008 = vmatpush.msrb.mxu0 %v2581_v53  ;;  %3048 = vmatpush.msra.mxu2 %v2582_v52  ;;  %v3523_v53 = vld [vmem:[#allocation7 + $0x708] sm:$0xff]  ;;  %v3514_v52 = vld [vmem:[#allocation7 + $0x6c0] sm:$0xff] }
 0x39c   :  { %3009 = vmatmul.f32.vlgmr.msrb.gmra.mxu0 %v7003_v54  ;;  %3049 = vmatmul.f32.vlgmr.msra.gmra.mxu2 %v7003_v54 }
 0x39d   :  { %3073 = vmatpush.msra.mxu0 %v2703_v22  ;;  %3113 = vmatpush.msrb.mxu2 %v2704_v18  ;;  %v3515_v22 = vld [vmem:[#allocation7 + $0x6c8] sm:$0xff] }
 0x39e   :  { %3617 = vmatpush.msra.mxu3 %v3523_v53  ;;  %3578 = vmatpush.msra.mxu1 %v3514_v52  ;;  %v3507_v18 = vld [vmem:[#allocation7 + $0x688] sm:$0xff]  ;;  %v3501_v53 = vld [vmem:[#allocation7 + $0x658] sm:$0xff] }
 0x39f   :  { %3074 = vmatpush.msra.mxu0 %v2695_v61  ;;  %3114 = vmatpush.msrb.mxu2 %v2696_v30  ;;  %v3498_v61 = vld [vmem:[#allocation7 + $0x640] sm:$0xff]  ;;  %v3499_v30 = vld [vmem:[#allocation7 + $0x648] sm:$0xff] }
 0x3a0   :  { %3618 = vmatpush.msra.mxu3 %v3515_v22 }
 0x3a1   :  { %3075 = vmatpush.msra.mxu0 %v2687_v5  ;;  %3115 = vmatpush.msrb.mxu2 %v2688_v26  ;;  %v3490_v5 = vld [vmem:[#allocation7 + $0x600] sm:$0xff]  ;;  %v3491_v26 = vld [vmem:[#allocation7 + $0x608] sm:$0xff] }
 0x3a2   :  { %3619 = vmatpush.msra.mxu3 %v3507_v18  ;;  %v3493_v18 = vld [vmem:[#allocation7 + $0x618] sm:$0xff] }
 0x3a3   :  { %3076 = vmatpush.msra.mxu0 %v2679_v7  ;;  %3116 = vmatpush.msrb.mxu2 %v2680_v32  ;;  %v3482_v7 = vld [vmem:[#allocation7 + $0x5c0] sm:$0xff]  ;;  %v3483_v32 = vld [vmem:[#allocation7 + $0x5c8] sm:$0xff] }
 0x3a4   :  { %3620 = vmatpush.msra.mxu3 %v3499_v30 }
 0x3a5   :  { %3077 = vmatpush.msra.mxu0 %v2671_v48  ;;  %3117 = vmatpush.msrb.mxu2 %v2672_v51  ;;  %v3474_v48 = vld [vmem:[#allocation7 + $0x580] sm:$0xff]  ;;  %v3475_v51 = vld [vmem:[#allocation7 + $0x588] sm:$0xff] }
 0x3a6   :  { %3621 = vmatpush.msra.mxu3 %v3491_v26  ;;  %v3485_v26 = vld [vmem:[#allocation7 + $0x5d8] sm:$0xff] }
 0x3a7   :  { %3078 = vmatpush.msra.mxu0 %v2663_v35  ;;  %3118 = vmatpush.msrb.mxu2 %v2664_v1  ;;  %v3466_v35 = vld [vmem:[#allocation7 + $0x540] sm:$0xff]  ;;  %v3467_v1 = vld [vmem:[#allocation7 + $0x548] sm:$0xff] }
 0x3a8   :  { %3622 = vmatpush.msra.mxu3 %v3483_v32  ;;  %v3476_v32 = vld [vmem:[#allocation7 + $0x590] sm:$0xff] }
 0x3a9   :  { %3079 = vmatpush.msra.mxu0 %v2655_v25  ;;  %3119 = vmatpush.msrb.mxu2 %v2656_v43  ;;  %v3458_v25 = vld [vmem:[#allocation7 + $0x500] sm:$0xff]  ;;  %v3459_v43 = vld [vmem:[#allocation7 + $0x508] sm:$0xff] }
 0x3aa   :  { %3623 = vmatpush.msra.mxu3 %v3475_v51 }
 0x3ab   :  { %3080 = vmatpush.msra.mxu0 %v2647_v58  ;;  %3120 = vmatpush.msrb.mxu2 %v2648_v59  ;;  %v3450_v58 = vld [vmem:[#allocation7 + $0x4c0] sm:$0xff]  ;;  %v3451_v59 = vld [vmem:[#allocation7 + $0x4c8] sm:$0xff] }
 0x3ac   :  { %3624 = vmatpush.msra.mxu3 %v3467_v1  ;;  %v3419_v1 = vld [vmem:[#allocation7 + $0x3c8] sm:$0xff] }
 0x3ad   :  { %3081 = vmatpush.msra.mxu0 %v2639_v10  ;;  %3121 = vmatpush.msrb.mxu2 %v2640_v4  ;;  %v3442_v10 = vld [vmem:[#allocation7 + $0x480] sm:$0xff]  ;;  %v3443_v4 = vld [vmem:[#allocation7 + $0x488] sm:$0xff] }
 0x3ae   :  { %3625 = vmatpush.msra.mxu3 %v3459_v43  ;;  %v3469_v43 = vld [vmem:[#allocation7 + $0x558] sm:$0xff] }
 0x3af   :  { %3082 = vmatpush.msra.mxu0 %v2631_v44  ;;  %3122 = vmatpush.msrb.mxu2 %v2632_v17  ;;  %v3434_v44 = vld [vmem:[#allocation7 + $0x440] sm:$0xff]  ;;  %v3435_v17 = vld [vmem:[#allocation7 + $0x448] sm:$0xff] }
 0x3b0   :  { %3626 = vmatpush.msra.mxu3 %v3451_v59  ;;  %v3410_v59 = vld [vmem:[#allocation7 + $0x380] sm:$0xff] }
 0x3b1   :  { %3083 = vmatpush.msra.mxu0 %v2623_v60  ;;  %3123 = vmatpush.msrb.mxu2 %v2624_v31  ;;  %v3426_v60 = vld [vmem:[#allocation7 + $0x400] sm:$0xff]  ;;  %v3427_v31 = vld [vmem:[#allocation7 + $0x408] sm:$0xff] }
 0x3b2   :  { %3627 = vmatpush.msra.mxu3 %v3443_v4  ;;  %v3460_v4 = vld [vmem:[#allocation7 + $0x510] sm:$0xff] }
 0x3b3   :  { %3084 = vmatpush.msra.mxu0 %v2615_v3  ;;  %3124 = vmatpush.msrb.mxu2 %v2616_v37  ;;  %v3548_v3 = vld [vmem:[#allocation7 + $0x7d0] sm:$0xff]  ;;  %v3549_v37 = vld [vmem:[#allocation7 + $0x7d8] sm:$0xff] }
 0x3b4   :  { %3628 = vmatpush.msra.mxu3 %v3435_v17 }
 0x3b5   :  { %3085 = vmatpush.msra.mxu0 %v2607_v0  ;;  %3125 = vmatpush.msrb.mxu2 %v2608_v29  ;;  %v3540_v0 = vld [vmem:[#allocation7 + $0x790] sm:$0xff]  ;;  %v3541_v29 = vld [vmem:[#allocation7 + $0x798] sm:$0xff] }
 0x3b6   :  { %3629 = vmatpush.msra.mxu3 %v3427_v31  ;;  %v3461_v31 = vld [vmem:[#allocation7 + $0x518] sm:$0xff] }
 0x3b7   :  { %3086 = vmatpush.msra.mxu0 %v2599_v46  ;;  %3126 = vmatpush.msrb.mxu2 %v2600_v39  ;;  %v3532_v46 = vld [vmem:[#allocation7 + $0x750] sm:$0xff]  ;;  %v3533_v39 = vld [vmem:[#allocation7 + $0x758] sm:$0xff] }
 0x3b8   :  { %3694 = vmatpush.msrb.mxu3 %v3549_v37  ;;  %v3402_v37 = vld [vmem:[#allocation7 + $0x340] sm:$0xff] }
 0x3b9   :  { %3087 = vmatpush.msra.mxu0 %v2591_v62  ;;  %3127 = vmatpush.msrb.mxu2 %v2592_v12  ;;  %v3524_v62 = vld [vmem:[#allocation7 + $0x710] sm:$0xff]  ;;  %v3525_v12 = vld [vmem:[#allocation7 + $0x718] sm:$0xff] }
 0x3ba   :  { %3695 = vmatpush.msrb.mxu3 %v3541_v29  ;;  %v3452_v29 = vld [vmem:[#allocation7 + $0x4d0] sm:$0xff] }
 0x3bb   :  { %3088 = vmatpush.msra.mxu0 %v2583_v40  ;;  %3128 = vmatpush.msrb.mxu2 %v2584_v27  ;;  %v3516_v40 = vld [vmem:[#allocation7 + $0x6d0] sm:$0xff]  ;;  %v3517_v27 = vld [vmem:[#allocation7 + $0x6d8] sm:$0xff] }
 0x3bc   :  { %3089 = vmatmul.f32.vlgmr.msra.gmra.mxu0 %v7003_v54  ;;  %3129 = vmatmul.f32.vlgmr.msrb.gmra.mxu2 %v7003_v54  ;;  %v3506_v54 = vld [vmem:[#allocation7 + $0x680] sm:$0xff] }
 0x3bd   :  { %3579 = vmatpush.msra.mxu1 %v3506_v54  ;;  %3696 = vmatpush.msrb.mxu3 %v3533_v39  ;;  %v3492_v54 = vld [vmem:[#allocation7 + $0x610] sm:$0xff] }
 0x3be   :  { %3594 = vmatpush.msra.mxu2 %v3419_v1 }
 0x3bf   :  { %3580 = vmatpush.msra.mxu1 %v3498_v61  ;;  %3697 = vmatpush.msrb.mxu3 %v3525_v12  ;;  %v3395_v12 = vld [vmem:[#allocation7 + $0x308] sm:$0xff] }
 0x3c1   :  { %3581 = vmatpush.msra.mxu1 %v3490_v5  ;;  %3698 = vmatpush.msrb.mxu3 %v3517_v27  ;;  %v3484_v5 = vld [vmem:[#allocation7 + $0x5d0] sm:$0xff]  ;;  %v3445_v27 = vld [vmem:[#allocation7 + $0x498] sm:$0xff] }
 0x3c2   :  { %v2870_v13 = vpop.f32.mrf.mxu1 }
 0x3c3   :  { %3582 = vmatpush.msra.mxu1 %v3482_v7  ;;  %3699 = vmatpush.msrb.mxu3 %v3509_v8  ;;  %v3436_v8 = vld [vmem:[#allocation7 + $0x450] sm:$0xff] }
 0x3c5   :  { %3583 = vmatpush.msra.mxu1 %v3474_v48  ;;  %3700 = vmatpush.msrb.mxu3 %v3501_v53  ;;  %v3477_v48 = vld [vmem:[#allocation7 + $0x598] sm:$0xff] }
 0x3c7   :  { %3584 = vmatpush.msra.mxu1 %v3466_v35  ;;  %3701 = vmatpush.msrb.mxu3 %v3493_v18  ;;  %v3418_v35 = vld [vmem:[#allocation7 + $0x3c0] sm:$0xff] }
 0x3c8   :  { %v2910_v52 = vpop.f32.mrf.mxu3  ;;  %3554 = vmatpush.msrb.mxu0 %v3418_v35  ;;  %v3363_v35 = vld [vmem:[#allocation7 + $0x208] sm:$0xff] }
 0x3c9   :  { %3585 = vmatpush.msra.mxu1 %v3458_v25  ;;  %3702 = vmatpush.msrb.mxu3 %v3485_v26  ;;  %v3468_v25 = vld [vmem:[#allocation7 + $0x550] sm:$0xff]  ;;  %v3370_v26 = vld [vmem:[#allocation7 + $0x240] sm:$0xff] }
 0x3ca   :  { %3555 = vmatpush.msrb.mxu0 %v3410_v59 }
 0x3cb   :  { %3586 = vmatpush.msra.mxu1 %v3450_v58  ;;  %3703 = vmatpush.msrb.mxu3 %v3477_v48 }
 0x3cc   :  { %3556 = vmatpush.msrb.mxu0 %v3402_v37 }
 0x3cd   :  { %3587 = vmatpush.msra.mxu1 %v3442_v10  ;;  %3704 = vmatpush.msrb.mxu3 %v3469_v43  ;;  %v3411_v10 = vld [vmem:[#allocation7 + $0x388] sm:$0xff]  ;;  %v3354_v43 = vld [vmem:[#allocation7 + $0x1c0] sm:$0xff] }
 0x3ce   :  { %3595 = vmatpush.msra.mxu2 %v3411_v10 }
 0x3cf   :  { %3588 = vmatpush.msra.mxu1 %v3434_v44  ;;  %3705 = vmatpush.msrb.mxu3 %v3461_v31  ;;  %v3346_v31 = vld [vmem:[#allocation7 + $0x180] sm:$0xff] }
 0x3d0   :  { %v2990_v44 = vpop.f32.mrf.mxu3 }
 0x3d1   :  { %3589 = vmatpush.msra.mxu1 %v3426_v60 }
 0x3d3   :  { %3654 = vmatpush.msrb.mxu1 %v3548_v3 }
 0x3d5   :  { %3655 = vmatpush.msrb.mxu1 %v3540_v0  ;;  %v3403_v0 = vld [vmem:[#allocation7 + $0x348] sm:$0xff] }
 0x3d6   :  { %3596 = vmatpush.msra.mxu2 %v3403_v0 }
 0x3d7   :  { %3656 = vmatpush.msrb.mxu1 %v3532_v46  ;;  %v3453_v46 = vld [vmem:[#allocation7 + $0x4d8] sm:$0xff] }
 0x3d8   :  { %3706 = vmatpush.msrb.mxu3 %v3453_v46  ;;  %3597 = vmatpush.msra.mxu2 %v3395_v12  ;;  %v3338_v46 = vld [vmem:[#allocation7 + $0x140] sm:$0xff]  ;;  %v3412_v12 = vld [vmem:[#allocation7 + $0x390] sm:$0xff] }
 0x3d9   :  { %3657 = vmatpush.msrb.mxu1 %v3524_v62  ;;  %v3394_v62 = vld [vmem:[#allocation7 + $0x300] sm:$0xff] }
 0x3da   :  { %3557 = vmatpush.msrb.mxu0 %v3394_v62  ;;  %3707 = vmatpush.msrb.mxu3 %v3445_v27 }
 0x3db   :  { %3658 = vmatpush.msrb.mxu1 %v3516_v40  ;;  %v3444_v40 = vld [vmem:[#allocation7 + $0x490] sm:$0xff] }
 0x3dd   :  { %3659 = vmatpush.msrb.mxu1 %v3508_v11  ;;  %v3387_v11 = vld [vmem:[#allocation7 + $0x2c8] sm:$0xff] }
 0x3de   :  { %3598 = vmatpush.msra.mxu2 %v3387_v11  ;;  %v3331_v11 = vld [vmem:[#allocation7 + $0x108] sm:$0xff] }
 0x3df   :  { %3660 = vmatpush.msrb.mxu1 %v3500_v38  ;;  %v3437_v38 = vld [vmem:[#allocation7 + $0x458] sm:$0xff] }
 0x3e0   :  { %3708 = vmatpush.msrb.mxu3 %v3437_v38 }
 0x3e1   :  { %3661 = vmatpush.msrb.mxu1 %v3492_v54  ;;  %v3428_v54 = vld [vmem:[#allocation7 + $0x410] sm:$0xff] }
 0x3e3   :  { %3662 = vmatpush.msrb.mxu1 %v3484_v5 }
 0x3e5   :  { %3663 = vmatpush.msrb.mxu1 %v3476_v32 }
 0x3e7   :  { %3664 = vmatpush.msrb.mxu1 %v3468_v25 }
 0x3e9   :  { %3665 = vmatpush.msrb.mxu1 %v3460_v4 }
 0x3eb   :  { %3666 = vmatpush.msrb.mxu1 %v3452_v29 }
 0x3ed   :  { %3667 = vmatpush.msrb.mxu1 %v3444_v40 }
 0x3ef   :  { %3668 = vmatpush.msrb.mxu1 %v3436_v8 }
 0x3f1   :  { %3669 = vmatpush.msrb.mxu1 %v3428_v54 }
 0x3f8   :  { %v2850_v20 = vpop.f32.mrf.mxu0 }
 0x3f9   :  { %v2871_v21 = vadd.f32 %v2870_v13, %v2850_v20 }
 0x3fb   :  { %v3153_v23 = vadd.f32 %v2871_v21, %v6629_v41  ;;  %v3386_v21 = vld [vmem:[#allocation7 + $0x2c0] sm:$0xff] }
 0x3fc   :  { %3558 = vmatpush.msrb.mxu0 %v3386_v21  ;;  %v3330_v21 = vld [vmem:[#allocation7 + $0x100] sm:$0xff] }
 0x3fd   :  { %v5940_v22 = vmul.f32 -1.442695, %v3153_v23 }
 0x3fe   :  { %v2890_v61 = vpop.f32.mrf.mxu2 }
 0x3ff   :  { %6100 = vpow2.f32 %v5940_v22  ;;  %v2911_v30 = vadd.f32 %v2910_v52, %v2890_v61  ;;  %v3378_v52 = vld [vmem:[#allocation7 + $0x280] sm:$0xff]  ;;  %v3379_v22 = vld [vmem:[#allocation7 + $0x288] sm:$0xff]  ;;  %v3429_v61 = vld [vmem:[#allocation7 + $0x418] sm:$0xff] }
 0x400   :  { %v2930_v53 = vpop.f32.mrf.mxu0  ;;  %3559 = vmatpush.msrb.mxu0 %v3378_v52  ;;  %3599 = vmatpush.msra.mxu2 %v3379_v22  ;;  %v3322_v52 = vld [vmem:[#allocation7 + $0xc0] sm:$0xff]  ;;  %v3323_v22 = vld [vmem:[#allocation7 + $0xc8] sm:$0xff] }
 0x401   :  { %v3154_v7 = vadd.f32 %v2911_v30, %v6633_v6  ;;  %v2950_v30 = vpop.f32.mrf.mxu1  ;;  %3709 = vmatpush.msrb.mxu3 %v3429_v61 }
 0x402   :  { %v2951_v32 = vadd.f32 %v2950_v30, %v2930_v53  ;;  %3560 = vmatpush.msrb.mxu0 %v3370_v26  ;;  %v3314_v26 = vld [vmem:[#allocation7 + $0x80] sm:$0xff] }
 0x403   :  { %v5941_v51 = vmul.f32 -1.442695, %v3154_v7  ;;  %v3371_v7 = vld [vmem:[#allocation7 + $0x248] sm:$0xff] }
 0x404   :  { %3600 = vmatpush.msra.mxu2 %v3371_v7  ;;  %v3155_v10 = vadd.f32 %v2951_v32, %v6651_v36  ;;  %v3315_v7 = vld [vmem:[#allocation7 + $0x88] sm:$0xff] }
 0x405   :  { %v6101_v58 = vpop.eup %6100  ;;  %6102 = vpow2.f32 %v5941_v51  ;;  %v3362_v51 = vld [vmem:[#allocation7 + $0x200] sm:$0xff] }
 0x406   :  { %v7017_v17 = vadd.f32 1.0, %v6101_v58  ;;  %v2970_v60 = vpop.f32.mrf.mxu2  ;;  %3561 = vmatpush.msrb.mxu0 %v3362_v51  ;;  %3601 = vmatpush.msra.mxu2 %v3363_v35  ;;  %v3355_v58 = vld [vmem:[#allocation7 + $0x1c8] sm:$0xff]  ;;  %v3070_v51 = vpop.f32.mrf.mxu3 }
 0x407   :  { %v2991_v3 = vadd.f32 %v2990_v44, %v2970_v60 }
 0x408   :  { %6104 = vrcp.f32 %v7017_v17  ;;  %3562 = vmatpush.msrb.mxu0 %v3354_v43  ;;  %3602 = vmatpush.msra.mxu2 %v3355_v58  ;;  %v3172_v37 = vand.u32 2147483648, %v7017_v17  ;;  %vm3166_vm7 = vweird.f32 %v7017_v17  ;;  %v3170_v29 = vand.u32 2147483647, %v7017_v17  ;;  %v3306_v58 = vld [vmem:[#allocation7 + $0x40] sm:$0xff] }
 0x409   :  { %v3156_v39 = vadd.f32 %v2991_v3, %v6637_v34  ;;  %v3347_v3 = vld [vmem:[#allocation7 + $0x188] sm:$0xff]  ;;  %v3030_v40 = vpop.f32.mrf.mxu1 }
 0x40a   :  { %3563 = vmatpush.msrb.mxu0 %v3346_v31  ;;  %3603 = vmatpush.msra.mxu2 %v3347_v3  ;;  %v3173_v8 = vor.u32 1.1754944e-38, %v3172_v37  ;;  %vm3171_vm11 = vcmp.eq.f32.partialorder %v3170_v29, 8.507059e+37  ;;  %v3298_v31 = vld [vmem:[#allocation7] sm:$0xff]  ;;  %v3299_v3 = vld [vmem:[#allocation7 + $0x8] sm:$0xff] }
 0x40b   :  { %v6103_v13 = vpop.eup %6102  ;;  %v5942_v20 = vmul.f32 -1.442695, %v3156_v39  ;;  %v3339_v39 = vld [vmem:[#allocation7 + $0x148] sm:$0xff] }
 0x40c   :  { %v7021_v23 = vadd.f32 1.0, %v6103_v13  ;;  %3564 = vmatpush.msrb.mxu0 %v3338_v46  ;;  %3604 = vmatpush.msra.mxu2 %v3339_v39 }
 0x40d   :  { %6106 = vpow2.f32 %v5942_v20 }
 0x40e   :  { %v7023_v18 = vpop.eup %6104  ;;  %6108 = vrcp.f32 %v7021_v23  ;;  %v3191_v62 = vand.u32 2147483648, %v7021_v23  ;;  %3565 = vmatpush.msrb.mxu0 %v3330_v21  ;;  %3605 = vmatpush.msra.mxu2 %v3331_v11  ;;  %vm3185_vm10 = vweird.f32 %v7021_v23  ;;  %v3397_v21 = vld [vmem:[#allocation7 + $0x318] sm:$0xff] }
 0x40f   :  { %v3162_v5 = vmul.f32 %v7023_v18, %v7017_v17  ;;  %vm3167_vm6 = vweird.f32 %v7023_v18  ;;  %v3189_v17 = vand.u32 2147483647, %v7021_v23 }
 0x410   :  { %vm7040_vm8 = vmor %vm3166_vm7, %vm3167_vm6  ;;  %3566 = vmatpush.msrb.mxu0 %v3322_v52  ;;  %3606 = vmatpush.msra.mxu2 %v3323_v22  ;;  %v3551_v52 = vld [vmem:[#allocation7 + $0x7e8] sm:$0xff]  ;;  %v3388_v22 = vld [vmem:[#allocation7 + $0x2d0] sm:$0xff] }
 0x411   :  { %v3163_v48 = vsub.f32 1.0, %v3162_v5  ;;  %vm3190_vm13 = vcmp.eq.f32.partialorder %v3189_v17, 8.507059e+37  ;;  %v3405_v17 = vld [vmem:[#allocation7 + $0x358] sm:$0xff] }
 0x412   :  { %3567 = vmatpush.msrb.mxu0 %v3314_v26  ;;  %3607 = vmatpush.msra.mxu2 %v3315_v7  ;;  %v3381_v26 = vld [vmem:[#allocation7 + $0x298] sm:$0xff] }
 0x413   :  { %v6107_v1 = vpop.eup %6106  ;;  %v3164_v25 = vmul.f32 %v7023_v18, %v3163_v48 }
 0x414   :  { %v6109_v59 = vpop.eup %6108  ;;  %v7030_v4 = vadd.f32 1.0, %v6107_v1  ;;  %3568 = vmatpush.msrb.mxu0 %v3306_v58  ;;  %v3364_v58 = vld [vmem:[#allocation7 + $0x210] sm:$0xff] }
 0x415   :  { %v3181_v44 = vmul.f32 %v6109_v59, %v7021_v23  ;;  %v3165_v60 = vadd.f32 %v7023_v18, %v3164_v25  ;;  %vm3186_vm9 = vweird.f32 %v6109_v59 }
 0x416   :  { %6110 = vrcp.f32 %v7030_v4  ;;  %vm3187_vm12 = vmor %vm3185_vm10, %vm3186_vm9  ;;  %3569 = vmatpush.msrb.mxu0 %v3298_v31  ;;  %v3211_v46 = vand.u32 2147483648, %v7030_v4  ;;  %vm3205_vm15 = vweird.f32 %v7030_v4  ;;  %v3209_v39 = vand.u32 2147483647, %v7030_v4  ;;  %v3356_v31 = vld [vmem:[#allocation7 + $0x1d0] sm:$0xff] }
 0x417   :  { %v3182_v0 = vsub.f32 1.0, %v3181_v44  ;;  %6112 = vtanh.f32 %v3155_v10  ;;  %v3169_v13 = vsel %vm7040_vm8, %v7023_v18, %v3165_v60  ;;  %v3192_v18 = vor.u32 1.1754944e-38, %v3191_v62 }
 0x418   :  { %v3174_v61 = vsel %vm3171_vm11, %v3173_v8, %v3169_v13  ;;  %v3404_v13 = vld [vmem:[#allocation7 + $0x350] sm:$0xff]  ;;  %vm3210_vm1 = vcmp.eq.f32.partialorder %v3209_v39, 8.507059e+37 }
 0x419   :  { %v3183_v27 = vmul.f32 %v6109_v59, %v3182_v0  ;;  %v3010_v20 = vpop.f32.mrf.mxu0  ;;  %v3421_v0 = vld [vmem:[#allocation7 + $0x3d8] sm:$0xff]  ;;  %v3340_v39 = vld [vmem:[#allocation7 + $0x150] sm:$0xff] }
 0x41a   :  { %v3031_v38 = vadd.f32 %v3030_v40, %v3010_v20  ;;  %v3413_v40 = vld [vmem:[#allocation7 + $0x398] sm:$0xff]  ;;  %v3212_v20 = vor.u32 1.1754944e-38, %v3211_v46  ;;  %v3503_v46 = vld [vmem:[#allocation7 + $0x668] sm:$0xff] }
 0x41b   :  { %v3184_v53 = vadd.f32 %v6109_v59, %v3183_v27 }
 0x41c   :  { %v7049_v54 = vpop.eup %6110  ;;  %v3228_v48 = vadd.f32 %v3031_v38, %v6617_v24  ;;  %v3550_v38 = vld [vmem:[#allocation7 + $0x7e0] sm:$0xff] }
 0x41d   :  { %v3188_v30 = vsel %vm3187_vm12, %v6109_v59, %v3184_v53  ;;  %v3201_v5 = vmul.f32 %v7049_v54, %v7030_v4  ;;  %v6113_v23 = vpop.eup %6112  ;;  %v3307_v59 = vld [vmem:[#allocation7 + $0x48] sm:$0xff]  ;;  %vm3206_vm14 = vweird.f32 %v7049_v54  ;;  %v3396_v4 = vld [vmem:[#allocation7 + $0x310] sm:$0xff] }
 0x41e   :  { %v3193_v32 = vsel %vm3190_vm13, %v3192_v18, %v3188_v30  ;;  %v3216_v1 = vmul.f32 %v6113_v23, %v3174_v61  ;;  %3608 = vmatpush.msra.mxu2 %v3307_v59  ;;  %v5943_v24 = vmul.f32 -1.442695, %v3228_v48  ;;  %vm7068_vm0 = vmor %vm3205_vm15, %vm3206_vm14  ;;  %v3542_v18 = vld [vmem:[#allocation7 + $0x7a0] sm:$0xff]  ;;  %v3543_v30 = vld [vmem:[#allocation7 + $0x7a8] sm:$0xff] }
 0x41f   :  { %v3215_v35 = vmul.f32 %v3193_v32, %v6926_v56  ;;  %v3202_v25 = vsub.f32 1.0, %v3201_v5  ;;  %v3050_v43 = vpop.f32.mrf.mxu2  ;;  %v3420_v56 = vld [vmem:[#allocation7 + $0x3d0] sm:$0xff]  ;;  %v3534_v23 = vld [vmem:[#allocation7 + $0x760] sm:$0xff]  ;;  %v3535_v32 = vld [vmem:[#allocation7 + $0x768] sm:$0xff] }
 0x420   :  { %v3071_v10 = vadd.f32 %v3070_v51, %v3050_v43  ;;  %3609 = vmatpush.msra.mxu2 %v3299_v3  ;;  %3634 = vmatpush.msra.mxu0 %v3420_v56  ;;  %v3380_v5 = vld [vmem:[#allocation7 + $0x290] sm:$0xff]  ;;  %v3373_v51 = vld [vmem:[#allocation7 + $0x258] sm:$0xff]  ;;  %v3527_v43 = vld [vmem:[#allocation7 + $0x728] sm:$0xff] }
 0x421   :  { %v7056_v44 = vadd.f32 %v3216_v1, %v3215_v35  ;;  %v3203_v60 = vmul.f32 %v7049_v54, %v3202_v25  ;;  %v3372_v48 = vld [vmem:[#allocation7 + $0x250] sm:$0xff]  ;;  %v3526_v1 = vld [vmem:[#allocation7 + $0x720] sm:$0xff]  ;;  %v3365_v59 = vld [vmem:[#allocation7 + $0x218] sm:$0xff] }
 0x422   :  { %v3229_v37 = vadd.f32 %v3071_v10, %v6591_v47  ;;  %3674 = vmatpush.msrb.mxu2 %v3421_v0  ;;  %3635 = vmatpush.msra.mxu0 %v3412_v12  ;;  %v3518_v10 = vld [vmem:[#allocation7 + $0x6e0] sm:$0xff]  ;;  %v3357_v3 = vld [vmem:[#allocation7 + $0x1d8] sm:$0xff]  ;;  %v3348_v56 = vld [vmem:[#allocation7 + $0x190] sm:$0xff] }
 0x423   :  { %6114 = vtanh.f32 %v7056_v44  ;;  %v3204_v29 = vadd.f32 %v7049_v54, %v3203_v60  ;;  %v3519_v60 = vld [vmem:[#allocation7 + $0x6e8] sm:$0xff]  ;;  %v3349_v0 = vld [vmem:[#allocation7 + $0x198] sm:$0xff]  ;;  %v3494_v12 = vld [vmem:[#allocation7 + $0x620] sm:$0xff] }
 0x424   :  { %v5944_v62 = vmul.f32 -1.442695, %v3229_v37  ;;  %3675 = vmatpush.msrb.mxu2 %v3413_v40  ;;  %6116 = vpow2.f32 %v5943_v24  ;;  %3636 = vmatpush.msra.mxu0 %v3404_v13  ;;  %v3510_v24 = vld [vmem:[#allocation7 + $0x6a0] sm:$0xff]  ;;  %v3511_v37 = vld [vmem:[#allocation7 + $0x6a8] sm:$0xff]  ;;  %v3333_v13 = vld [vmem:[#allocation7 + $0x118] sm:$0xff] }
 0x425   :  { %v3208_v27 = vsel %vm7068_vm0, %v7049_v54, %v3204_v29  ;;  %v3389_v54 = vld [vmem:[#allocation7 + $0x2d8] sm:$0xff]  ;;  %v3502_v29 = vld [vmem:[#allocation7 + $0x660] sm:$0xff]  ;;  %v3495_v40 = vld [vmem:[#allocation7 + $0x628] sm:$0xff] }
 0x426   :  { %6118 = vpow2.f32 %v5944_v62  ;;  %3676 = vmatpush.msrb.mxu2 %v3405_v17  ;;  %v3213_v8 = vsel %vm3210_vm1, %v3212_v20, %v3208_v27  ;;  %3637 = vmatpush.msra.mxu0 %v3396_v4  ;;  %v3341_v62 = vld [vmem:[#allocation7 + $0x158] sm:$0xff]  ;;  %v3332_v27 = vld [vmem:[#allocation7 + $0x110] sm:$0xff]  ;;  %v3486_v20 = vld [vmem:[#allocation7 + $0x5e0] sm:$0xff] }
 0x427   :  { %v3487_v4 = vld [vmem:[#allocation7 + $0x5e8] sm:$0xff] }
 0x428   :  { %3677 = vmatpush.msrb.mxu2 %v3397_v21  ;;  %3638 = vmatpush.msra.mxu0 %v3388_v22  ;;  %v3324_v21 = vld [vmem:[#allocation7 + $0xd0] sm:$0xff] }
 0x429   :  { %v6115_v11 = vpop.eup %6114 }
 0x42a   :  { %v7075_v53 = vmul.f32 %v6115_v11, %v3213_v8  ;;  %3678 = vmatpush.msrb.mxu2 %v3389_v54  ;;  %v6117_v61 = vpop.eup %6116  ;;  %3639 = vmatpush.msra.mxu0 %v3380_v5  ;;  %v3325_v11 = vld [vmem:[#allocation7 + $0xd8] sm:$0xff]  ;;  %v3478_v8 = vld [vmem:[#allocation7 + $0x5a0] sm:$0xff] }
 0x42b   :  { %v7079_v35 = vadd.f32 1.0, %v6117_v61  ;;  %v3317_v61 = vld [vmem:[#allocation7 + $0x98] sm:$0xff]  ;;  %v3470_v5 = vld [vmem:[#allocation7 + $0x560] sm:$0xff] }
 0x42c   :  { %3590 = vmatmul.f32.vlgmr.msra.gmra.mxu1 %v7075_v53  ;;  %3630 = vmatmul.f32.vlgmr.msra.gmra.mxu3 %v7075_v53  ;;  %v6119_v7 = vpop.eup %6118 }
 0x42d   :  { %3734 = vmatpush.msra.mxu1 %v3550_v38  ;;  %3774 = vmatpush.msra.mxu3 %v3551_v52  ;;  %v7081_v25 = vadd.f32 1.0, %v6119_v7  ;;  %6120 = vrcp.f32 %v7079_v35  ;;  %v3479_v38 = vld [vmem:[#allocation7 + $0x5a8] sm:$0xff]  ;;  %v3150_v7 = vpop.f32.mrf.mxu3  ;;  %vm3241_vm4 = vweird.f32 %v7079_v35 }
 0x42e   :  { %3679 = vmatpush.msrb.mxu2 %v3381_v26  ;;  %3640 = vmatpush.msra.mxu0 %v3372_v48  ;;  %v3471_v26 = vld [vmem:[#allocation7 + $0x568] sm:$0xff]  ;;  %v3309_v48 = vld [vmem:[#allocation7 + $0x58] sm:$0xff] }
 0x42f   :  { %3735 = vmatpush.msra.mxu1 %v3542_v18  ;;  %3775 = vmatpush.msra.mxu3 %v3543_v30  ;;  %6122 = vrcp.f32 %v7081_v25  ;;  %v3316_v18 = vld [vmem:[#allocation7 + $0x90] sm:$0xff]  ;;  %v3110_v30 = vpop.f32.mrf.mxu1  ;;  %vm3260_vm5 = vweird.f32 %v7081_v25 }
 0x430   :  { %3680 = vmatpush.msrb.mxu2 %v3373_v51  ;;  %3641 = vmatpush.msra.mxu0 %v3364_v58  ;;  %v3463_v58 = vld [vmem:[#allocation7 + $0x528] sm:$0xff] }
 0x431   :  { %3736 = vmatpush.msra.mxu1 %v3534_v23  ;;  %3776 = vmatpush.msra.mxu3 %v3535_v32  ;;  %v3308_v32 = vld [vmem:[#allocation7 + $0x50] sm:$0xff] }
 0x432   :  { %3681 = vmatpush.msrb.mxu2 %v3365_v59  ;;  %3642 = vmatpush.msra.mxu0 %v3356_v31  ;;  %v3301_v31 = vld [vmem:[#allocation7 + $0x18] sm:$0xff] }
 0x433   :  { %3737 = vmatpush.msra.mxu1 %v3526_v1  ;;  %3777 = vmatpush.msra.mxu3 %v3527_v43  ;;  %v7087_v47 = vpop.eup %6120  ;;  %v3462_v43 = vld [vmem:[#allocation7 + $0x520] sm:$0xff] }
 0x434   :  { %3670 = vmatmul.f32.vlgmr.msrb.gmra.mxu1 %v7075_v53  ;;  %3710 = vmatmul.f32.vlgmr.msrb.gmra.mxu3 %v7075_v53  ;;  %v3237_v52 = vmul.f32 %v7087_v47, %v7079_v35  ;;  %vm3242_vm2 = vweird.f32 %v7087_v47 }
 0x435   :  { %3738 = vmatpush.msra.mxu1 %v3518_v10  ;;  %3778 = vmatpush.msra.mxu3 %v3519_v60  ;;  %v7089_v17 = vpop.eup %6122  ;;  %v3300_v60 = vld [vmem:[#allocation7 + $0x10] sm:$0xff]  ;;  %vm7109_vm6 = vmor %vm3241_vm4, %vm3242_vm2 }
 0x436   :  { %3682 = vmatpush.msrb.mxu2 %v3357_v3  ;;  %3643 = vmatpush.msra.mxu0 %v3348_v56  ;;  %v3256_v22 = vmul.f32 %v7089_v17, %v7081_v25  ;;  %v3238_v59 = vsub.f32 1.0, %v3237_v52  ;;  %vm3261_vm3 = vweird.f32 %v7089_v17  ;;  %v3264_v52 = vand.u32 2147483647, %v7081_v25 }
 0x437   :  { %3739 = vmatpush.msra.mxu1 %v3510_v24  ;;  %3779 = vmatpush.msra.mxu3 %v3511_v37  ;;  %v3454_v24 = vld [vmem:[#allocation7 + $0x4e0] sm:$0xff]  ;;  %v3455_v37 = vld [vmem:[#allocation7 + $0x4e8] sm:$0xff]  ;;  %vm7117_vm7 = vmor %vm3260_vm5, %vm3261_vm3 }
 0x438   :  { %3683 = vmatpush.msrb.mxu2 %v3349_v0  ;;  %3644 = vmatpush.msra.mxu0 %v3340_v39  ;;  %v3257_v10 = vsub.f32 1.0, %v3256_v22  ;;  %vm3265_vm9 = vcmp.eq.f32.partialorder %v3264_v52, 8.507059e+37  ;;  %v3422_v52 = vld [vmem:[#allocation7 + $0x3e0] sm:$0xff] }
 0x439   :  { %3740 = vmatpush.msra.mxu1 %v3502_v29  ;;  %3780 = vmatpush.msra.mxu3 %v3503_v46  ;;  %v3090_v54 = vpop.f32.mrf.mxu0  ;;  %v3446_v29 = vld [vmem:[#allocation7 + $0x4a0] sm:$0xff]  ;;  %v3447_v46 = vld [vmem:[#allocation7 + $0x4a8] sm:$0xff] }
 0x43a   :  { %3684 = vmatpush.msrb.mxu2 %v3341_v62  ;;  %3645 = vmatpush.msra.mxu0 %v3332_v27  ;;  %v3111_v51 = vadd.f32 %v3110_v30, %v3090_v54  ;;  %v3258_v39 = vmul.f32 %v7089_v17, %v3257_v10  ;;  %v3239_v62 = vmul.f32 %v7087_v47, %v3238_v59  ;;  %v3512_v10 = vld [vmem:[#allocation7 + $0x6b0] sm:$0xff] }
 0x43b   :  { %3741 = vmatpush.msra.mxu1 %v3494_v12  ;;  %3781 = vmatpush.msra.mxu3 %v3495_v40  ;;  %v3439_v12 = vld [vmem:[#allocation7 + $0x468] sm:$0xff]  ;;  %v3464_v54 = vld [vmem:[#allocation7 + $0x530] sm:$0xff] }
 0x43c   :  { %3685 = vmatpush.msrb.mxu2 %v3333_v13  ;;  %3646 = vmatpush.msra.mxu0 %v3324_v21  ;;  %v3230_v56 = vadd.f32 %v3111_v51, %v6597_v45  ;;  %v3430_v45 = vld [vmem:[#allocation7 + $0x420] sm:$0xff]  ;;  %v3431_v40 = vld [vmem:[#allocation7 + $0x428] sm:$0xff]  ;;  %v3240_v27 = vadd.f32 %v7087_v47, %v3239_v62  ;;  %v3259_v13 = vadd.f32 %v7089_v17, %v3258_v39  ;;  %v3552_v21 = vld [vmem:[#allocation7 + $0x7f0] sm:$0xff] }
 0x43d   :  { %3742 = vmatpush.msra.mxu1 %v3486_v20  ;;  %3782 = vmatpush.msra.mxu3 %v3487_v4  ;;  %v3266_v20 = vand.u32 2147483648, %v7081_v25  ;;  %v3247_v4 = vand.u32 2147483648, %v7079_v35 }
 0x43e   :  { %3686 = vmatpush.msrb.mxu2 %v3325_v11  ;;  %3647 = vmatpush.msra.mxu0 %v3316_v18  ;;  %v3553_v11 = vld [vmem:[#allocation7 + $0x7f8] sm:$0xff]  ;;  %v3544_v18 = vld [vmem:[#allocation7 + $0x7b0] sm:$0xff]  ;;  %v3263_v25 = vsel %vm7117_vm7, %v7089_v17, %v3259_v13 }
 0x43f   :  { %v3130_v23 = vpop.f32.mrf.mxu2  ;;  %3743 = vmatpush.msra.mxu1 %v3478_v8  ;;  %3783 = vmatpush.msra.mxu3 %v3479_v38  ;;  %v3245_v38 = vand.u32 2147483647, %v7079_v35  ;;  %v3244_v35 = vsel %vm7109_vm6, %v7087_v47, %v3240_v27  ;;  %v3528_v47 = vld [vmem:[#allocation7 + $0x730] sm:$0xff]  ;;  %v3481_v27 = vld [vmem:[#allocation7 + $0x5b8] sm:$0xff] }
 0x440   :  { %v3151_v1 = vadd.f32 %v3150_v7, %v3130_v23  ;;  %3687 = vmatpush.msrb.mxu2 %v3317_v61  ;;  %3648 = vmatpush.msra.mxu0 %v3308_v32  ;;  %v3545_v61 = vld [vmem:[#allocation7 + $0x7b8] sm:$0xff]  ;;  %v3248_v7 = vor.u32 1.1754944e-38, %v3247_v4  ;;  %v3536_v23 = vld [vmem:[#allocation7 + $0x770] sm:$0xff] }
 0x441   :  { %3744 = vmatpush.msra.mxu1 %v3470_v5  ;;  %3784 = vmatpush.msra.mxu3 %v3471_v26  ;;  %v3267_v26 = vor.u32 1.1754944e-38, %v3266_v20  ;;  %v3537_v32 = vld [vmem:[#allocation7 + $0x778] sm:$0xff]  ;;  %vm3246_vm8 = vcmp.eq.f32.partialorder %v3245_v38, 8.507059e+37  ;;  %v3520_v17 = vld [vmem:[#allocation7 + $0x6f0] sm:$0xff] }
 0x442   :  { %v3231_v3 = vadd.f32 %v3151_v1, %v6595_v49  ;;  %3688 = vmatpush.msrb.mxu2 %v3309_v48  ;;  %3649 = vmatpush.msra.mxu0 %v3300_v60  ;;  %v3438_v49 = vld [vmem:[#allocation7 + $0x460] sm:$0xff]  ;;  %v3249_v48 = vsel %vm3246_vm8, %v3248_v7, %v3244_v35  ;;  %v3529_v1 = vld [vmem:[#allocation7 + $0x738] sm:$0xff]  ;;  %v3472_v4 = vld [vmem:[#allocation7 + $0x570] sm:$0xff] }
 0x443   :  { %3745 = vmatpush.msra.mxu1 %v3462_v43  ;;  %3785 = vmatpush.msra.mxu3 %v3463_v58  ;;  %v3268_v51 = vsel %vm3265_vm9, %v3267_v26, %v3263_v25  ;;  %v3521_v58 = vld [vmem:[#allocation7 + $0x6f8] sm:$0xff]  ;;  %v3415_v35 = vld [vmem:[#allocation7 + $0x3a8] sm:$0xff]  ;;  %v3456_v25 = vld [vmem:[#allocation7 + $0x4f0] sm:$0xff] }
 0x444   :  { %v5945_v0 = vmul.f32 -1.442695, %v3231_v3  ;;  %3689 = vmatpush.msrb.mxu2 %v3301_v31  ;;  %v3290_v59 = vmul.f32 %v3268_v51, %v7000_v14  ;;  %v3513_v60 = vld [vmem:[#allocation7 + $0x6b8] sm:$0xff]  ;;  %v3407_v26 = vld [vmem:[#allocation7 + $0x368] sm:$0xff]  ;;  %v3448_v7 = vld [vmem:[#allocation7 + $0x4b0] sm:$0xff] }
 0x445   :  { %3746 = vmatpush.msra.mxu1 %v3454_v24  ;;  %3786 = vmatpush.msra.mxu3 %v3455_v37  ;;  %v3504_v37 = vld [vmem:[#allocation7 + $0x670] sm:$0xff]  ;;  %v3390_v51 = vld [vmem:[#allocation7 + $0x2e0] sm:$0xff] }
 0x446   :  { %6124 = vpow2.f32 %v5945_v0 }
 0x447   :  { %3747 = vmatpush.msra.mxu1 %v3446_v29  ;;  %3787 = vmatpush.msra.mxu3 %v3447_v46  ;;  %6126 = vtanh.f32 %v3230_v56  ;;  %v3505_v56 = vld [vmem:[#allocation7 + $0x678] sm:$0xff]  ;;  %v3496_v29 = vld [vmem:[#allocation7 + $0x630] sm:$0xff] }
 0x448   :  { %v3497_v46 = vld [vmem:[#allocation7 + $0x638] sm:$0xff] }
 0x449   :  { %3748 = vmatpush.msra.mxu1 %v3438_v49  ;;  %3788 = vmatpush.msra.mxu3 %v3439_v12  ;;  %v3488_v49 = vld [vmem:[#allocation7 + $0x5f0] sm:$0xff]  ;;  %v3489_v12 = vld [vmem:[#allocation7 + $0x5f8] sm:$0xff] }
 0x44b   :  { %3749 = vmatpush.msra.mxu1 %v3430_v45  ;;  %3789 = vmatpush.msra.mxu3 %v3431_v40  ;;  %v3480_v40 = vld [vmem:[#allocation7 + $0x5b0] sm:$0xff] }
 0x44c   :  { %v6125_v22 = vpop.eup %6124  ;;  %3750 = vmatmul.f32.vlgmr.msra.gmra.mxu1 %v7075_v53  ;;  %3790 = vmatmul.f32.vlgmr.msra.gmra.mxu3 %v7075_v53 }
 0x44d   :  { %v3274_v30 = vadd.f32 1.0, %v6125_v22  ;;  %3814 = vmatpush.msrb.mxu1 %v3552_v21  ;;  %3854 = vmatpush.msrb.mxu3 %v3553_v11  ;;  %v6127_v5 = vpop.eup %6126  ;;  %v3473_v21 = vld [vmem:[#allocation7 + $0x578] sm:$0xff]  ;;  %v3423_v22 = vld [vmem:[#allocation7 + $0x3e8] sm:$0xff] }
 0x44e   :  { %v3291_v43 = vmul.f32 %v6127_v5, %v3249_v48  ;;  %v3406_v5 = vld [vmem:[#allocation7 + $0x360] sm:$0xff]  ;;  %v3399_v48 = vld [vmem:[#allocation7 + $0x328] sm:$0xff] }
 0x44f   :  { %6128 = vrcp.f32 %v3274_v30  ;;  %3815 = vmatpush.msrb.mxu1 %v3544_v18  ;;  %3855 = vmatpush.msrb.mxu3 %v3545_v61  ;;  %v3286_v14 = vand.u32 2147483648, %v3274_v30  ;;  %v3284_v62 = vand.u32 2147483647, %v3274_v30  ;;  %vm3280_vm11 = vweird.f32 %v3274_v30  ;;  %v3465_v18 = vld [vmem:[#allocation7 + $0x538] sm:$0xff]  ;;  %v3414_v61 = vld [vmem:[#allocation7 + $0x3a0] sm:$0xff] }
 0x450   :  { %v7130_v3 = vadd.f32 %v3291_v43, %v3290_v59  ;;  %v3441_v43 = vld [vmem:[#allocation7 + $0x478] sm:$0xff]  ;;  %v3432_v59 = vld [vmem:[#allocation7 + $0x430] sm:$0xff] }
 0x451   :  { %3816 = vmatpush.msrb.mxu1 %v3536_v23  ;;  %3856 = vmatpush.msrb.mxu3 %v3537_v32  ;;  %v3287_v13 = vor.u32 1.1754944e-38, %v3286_v14  ;;  %vm3285_vm13 = vcmp.eq.f32.partialorder %v3284_v62, 8.507059e+37  ;;  %v3449_v23 = vld [vmem:[#allocation7 + $0x4b8] sm:$0xff]  ;;  %v3398_v32 = vld [vmem:[#allocation7 + $0x320] sm:$0xff] }
 0x452   :  { %6130 = vtanh.f32 %v7130_v3  ;;  %v3342_v14 = vld [vmem:[#allocation7 + $0x160] sm:$0xff] }
 0x453   :  { %3817 = vmatpush.msrb.mxu1 %v3528_v47  ;;  %3857 = vmatpush.msrb.mxu3 %v3529_v1  ;;  %v3391_v47 = vld [vmem:[#allocation7 + $0x2e8] sm:$0xff]  ;;  %v3440_v1 = vld [vmem:[#allocation7 + $0x470] sm:$0xff]  ;;  %v3334_v62 = vld [vmem:[#allocation7 + $0x120] sm:$0xff] }
 0x455   :  { %v6129_v31 = vpop.eup %6128  ;;  %3818 = vmatpush.msrb.mxu1 %v3520_v17  ;;  %3858 = vmatpush.msrb.mxu3 %v3521_v58  ;;  %v3382_v17 = vld [vmem:[#allocation7 + $0x2a0] sm:$0xff]  ;;  %v3383_v58 = vld [vmem:[#allocation7 + $0x2a8] sm:$0xff] }
 0x456   :  { %v3276_v24 = vmul.f32 %v6129_v31, %v3274_v30  ;;  %vm3281_vm10 = vweird.f32 %v6129_v31  ;;  %v3457_v30 = vld [vmem:[#allocation7 + $0x4f8] sm:$0xff] }
 0x457   :  { %3819 = vmatpush.msrb.mxu1 %v3512_v10  ;;  %3859 = vmatpush.msrb.mxu3 %v3513_v60  ;;  %vm3282_vm12 = vmor %vm3280_vm11, %vm3281_vm10  ;;  %v3433_v10 = vld [vmem:[#allocation7 + $0x438] sm:$0xff]  ;;  %v3374_v60 = vld [vmem:[#allocation7 + $0x260] sm:$0xff] }
 0x458   :  { %v3277_v0 = vsub.f32 1.0, %v3276_v24  ;;  %v6131_v11 = vpop.eup %6130  ;;  %v3366_v24 = vld [vmem:[#allocation7 + $0x220] sm:$0xff] }
 0x459   :  { %3820 = vmatpush.msrb.mxu1 %v3504_v37  ;;  %3860 = vmatpush.msrb.mxu3 %v3505_v56  ;;  %v3367_v37 = vld [vmem:[#allocation7 + $0x228] sm:$0xff]  ;;  %v3358_v56 = vld [vmem:[#allocation7 + $0x1e0] sm:$0xff] }
 0x45a   :  { %v3278_v39 = vmul.f32 %v6129_v31, %v3277_v0  ;;  %v3359_v0 = vld [vmem:[#allocation7 + $0x1e8] sm:$0xff] }
 0x45b   :  { %3821 = vmatpush.msrb.mxu1 %v3496_v29  ;;  %3861 = vmatpush.msrb.mxu3 %v3497_v46  ;;  %v3350_v29 = vld [vmem:[#allocation7 + $0x1a0] sm:$0xff]  ;;  %v3351_v46 = vld [vmem:[#allocation7 + $0x1a8] sm:$0xff] }
 0x45c   :  { %v3279_v45 = vadd.f32 %v6129_v31, %v3278_v39  ;;  %v3343_v39 = vld [vmem:[#allocation7 + $0x168] sm:$0xff] }
 0x45d   :  { %3822 = vmatpush.msrb.mxu1 %v3488_v49  ;;  %3862 = vmatpush.msrb.mxu3 %v3489_v12  ;;  %v3335_v49 = vld [vmem:[#allocation7 + $0x128] sm:$0xff] }
 0x45e   :  { %v3283_v20 = vsel %vm3282_vm12, %v6129_v31, %v3279_v45  ;;  %v3375_v31 = vld [vmem:[#allocation7 + $0x268] sm:$0xff]  ;;  %v3318_v45 = vld [vmem:[#allocation7 + $0xa0] sm:$0xff] }
 0x45f   :  { %v3288_v8 = vsel %vm3285_vm13, %v3287_v13, %v3283_v20  ;;  %3823 = vmatpush.msrb.mxu1 %v3480_v40  ;;  %3863 = vmatpush.msrb.mxu3 %v3481_v27  ;;  %v3327_v12 = vld [vmem:[#allocation7 + $0xe8] sm:$0xff]  ;;  %v3310_v27 = vld [vmem:[#allocation7 + $0x60] sm:$0xff] }
 0x460   :  { %v7133_v38 = vmul.f32 %v6131_v11, %v3288_v8  ;;  %v3319_v40 = vld [vmem:[#allocation7 + $0xa8] sm:$0xff]  ;;  %v3302_v20 = vld [vmem:[#allocation7 + $0x20] sm:$0xff]  ;;  %v3425_v11 = vld [vmem:[#allocation7 + $0x3f8] sm:$0xff] }
 0x461   :  { %3824 = vmatpush.msrb.mxu1 %v3472_v4  ;;  %3864 = vmatpush.msrb.mxu3 %v3473_v21  ;;  %v3311_v13 = vld [vmem:[#allocation7 + $0x68] sm:$0xff]  ;;  %v3424_v21 = vld [vmem:[#allocation7 + $0x3f0] sm:$0xff] }
 0x462   :  { %3570 = vmatmul.f32.vlgmr.msrb.gmra.mxu0 %v7133_v38  ;;  %3610 = vmatmul.f32.vlgmr.msra.gmra.mxu2 %v7133_v38  ;;  %v3303_v4 = vld [vmem:[#allocation7 + $0x28] sm:$0xff]  ;;  %v3416_v8 = vld [vmem:[#allocation7 + $0x3b0] sm:$0xff] }
 0x463   :  { %3714 = vmatpush.msrb.mxu0 %v3422_v52  ;;  %3754 = vmatpush.msra.mxu2 %v3423_v22  ;;  %v3417_v52 = vld [vmem:[#allocation7 + $0x3b8] sm:$0xff]  ;;  %v3408_v22 = vld [vmem:[#allocation7 + $0x370] sm:$0xff] }
 0x464   :  { %3825 = vmatpush.msrb.mxu1 %v3464_v54  ;;  %3865 = vmatpush.msrb.mxu3 %v3465_v18  ;;  %v3409_v54 = vld [vmem:[#allocation7 + $0x378] sm:$0xff]  ;;  %v3400_v18 = vld [vmem:[#allocation7 + $0x330] sm:$0xff] }
 0x465   :  { %3715 = vmatpush.msrb.mxu0 %v3414_v61  ;;  %3755 = vmatpush.msra.mxu2 %v3415_v35  ;;  %v3401_v61 = vld [vmem:[#allocation7 + $0x338] sm:$0xff]  ;;  %v3392_v35 = vld [vmem:[#allocation7 + $0x2f0] sm:$0xff] }
 0x466   :  { %3826 = vmatpush.msrb.mxu1 %v3456_v25  ;;  %3866 = vmatpush.msrb.mxu3 %v3457_v30  ;;  %v3393_v25 = vld [vmem:[#allocation7 + $0x2f8] sm:$0xff]  ;;  %v3384_v30 = vld [vmem:[#allocation7 + $0x2b0] sm:$0xff] }
 0x467   :  { %3716 = vmatpush.msrb.mxu0 %v3406_v5  ;;  %3756 = vmatpush.msra.mxu2 %v3407_v26  ;;  %v3385_v5 = vld [vmem:[#allocation7 + $0x2b8] sm:$0xff]  ;;  %v3376_v26 = vld [vmem:[#allocation7 + $0x270] sm:$0xff] }
 0x468   :  { %3827 = vmatpush.msrb.mxu1 %v3448_v7  ;;  %3867 = vmatpush.msrb.mxu3 %v3449_v23  ;;  %v3377_v7 = vld [vmem:[#allocation7 + $0x278] sm:$0xff]  ;;  %v3368_v23 = vld [vmem:[#allocation7 + $0x230] sm:$0xff] }
 0x469   :  { %3717 = vmatpush.msrb.mxu0 %v3398_v32  ;;  %3757 = vmatpush.msra.mxu2 %v3399_v48  ;;  %v3369_v32 = vld [vmem:[#allocation7 + $0x238] sm:$0xff]  ;;  %v3360_v48 = vld [vmem:[#allocation7 + $0x1f0] sm:$0xff] }
 0x46a   :  { %3650 = vmatmul.f32.vlgmr.msra.gmra.mxu0 %v7133_v38  ;;  %3690 = vmatmul.f32.vlgmr.msrb.gmra.mxu2 %v7133_v38 }
 0x46b   :  { %3718 = vmatpush.msrb.mxu0 %v3390_v51  ;;  %3758 = vmatpush.msra.mxu2 %v3391_v47  ;;  %v3361_v51 = vld [vmem:[#allocation7 + $0x1f8] sm:$0xff]  ;;  %v3352_v47 = vld [vmem:[#allocation7 + $0x1b0] sm:$0xff] }
 0x46c   :  { %3828 = vmatpush.msrb.mxu1 %v3440_v1  ;;  %3868 = vmatpush.msrb.mxu3 %v3441_v43  ;;  %v3353_v1 = vld [vmem:[#allocation7 + $0x1b8] sm:$0xff]  ;;  %v3344_v43 = vld [vmem:[#allocation7 + $0x170] sm:$0xff] }
 0x46d   :  { %3719 = vmatpush.msrb.mxu0 %v3382_v17  ;;  %3759 = vmatpush.msra.mxu2 %v3383_v58  ;;  %v3345_v17 = vld [vmem:[#allocation7 + $0x178] sm:$0xff]  ;;  %v3336_v58 = vld [vmem:[#allocation7 + $0x130] sm:$0xff] }
 0x46e   :  { %3829 = vmatpush.msrb.mxu1 %v3432_v59  ;;  %3869 = vmatpush.msrb.mxu3 %v3433_v10  ;;  %v3337_v59 = vld [vmem:[#allocation7 + $0x138] sm:$0xff]  ;;  %v3328_v10 = vld [vmem:[#allocation7 + $0xf0] sm:$0xff] }
 0x46f   :  { %3830 = vmatmul.f32.vlgmr.msrb.gmra.mxu1 %v7075_v53  ;;  %3870 = vmatmul.f32.vlgmr.msrb.gmra.mxu3 %v7075_v53  ;;  %v3326_v53 = vld [vmem:[#allocation7 + $0xe0] sm:$0xff] }
 0x470   :  { %3720 = vmatpush.msrb.mxu0 %v3374_v60  ;;  %3760 = vmatpush.msra.mxu2 %v3375_v31  ;;  %v3329_v60 = vld [vmem:[#allocation7 + $0xf8] sm:$0xff]  ;;  %v3320_v31 = vld [vmem:[#allocation7 + $0xb0] sm:$0xff] }
 0x472   :  { %3721 = vmatpush.msrb.mxu0 %v3366_v24  ;;  %3761 = vmatpush.msra.mxu2 %v3367_v37  ;;  %v3321_v24 = vld [vmem:[#allocation7 + $0xb8] sm:$0xff]  ;;  %v3312_v37 = vld [vmem:[#allocation7 + $0x70] sm:$0xff] }
 0x474   :  { %3722 = vmatpush.msrb.mxu0 %v3358_v56  ;;  %3762 = vmatpush.msra.mxu2 %v3359_v0  ;;  %v3313_v56 = vld [vmem:[#allocation7 + $0x78] sm:$0xff]  ;;  %v3304_v0 = vld [vmem:[#allocation7 + $0x30] sm:$0xff] }
 0x476   :  { %3723 = vmatpush.msrb.mxu0 %v3350_v29  ;;  %3763 = vmatpush.msra.mxu2 %v3351_v46  ;;  %v3305_v29 = vld [vmem:[#allocation7 + $0x38] sm:$0xff]  ;;  %v4267_v46 = vld [vmem:[#allocation7 + $0x7c0] sm:$0xff] }
 0x477   :  { %4295 = vmatpush.msra.mxu1 %v4267_v46  ;;  %v4230_v46 = vld [vmem:[#allocation7 + $0x698] sm:$0xff] }
 0x478   :  { %3724 = vmatpush.msrb.mxu0 %v3342_v14  ;;  %3764 = vmatpush.msra.mxu2 %v3343_v39  ;;  %v4268_v14 = vld [vmem:[#allocation7 + $0x7c8] sm:$0xff]  ;;  %v4259_v39 = vld [vmem:[#allocation7 + $0x780] sm:$0xff] }
 0x479   :  { %4335 = vmatpush.msra.mxu3 %v4268_v14  ;;  %4296 = vmatpush.msra.mxu1 %v4259_v39  ;;  %v4221_v39 = vld [vmem:[#allocation7 + $0x650] sm:$0xff] }
 0x47a   :  { %3725 = vmatpush.msrb.mxu0 %v3334_v62  ;;  %3765 = vmatpush.msra.mxu2 %v3335_v49  ;;  %v4260_v62 = vld [vmem:[#allocation7 + $0x788] sm:$0xff]  ;;  %v4251_v49 = vld [vmem:[#allocation7 + $0x740] sm:$0xff] }
 0x47b   :  { %4336 = vmatpush.msra.mxu3 %v4260_v62  ;;  %4297 = vmatpush.msra.mxu1 %v4251_v49  ;;  %v4222_v62 = vld [vmem:[#allocation7 + $0x658] sm:$0xff] }
 0x47c   :  { %3726 = vmatpush.msrb.mxu0 %v3326_v53  ;;  %3766 = vmatpush.msra.mxu2 %v3327_v12  ;;  %v4252_v53 = vld [vmem:[#allocation7 + $0x748] sm:$0xff]  ;;  %v4243_v12 = vld [vmem:[#allocation7 + $0x700] sm:$0xff] }
 0x47d   :  { %4337 = vmatpush.msra.mxu3 %v4252_v53  ;;  %4298 = vmatpush.msra.mxu1 %v4243_v12  ;;  %v4213_v12 = vld [vmem:[#allocation7 + $0x610] sm:$0xff] }
 0x47e   :  { %3727 = vmatpush.msrb.mxu0 %v3318_v45  ;;  %3767 = vmatpush.msra.mxu2 %v3319_v40  ;;  %v4244_v45 = vld [vmem:[#allocation7 + $0x708] sm:$0xff]  ;;  %v4235_v40 = vld [vmem:[#allocation7 + $0x6c0] sm:$0xff] }
 0x47f   :  { %4338 = vmatpush.msra.mxu3 %v4244_v45  ;;  %4299 = vmatpush.msra.mxu1 %v4235_v40  ;;  %v4214_v45 = vld [vmem:[#allocation7 + $0x618] sm:$0xff] }
 0x480   :  { %3728 = vmatpush.msrb.mxu0 %v3310_v27  ;;  %3768 = vmatpush.msra.mxu2 %v3311_v13  ;;  %v4236_v27 = vld [vmem:[#allocation7 + $0x6c8] sm:$0xff] }
 0x481   :  { %4339 = vmatpush.msra.mxu3 %v4236_v27  ;;  %v4228_v13 = vld [vmem:[#allocation7 + $0x688] sm:$0xff] }
 0x482   :  { %3729 = vmatpush.msrb.mxu0 %v3302_v20  ;;  %3769 = vmatpush.msra.mxu2 %v3303_v4  ;;  %v4219_v20 = vld [vmem:[#allocation7 + $0x640] sm:$0xff]  ;;  %v4220_v4 = vld [vmem:[#allocation7 + $0x648] sm:$0xff] }
 0x483   :  { %3730 = vmatmul.f32.vlgmr.msrb.gmra.mxu0 %v7133_v38  ;;  %3770 = vmatmul.f32.vlgmr.msra.gmra.mxu2 %v7133_v38 }
 0x484   :  { %3794 = vmatpush.msra.mxu0 %v3424_v21  ;;  %3834 = vmatpush.msrb.mxu2 %v3425_v11  ;;  %v4211_v21 = vld [vmem:[#allocation7 + $0x600] sm:$0xff]  ;;  %v4212_v11 = vld [vmem:[#allocation7 + $0x608] sm:$0xff] }
 0x485   :  { %4340 = vmatpush.msra.mxu3 %v4228_v13  ;;  %v4206_v13 = vld [vmem:[#allocation7 + $0x5d8] sm:$0xff] }
 0x486   :  { %3795 = vmatpush.msra.mxu0 %v3416_v8  ;;  %3835 = vmatpush.msrb.mxu2 %v3417_v52  ;;  %v4203_v8 = vld [vmem:[#allocation7 + $0x5c0] sm:$0xff]  ;;  %v4204_v52 = vld [vmem:[#allocation7 + $0x5c8] sm:$0xff] }
 0x487   :  { %4341 = vmatpush.msra.mxu3 %v4220_v4  ;;  %v4197_v4 = vld [vmem:[#allocation7 + $0x590] sm:$0xff] }
 0x488   :  { %3796 = vmatpush.msra.mxu0 %v3408_v22  ;;  %3836 = vmatpush.msrb.mxu2 %v3409_v54  ;;  %v4195_v22 = vld [vmem:[#allocation7 + $0x580] sm:$0xff]  ;;  %v4196_v54 = vld [vmem:[#allocation7 + $0x588] sm:$0xff] }
 0x489   :  { %4342 = vmatpush.msra.mxu3 %v4212_v11 }
 0x48a   :  { %3797 = vmatpush.msra.mxu0 %v3400_v18  ;;  %3837 = vmatpush.msrb.mxu2 %v3401_v61  ;;  %v4187_v18 = vld [vmem:[#allocation7 + $0x540] sm:$0xff]  ;;  %v4188_v61 = vld [vmem:[#allocation7 + $0x548] sm:$0xff] }
 0x48b   :  { %4343 = vmatpush.msra.mxu3 %v4204_v52  ;;  %v4140_v52 = vld [vmem:[#allocation7 + $0x3c8] sm:$0xff] }
 0x48c   :  { %3798 = vmatpush.msra.mxu0 %v3392_v35  ;;  %3838 = vmatpush.msrb.mxu2 %v3393_v25  ;;  %v4179_v35 = vld [vmem:[#allocation7 + $0x500] sm:$0xff]  ;;  %v4180_v25 = vld [vmem:[#allocation7 + $0x508] sm:$0xff] }
 0x48d   :  { %4344 = vmatpush.msra.mxu3 %v4196_v54  ;;  %v4190_v54 = vld [vmem:[#allocation7 + $0x558] sm:$0xff] }
 0x48e   :  { %3799 = vmatpush.msra.mxu0 %v3384_v30  ;;  %3839 = vmatpush.msrb.mxu2 %v3385_v5  ;;  %v4171_v30 = vld [vmem:[#allocation7 + $0x4c0] sm:$0xff]  ;;  %v4172_v5 = vld [vmem:[#allocation7 + $0x4c8] sm:$0xff] }
 0x48f   :  { %4345 = vmatpush.msra.mxu3 %v4188_v61  ;;  %v4131_v61 = vld [vmem:[#allocation7 + $0x380] sm:$0xff] }
 0x490   :  { %3800 = vmatpush.msra.mxu0 %v3376_v26  ;;  %3840 = vmatpush.msrb.mxu2 %v3377_v7  ;;  %v4163_v26 = vld [vmem:[#allocation7 + $0x480] sm:$0xff]  ;;  %v4164_v7 = vld [vmem:[#allocation7 + $0x488] sm:$0xff] }
 0x491   :  { %4346 = vmatpush.msra.mxu3 %v4180_v25  ;;  %v4181_v25 = vld [vmem:[#allocation7 + $0x510] sm:$0xff] }
 0x492   :  { %3801 = vmatpush.msra.mxu0 %v3368_v23  ;;  %3841 = vmatpush.msrb.mxu2 %v3369_v32  ;;  %v4155_v23 = vld [vmem:[#allocation7 + $0x440] sm:$0xff]  ;;  %v4156_v32 = vld [vmem:[#allocation7 + $0x448] sm:$0xff] }
 0x493   :  { %4347 = vmatpush.msra.mxu3 %v4172_v5 }
 0x494   :  { %3802 = vmatpush.msra.mxu0 %v3360_v48  ;;  %3842 = vmatpush.msrb.mxu2 %v3361_v51  ;;  %v4147_v48 = vld [vmem:[#allocation7 + $0x400] sm:$0xff]  ;;  %v4148_v51 = vld [vmem:[#allocation7 + $0x408] sm:$0xff] }
 0x495   :  { %4348 = vmatpush.msra.mxu3 %v4164_v7  ;;  %v4182_v7 = vld [vmem:[#allocation7 + $0x518] sm:$0xff] }
 0x496   :  { %3803 = vmatpush.msra.mxu0 %v3352_v47  ;;  %3843 = vmatpush.msrb.mxu2 %v3353_v1  ;;  %v4269_v47 = vld [vmem:[#allocation7 + $0x7d0] sm:$0xff]  ;;  %v4270_v1 = vld [vmem:[#allocation7 + $0x7d8] sm:$0xff] }
 0x497   :  { %4349 = vmatpush.msra.mxu3 %v4156_v32  ;;  %v4123_v32 = vld [vmem:[#allocation7 + $0x340] sm:$0xff] }
 0x498   :  { %3804 = vmatpush.msra.mxu0 %v3344_v43  ;;  %3844 = vmatpush.msrb.mxu2 %v3345_v17  ;;  %v4261_v43 = vld [vmem:[#allocation7 + $0x790] sm:$0xff]  ;;  %v4262_v17 = vld [vmem:[#allocation7 + $0x798] sm:$0xff] }
 0x499   :  { %4350 = vmatpush.msra.mxu3 %v4148_v51  ;;  %v4173_v51 = vld [vmem:[#allocation7 + $0x4d0] sm:$0xff] }
 0x49a   :  { %3805 = vmatpush.msra.mxu0 %v3336_v58  ;;  %3845 = vmatpush.msrb.mxu2 %v3337_v59  ;;  %v4253_v58 = vld [vmem:[#allocation7 + $0x750] sm:$0xff]  ;;  %v4254_v59 = vld [vmem:[#allocation7 + $0x758] sm:$0xff] }
 0x49b   :  { %4415 = vmatpush.msrb.mxu3 %v4270_v1 }
 0x49c   :  { %3806 = vmatpush.msra.mxu0 %v3328_v10  ;;  %3846 = vmatpush.msrb.mxu2 %v3329_v60  ;;  %v4245_v10 = vld [vmem:[#allocation7 + $0x710] sm:$0xff]  ;;  %v4246_v60 = vld [vmem:[#allocation7 + $0x718] sm:$0xff] }
 0x49d   :  { %4416 = vmatpush.msrb.mxu3 %v4262_v17  ;;  %v4116_v17 = vld [vmem:[#allocation7 + $0x308] sm:$0xff] }
 0x49e   :  { %3807 = vmatpush.msra.mxu0 %v3320_v31  ;;  %3847 = vmatpush.msrb.mxu2 %v3321_v24  ;;  %v4237_v31 = vld [vmem:[#allocation7 + $0x6d0] sm:$0xff]  ;;  %v4238_v24 = vld [vmem:[#allocation7 + $0x6d8] sm:$0xff] }
 0x49f   :  { %4417 = vmatpush.msrb.mxu3 %v4254_v59  ;;  %v4166_v59 = vld [vmem:[#allocation7 + $0x498] sm:$0xff] }
 0x4a0   :  { %3808 = vmatpush.msra.mxu0 %v3312_v37  ;;  %3848 = vmatpush.msrb.mxu2 %v3313_v56 }
 0x4a1   :  { %4418 = vmatpush.msrb.mxu3 %v4246_v60 }
 0x4a2   :  { %3809 = vmatpush.msra.mxu0 %v3304_v0  ;;  %3849 = vmatpush.msrb.mxu2 %v3305_v29  ;;  %v4229_v29 = vld [vmem:[#allocation7 + $0x690] sm:$0xff] }
 0x4a3   :  { %3810 = vmatmul.f32.vlgmr.msra.gmra.mxu0 %v7133_v38  ;;  %3850 = vmatmul.f32.vlgmr.msrb.gmra.mxu2 %v7133_v38  ;;  %v4227_v38 = vld [vmem:[#allocation7 + $0x680] sm:$0xff] }
 0x4a4   :  { %4300 = vmatpush.msra.mxu1 %v4227_v38  ;;  %4419 = vmatpush.msrb.mxu3 %v4238_v24  ;;  %v4205_v38 = vld [vmem:[#allocation7 + $0x5d0] sm:$0xff]  ;;  %v4108_v24 = vld [vmem:[#allocation7 + $0x2c8] sm:$0xff] }
 0x4a5   :  { %4315 = vmatpush.msra.mxu2 %v4140_v52 }
 0x4a6   :  { %4301 = vmatpush.msra.mxu1 %v4219_v20  ;;  %4420 = vmatpush.msrb.mxu3 %v4230_v46  ;;  %v4099_v46 = vld [vmem:[#allocation7 + $0x280] sm:$0xff] }
 0x4a8   :  { %4302 = vmatpush.msra.mxu1 %v4211_v21  ;;  %4421 = vmatpush.msrb.mxu3 %v4222_v62  ;;  %v4198_v21 = vld [vmem:[#allocation7 + $0x598] sm:$0xff] }
 0x4a9   :  { %v3591_v37 = vpop.f32.mrf.mxu1 }
 0x4aa   :  { %4303 = vmatpush.msra.mxu1 %v4203_v8  ;;  %4422 = vmatpush.msrb.mxu3 %v4214_v45  ;;  %v4139_v8 = vld [vmem:[#allocation7 + $0x3c0] sm:$0xff] }
 0x4ab   :  { %4275 = vmatpush.msrb.mxu0 %v4139_v8  ;;  %v4091_v45 = vld [vmem:[#allocation7 + $0x240] sm:$0xff]  ;;  %v4076_v8 = vld [vmem:[#allocation7 + $0x1c8] sm:$0xff] }
 0x4ac   :  { %4304 = vmatpush.msra.mxu1 %v4195_v22  ;;  %4423 = vmatpush.msrb.mxu3 %v4206_v13  ;;  %v4189_v22 = vld [vmem:[#allocation7 + $0x550] sm:$0xff]  ;;  %v4083_v13 = vld [vmem:[#allocation7 + $0x200] sm:$0xff] }
 0x4ad   :  { %4276 = vmatpush.msrb.mxu0 %v4131_v61 }
 0x4ae   :  { %4305 = vmatpush.msra.mxu1 %v4187_v18  ;;  %4424 = vmatpush.msrb.mxu3 %v4198_v21 }
 0x4af   :  { %v3631_v49 = vpop.f32.mrf.mxu3  ;;  %4277 = vmatpush.msrb.mxu0 %v4123_v32  ;;  %v4060_v32 = vld [vmem:[#allocation7 + $0x148] sm:$0xff] }
 0x4b0   :  { %4306 = vmatpush.msra.mxu1 %v4179_v35  ;;  %4425 = vmatpush.msrb.mxu3 %v4190_v54  ;;  %v4132_v35 = vld [vmem:[#allocation7 + $0x388] sm:$0xff] }
 0x4b1   :  { %4316 = vmatpush.msra.mxu2 %v4132_v35  ;;  %v4067_v35 = vld [vmem:[#allocation7 + $0x180] sm:$0xff] }
 0x4b2   :  { %4307 = vmatpush.msra.mxu1 %v4171_v30  ;;  %4426 = vmatpush.msrb.mxu3 %v4182_v7 }
 0x4b4   :  { %4308 = vmatpush.msra.mxu1 %v4163_v26 }
 0x4b6   :  { %4309 = vmatpush.msra.mxu1 %v4155_v23 }
 0x4b7   :  { %v3711_v30 = vpop.f32.mrf.mxu3 }
 0x4b8   :  { %4310 = vmatpush.msra.mxu1 %v4147_v48  ;;  %v4124_v48 = vld [vmem:[#allocation7 + $0x348] sm:$0xff] }
 0x4b9   :  { %4317 = vmatpush.msra.mxu2 %v4124_v48 }
 0x4ba   :  { %4375 = vmatpush.msrb.mxu1 %v4269_v47  ;;  %v4174_v47 = vld [vmem:[#allocation7 + $0x4d8] sm:$0xff] }
 0x4bb   :  { %4427 = vmatpush.msrb.mxu3 %v4174_v47  ;;  %4318 = vmatpush.msra.mxu2 %v4116_v17 }
 0x4bc   :  { %4376 = vmatpush.msrb.mxu1 %v4261_v43  ;;  %v4115_v43 = vld [vmem:[#allocation7 + $0x300] sm:$0xff] }
 0x4bd   :  { %4278 = vmatpush.msrb.mxu0 %v4115_v43  ;;  %4428 = vmatpush.msrb.mxu3 %v4166_v59  ;;  %v4052_v59 = vld [vmem:[#allocation7 + $0x108] sm:$0xff] }
 0x4be   :  { %4377 = vmatpush.msrb.mxu1 %v4253_v58  ;;  %v4165_v58 = vld [vmem:[#allocation7 + $0x490] sm:$0xff]  ;;  %4319 = vmatpush.msra.mxu2 %v4108_v24  ;;  %v4043_v24 = vld [vmem:[#allocation7 + $0xc0] sm:$0xff] }
 0x4c0   :  { %4378 = vmatpush.msrb.mxu1 %v4245_v10 }
 0x4c2   :  { %4379 = vmatpush.msrb.mxu1 %v4237_v31  ;;  %v4107_v31 = vld [vmem:[#allocation7 + $0x2c0] sm:$0xff] }
 0x4c3   :  { %4279 = vmatpush.msrb.mxu0 %v4107_v31 }
 0x4c4   :  { %4380 = vmatpush.msrb.mxu1 %v4229_v29 }
 0x4c5   :  { %4280 = vmatpush.msrb.mxu0 %v4099_v46 }
 0x4c6   :  { %4381 = vmatpush.msrb.mxu1 %v4221_v39  ;;  %v4149_v39 = vld [vmem:[#allocation7 + $0x410] sm:$0xff] }
 0x4c7   :  { %4281 = vmatpush.msrb.mxu0 %v4091_v45 }
 0x4c8   :  { %4382 = vmatpush.msrb.mxu1 %v4213_v12 }
 0x4c9   :  { %4282 = vmatpush.msrb.mxu0 %v4083_v13 }
 0x4ca   :  { %4383 = vmatpush.msrb.mxu1 %v4205_v38 }
 0x4cc   :  { %4384 = vmatpush.msrb.mxu1 %v4197_v4 }
 0x4ce   :  { %4385 = vmatpush.msrb.mxu1 %v4189_v22 }
 0x4cf   :  { %v3791_v45 = vpop.f32.mrf.mxu3 }
 0x4d0   :  { %4386 = vmatpush.msrb.mxu1 %v4181_v25  ;;  %v4068_v25 = vld [vmem:[#allocation7 + $0x188] sm:$0xff] }
 0x4d2   :  { %4387 = vmatpush.msrb.mxu1 %v4173_v51  ;;  %v4126_v51 = vld [vmem:[#allocation7 + $0x358] sm:$0xff] }
 0x4d4   :  { %4388 = vmatpush.msrb.mxu1 %v4165_v58  ;;  %v4051_v58 = vld [vmem:[#allocation7 + $0x100] sm:$0xff] }
 0x4df   :  { %v3571_v56 = vpop.f32.mrf.mxu0 }
 0x4e0   :  { %v3592_v0 = vadd.f32 %v3591_v37, %v3571_v56  ;;  %v4157_v37 = vld [vmem:[#allocation7 + $0x450] sm:$0xff] }
 0x4e1   :  { %4389 = vmatpush.msrb.mxu1 %v4157_v37  ;;  %v4044_v37 = vld [vmem:[#allocation7 + $0xc8] sm:$0xff] }
 0x4e2   :  { %v3874_v14 = vadd.f32 %v3592_v0, %v6629_v41  ;;  %v4158_v0 = vld [vmem:[#allocation7 + $0x458] sm:$0xff] }
 0x4e3   :  { %4429 = vmatpush.msrb.mxu3 %v4158_v0  ;;  %4390 = vmatpush.msrb.mxu1 %v4149_v39 }
 0x4e4   :  { %v5946_v53 = vmul.f32 -1.442695, %v3874_v14  ;;  %v4100_v14 = vld [vmem:[#allocation7 + $0x288] sm:$0xff] }
 0x4e5   :  { %v3611_v40 = vpop.f32.mrf.mxu2  ;;  %4320 = vmatpush.msra.mxu2 %v4100_v14 }
 0x4e6   :  { %6132 = vpow2.f32 %v5946_v53  ;;  %v3632_v27 = vadd.f32 %v3631_v49, %v3611_v40  ;;  %v4150_v49 = vld [vmem:[#allocation7 + $0x418] sm:$0xff]  ;;  %v3671_v53 = vpop.f32.mrf.mxu1  ;;  %v4092_v40 = vld [vmem:[#allocation7 + $0x248] sm:$0xff] }
 0x4e7   :  { %v3651_v29 = vpop.f32.mrf.mxu0  ;;  %4430 = vmatpush.msrb.mxu3 %v4150_v49  ;;  %4321 = vmatpush.msra.mxu2 %v4092_v40  ;;  %v4036_v49 = vld [vmem:[#allocation7 + $0x88] sm:$0xff] }
 0x4e8   :  { %v3875_v20 = vadd.f32 %v3632_v27, %v6633_v6  ;;  %v3672_v27 = vadd.f32 %v3671_v53, %v3651_v29 }
 0x4ea   :  { %v5947_v11 = vmul.f32 -1.442695, %v3875_v20  ;;  %v4084_v20 = vld [vmem:[#allocation7 + $0x208] sm:$0xff]  ;;  %v3876_v22 = vadd.f32 %v3672_v27, %v6651_v36 }
 0x4eb   :  { %4322 = vmatpush.msra.mxu2 %v4084_v20  ;;  %v4027_v20 = vld [vmem:[#allocation7 + $0x40] sm:$0xff] }
 0x4ec   :  { %v6133_v18 = vpop.eup %6132  ;;  %6134 = vpow2.f32 %v5947_v11  ;;  %v4075_v11 = vld [vmem:[#allocation7 + $0x1c0] sm:$0xff] }
 0x4ed   :  { %v7147_v5 = vadd.f32 1.0, %v6133_v18  ;;  %v3691_v26 = vpop.f32.mrf.mxu2  ;;  %4283 = vmatpush.msrb.mxu0 %v4075_v11  ;;  %4323 = vmatpush.msra.mxu2 %v4076_v8 }
 0x4ee   :  { %v3712_v23 = vadd.f32 %v3711_v30, %v3691_v26  ;;  %v3751_v47 = vpop.f32.mrf.mxu1 }
 0x4ef   :  { %6136 = vrcp.f32 %v7147_v5  ;;  %v3893_v30 = vand.u32 2147483648, %v7147_v5  ;;  %4284 = vmatpush.msrb.mxu0 %v4067_v35  ;;  %4324 = vmatpush.msra.mxu2 %v4068_v25  ;;  %vm3887_vm15 = vweird.f32 %v7147_v5  ;;  %v3891_v7 = vand.u32 2147483647, %v7147_v5 }
 0x4f0   :  { %v3877_v1 = vadd.f32 %v3712_v23, %v6637_v34  ;;  %v4059_v23 = vld [vmem:[#allocation7 + $0x140] sm:$0xff] }
 0x4f1   :  { %4285 = vmatpush.msrb.mxu0 %v4059_v23  ;;  %4325 = vmatpush.msra.mxu2 %v4060_v32  ;;  %vm3892_vm3 = vcmp.eq.f32.partialorder %v3891_v7, 8.507059e+37  ;;  %v4133_v7 = vld [vmem:[#allocation7 + $0x390] sm:$0xff]  ;;  %v4134_v23 = vld [vmem:[#allocation7 + $0x398] sm:$0xff] }
 0x4f2   :  { %v6135_v10 = vpop.eup %6134  ;;  %v5948_v60 = vmul.f32 -1.442695, %v3877_v1 }
 0x4f3   :  { %v7151_v56 = vadd.f32 1.0, %v6135_v10  ;;  %v3894_v10 = vor.u32 1.1754944e-38, %v3893_v30  ;;  %4286 = vmatpush.msrb.mxu0 %v4051_v58  ;;  %4326 = vmatpush.msra.mxu2 %v4052_v59  ;;  %v4272_v59 = vld [vmem:[#allocation7 + $0x7e8] sm:$0xff] }
 0x4f4   :  { %6138 = vpow2.f32 %v5948_v60 }
 0x4f5   :  { %v7153_v62 = vpop.eup %6136  ;;  %6140 = vrcp.f32 %v7151_v56  ;;  %v3912_v48 = vand.u32 2147483648, %v7151_v56  ;;  %vm3906_vm2 = vweird.f32 %v7151_v56  ;;  %4287 = vmatpush.msrb.mxu0 %v4043_v24  ;;  %4327 = vmatpush.msra.mxu2 %v4044_v37  ;;  %v4264_v37 = vld [vmem:[#allocation7 + $0x7a8] sm:$0xff] }
 0x4f6   :  { %v3883_v12 = vmul.f32 %v7153_v62, %v7147_v5  ;;  %vm3888_vm14 = vweird.f32 %v7153_v62  ;;  %v3910_v5 = vand.u32 2147483647, %v7151_v56 }
 0x4f7   :  { %vm7170_vm0 = vmor %vm3887_vm15, %vm3888_vm14  ;;  %v3913_v29 = vor.u32 1.1754944e-38, %v3912_v48  ;;  %4328 = vmatpush.msra.mxu2 %v4036_v49  ;;  %v4125_v48 = vld [vmem:[#allocation7 + $0x350] sm:$0xff]  ;;  %v4094_v49 = vld [vmem:[#allocation7 + $0x258] sm:$0xff] }
 0x4f8   :  { %v3884_v38 = vsub.f32 1.0, %v3883_v12  ;;  %vm3911_vm5 = vcmp.eq.f32.partialorder %v3910_v5, 8.507059e+37 }
 0x4fa   :  { %v6139_v4 = vpop.eup %6138  ;;  %v3885_v21 = vmul.f32 %v7153_v62, %v3884_v38 }
 0x4fb   :  { %v6141_v52 = vpop.eup %6140  ;;  %v7160_v54 = vadd.f32 1.0, %v6139_v4  ;;  %v4028_v4 = vld [vmem:[#allocation7 + $0x48] sm:$0xff] }
 0x4fc   :  { %v3902_v18 = vmul.f32 %v6141_v52, %v7151_v56  ;;  %v3886_v61 = vadd.f32 %v7153_v62, %v3885_v21  ;;  %vm3907_vm1 = vweird.f32 %v6141_v52  ;;  %4329 = vmatpush.msra.mxu2 %v4028_v4  ;;  %v4078_v4 = vld [vmem:[#allocation7 + $0x1d8] sm:$0xff] }
 0x4fd   :  { %6142 = vrcp.f32 %v7160_v54  ;;  %vm3908_vm4 = vmor %vm3906_vm2, %vm3907_vm1  ;;  %v3932_v25 = vand.u32 2147483648, %v7160_v54  ;;  %vm3926_vm7 = vweird.f32 %v7160_v54  ;;  %v3930_v30 = vand.u32 2147483647, %v7160_v54 }
 0x4fe   :  { %v3903_v26 = vsub.f32 1.0, %v3902_v18  ;;  %6144 = vtanh.f32 %v3876_v22  ;;  %v3890_v43 = vsel %vm7170_vm0, %v7153_v62, %v3886_v61  ;;  %v4035_v62 = vld [vmem:[#allocation7 + $0x80] sm:$0xff]  ;;  %v4020_v22 = vld [vmem:[#allocation7 + $0x8] sm:$0xff]  ;;  %v4142_v61 = vld [vmem:[#allocation7 + $0x3d8] sm:$0xff] }
 0x4ff   :  { %v3895_v46 = vsel %vm3892_vm3, %v3894_v10, %v3890_v43  ;;  %4288 = vmatpush.msrb.mxu0 %v4035_v62  ;;  %4330 = vmatpush.msra.mxu2 %v4020_v22  ;;  %vm3931_vm9 = vcmp.eq.f32.partialorder %v3930_v30, 8.507059e+37  ;;  %v4109_v10 = vld [vmem:[#allocation7 + $0x2d0] sm:$0xff]  ;;  %v4070_v22 = vld [vmem:[#allocation7 + $0x198] sm:$0xff] }
 0x500   :  { %v3904_v1 = vmul.f32 %v6141_v52, %v3903_v26  ;;  %v3731_v17 = vpop.f32.mrf.mxu0  ;;  %v4093_v62 = vld [vmem:[#allocation7 + $0x250] sm:$0xff] }
 0x501   :  { %v3752_v60 = vadd.f32 %v3751_v47, %v3731_v17  ;;  %4289 = vmatpush.msrb.mxu0 %v4027_v20  ;;  %4395 = vmatpush.msrb.mxu2 %v4142_v61  ;;  %v3933_v47 = vor.u32 1.1754944e-38, %v3932_v25  ;;  %v4271_v17 = vld [vmem:[#allocation7 + $0x7e0] sm:$0xff]  ;;  %v4077_v20 = vld [vmem:[#allocation7 + $0x1d0] sm:$0xff]  ;;  %v4062_v61 = vld [vmem:[#allocation7 + $0x158] sm:$0xff] }
 0x502   :  { %v3905_v31 = vadd.f32 %v6141_v52, %v3904_v1  ;;  %v4118_v1 = vld [vmem:[#allocation7 + $0x318] sm:$0xff]  ;;  %v4216_v25 = vld [vmem:[#allocation7 + $0x628] sm:$0xff] }
 0x503   :  { %v7179_v0 = vpop.eup %6142  ;;  %v3949_v12 = vadd.f32 %v3752_v60, %v6476_v42  ;;  %4396 = vmatpush.msrb.mxu2 %v4134_v23  ;;  %v4110_v60 = vld [vmem:[#allocation7 + $0x2d8] sm:$0xff] }
 0x504   :  { %v3909_v14 = vsel %vm3908_vm4, %v6141_v52, %v3905_v31  ;;  %v3922_v39 = vmul.f32 %v7179_v0, %v7160_v54  ;;  %v6145_v56 = vpop.eup %6144  ;;  %v4019_v52 = vld [vmem:[#allocation7] sm:$0xff]  ;;  %vm3927_vm6 = vweird.f32 %v7179_v0  ;;  %v4117_v54 = vld [vmem:[#allocation7 + $0x310] sm:$0xff] }
 0x505   :  { %v3914_v53 = vsel %vm3911_vm5, %v3913_v29, %v3909_v14  ;;  %v3937_v27 = vmul.f32 %v6145_v56, %v3895_v46  ;;  %v5949_v42 = vmul.f32 -1.442695, %v3949_v12  ;;  %4290 = vmatpush.msrb.mxu0 %v4019_v52  ;;  %vm7198_vm8 = vmor %vm3926_vm7, %vm3927_vm6  ;;  %4397 = vmatpush.msrb.mxu2 %v4126_v51  ;;  %v4263_v31 = vld [vmem:[#allocation7 + $0x7a0] sm:$0xff]  ;;  %v4102_v29 = vld [vmem:[#allocation7 + $0x298] sm:$0xff] }
 0x506   :  { %v3936_v40 = vmul.f32 %v3914_v53, %v7056_v44  ;;  %v3923_v38 = vsub.f32 1.0, %v3922_v39  ;;  %v3771_v13 = vpop.f32.mrf.mxu2  ;;  %v4141_v44 = vld [vmem:[#allocation7 + $0x3d0] sm:$0xff]  ;;  %v4255_v14 = vld [vmem:[#allocation7 + $0x760] sm:$0xff]  ;;  %v4256_v39 = vld [vmem:[#allocation7 + $0x768] sm:$0xff] }
 0x507   :  { %v3792_v21 = vadd.f32 %v3791_v45, %v3771_v13  ;;  %4355 = vmatpush.msra.mxu0 %v4141_v44  ;;  %4398 = vmatpush.msrb.mxu2 %v4118_v1  ;;  %v4247_v53 = vld [vmem:[#allocation7 + $0x720] sm:$0xff]  ;;  %v4248_v45 = vld [vmem:[#allocation7 + $0x728] sm:$0xff]  ;;  %v4069_v52 = vld [vmem:[#allocation7 + $0x190] sm:$0xff] }
 0x508   :  { %v7186_v11 = vadd.f32 %v3937_v27, %v3936_v40  ;;  %v3924_v8 = vmul.f32 %v7179_v0, %v3923_v38  ;;  %v4085_v40 = vld [vmem:[#allocation7 + $0x210] sm:$0xff]  ;;  %v4086_v27 = vld [vmem:[#allocation7 + $0x218] sm:$0xff]  ;;  %v4239_v38 = vld [vmem:[#allocation7 + $0x6e0] sm:$0xff] }
 0x509   :  { %v3950_v18 = vadd.f32 %v3792_v21, %v6599_v50  ;;  %4356 = vmatpush.msra.mxu0 %v4133_v7  ;;  %4399 = vmatpush.msrb.mxu2 %v4110_v60  ;;  %v4240_v13 = vld [vmem:[#allocation7 + $0x6e8] sm:$0xff]  ;;  %v4231_v21 = vld [vmem:[#allocation7 + $0x6a0] sm:$0xff]  ;;  %v4061_v44 = vld [vmem:[#allocation7 + $0x150] sm:$0xff] }
 0x50a   :  { %6146 = vtanh.f32 %v7186_v11  ;;  %v3925_v35 = vadd.f32 %v7179_v0, %v3924_v8  ;;  %v4232_v8 = vld [vmem:[#allocation7 + $0x6a8] sm:$0xff]  ;;  %v4054_v7 = vld [vmem:[#allocation7 + $0x118] sm:$0xff]  ;;  %v4207_v50 = vld [vmem:[#allocation7 + $0x5e0] sm:$0xff] }
 0x50b   :  { %v5950_v26 = vmul.f32 -1.442695, %v3950_v18  ;;  %6148 = vpow2.f32 %v5949_v42  ;;  %4357 = vmatpush.msra.mxu0 %v4125_v48  ;;  %4400 = vmatpush.msrb.mxu2 %v4102_v29  ;;  %v4223_v42 = vld [vmem:[#allocation7 + $0x660] sm:$0xff]  ;;  %v4224_v18 = vld [vmem:[#allocation7 + $0x668] sm:$0xff]  ;;  %v4045_v48 = vld [vmem:[#allocation7 + $0xd0] sm:$0xff] }
 0x50c   :  { %v3929_v32 = vsel %vm7198_vm8, %v7179_v0, %v3925_v35  ;;  %v4101_v0 = vld [vmem:[#allocation7 + $0x290] sm:$0xff]  ;;  %v4215_v35 = vld [vmem:[#allocation7 + $0x620] sm:$0xff]  ;;  %v4046_v51 = vld [vmem:[#allocation7 + $0xd8] sm:$0xff] }
 0x50d   :  { %6150 = vpow2.f32 %v5950_v26  ;;  %v3934_v5 = vsel %vm3931_vm9, %v3933_v47, %v3929_v32  ;;  %4358 = vmatpush.msra.mxu0 %v4117_v54  ;;  %4401 = vmatpush.msrb.mxu2 %v4094_v49  ;;  %v4053_v26 = vld [vmem:[#allocation7 + $0x110] sm:$0xff]  ;;  %v4208_v32 = vld [vmem:[#allocation7 + $0x5e8] sm:$0xff]  ;;  %v4199_v47 = vld [vmem:[#allocation7 + $0x5a0] sm:$0xff] }
 0x50e   :  { %v4200_v54 = vld [vmem:[#allocation7 + $0x5a8] sm:$0xff]  ;;  %v4191_v60 = vld [vmem:[#allocation7 + $0x560] sm:$0xff]  ;;  %v4030_v29 = vld [vmem:[#allocation7 + $0x58] sm:$0xff] }
 0x50f   :  { %4359 = vmatpush.msra.mxu0 %v4109_v10  ;;  %4402 = vmatpush.msrb.mxu2 %v4086_v27  ;;  %v3831_v10 = vpop.f32.mrf.mxu1 }
 0x510   :  { %v6147_v43 = vpop.eup %6146 }
 0x511   :  { %v7205_v58 = vmul.f32 %v6147_v43, %v3934_v5  ;;  %v6149_v24 = vpop.eup %6148  ;;  %4360 = vmatpush.msra.mxu0 %v4101_v0  ;;  %4403 = vmatpush.msrb.mxu2 %v4078_v4  ;;  %v4029_v0 = vld [vmem:[#allocation7 + $0x50] sm:$0xff] }
 0x512   :  { %v7209_v56 = vadd.f32 1.0, %v6149_v24  ;;  %v3871_v24 = vpop.f32.mrf.mxu3 }
 0x513   :  { %4311 = vmatmul.f32.vlgmr.msra.gmra.mxu1 %v7205_v58  ;;  %4351 = vmatmul.f32.vlgmr.msra.gmra.mxu3 %v7205_v58  ;;  %v6151_v46 = vpop.eup %6150 }
 0x514   :  { %4455 = vmatpush.msra.mxu1 %v4271_v17  ;;  %4495 = vmatpush.msra.mxu3 %v4272_v59  ;;  %v7211_v12 = vadd.f32 1.0, %v6151_v46  ;;  %6152 = vrcp.f32 %v7209_v56  ;;  %v4037_v17 = vld [vmem:[#allocation7 + $0x90] sm:$0xff]  ;;  %v4038_v59 = vld [vmem:[#allocation7 + $0x98] sm:$0xff]  ;;  %vm3962_vm12 = vweird.f32 %v7209_v56 }
 0x515   :  { %4361 = vmatpush.msra.mxu0 %v4093_v62  ;;  %4404 = vmatpush.msrb.mxu2 %v4070_v22  ;;  %v4184_v62 = vld [vmem:[#allocation7 + $0x528] sm:$0xff] }
 0x516   :  { %4456 = vmatpush.msra.mxu1 %v4263_v31  ;;  %4496 = vmatpush.msra.mxu3 %v4264_v37  ;;  %6154 = vrcp.f32 %v7211_v12  ;;  %v4192_v31 = vld [vmem:[#allocation7 + $0x568] sm:$0xff]  ;;  %vm3981_vm13 = vweird.f32 %v7211_v12 }
 0x517   :  { %4362 = vmatpush.msra.mxu0 %v4085_v40  ;;  %4405 = vmatpush.msrb.mxu2 %v4062_v61  ;;  %v4022_v40 = vld [vmem:[#allocation7 + $0x18] sm:$0xff] }
 0x518   :  { %4457 = vmatpush.msra.mxu1 %v4255_v14  ;;  %4497 = vmatpush.msra.mxu3 %v4256_v39  ;;  %v4183_v39 = vld [vmem:[#allocation7 + $0x520] sm:$0xff] }
 0x519   :  { %4363 = vmatpush.msra.mxu0 %v4077_v20  ;;  %4406 = vmatpush.msrb.mxu2 %v4054_v7  ;;  %v4274_v7 = vld [vmem:[#allocation7 + $0x7f8] sm:$0xff] }
 0x51a   :  { %4458 = vmatpush.msra.mxu1 %v4247_v53  ;;  %4498 = vmatpush.msra.mxu3 %v4248_v45  ;;  %v7217_v30 = vpop.eup %6152  ;;  %v4021_v45 = vld [vmem:[#allocation7 + $0x10] sm:$0xff] }
 0x51b   :  { %4391 = vmatmul.f32.vlgmr.msrb.gmra.mxu1 %v7205_v58  ;;  %4431 = vmatmul.f32.vlgmr.msrb.gmra.mxu3 %v7205_v58  ;;  %v3958_v1 = vmul.f32 %v7217_v30, %v7209_v56  ;;  %vm3963_vm10 = vweird.f32 %v7217_v30 }
 0x51c   :  { %4459 = vmatpush.msra.mxu1 %v4239_v38  ;;  %4499 = vmatpush.msra.mxu3 %v4240_v13  ;;  %v7219_v23 = vpop.eup %6154  ;;  %v4175_v38 = vld [vmem:[#allocation7 + $0x4e0] sm:$0xff]  ;;  %v4176_v13 = vld [vmem:[#allocation7 + $0x4e8] sm:$0xff]  ;;  %vm7239_vm14 = vmor %vm3962_vm12, %vm3963_vm10 }
 0x51d   :  { %4364 = vmatpush.msra.mxu0 %v4069_v52  ;;  %v3977_v43 = vmul.f32 %v7219_v23, %v7211_v12  ;;  %4407 = vmatpush.msrb.mxu2 %v4046_v51  ;;  %v3959_v49 = vsub.f32 1.0, %v3958_v1  ;;  %vm3982_vm11 = vweird.f32 %v7219_v23  ;;  %v4266_v1 = vld [vmem:[#allocation7 + $0x7b8] sm:$0xff] }
 0x51e   :  { %4460 = vmatpush.msra.mxu1 %v4231_v21  ;;  %4500 = vmatpush.msra.mxu3 %v4232_v8  ;;  %v4167_v21 = vld [vmem:[#allocation7 + $0x4a0] sm:$0xff]  ;;  %v4168_v8 = vld [vmem:[#allocation7 + $0x4a8] sm:$0xff]  ;;  %vm7247_vm15 = vmor %vm3981_vm13, %vm3982_vm11 }
 0x51f   :  { %4365 = vmatpush.msra.mxu0 %v4061_v44  ;;  %4408 = vmatpush.msrb.mxu2 %v4038_v59  ;;  %v3978_v53 = vsub.f32 1.0, %v3977_v43  ;;  %v3960_v22 = vmul.f32 %v7217_v30, %v3959_v49 }
 0x520   :  { %4461 = vmatpush.msra.mxu1 %v4223_v42  ;;  %4501 = vmatpush.msra.mxu3 %v4224_v18  ;;  %v3811_v5 = vpop.f32.mrf.mxu0  ;;  %v4160_v42 = vld [vmem:[#allocation7 + $0x468] sm:$0xff] }
 0x521   :  { %4366 = vmatpush.msra.mxu0 %v4053_v26  ;;  %v3832_v46 = vadd.f32 %v3831_v10, %v3811_v5  ;;  %4409 = vmatpush.msrb.mxu2 %v4030_v29  ;;  %v3979_v52 = vmul.f32 %v7219_v23, %v3978_v53  ;;  %v4152_v18 = vld [vmem:[#allocation7 + $0x428] sm:$0xff]  ;;  %v3961_v44 = vadd.f32 %v7217_v30, %v3960_v22  ;;  %v4273_v26 = vld [vmem:[#allocation7 + $0x7f0] sm:$0xff]  ;;  %v4242_v29 = vld [vmem:[#allocation7 + $0x6f8] sm:$0xff] }
 0x522   :  { %4462 = vmatpush.msra.mxu1 %v4215_v35  ;;  %4502 = vmatpush.msra.mxu3 %v4216_v25  ;;  %v3987_v35 = vand.u32 2147483648, %v7211_v12  ;;  %v3968_v25 = vand.u32 2147483648, %v7209_v56  ;;  %v4257_v10 = vld [vmem:[#allocation7 + $0x770] sm:$0xff] }
 0x523   :  { %4367 = vmatpush.msra.mxu0 %v4045_v48  ;;  %v3951_v20 = vadd.f32 %v3832_v46, %v6605_v63  ;;  %4410 = vmatpush.msrb.mxu2 %v4022_v40  ;;  %v4151_v63 = vld [vmem:[#allocation7 + $0x420] sm:$0xff]  ;;  %v3980_v61 = vadd.f32 %v7219_v23, %v3979_v52  ;;  %v3985_v48 = vand.u32 2147483647, %v7211_v12  ;;  %v4226_v40 = vld [vmem:[#allocation7 + $0x678] sm:$0xff]  ;;  %v4201_v22 = vld [vmem:[#allocation7 + $0x5b0] sm:$0xff] }
 0x524   :  { %4463 = vmatpush.msra.mxu1 %v4207_v50  ;;  %4503 = vmatpush.msra.mxu3 %v4208_v32  ;;  %v3966_v32 = vand.u32 2147483647, %v7209_v56  ;;  %v3965_v56 = vsel %vm7239_vm14, %v7217_v30, %v3961_v44  ;;  %v3969_v59 = vor.u32 1.1754944e-38, %v3968_v25  ;;  %v4249_v30 = vld [vmem:[#allocation7 + $0x730] sm:$0xff]  ;;  %v4194_v44 = vld [vmem:[#allocation7 + $0x578] sm:$0xff] }
 0x525   :  { %4368 = vmatpush.msra.mxu0 %v4037_v17  ;;  %v3984_v12 = vsel %vm7247_vm15, %v7219_v23, %v3980_v61  ;;  %v3988_v17 = vor.u32 1.1754944e-38, %v3987_v35  ;;  %vm3986_vm1 = vcmp.eq.f32.partialorder %v3985_v48, 8.507059e+37  ;;  %v4241_v23 = vld [vmem:[#allocation7 + $0x6f0] sm:$0xff]  ;;  %v4135_v48 = vld [vmem:[#allocation7 + $0x3a0] sm:$0xff] }
 0x526   :  { %v3851_v37 = vpop.f32.mrf.mxu2  ;;  %4464 = vmatpush.msra.mxu1 %v4199_v47  ;;  %4504 = vmatpush.msra.mxu3 %v4200_v54  ;;  %v4265_v54 = vld [vmem:[#allocation7 + $0x7b0] sm:$0xff]  ;;  %vm3967_vm0 = vcmp.eq.f32.partialorder %v3966_v32, 8.507059e+37  ;;  %v4186_v32 = vld [vmem:[#allocation7 + $0x538] sm:$0xff] }
 0x527   :  { %v3872_v14 = vadd.f32 %v3871_v24, %v3851_v37  ;;  %4369 = vmatpush.msra.mxu0 %v4029_v0  ;;  %v3989_v24 = vsel %vm3986_vm1, %v3988_v17, %v3984_v12  ;;  %v4250_v37 = vld [vmem:[#allocation7 + $0x738] sm:$0xff]  ;;  %v4185_v50 = vld [vmem:[#allocation7 + $0x530] sm:$0xff]  ;;  %v4120_v17 = vld [vmem:[#allocation7 + $0x328] sm:$0xff] }
 0x528   :  { %4465 = vmatpush.msra.mxu1 %v4191_v60  ;;  %4505 = vmatpush.msra.mxu3 %v4192_v31  ;;  %v4258_v60 = vld [vmem:[#allocation7 + $0x778] sm:$0xff]  ;;  %v3970_v31 = vsel %vm3967_vm0, %v3969_v59, %v3965_v56  ;;  %v4011_v46 = vmul.f32 %v3989_v24, %v7130_v3  ;;  %v4177_v47 = vld [vmem:[#allocation7 + $0x4f0] sm:$0xff]  ;;  %v4128_v56 = vld [vmem:[#allocation7 + $0x368] sm:$0xff] }
 0x529   :  { %v3952_v27 = vadd.f32 %v3872_v14, %v6603_v57  ;;  %4370 = vmatpush.msra.mxu0 %v4021_v45  ;;  %v4159_v57 = vld [vmem:[#allocation7 + $0x460] sm:$0xff]  ;;  %v4233_v14 = vld [vmem:[#allocation7 + $0x6b0] sm:$0xff] }
 0x52a   :  { %4466 = vmatpush.msra.mxu1 %v4183_v39  ;;  %4506 = vmatpush.msra.mxu3 %v4184_v62  ;;  %v4234_v39 = vld [vmem:[#allocation7 + $0x6b8] sm:$0xff]  ;;  %v4225_v45 = vld [vmem:[#allocation7 + $0x670] sm:$0xff]  ;;  %v4111_v59 = vld [vmem:[#allocation7 + $0x2e0] sm:$0xff] }
 0x52b   :  { %v5951_v4 = vmul.f32 -1.442695, %v3952_v27  ;;  %v4169_v12 = vld [vmem:[#allocation7 + $0x4b0] sm:$0xff]  ;;  %v4103_v24 = vld [vmem:[#allocation7 + $0x2a0] sm:$0xff] }
 0x52c   :  { %4467 = vmatpush.msra.mxu1 %v4175_v38  ;;  %4507 = vmatpush.msra.mxu3 %v4176_v13  ;;  %v4217_v38 = vld [vmem:[#allocation7 + $0x630] sm:$0xff]  ;;  %v4218_v13 = vld [vmem:[#allocation7 + $0x638] sm:$0xff] }
 0x52d   :  { %6156 = vpow2.f32 %v5951_v4 }
 0x52e   :  { %4468 = vmatpush.msra.mxu1 %v4167_v21  ;;  %4508 = vmatpush.msra.mxu3 %v4168_v8  ;;  %6158 = vtanh.f32 %v3951_v20  ;;  %v4209_v21 = vld [vmem:[#allocation7 + $0x5f0] sm:$0xff]  ;;  %v4210_v8 = vld [vmem:[#allocation7 + $0x5f8] sm:$0xff] }
 0x530   :  { %4469 = vmatpush.msra.mxu1 %v4159_v57  ;;  %4509 = vmatpush.msra.mxu3 %v4160_v42  ;;  %v4202_v57 = vld [vmem:[#allocation7 + $0x5b8] sm:$0xff] }
 0x532   :  { %4470 = vmatpush.msra.mxu1 %v4151_v63  ;;  %4510 = vmatpush.msra.mxu3 %v4152_v18  ;;  %v4193_v18 = vld [vmem:[#allocation7 + $0x570] sm:$0xff] }
 0x533   :  { %v6157_v51 = vpop.eup %6156  ;;  %4471 = vmatmul.f32.vlgmr.msra.gmra.mxu1 %v7205_v58  ;;  %4511 = vmatmul.f32.vlgmr.msra.gmra.mxu3 %v7205_v58 }
 0x534   :  { %v3995_v43 = vadd.f32 1.0, %v6157_v51  ;;  %4535 = vmatpush.msrb.mxu1 %v4273_v26  ;;  %4575 = vmatpush.msrb.mxu3 %v4274_v7  ;;  %v6159_v5 = vpop.eup %6158  ;;  %v4143_v26 = vld [vmem:[#allocation7 + $0x3e0] sm:$0xff]  ;;  %v4144_v7 = vld [vmem:[#allocation7 + $0x3e8] sm:$0xff] }
 0x535   :  { %v4012_v0 = vmul.f32 %v6159_v5, %v3970_v31  ;;  %v4136_v51 = vld [vmem:[#allocation7 + $0x3a8] sm:$0xff]  ;;  %v4119_v5 = vld [vmem:[#allocation7 + $0x320] sm:$0xff]  ;;  %v4162_v31 = vld [vmem:[#allocation7 + $0x478] sm:$0xff] }
 0x536   :  { %6160 = vrcp.f32 %v3995_v43  ;;  %4536 = vmatpush.msrb.mxu1 %v4265_v54  ;;  %4576 = vmatpush.msrb.mxu3 %v4266_v1  ;;  %v4007_v3 = vand.u32 2147483648, %v3995_v43  ;;  %v4005_v4 = vand.u32 2147483647, %v3995_v43  ;;  %vm4001_vm3 = vweird.f32 %v3995_v43  ;;  %v4178_v54 = vld [vmem:[#allocation7 + $0x4f8] sm:$0xff]  ;;  %v4127_v1 = vld [vmem:[#allocation7 + $0x360] sm:$0xff] }
 0x537   :  { %v7260_v49 = vadd.f32 %v4012_v0, %v4011_v46  ;;  %v4154_v0 = vld [vmem:[#allocation7 + $0x438] sm:$0xff]  ;;  %v4087_v46 = vld [vmem:[#allocation7 + $0x220] sm:$0xff] }
 0x538   :  { %4537 = vmatpush.msrb.mxu1 %v4257_v10  ;;  %4577 = vmatpush.msrb.mxu3 %v4258_v60  ;;  %v4008_v42 = vor.u32 1.1754944e-38, %v4007_v3  ;;  %vm4006_vm5 = vcmp.eq.f32.partialorder %v4005_v4, 8.507059e+37  ;;  %v4112_v10 = vld [vmem:[#allocation7 + $0x2e8] sm:$0xff]  ;;  %v4161_v60 = vld [vmem:[#allocation7 + $0x470] sm:$0xff] }
 0x539   :  { %6162 = vtanh.f32 %v7260_v49  ;;  %v4048_v3 = vld [vmem:[#allocation7 + $0xe8] sm:$0xff] }
 0x53a   :  { %4538 = vmatpush.msrb.mxu1 %v4249_v30  ;;  %4578 = vmatpush.msrb.mxu3 %v4250_v37  ;;  %v4104_v30 = vld [vmem:[#allocation7 + $0x2a8] sm:$0xff]  ;;  %v4153_v37 = vld [vmem:[#allocation7 + $0x430] sm:$0xff] }
 0x53b   :  { %v4040_v4 = vld [vmem:[#allocation7 + $0xa8] sm:$0xff] }
 0x53c   :  { %v6161_v62 = vpop.eup %6160  ;;  %4539 = vmatpush.msrb.mxu1 %v4241_v23  ;;  %4579 = vmatpush.msrb.mxu3 %v4242_v29  ;;  %v4095_v23 = vld [vmem:[#allocation7 + $0x260] sm:$0xff]  ;;  %v4096_v29 = vld [vmem:[#allocation7 + $0x268] sm:$0xff] }
 0x53d   :  { %v3997_v53 = vmul.f32 %v6161_v62, %v3995_v43  ;;  %vm4002_vm2 = vweird.f32 %v6161_v62  ;;  %v4170_v43 = vld [vmem:[#allocation7 + $0x4b8] sm:$0xff] }
 0x53e   :  { %4540 = vmatpush.msrb.mxu1 %v4233_v14  ;;  %4580 = vmatpush.msrb.mxu3 %v4234_v39  ;;  %vm4003_vm4 = vmor %vm4001_vm3, %vm4002_vm2  ;;  %v4088_v14 = vld [vmem:[#allocation7 + $0x228] sm:$0xff]  ;;  %v4079_v39 = vld [vmem:[#allocation7 + $0x1e0] sm:$0xff] }
 0x53f   :  { %v3998_v27 = vsub.f32 1.0, %v3997_v53  ;;  %v6163_v61 = vpop.eup %6162  ;;  %v4071_v53 = vld [vmem:[#allocation7 + $0x1a0] sm:$0xff] }
 0x540   :  { %4541 = vmatpush.msrb.mxu1 %v4225_v45  ;;  %4581 = vmatpush.msrb.mxu3 %v4226_v40  ;;  %v4072_v45 = vld [vmem:[#allocation7 + $0x1a8] sm:$0xff]  ;;  %v4063_v40 = vld [vmem:[#allocation7 + $0x160] sm:$0xff] }
 0x541   :  { %v3999_v20 = vmul.f32 %v6161_v62, %v3998_v27  ;;  %v4064_v27 = vld [vmem:[#allocation7 + $0x168] sm:$0xff] }
 0x542   :  { %4542 = vmatpush.msrb.mxu1 %v4217_v38  ;;  %4582 = vmatpush.msrb.mxu3 %v4218_v13  ;;  %v4055_v38 = vld [vmem:[#allocation7 + $0x120] sm:$0xff]  ;;  %v4056_v13 = vld [vmem:[#allocation7 + $0x128] sm:$0xff] }
 0x543   :  { %v4000_v52 = vadd.f32 %v6161_v62, %v3999_v20  ;;  %v4039_v20 = vld [vmem:[#allocation7 + $0xa0] sm:$0xff] }
 0x544   :  { %4543 = vmatpush.msrb.mxu1 %v4209_v21  ;;  %4583 = vmatpush.msrb.mxu3 %v4210_v8  ;;  %v4031_v21 = vld [vmem:[#allocation7 + $0x60] sm:$0xff]  ;;  %v4032_v8 = vld [vmem:[#allocation7 + $0x68] sm:$0xff] }
 0x545   :  { %v4004_v63 = vsel %vm4003_vm4, %v6161_v62, %v4000_v52  ;;  %v4080_v62 = vld [vmem:[#allocation7 + $0x1e8] sm:$0xff]  ;;  %v4023_v52 = vld [vmem:[#allocation7 + $0x20] sm:$0xff] }
 0x546   :  { %v4009_v35 = vsel %vm4006_vm5, %v4008_v42, %v4004_v63  ;;  %4544 = vmatpush.msrb.mxu1 %v4201_v22  ;;  %4584 = vmatpush.msrb.mxu3 %v4202_v57  ;;  %v4024_v22 = vld [vmem:[#allocation7 + $0x28] sm:$0xff]  ;;  %v4145_v57 = vld [vmem:[#allocation7 + $0x3f0] sm:$0xff]  ;;  %v4146_v42 = vld [vmem:[#allocation7 + $0x3f8] sm:$0xff] }
 0x547   :  { %v7263_v25 = vmul.f32 %v6163_v61, %v4009_v35  ;;  %v4137_v63 = vld [vmem:[#allocation7 + $0x3b0] sm:$0xff]  ;;  %v4130_v61 = vld [vmem:[#allocation7 + $0x378] sm:$0xff] }
 0x548   :  { %4545 = vmatpush.msrb.mxu1 %v4193_v18  ;;  %4585 = vmatpush.msrb.mxu3 %v4194_v44  ;;  %v4138_v18 = vld [vmem:[#allocation7 + $0x3b8] sm:$0xff]  ;;  %v4129_v44 = vld [vmem:[#allocation7 + $0x370] sm:$0xff] }
 0x549   :  { %4291 = vmatmul.f32.vlgmr.msrb.gmra.mxu0 %v7263_v25  ;;  %4331 = vmatmul.f32.vlgmr.msra.gmra.mxu2 %v7263_v25  ;;  %v4121_v35 = vld [vmem:[#allocation7 + $0x330] sm:$0xff] }
 0x54a   :  { %4435 = vmatpush.msrb.mxu0 %v4143_v26  ;;  %4475 = vmatpush.msra.mxu2 %v4144_v7  ;;  %v4122_v26 = vld [vmem:[#allocation7 + $0x338] sm:$0xff]  ;;  %v4113_v7 = vld [vmem:[#allocation7 + $0x2f0] sm:$0xff] }
 0x54b   :  { %4546 = vmatpush.msrb.mxu1 %v4185_v50  ;;  %4586 = vmatpush.msrb.mxu3 %v4186_v32  ;;  %v4114_v50 = vld [vmem:[#allocation7 + $0x2f8] sm:$0xff]  ;;  %v4105_v32 = vld [vmem:[#allocation7 + $0x2b0] sm:$0xff] }
 0x54c   :  { %4436 = vmatpush.msrb.mxu0 %v4135_v48  ;;  %4476 = vmatpush.msra.mxu2 %v4136_v51  ;;  %v4106_v48 = vld [vmem:[#allocation7 + $0x2b8] sm:$0xff]  ;;  %v4097_v51 = vld [vmem:[#allocation7 + $0x270] sm:$0xff] }
 0x54d   :  { %4547 = vmatpush.msrb.mxu1 %v4177_v47  ;;  %4587 = vmatpush.msrb.mxu3 %v4178_v54  ;;  %v4098_v47 = vld [vmem:[#allocation7 + $0x278] sm:$0xff]  ;;  %v4089_v54 = vld [vmem:[#allocation7 + $0x230] sm:$0xff] }
 0x54e   :  { %4437 = vmatpush.msrb.mxu0 %v4127_v1  ;;  %4477 = vmatpush.msra.mxu2 %v4128_v56  ;;  %v4090_v1 = vld [vmem:[#allocation7 + $0x238] sm:$0xff]  ;;  %v4081_v56 = vld [vmem:[#allocation7 + $0x1f0] sm:$0xff] }
 0x54f   :  { %4548 = vmatpush.msrb.mxu1 %v4169_v12  ;;  %4588 = vmatpush.msrb.mxu3 %v4170_v43  ;;  %v4082_v12 = vld [vmem:[#allocation7 + $0x1f8] sm:$0xff]  ;;  %v4073_v43 = vld [vmem:[#allocation7 + $0x1b0] sm:$0xff] }
 0x550   :  { %4438 = vmatpush.msrb.mxu0 %v4119_v5  ;;  %4478 = vmatpush.msra.mxu2 %v4120_v17  ;;  %v4074_v5 = vld [vmem:[#allocation7 + $0x1b8] sm:$0xff]  ;;  %v4065_v17 = vld [vmem:[#allocation7 + $0x170] sm:$0xff] }
 0x551   :  { %4371 = vmatmul.f32.vlgmr.msra.gmra.mxu0 %v7263_v25  ;;  %4411 = vmatmul.f32.vlgmr.msrb.gmra.mxu2 %v7263_v25 }
 0x552   :  { %4439 = vmatpush.msrb.mxu0 %v4111_v59  ;;  %4479 = vmatpush.msra.mxu2 %v4112_v10  ;;  %v4066_v59 = vld [vmem:[#allocation7 + $0x178] sm:$0xff]  ;;  %v4057_v10 = vld [vmem:[#allocation7 + $0x130] sm:$0xff] }
 0x553   :  { %4549 = vmatpush.msrb.mxu1 %v4161_v60  ;;  %4589 = vmatpush.msrb.mxu3 %v4162_v31  ;;  %v4058_v60 = vld [vmem:[#allocation7 + $0x138] sm:$0xff]  ;;  %v4049_v31 = vld [vmem:[#allocation7 + $0xf0] sm:$0xff] }
 0x554   :  { %4440 = vmatpush.msrb.mxu0 %v4103_v24  ;;  %4480 = vmatpush.msra.mxu2 %v4104_v30  ;;  %v4050_v24 = vld [vmem:[#allocation7 + $0xf8] sm:$0xff]  ;;  %v4041_v30 = vld [vmem:[#allocation7 + $0xb0] sm:$0xff] }
 0x555   :  { %4550 = vmatpush.msrb.mxu1 %v4153_v37  ;;  %4590 = vmatpush.msrb.mxu3 %v4154_v0  ;;  %v4042_v37 = vld [vmem:[#allocation7 + $0xb8] sm:$0xff]  ;;  %v4033_v0 = vld [vmem:[#allocation7 + $0x70] sm:$0xff] }
 0x556   :  { %4551 = vmatmul.f32.vlgmr.msrb.gmra.mxu1 %v7205_v58  ;;  %4591 = vmatmul.f32.vlgmr.msrb.gmra.mxu3 %v7205_v58  ;;  %v4047_v58 = vld [vmem:[#allocation7 + $0xe0] sm:$0xff] }
 0x557   :  { %4441 = vmatpush.msrb.mxu0 %v4095_v23  ;;  %4481 = vmatpush.msra.mxu2 %v4096_v29  ;;  %v4034_v23 = vld [vmem:[#allocation7 + $0x78] sm:$0xff]  ;;  %v4025_v29 = vld [vmem:[#allocation7 + $0x30] sm:$0xff] }
 0x559   :  { %4442 = vmatpush.msrb.mxu0 %v4087_v46  ;;  %4482 = vmatpush.msra.mxu2 %v4088_v14  ;;  %v4026_v46 = vld [vmem:[#allocation7 + $0x38] sm:$0xff]  ;;  %v4988_v14 = vld [vmem:[#allocation7 + $0x7c0] sm:$0xff] }
 0x55a   :  { %5016 = vmatpush.msra.mxu1 %v4988_v14 }
 0x55b   :  { %4443 = vmatpush.msrb.mxu0 %v4079_v39  ;;  %4483 = vmatpush.msra.mxu2 %v4080_v62  ;;  %v4989_v39 = vld [vmem:[#allocation7 + $0x7c8] sm:$0xff]  ;;  %v4980_v62 = vld [vmem:[#allocation7 + $0x780] sm:$0xff] }
 0x55c   :  { %5056 = vmatpush.msra.mxu3 %v4989_v39  ;;  %5017 = vmatpush.msra.mxu1 %v4980_v62  ;;  %v4934_v62 = vld [vmem:[#allocation7 + $0x610] sm:$0xff] }
 0x55d   :  { %4444 = vmatpush.msrb.mxu0 %v4071_v53  ;;  %4484 = vmatpush.msra.mxu2 %v4072_v45  ;;  %v4981_v53 = vld [vmem:[#allocation7 + $0x788] sm:$0xff]  ;;  %v4972_v45 = vld [vmem:[#allocation7 + $0x740] sm:$0xff] }
 0x55e   :  { %5057 = vmatpush.msra.mxu3 %v4981_v53  ;;  %5018 = vmatpush.msra.mxu1 %v4972_v45  ;;  %v4935_v53 = vld [vmem:[#allocation7 + $0x618] sm:$0xff] }
 0x55f   :  { %4445 = vmatpush.msrb.mxu0 %v4063_v40  ;;  %4485 = vmatpush.msra.mxu2 %v4064_v27  ;;  %v4973_v40 = vld [vmem:[#allocation7 + $0x748] sm:$0xff]  ;;  %v4964_v27 = vld [vmem:[#allocation7 + $0x700] sm:$0xff] }
 0x560   :  { %5058 = vmatpush.msra.mxu3 %v4973_v40  ;;  %5019 = vmatpush.msra.mxu1 %v4964_v27  ;;  %v4926_v27 = vld [vmem:[#allocation7 + $0x5d0] sm:$0xff] }
 0x561   :  { %4446 = vmatpush.msrb.mxu0 %v4055_v38  ;;  %4486 = vmatpush.msra.mxu2 %v4056_v13  ;;  %v4965_v38 = vld [vmem:[#allocation7 + $0x708] sm:$0xff]  ;;  %v4956_v13 = vld [vmem:[#allocation7 + $0x6c0] sm:$0xff] }
 0x562   :  { %5059 = vmatpush.msra.mxu3 %v4965_v38  ;;  %5020 = vmatpush.msra.mxu1 %v4956_v13  ;;  %v4927_v38 = vld [vmem:[#allocation7 + $0x5d8] sm:$0xff] }
 0x563   :  { %4447 = vmatpush.msrb.mxu0 %v4047_v58  ;;  %4487 = vmatpush.msra.mxu2 %v4048_v3  ;;  %v4957_v58 = vld [vmem:[#allocation7 + $0x6c8] sm:$0xff] }
 0x564   :  { %5060 = vmatpush.msra.mxu3 %v4957_v58  ;;  %v4949_v3 = vld [vmem:[#allocation7 + $0x688] sm:$0xff]  ;;  %v4918_v58 = vld [vmem:[#allocation7 + $0x590] sm:$0xff] }
 0x565   :  { %4448 = vmatpush.msrb.mxu0 %v4039_v20  ;;  %4488 = vmatpush.msra.mxu2 %v4040_v4  ;;  %v4940_v20 = vld [vmem:[#allocation7 + $0x640] sm:$0xff]  ;;  %v4941_v4 = vld [vmem:[#allocation7 + $0x648] sm:$0xff] }
 0x566   :  { %5061 = vmatpush.msra.mxu3 %v4949_v3 }
 0x567   :  { %4449 = vmatpush.msrb.mxu0 %v4031_v21  ;;  %4489 = vmatpush.msra.mxu2 %v4032_v8  ;;  %v4932_v21 = vld [vmem:[#allocation7 + $0x600] sm:$0xff]  ;;  %v4933_v8 = vld [vmem:[#allocation7 + $0x608] sm:$0xff] }
 0x568   :  { %5062 = vmatpush.msra.mxu3 %v4941_v4  ;;  %v4861_v4 = vld [vmem:[#allocation7 + $0x3c8] sm:$0xff] }
 0x569   :  { %4450 = vmatpush.msrb.mxu0 %v4023_v52  ;;  %4490 = vmatpush.msra.mxu2 %v4024_v22  ;;  %v4924_v52 = vld [vmem:[#allocation7 + $0x5c0] sm:$0xff]  ;;  %v4925_v22 = vld [vmem:[#allocation7 + $0x5c8] sm:$0xff] }
 0x56a   :  { %4451 = vmatmul.f32.vlgmr.msrb.gmra.mxu0 %v7263_v25  ;;  %4491 = vmatmul.f32.vlgmr.msra.gmra.mxu2 %v7263_v25 }
 0x56b   :  { %4515 = vmatpush.msra.mxu0 %v4145_v57  ;;  %4555 = vmatpush.msrb.mxu2 %v4146_v42  ;;  %v4916_v57 = vld [vmem:[#allocation7 + $0x580] sm:$0xff]  ;;  %v4917_v42 = vld [vmem:[#allocation7 + $0x588] sm:$0xff] }
 0x56c   :  { %5063 = vmatpush.msra.mxu3 %v4933_v8  ;;  %v4911_v8 = vld [vmem:[#allocation7 + $0x558] sm:$0xff] }
 0x56d   :  { %4516 = vmatpush.msra.mxu0 %v4137_v63  ;;  %4556 = vmatpush.msrb.mxu2 %v4138_v18  ;;  %v4908_v63 = vld [vmem:[#allocation7 + $0x540] sm:$0xff]  ;;  %v4909_v18 = vld [vmem:[#allocation7 + $0x548] sm:$0xff] }
 0x56e   :  { %5064 = vmatpush.msra.mxu3 %v4925_v22  ;;  %v4852_v22 = vld [vmem:[#allocation7 + $0x380] sm:$0xff] }
 0x56f   :  { %4517 = vmatpush.msra.mxu0 %v4129_v44  ;;  %4557 = vmatpush.msrb.mxu2 %v4130_v61  ;;  %v4900_v44 = vld [vmem:[#allocation7 + $0x500] sm:$0xff]  ;;  %v4901_v61 = vld [vmem:[#allocation7 + $0x508] sm:$0xff] }
 0x570   :  { %5065 = vmatpush.msra.mxu3 %v4917_v42  ;;  %v4902_v42 = vld [vmem:[#allocation7 + $0x510] sm:$0xff] }
 0x571   :  { %4518 = vmatpush.msra.mxu0 %v4121_v35  ;;  %4558 = vmatpush.msrb.mxu2 %v4122_v26  ;;  %v4892_v35 = vld [vmem:[#allocation7 + $0x4c0] sm:$0xff]  ;;  %v4893_v26 = vld [vmem:[#allocation7 + $0x4c8] sm:$0xff] }
 0x572   :  { %5066 = vmatpush.msra.mxu3 %v4909_v18 }
 0x573   :  { %4519 = vmatpush.msra.mxu0 %v4113_v7  ;;  %4559 = vmatpush.msrb.mxu2 %v4114_v50  ;;  %v4884_v7 = vld [vmem:[#allocation7 + $0x480] sm:$0xff]  ;;  %v4885_v50 = vld [vmem:[#allocation7 + $0x488] sm:$0xff] }
 0x574   :  { %5067 = vmatpush.msra.mxu3 %v4901_v61  ;;  %v4903_v61 = vld [vmem:[#allocation7 + $0x518] sm:$0xff] }
 0x575   :  { %4520 = vmatpush.msra.mxu0 %v4105_v32  ;;  %4560 = vmatpush.msrb.mxu2 %v4106_v48  ;;  %v4876_v32 = vld [vmem:[#allocation7 + $0x440] sm:$0xff]  ;;  %v4877_v48 = vld [vmem:[#allocation7 + $0x448] sm:$0xff] }
 0x576   :  { %5068 = vmatpush.msra.mxu3 %v4893_v26  ;;  %v4844_v26 = vld [vmem:[#allocation7 + $0x340] sm:$0xff] }
 0x577   :  { %4521 = vmatpush.msra.mxu0 %v4097_v51  ;;  %4561 = vmatpush.msrb.mxu2 %v4098_v47  ;;  %v4868_v51 = vld [vmem:[#allocation7 + $0x400] sm:$0xff]  ;;  %v4869_v47 = vld [vmem:[#allocation7 + $0x408] sm:$0xff] }
 0x578   :  { %5069 = vmatpush.msra.mxu3 %v4885_v50  ;;  %v4894_v50 = vld [vmem:[#allocation7 + $0x4d0] sm:$0xff] }
 0x579   :  { %4522 = vmatpush.msra.mxu0 %v4089_v54  ;;  %4562 = vmatpush.msrb.mxu2 %v4090_v1  ;;  %v4990_v54 = vld [vmem:[#allocation7 + $0x7d0] sm:$0xff]  ;;  %v4991_v1 = vld [vmem:[#allocation7 + $0x7d8] sm:$0xff] }
 0x57a   :  { %5070 = vmatpush.msra.mxu3 %v4877_v48 }
 0x57b   :  { %4523 = vmatpush.msra.mxu0 %v4081_v56  ;;  %4563 = vmatpush.msrb.mxu2 %v4082_v12  ;;  %v4982_v56 = vld [vmem:[#allocation7 + $0x790] sm:$0xff]  ;;  %v4983_v12 = vld [vmem:[#allocation7 + $0x798] sm:$0xff] }
 0x57c   :  { %5071 = vmatpush.msra.mxu3 %v4869_v47  ;;  %v4837_v47 = vld [vmem:[#allocation7 + $0x308] sm:$0xff] }
 0x57d   :  { %4524 = vmatpush.msra.mxu0 %v4073_v43  ;;  %4564 = vmatpush.msrb.mxu2 %v4074_v5  ;;  %v4974_v43 = vld [vmem:[#allocation7 + $0x750] sm:$0xff]  ;;  %v4975_v5 = vld [vmem:[#allocation7 + $0x758] sm:$0xff] }
 0x57e   :  { %5136 = vmatpush.msrb.mxu3 %v4991_v1  ;;  %v4887_v1 = vld [vmem:[#allocation7 + $0x498] sm:$0xff] }
 0x57f   :  { %4525 = vmatpush.msra.mxu0 %v4065_v17  ;;  %4565 = vmatpush.msrb.mxu2 %v4066_v59  ;;  %v4966_v17 = vld [vmem:[#allocation7 + $0x710] sm:$0xff]  ;;  %v4967_v59 = vld [vmem:[#allocation7 + $0x718] sm:$0xff] }
 0x580   :  { %5137 = vmatpush.msrb.mxu3 %v4983_v12 }
 0x581   :  { %4526 = vmatpush.msra.mxu0 %v4057_v10  ;;  %4566 = vmatpush.msrb.mxu2 %v4058_v60  ;;  %v4958_v10 = vld [vmem:[#allocation7 + $0x6d0] sm:$0xff]  ;;  %v4959_v60 = vld [vmem:[#allocation7 + $0x6d8] sm:$0xff] }
 0x582   :  { %5138 = vmatpush.msrb.mxu3 %v4975_v5  ;;  %v4829_v5 = vld [vmem:[#allocation7 + $0x2c8] sm:$0xff] }
 0x583   :  { %4527 = vmatpush.msra.mxu0 %v4049_v31  ;;  %4567 = vmatpush.msrb.mxu2 %v4050_v24 }
 0x584   :  { %5139 = vmatpush.msrb.mxu3 %v4967_v59 }
 0x585   :  { %4528 = vmatpush.msra.mxu0 %v4041_v30  ;;  %4568 = vmatpush.msrb.mxu2 %v4042_v37  ;;  %v4950_v37 = vld [vmem:[#allocation7 + $0x690] sm:$0xff] }
 0x586   :  { %5140 = vmatpush.msrb.mxu3 %v4959_v60 }
 0x587   :  { %4529 = vmatpush.msra.mxu0 %v4033_v0  ;;  %4569 = vmatpush.msrb.mxu2 %v4034_v23  ;;  %v4951_v0 = vld [vmem:[#allocation7 + $0x698] sm:$0xff] }
 0x588   :  { %5141 = vmatpush.msrb.mxu3 %v4951_v0  ;;  %v4871_v0 = vld [vmem:[#allocation7 + $0x418] sm:$0xff] }
 0x589   :  { %4530 = vmatpush.msra.mxu0 %v4025_v29  ;;  %4570 = vmatpush.msrb.mxu2 %v4026_v46  ;;  %v4942_v29 = vld [vmem:[#allocation7 + $0x650] sm:$0xff]  ;;  %v4943_v46 = vld [vmem:[#allocation7 + $0x658] sm:$0xff] }
 0x58a   :  { %4531 = vmatmul.f32.vlgmr.msra.gmra.mxu0 %v7263_v25  ;;  %4571 = vmatmul.f32.vlgmr.msrb.gmra.mxu2 %v7263_v25  ;;  %v4948_v25 = vld [vmem:[#allocation7 + $0x680] sm:$0xff] }
 0x58b   :  { %5021 = vmatpush.msra.mxu1 %v4948_v25  ;;  %5142 = vmatpush.msrb.mxu3 %v4943_v46  ;;  %v4919_v25 = vld [vmem:[#allocation7 + $0x598] sm:$0xff]  ;;  %v4812_v46 = vld [vmem:[#allocation7 + $0x240] sm:$0xff] }
 0x58c   :  { %5036 = vmatpush.msra.mxu2 %v4861_v4 }
 0x58d   :  { %5022 = vmatpush.msra.mxu1 %v4940_v20  ;;  %5143 = vmatpush.msrb.mxu3 %v4935_v53  ;;  %v4860_v20 = vld [vmem:[#allocation7 + $0x3c0] sm:$0xff] }
 0x58e   :  { %4996 = vmatpush.msrb.mxu0 %v4860_v20  ;;  %v4804_v53 = vld [vmem:[#allocation7 + $0x200] sm:$0xff] }
 0x58f   :  { %5023 = vmatpush.msra.mxu1 %v4932_v21  ;;  %5144 = vmatpush.msrb.mxu3 %v4927_v38  ;;  %v4910_v21 = vld [vmem:[#allocation7 + $0x550] sm:$0xff]  ;;  %v4796_v38 = vld [vmem:[#allocation7 + $0x1c0] sm:$0xff] }
 0x590   :  { %v4312_v31 = vpop.f32.mrf.mxu1  ;;  %4997 = vmatpush.msrb.mxu0 %v4852_v22 }
 0x591   :  { %5024 = vmatpush.msra.mxu1 %v4924_v52  ;;  %5145 = vmatpush.msrb.mxu3 %v4919_v25 }
 0x592   :  { %4998 = vmatpush.msrb.mxu0 %v4844_v26 }
 0x593   :  { %5025 = vmatpush.msra.mxu1 %v4916_v57  ;;  %5146 = vmatpush.msrb.mxu3 %v4911_v8  ;;  %v4853_v57 = vld [vmem:[#allocation7 + $0x388] sm:$0xff] }
 0x594   :  { %5037 = vmatpush.msra.mxu2 %v4853_v57  ;;  %v4789_v8 = vld [vmem:[#allocation7 + $0x188] sm:$0xff] }
 0x595   :  { %5026 = vmatpush.msra.mxu1 %v4908_v63  ;;  %5147 = vmatpush.msrb.mxu3 %v4903_v61 }
 0x596   :  { %v4352_v14 = vpop.f32.mrf.mxu3 }
 0x597   :  { %5027 = vmatpush.msra.mxu1 %v4900_v44 }
 0x599   :  { %5028 = vmatpush.msra.mxu1 %v4892_v35 }
 0x59b   :  { %5029 = vmatpush.msra.mxu1 %v4884_v7  ;;  %v4845_v7 = vld [vmem:[#allocation7 + $0x348] sm:$0xff] }
 0x59c   :  { %5038 = vmatpush.msra.mxu2 %v4845_v7 }
 0x59d   :  { %5030 = vmatpush.msra.mxu1 %v4876_v32  ;;  %v4895_v32 = vld [vmem:[#allocation7 + $0x4d8] sm:$0xff] }
 0x59e   :  { %v4432_v63 = vpop.f32.mrf.mxu3  ;;  %5148 = vmatpush.msrb.mxu3 %v4895_v32  ;;  %5039 = vmatpush.msra.mxu2 %v4837_v47  ;;  %v4772_v32 = vld [vmem:[#allocation7 + $0x100] sm:$0xff] }
 0x59f   :  { %5031 = vmatpush.msra.mxu1 %v4868_v51  ;;  %v4836_v51 = vld [vmem:[#allocation7 + $0x300] sm:$0xff] }
 0x5a0   :  { %4999 = vmatpush.msrb.mxu0 %v4836_v51  ;;  %5149 = vmatpush.msrb.mxu3 %v4887_v1  ;;  %v4764_v1 = vld [vmem:[#allocation7 + $0xc0] sm:$0xff] }
 0x5a1   :  { %5096 = vmatpush.msrb.mxu1 %v4990_v54  ;;  %v4886_v54 = vld [vmem:[#allocation7 + $0x490] sm:$0xff]  ;;  %5040 = vmatpush.msra.mxu2 %v4829_v5 }
 0x5a3   :  { %5097 = vmatpush.msrb.mxu1 %v4982_v56 }
 0x5a5   :  { %5098 = vmatpush.msrb.mxu1 %v4974_v43  ;;  %v4828_v43 = vld [vmem:[#allocation7 + $0x2c0] sm:$0xff] }
 0x5a6   :  { %5000 = vmatpush.msrb.mxu0 %v4828_v43 }
 0x5a7   :  { %5099 = vmatpush.msrb.mxu1 %v4966_v17  ;;  %v4878_v17 = vld [vmem:[#allocation7 + $0x450] sm:$0xff] }
 0x5a9   :  { %5100 = vmatpush.msrb.mxu1 %v4958_v10  ;;  %v4879_v10 = vld [vmem:[#allocation7 + $0x458] sm:$0xff] }
 0x5aa   :  { %5150 = vmatpush.msrb.mxu3 %v4879_v10 }
 0x5ab   :  { %5101 = vmatpush.msrb.mxu1 %v4950_v37 }
 0x5ac   :  { %5151 = vmatpush.msrb.mxu3 %v4871_v0 }
 0x5ad   :  { %5102 = vmatpush.msrb.mxu1 %v4942_v29 }
 0x5af   :  { %5103 = vmatpush.msrb.mxu1 %v4934_v62 }
 0x5b1   :  { %5104 = vmatpush.msrb.mxu1 %v4926_v27 }
 0x5b3   :  { %5105 = vmatpush.msrb.mxu1 %v4918_v58 }
 0x5b5   :  { %5106 = vmatpush.msrb.mxu1 %v4910_v21  ;;  %v4788_v21 = vld [vmem:[#allocation7 + $0x180] sm:$0xff] }
 0x5b7   :  { %5107 = vmatpush.msrb.mxu1 %v4902_v42  ;;  %v4780_v42 = vld [vmem:[#allocation7 + $0x140] sm:$0xff] }
 0x5b9   :  { %5108 = vmatpush.msrb.mxu1 %v4894_v50 }
 0x5bb   :  { %5109 = vmatpush.msrb.mxu1 %v4886_v54 }
 0x5bd   :  { %5110 = vmatpush.msrb.mxu1 %v4878_v17 }
 0x5c6   :  { %v4292_v24 = vpop.f32.mrf.mxu0 }
 0x5c7   :  { %v4313_v30 = vadd.f32 %v4312_v31, %v4292_v24  ;;  %v4820_v31 = vld [vmem:[#allocation7 + $0x280] sm:$0xff]  ;;  %v4821_v24 = vld [vmem:[#allocation7 + $0x288] sm:$0xff] }
 0x5c8   :  { %5001 = vmatpush.msrb.mxu0 %v4820_v31  ;;  %5041 = vmatpush.msra.mxu2 %v4821_v24  ;;  %v4757_v31 = vld [vmem:[#allocation7 + $0x88] sm:$0xff] }
 0x5c9   :  { %v4595_v23 = vadd.f32 %v4313_v30, %v6629_v41  ;;  %v4870_v30 = vld [vmem:[#allocation7 + $0x410] sm:$0xff] }
 0x5ca   :  { %5111 = vmatpush.msrb.mxu1 %v4870_v30  ;;  %5002 = vmatpush.msrb.mxu0 %v4812_v46 }
 0x5cb   :  { %v5952_v39 = vmul.f32 -1.442695, %v4595_v23  ;;  %v4392_v23 = vpop.f32.mrf.mxu1 }
 0x5cc   :  { %v4332_v45 = vpop.f32.mrf.mxu2  ;;  %5003 = vmatpush.msrb.mxu0 %v4804_v53 }
 0x5cd   :  { %6164 = vpow2.f32 %v5952_v39  ;;  %v4353_v40 = vadd.f32 %v4352_v14, %v4332_v45  ;;  %v4813_v14 = vld [vmem:[#allocation7 + $0x248] sm:$0xff] }
 0x5ce   :  { %v4372_v60 = vpop.f32.mrf.mxu0  ;;  %5042 = vmatpush.msra.mxu2 %v4813_v14  ;;  %v4805_v45 = vld [vmem:[#allocation7 + $0x208] sm:$0xff]  ;;  %5004 = vmatpush.msrb.mxu0 %v4796_v38  ;;  %v4748_v14 = vld [vmem:[#allocation7 + $0x40] sm:$0xff] }
 0x5cf   :  { %v4596_v13 = vadd.f32 %v4353_v40, %v6633_v6  ;;  %v4393_v39 = vadd.f32 %v4392_v23, %v4372_v60  ;;  %v4756_v60 = vld [vmem:[#allocation7 + $0x80] sm:$0xff] }
 0x5d0   :  { %5043 = vmatpush.msra.mxu2 %v4805_v45  ;;  %5005 = vmatpush.msrb.mxu0 %v4788_v21  ;;  %v4854_v21 = vld [vmem:[#allocation7 + $0x390] sm:$0xff] }
 0x5d1   :  { %v5953_v3 = vmul.f32 -1.442695, %v4596_v13  ;;  %v4797_v13 = vld [vmem:[#allocation7 + $0x1c8] sm:$0xff]  ;;  %v4597_v25 = vadd.f32 %v4393_v39, %v6651_v36 }
 0x5d2   :  { %5044 = vmatpush.msra.mxu2 %v4797_v13  ;;  %5006 = vmatpush.msrb.mxu0 %v4780_v42  ;;  %v4749_v39 = vld [vmem:[#allocation7 + $0x48] sm:$0xff]  ;;  %v4863_v13 = vld [vmem:[#allocation7 + $0x3d8] sm:$0xff] }
 0x5d3   :  { %v6165_v52 = vpop.eup %6164  ;;  %6166 = vpow2.f32 %v5953_v3 }
 0x5d4   :  { %v7277_v18 = vadd.f32 1.0, %v6165_v52  ;;  %v4412_v44 = vpop.f32.mrf.mxu2  ;;  %5045 = vmatpush.msra.mxu2 %v4789_v8  ;;  %5007 = vmatpush.msrb.mxu0 %v4772_v32  ;;  %v4855_v8 = vld [vmem:[#allocation7 + $0x398] sm:$0xff]  ;;  %v4984_v32 = vld [vmem:[#allocation7 + $0x7a0] sm:$0xff] }
 0x5d5   :  { %v4433_v35 = vadd.f32 %v4432_v63, %v4412_v44  ;;  %v4781_v63 = vld [vmem:[#allocation7 + $0x148] sm:$0xff] }
 0x5d6   :  { %6168 = vrcp.f32 %v7277_v18  ;;  %v4614_v52 = vand.u32 2147483648, %v7277_v18  ;;  %vm4608_vm7 = vweird.f32 %v7277_v18  ;;  %v4612_v57 = vand.u32 2147483647, %v7277_v18  ;;  %5046 = vmatpush.msra.mxu2 %v4781_v63  ;;  %5008 = vmatpush.msrb.mxu0 %v4764_v1  ;;  %v4839_v63 = vld [vmem:[#allocation7 + $0x318] sm:$0xff] }
 0x5d7   :  { %v4598_v48 = vadd.f32 %v4433_v35, %v6637_v34  ;;  %v4472_v35 = vpop.f32.mrf.mxu1 }
 0x5d8   :  { %v4615_v51 = vor.u32 1.1754944e-38, %v4614_v52  ;;  %vm4613_vm11 = vcmp.eq.f32.partialorder %v4612_v57, 8.507059e+37  ;;  %5009 = vmatpush.msrb.mxu0 %v4756_v60  ;;  %v4847_v57 = vld [vmem:[#allocation7 + $0x358] sm:$0xff] }
 0x5d9   :  { %v6167_v56 = vpop.eup %6166  ;;  %v5954_v12 = vmul.f32 -1.442695, %v4598_v48  ;;  %v4773_v48 = vld [vmem:[#allocation7 + $0x108] sm:$0xff] }
 0x5da   :  { %v7281_v59 = vadd.f32 1.0, %v6167_v56  ;;  %5047 = vmatpush.msra.mxu2 %v4773_v48  ;;  %v4765_v56 = vld [vmem:[#allocation7 + $0xc8] sm:$0xff]  ;;  %5010 = vmatpush.msrb.mxu0 %v4748_v14  ;;  %v4790_v14 = vld [vmem:[#allocation7 + $0x190] sm:$0xff] }
 0x5db   :  { %6170 = vpow2.f32 %v5954_v12 }
 0x5dc   :  { %v7283_v37 = vpop.eup %6168  ;;  %6172 = vrcp.f32 %v7281_v59  ;;  %v4633_v44 = vand.u32 2147483648, %v7281_v59  ;;  %vm4627_vm10 = vweird.f32 %v7281_v59  ;;  %5048 = vmatpush.msra.mxu2 %v4765_v56  ;;  %v4976_v56 = vld [vmem:[#allocation7 + $0x760] sm:$0xff] }
 0x5dd   :  { %v4604_v29 = vmul.f32 %v7283_v37, %v7277_v18  ;;  %vm4609_vm6 = vweird.f32 %v7283_v37  ;;  %v4631_v18 = vand.u32 2147483647, %v7281_v59 }
 0x5de   :  { %vm7300_vm8 = vmor %vm4608_vm7, %vm4609_vm6  ;;  %v4634_v43 = vor.u32 1.1754944e-38, %v4633_v44  ;;  %5049 = vmatpush.msra.mxu2 %v4757_v31  ;;  %v4969_v31 = vld [vmem:[#allocation7 + $0x728] sm:$0xff] }
 0x5df   :  { %v4605_v62 = vsub.f32 1.0, %v4604_v29  ;;  %vm4632_vm13 = vcmp.eq.f32.partialorder %v4631_v18, 8.507059e+37  ;;  %v4830_v18 = vld [vmem:[#allocation7 + $0x2d0] sm:$0xff] }
 0x5e0   :  { %5050 = vmatpush.msra.mxu2 %v4749_v39  ;;  %v4791_v39 = vld [vmem:[#allocation7 + $0x198] sm:$0xff] }
 0x5e1   :  { %v6171_v40 = vpop.eup %6170  ;;  %v4606_v27 = vmul.f32 %v7283_v37, %v4605_v62 }
 0x5e2   :  { %v6173_v58 = vpop.eup %6172  ;;  %v7290_v3 = vadd.f32 1.0, %v6171_v40  ;;  %v4740_v40 = vld [vmem:[#allocation7] sm:$0xff] }
 0x5e3   :  { %v4623_v20 = vmul.f32 %v6173_v58, %v7281_v59  ;;  %v4607_v4 = vadd.f32 %v7283_v37, %v4606_v27  ;;  %vm4628_vm9 = vweird.f32 %v6173_v58  ;;  %v4741_v27 = vld [vmem:[#allocation7 + $0x8] sm:$0xff]  ;;  %5011 = vmatpush.msrb.mxu0 %v4740_v40  ;;  %v4782_v40 = vld [vmem:[#allocation7 + $0x150] sm:$0xff] }
 0x5e4   :  { %6174 = vrcp.f32 %v7290_v3  ;;  %vm4629_vm12 = vmor %vm4627_vm10, %vm4628_vm9  ;;  %5051 = vmatpush.msra.mxu2 %v4741_v27  ;;  %vm4647_vm15 = vweird.f32 %v7290_v3  ;;  %v4783_v27 = vld [vmem:[#allocation7 + $0x158] sm:$0xff] }
 0x5e5   :  { %v4624_v22 = vsub.f32 1.0, %v4623_v20  ;;  %6176 = vtanh.f32 %v4597_v25  ;;  %v4611_v7 = vsel %vm7300_vm8, %v7283_v37, %v4607_v4  ;;  %v4512_v37 = vpop.f32.mrf.mxu3  ;;  %v4653_v25 = vand.u32 2147483648, %v7290_v3 }
 0x5e6   :  { %v4616_v5 = vsel %vm4613_vm11, %v4615_v51, %v4611_v7  ;;  %5116 = vmatpush.msrb.mxu2 %v4863_v13  ;;  %v4651_v20 = vand.u32 2147483647, %v7290_v3  ;;  %v4993_v7 = vld [vmem:[#allocation7 + $0x7e8] sm:$0xff]  ;;  %v4774_v13 = vld [vmem:[#allocation7 + $0x110] sm:$0xff] }
 0x5e7   :  { %v4625_v26 = vmul.f32 %v6173_v58, %v4624_v22  ;;  %v4452_v50 = vpop.f32.mrf.mxu0  ;;  %v4846_v22 = vld [vmem:[#allocation7 + $0x350] sm:$0xff]  ;;  %v4654_v42 = vor.u32 1.1754944e-38, %v4653_v25  ;;  %v4985_v51 = vld [vmem:[#allocation7 + $0x7a8] sm:$0xff] }
 0x5e8   :  { %v4473_v47 = vadd.f32 %v4472_v35, %v4452_v50  ;;  %5117 = vmatpush.msrb.mxu2 %v4855_v8  ;;  %vm4652_vm1 = vcmp.eq.f32.partialorder %v4651_v20, 8.507059e+37  ;;  %v4992_v35 = vld [vmem:[#allocation7 + $0x7e0] sm:$0xff]  ;;  %v4831_v50 = vld [vmem:[#allocation7 + $0x2d8] sm:$0xff] }
 0x5e9   :  { %v4626_v54 = vadd.f32 %v6173_v58, %v4625_v26  ;;  %v4928_v20 = vld [vmem:[#allocation7 + $0x5e0] sm:$0xff]  ;;  %v4767_v8 = vld [vmem:[#allocation7 + $0xd8] sm:$0xff] }
 0x5ea   :  { %v7309_v12 = vpop.eup %6174  ;;  %v4670_v30 = vadd.f32 %v4473_v47, %v6499_v16  ;;  %5118 = vmatpush.msrb.mxu2 %v4847_v57  ;;  %v4822_v47 = vld [vmem:[#allocation7 + $0x290] sm:$0xff] }
 0x5eb   :  { %v4630_v17 = vsel %vm4629_vm12, %v6173_v58, %v4626_v54  ;;  %v4643_v10 = vmul.f32 %v7309_v12, %v7290_v3  ;;  %v6177_v59 = vpop.eup %6176  ;;  %vm4648_vm14 = vweird.f32 %v7309_v12  ;;  %v4838_v3 = vld [vmem:[#allocation7 + $0x310] sm:$0xff]  ;;  %v4823_v54 = vld [vmem:[#allocation7 + $0x298] sm:$0xff] }
 0x5ec   :  { %v4635_v24 = vsel %vm4632_vm13, %v4634_v43, %v4630_v17  ;;  %v4658_v23 = vmul.f32 %v6177_v59, %v4616_v5  ;;  %v5955_v16 = vmul.f32 -1.442695, %v4670_v30  ;;  %vm7328_vm0 = vmor %vm4647_vm15, %vm4648_vm14  ;;  %5119 = vmatpush.msrb.mxu2 %v4839_v63  ;;  %v4814_v43 = vld [vmem:[#allocation7 + $0x250] sm:$0xff]  ;;  %v4815_v5 = vld [vmem:[#allocation7 + $0x258] sm:$0xff] }
 0x5ed   :  { %v4657_v0 = vmul.f32 %v4635_v24, %v7186_v11  ;;  %v4644_v29 = vsub.f32 1.0, %v4643_v10  ;;  %v4492_v46 = vpop.f32.mrf.mxu2  ;;  %v4862_v11 = vld [vmem:[#allocation7 + $0x3d0] sm:$0xff]  ;;  %v4968_v10 = vld [vmem:[#allocation7 + $0x720] sm:$0xff]  ;;  %v4807_v24 = vld [vmem:[#allocation7 + $0x218] sm:$0xff] }
 0x5ee   :  { %v4513_v62 = vadd.f32 %v4512_v37, %v4492_v46  ;;  %5076 = vmatpush.msra.mxu0 %v4862_v11  ;;  %5120 = vmatpush.msrb.mxu2 %v4831_v50  ;;  %v4806_v59 = vld [vmem:[#allocation7 + $0x210] sm:$0xff]  ;;  %v4960_v30 = vld [vmem:[#allocation7 + $0x6e0] sm:$0xff]  ;;  %v4961_v37 = vld [vmem:[#allocation7 + $0x6e8] sm:$0xff] }
 0x5ef   :  { %v7316_v53 = vadd.f32 %v4658_v23, %v4657_v0  ;;  %v4645_v45 = vmul.f32 %v7309_v12, %v4644_v29  ;;  %v4798_v0 = vld [vmem:[#allocation7 + $0x1d0] sm:$0xff]  ;;  %v4799_v23 = vld [vmem:[#allocation7 + $0x1d8] sm:$0xff]  ;;  %v4952_v29 = vld [vmem:[#allocation7 + $0x6a0] sm:$0xff] }
 0x5f0   :  { %v4671_v38 = vadd.f32 %v4513_v62, %v6607_v2  ;;  %5077 = vmatpush.msra.mxu0 %v4854_v21  ;;  %5121 = vmatpush.msrb.mxu2 %v4823_v54  ;;  %v4953_v46 = vld [vmem:[#allocation7 + $0x6a8] sm:$0xff]  ;;  %v4944_v62 = vld [vmem:[#allocation7 + $0x660] sm:$0xff]  ;;  %v4766_v21 = vld [vmem:[#allocation7 + $0xd0] sm:$0xff] }
 0x5f1   :  { %6178 = vtanh.f32 %v7316_v53  ;;  %v4646_v58 = vadd.f32 %v7309_v12, %v4645_v45  ;;  %v4945_v45 = vld [vmem:[#allocation7 + $0x668] sm:$0xff]  ;;  %v4920_v2 = vld [vmem:[#allocation7 + $0x5a0] sm:$0xff]  ;;  %v4759_v63 = vld [vmem:[#allocation7 + $0x98] sm:$0xff] }
 0x5f2   :  { %v5956_v4 = vmul.f32 -1.442695, %v4671_v38  ;;  %6180 = vpow2.f32 %v5955_v16  ;;  %5078 = vmatpush.msra.mxu0 %v4846_v22  ;;  %5122 = vmatpush.msrb.mxu2 %v4815_v5  ;;  %v4936_v16 = vld [vmem:[#allocation7 + $0x620] sm:$0xff]  ;;  %v4937_v38 = vld [vmem:[#allocation7 + $0x628] sm:$0xff]  ;;  %v4750_v50 = vld [vmem:[#allocation7 + $0x50] sm:$0xff] }
 0x5f3   :  { %v4650_v52 = vsel %vm7328_vm0, %v7309_v12, %v4646_v58  ;;  %v4977_v12 = vld [vmem:[#allocation7 + $0x768] sm:$0xff]  ;;  %v4775_v58 = vld [vmem:[#allocation7 + $0x118] sm:$0xff] }
 0x5f4   :  { %6182 = vpow2.f32 %v5956_v4  ;;  %v4655_v61 = vsel %vm4652_vm1, %v4654_v42, %v4650_v52  ;;  %5079 = vmatpush.msra.mxu0 %v4838_v3  ;;  %5123 = vmatpush.msrb.mxu2 %v4807_v24  ;;  %v4929_v4 = vld [vmem:[#allocation7 + $0x5e8] sm:$0xff]  ;;  %v4758_v3 = vld [vmem:[#allocation7 + $0x90] sm:$0xff] }
 0x5f5   :  { %v4921_v52 = vld [vmem:[#allocation7 + $0x5a8] sm:$0xff] }
 0x5f6   :  { %5080 = vmatpush.msra.mxu0 %v4830_v18  ;;  %5124 = vmatpush.msrb.mxu2 %v4799_v23  ;;  %v4905_v54 = vld [vmem:[#allocation7 + $0x528] sm:$0xff] }
 0x5f7   :  { %v6179_v44 = vpop.eup %6178 }
 0x5f8   :  { %v7335_v26 = vmul.f32 %v6179_v44, %v4655_v61  ;;  %v6181_v48 = vpop.eup %6180  ;;  %5081 = vmatpush.msra.mxu0 %v4822_v47  ;;  %5125 = vmatpush.msrb.mxu2 %v4791_v39  ;;  %v4552_v44 = vpop.f32.mrf.mxu1  ;;  %v4912_v61 = vld [vmem:[#allocation7 + $0x560] sm:$0xff] }
 0x5f9   :  { %v7339_v17 = vadd.f32 1.0, %v6181_v48  ;;  %v4904_v47 = vld [vmem:[#allocation7 + $0x520] sm:$0xff] }
 0x5fa   :  { %5032 = vmatmul.f32.vlgmr.msra.gmra.mxu1 %v7335_v26  ;;  %5072 = vmatmul.f32.vlgmr.msra.gmra.mxu3 %v7335_v26  ;;  %v6183_v1 = vpop.eup %6182 }
 0x5fb   :  { %5176 = vmatpush.msra.mxu1 %v4992_v35  ;;  %5216 = vmatpush.msra.mxu3 %v4993_v7  ;;  %v7341_v60 = vadd.f32 1.0, %v6183_v1  ;;  %6184 = vrcp.f32 %v7339_v17  ;;  %v4913_v35 = vld [vmem:[#allocation7 + $0x568] sm:$0xff]  ;;  %v4592_v7 = vpop.f32.mrf.mxu3  ;;  %vm4683_vm4 = vweird.f32 %v7339_v17 }
 0x5fc   :  { %5082 = vmatpush.msra.mxu0 %v4814_v43  ;;  %5126 = vmatpush.msrb.mxu2 %v4783_v27  ;;  %v4743_v43 = vld [vmem:[#allocation7 + $0x18] sm:$0xff] }
 0x5fd   :  { %5177 = vmatpush.msra.mxu1 %v4984_v32  ;;  %5217 = vmatpush.msra.mxu3 %v4985_v51  ;;  %6186 = vrcp.f32 %v7341_v60  ;;  %v4751_v32 = vld [vmem:[#allocation7 + $0x58] sm:$0xff]  ;;  %vm4702_vm5 = vweird.f32 %v7341_v60 }
 0x5fe   :  { %5083 = vmatpush.msra.mxu0 %v4806_v59  ;;  %5127 = vmatpush.msrb.mxu2 %v4775_v58  ;;  %v4995_v27 = vld [vmem:[#allocation7 + $0x7f8] sm:$0xff] }
 0x5ff   :  { %5178 = vmatpush.msra.mxu1 %v4976_v56  ;;  %5218 = vmatpush.msra.mxu3 %v4977_v12  ;;  %v4742_v12 = vld [vmem:[#allocation7 + $0x10] sm:$0xff] }
 0x600   :  { %5084 = vmatpush.msra.mxu0 %v4798_v0  ;;  %5128 = vmatpush.msrb.mxu2 %v4767_v8 }
 0x601   :  { %5179 = vmatpush.msra.mxu1 %v4968_v10  ;;  %5219 = vmatpush.msra.mxu3 %v4969_v31  ;;  %v7347_v11 = vpop.eup %6184  ;;  %v4896_v10 = vld [vmem:[#allocation7 + $0x4e0] sm:$0xff]  ;;  %v4897_v31 = vld [vmem:[#allocation7 + $0x4e8] sm:$0xff] }
 0x602   :  { %5112 = vmatmul.f32.vlgmr.msrb.gmra.mxu1 %v7335_v26  ;;  %5152 = vmatmul.f32.vlgmr.msrb.gmra.mxu3 %v7335_v26  ;;  %v4679_v22 = vmul.f32 %v7347_v11, %v7339_v17  ;;  %vm4684_vm2 = vweird.f32 %v7347_v11 }
 0x603   :  { %5180 = vmatpush.msra.mxu1 %v4960_v30  ;;  %5220 = vmatpush.msra.mxu3 %v4961_v37  ;;  %v7349_v25 = vpop.eup %6186  ;;  %v4888_v30 = vld [vmem:[#allocation7 + $0x4a0] sm:$0xff]  ;;  %v4889_v37 = vld [vmem:[#allocation7 + $0x4a8] sm:$0xff]  ;;  %vm7369_vm6 = vmor %vm4683_vm4, %vm4684_vm2 }
 0x604   :  { %5085 = vmatpush.msra.mxu0 %v4790_v14  ;;  %v4698_v57 = vmul.f32 %v7349_v25, %v7341_v60  ;;  %5129 = vmatpush.msrb.mxu2 %v4759_v63  ;;  %v4680_v1 = vsub.f32 1.0, %v4679_v22  ;;  %vm4703_vm3 = vweird.f32 %v7349_v25 }
 0x605   :  { %5181 = vmatpush.msra.mxu1 %v4952_v29  ;;  %5221 = vmatpush.msra.mxu3 %v4953_v46  ;;  %v4881_v29 = vld [vmem:[#allocation7 + $0x468] sm:$0xff]  ;;  %vm7377_vm7 = vmor %vm4702_vm5, %vm4703_vm3 }
 0x606   :  { %5086 = vmatpush.msra.mxu0 %v4782_v40  ;;  %v4699_v56 = vsub.f32 1.0, %v4698_v57  ;;  %5130 = vmatpush.msrb.mxu2 %v4751_v32  ;;  %v4681_v23 = vmul.f32 %v7347_v11, %v4680_v1  ;;  %v4873_v46 = vld [vmem:[#allocation7 + $0x428] sm:$0xff]  ;;  %v4994_v40 = vld [vmem:[#allocation7 + $0x7f0] sm:$0xff] }
 0x607   :  { %5182 = vmatpush.msra.mxu1 %v4944_v62  ;;  %5222 = vmatpush.msra.mxu3 %v4945_v45  ;;  %v4532_v42 = vpop.f32.mrf.mxu0  ;;  %v4708_v62 = vand.u32 2147483648, %v7341_v60  ;;  %v4689_v45 = vand.u32 2147483648, %v7339_v17  ;;  %v4978_v57 = vld [vmem:[#allocation7 + $0x770] sm:$0xff] }
 0x608   :  { %5087 = vmatpush.msra.mxu0 %v4774_v13  ;;  %v4553_v48 = vadd.f32 %v4552_v44, %v4532_v42  ;;  %5131 = vmatpush.msrb.mxu2 %v4743_v43  ;;  %v4700_v0 = vmul.f32 %v7349_v25, %v4699_v56  ;;  %v4682_v14 = vadd.f32 %v7347_v11, %v4681_v23  ;;  %v4706_v13 = vand.u32 2147483647, %v7341_v60  ;;  %v4979_v42 = vld [vmem:[#allocation7 + $0x778] sm:$0xff]  ;;  %v4938_v56 = vld [vmem:[#allocation7 + $0x630] sm:$0xff] }
 0x609   :  { %5183 = vmatpush.msra.mxu1 %v4936_v16  ;;  %5223 = vmatpush.msra.mxu3 %v4937_v38  ;;  %v4687_v38 = vand.u32 2147483647, %v7339_v17  ;;  %v4690_v22 = vor.u32 1.1754944e-38, %v4689_v45  ;;  %v4971_v44 = vld [vmem:[#allocation7 + $0x738] sm:$0xff]  ;;  %v4914_v23 = vld [vmem:[#allocation7 + $0x570] sm:$0xff] }
 0x60a   :  { %5088 = vmatpush.msra.mxu0 %v4766_v21  ;;  %v4672_v59 = vadd.f32 %v4553_v48, %v6613_v15  ;;  %v4872_v15 = vld [vmem:[#allocation7 + $0x420] sm:$0xff]  ;;  %v4701_v39 = vadd.f32 %v7349_v25, %v4700_v0  ;;  %v4987_v21 = vld [vmem:[#allocation7 + $0x7b8] sm:$0xff]  ;;  %v4686_v17 = vsel %vm7369_vm6, %v7347_v11, %v4682_v14  ;;  %vm4707_vm9 = vcmp.eq.f32.partialorder %v4706_v13, 8.507059e+37  ;;  %v4970_v11 = vld [vmem:[#allocation7 + $0x730] sm:$0xff] }
 0x60b   :  { %5184 = vmatpush.msra.mxu1 %v4928_v20  ;;  %5224 = vmatpush.msra.mxu3 %v4929_v4  ;;  %v4986_v4 = vld [vmem:[#allocation7 + $0x7b0] sm:$0xff]  ;;  %vm4688_vm8 = vcmp.eq.f32.partialorder %v4687_v38, 8.507059e+37  ;;  %v4864_v14 = vld [vmem:[#allocation7 + $0x3e0] sm:$0xff]  ;;  %v4907_v45 = vld [vmem:[#allocation7 + $0x538] sm:$0xff] }
 0x60c   :  { %5089 = vmatpush.msra.mxu0 %v4758_v3  ;;  %v4705_v60 = vsel %vm7377_vm7, %v7349_v25, %v4701_v39  ;;  %v4691_v3 = vsel %vm4688_vm8, %v4690_v22, %v4686_v17  ;;  %v4962_v25 = vld [vmem:[#allocation7 + $0x6f0] sm:$0xff]  ;;  %v4865_v39 = vld [vmem:[#allocation7 + $0x3e8] sm:$0xff]  ;;  %v4899_v38 = vld [vmem:[#allocation7 + $0x4f8] sm:$0xff] }
 0x60d   :  { %v4572_v18 = vpop.f32.mrf.mxu2  ;;  %5185 = vmatpush.msra.mxu1 %v4920_v2  ;;  %5225 = vmatpush.msra.mxu3 %v4921_v52  ;;  %v4709_v52 = vor.u32 1.1754944e-38, %v4708_v62  ;;  %v4906_v62 = vld [vmem:[#allocation7 + $0x530] sm:$0xff]  ;;  %v4848_v13 = vld [vmem:[#allocation7 + $0x360] sm:$0xff]  ;;  %v4841_v17 = vld [vmem:[#allocation7 + $0x328] sm:$0xff] }
 0x60e   :  { %v4593_v51 = vadd.f32 %v4592_v7, %v4572_v18  ;;  %5090 = vmatpush.msra.mxu0 %v4750_v50  ;;  %v4954_v18 = vld [vmem:[#allocation7 + $0x6b0] sm:$0xff]  ;;  %v4955_v50 = vld [vmem:[#allocation7 + $0x6b8] sm:$0xff]  ;;  %v4824_v22 = vld [vmem:[#allocation7 + $0x2a0] sm:$0xff] }
 0x60f   :  { %5186 = vmatpush.msra.mxu1 %v4912_v61  ;;  %5226 = vmatpush.msra.mxu3 %v4913_v35  ;;  %v4710_v63 = vsel %vm4707_vm9, %v4709_v52, %v4705_v60  ;;  %v4963_v35 = vld [vmem:[#allocation7 + $0x6f8] sm:$0xff]  ;;  %v4898_v16 = vld [vmem:[#allocation7 + $0x4f0] sm:$0xff]  ;;  %v4832_v60 = vld [vmem:[#allocation7 + $0x2e0] sm:$0xff] }
 0x610   :  { %v4673_v5 = vadd.f32 %v4593_v51, %v6611_v9  ;;  %5091 = vmatpush.msra.mxu0 %v4742_v12  ;;  %v4880_v9 = vld [vmem:[#allocation7 + $0x460] sm:$0xff]  ;;  %v4732_v7 = vmul.f32 %v4710_v63, %v7260_v49  ;;  %v4939_v12 = vld [vmem:[#allocation7 + $0x638] sm:$0xff]  ;;  %v4890_v20 = vld [vmem:[#allocation7 + $0x4b0] sm:$0xff] }
 0x611   :  { %5187 = vmatpush.msra.mxu1 %v4904_v47  ;;  %5227 = vmatpush.msra.mxu3 %v4905_v54  ;;  %v4946_v47 = vld [vmem:[#allocation7 + $0x670] sm:$0xff]  ;;  %v4947_v54 = vld [vmem:[#allocation7 + $0x678] sm:$0xff]  ;;  %v4816_v63 = vld [vmem:[#allocation7 + $0x260] sm:$0xff] }
 0x612   :  { %v5957_v24 = vmul.f32 -1.442695, %v4673_v5  ;;  %v4883_v52 = vld [vmem:[#allocation7 + $0x478] sm:$0xff] }
 0x613   :  { %5188 = vmatpush.msra.mxu1 %v4896_v10  ;;  %5228 = vmatpush.msra.mxu3 %v4897_v31  ;;  %v4930_v10 = vld [vmem:[#allocation7 + $0x5f0] sm:$0xff]  ;;  %v4931_v31 = vld [vmem:[#allocation7 + $0x5f8] sm:$0xff] }
 0x614   :  { %6188 = vpow2.f32 %v5957_v24  ;;  %v4922_v24 = vld [vmem:[#allocation7 + $0x5b0] sm:$0xff] }
 0x615   :  { %5189 = vmatpush.msra.mxu1 %v4888_v30  ;;  %5229 = vmatpush.msra.mxu3 %v4889_v37  ;;  %6190 = vtanh.f32 %v4672_v59  ;;  %v4923_v30 = vld [vmem:[#allocation7 + $0x5b8] sm:$0xff] }
 0x617   :  { %5190 = vmatpush.msra.mxu1 %v4880_v9  ;;  %5230 = vmatpush.msra.mxu3 %v4881_v29  ;;  %v4915_v9 = vld [vmem:[#allocation7 + $0x578] sm:$0xff] }
 0x619   :  { %5191 = vmatpush.msra.mxu1 %v4872_v15  ;;  %5231 = vmatpush.msra.mxu3 %v4873_v46 }
 0x61a   :  { %v6189_v58 = vpop.eup %6188  ;;  %5192 = vmatmul.f32.vlgmr.msra.gmra.mxu1 %v7335_v26  ;;  %5232 = vmatmul.f32.vlgmr.msra.gmra.mxu3 %v7335_v26 }
 0x61b   :  { %v4716_v8 = vadd.f32 1.0, %v6189_v58  ;;  %5256 = vmatpush.msrb.mxu1 %v4994_v40  ;;  %5296 = vmatpush.msrb.mxu3 %v4995_v27  ;;  %v6191_v2 = vpop.eup %6190  ;;  %v4856_v40 = vld [vmem:[#allocation7 + $0x3a0] sm:$0xff]  ;;  %v4857_v27 = vld [vmem:[#allocation7 + $0x3a8] sm:$0xff] }
 0x61c   :  { %v4733_v61 = vmul.f32 %v6191_v2, %v4691_v3  ;;  %v4849_v58 = vld [vmem:[#allocation7 + $0x368] sm:$0xff]  ;;  %v4882_v2 = vld [vmem:[#allocation7 + $0x470] sm:$0xff]  ;;  %v4875_v3 = vld [vmem:[#allocation7 + $0x438] sm:$0xff] }
 0x61d   :  { %6192 = vrcp.f32 %v4716_v8  ;;  %5257 = vmatpush.msrb.mxu1 %v4986_v4  ;;  %5297 = vmatpush.msrb.mxu3 %v4987_v21  ;;  %v4728_v49 = vand.u32 2147483648, %v4716_v8  ;;  %v4726_v5 = vand.u32 2147483647, %v4716_v8  ;;  %vm4722_vm11 = vweird.f32 %v4716_v8  ;;  %v4891_v4 = vld [vmem:[#allocation7 + $0x4b8] sm:$0xff]  ;;  %v4840_v21 = vld [vmem:[#allocation7 + $0x320] sm:$0xff] }
 0x61e   :  { %v7390_v48 = vadd.f32 %v4733_v61, %v4732_v7  ;;  %v4809_v61 = vld [vmem:[#allocation7 + $0x228] sm:$0xff]  ;;  %v4792_v7 = vld [vmem:[#allocation7 + $0x1a0] sm:$0xff] }
 0x61f   :  { %5258 = vmatpush.msrb.mxu1 %v4978_v57  ;;  %5298 = vmatpush.msrb.mxu3 %v4979_v42  ;;  %v4729_v37 = vor.u32 1.1754944e-38, %v4728_v49  ;;  %vm4727_vm13 = vcmp.eq.f32.partialorder %v4726_v5, 8.507059e+37  ;;  %v4825_v57 = vld [vmem:[#allocation7 + $0x2a8] sm:$0xff]  ;;  %v4874_v42 = vld [vmem:[#allocation7 + $0x430] sm:$0xff] }
 0x620   :  { %6194 = vtanh.f32 %v7390_v48  ;;  %v4753_v49 = vld [vmem:[#allocation7 + $0x68] sm:$0xff] }
 0x621   :  { %5259 = vmatpush.msrb.mxu1 %v4970_v11  ;;  %5299 = vmatpush.msrb.mxu3 %v4971_v44  ;;  %v4817_v11 = vld [vmem:[#allocation7 + $0x268] sm:$0xff]  ;;  %v4808_v44 = vld [vmem:[#allocation7 + $0x220] sm:$0xff] }
 0x622   :  { %v4745_v5 = vld [vmem:[#allocation7 + $0x28] sm:$0xff] }
 0x623   :  { %v6193_v32 = vpop.eup %6192  ;;  %5260 = vmatpush.msrb.mxu1 %v4962_v25  ;;  %5300 = vmatpush.msrb.mxu3 %v4963_v35  ;;  %v4800_v25 = vld [vmem:[#allocation7 + $0x1e0] sm:$0xff]  ;;  %v4801_v35 = vld [vmem:[#allocation7 + $0x1e8] sm:$0xff] }
 0x624   :  { %v4718_v51 = vmul.f32 %v6193_v32, %v4716_v8  ;;  %vm4723_vm10 = vweird.f32 %v6193_v32  ;;  %v4833_v8 = vld [vmem:[#allocation7 + $0x2e8] sm:$0xff] }
 0x625   :  { %5261 = vmatpush.msrb.mxu1 %v4954_v18  ;;  %5301 = vmatpush.msrb.mxu3 %v4955_v50  ;;  %vm4724_vm12 = vmor %vm4722_vm11, %vm4723_vm10  ;;  %v4793_v18 = vld [vmem:[#allocation7 + $0x1a8] sm:$0xff]  ;;  %v4784_v50 = vld [vmem:[#allocation7 + $0x160] sm:$0xff] }
 0x626   :  { %v4719_v1 = vsub.f32 1.0, %v4718_v51  ;;  %v6195_v29 = vpop.eup %6194  ;;  %v4776_v51 = vld [vmem:[#allocation7 + $0x120] sm:$0xff] }
 0x627   :  { %5262 = vmatpush.msrb.mxu1 %v4946_v47  ;;  %5302 = vmatpush.msrb.mxu3 %v4947_v54  ;;  %v4777_v47 = vld [vmem:[#allocation7 + $0x128] sm:$0xff] }
 0x628   :  { %v4720_v43 = vmul.f32 %v6193_v32, %v4719_v1  ;;  %v4769_v54 = vld [vmem:[#allocation7 + $0xe8] sm:$0xff]  ;;  %v4760_v1 = vld [vmem:[#allocation7 + $0xa0] sm:$0xff] }
 0x629   :  { %5263 = vmatpush.msrb.mxu1 %v4938_v56  ;;  %5303 = vmatpush.msrb.mxu3 %v4939_v12  ;;  %v4761_v56 = vld [vmem:[#allocation7 + $0xa8] sm:$0xff]  ;;  %v4752_v12 = vld [vmem:[#allocation7 + $0x60] sm:$0xff] }
 0x62a   :  { %v4721_v59 = vadd.f32 %v6193_v32, %v4720_v43  ;;  %v4744_v43 = vld [vmem:[#allocation7 + $0x20] sm:$0xff] }
 0x62b   :  { %5264 = vmatpush.msrb.mxu1 %v4930_v10  ;;  %5304 = vmatpush.msrb.mxu3 %v4931_v31  ;;  %v4866_v10 = vld [vmem:[#allocation7 + $0x3f0] sm:$0xff]  ;;  %v4867_v31 = vld [vmem:[#allocation7 + $0x3f8] sm:$0xff] }
 0x62c   :  { %v4725_v0 = vsel %vm4724_vm12, %v6193_v32, %v4721_v59  ;;  %v4785_v32 = vld [vmem:[#allocation7 + $0x168] sm:$0xff]  ;;  %v4858_v59 = vld [vmem:[#allocation7 + $0x3b0] sm:$0xff] }
 0x62d   :  { %v4730_v15 = vsel %vm4727_vm13, %v4729_v37, %v4725_v0  ;;  %5265 = vmatpush.msrb.mxu1 %v4922_v24  ;;  %5305 = vmatpush.msrb.mxu3 %v4923_v30  ;;  %v4859_v24 = vld [vmem:[#allocation7 + $0x3b8] sm:$0xff]  ;;  %v4850_v30 = vld [vmem:[#allocation7 + $0x370] sm:$0xff] }
 0x62e   :  { %v7393_v46 = vmul.f32 %v6195_v29, %v4730_v15  ;;  %v4851_v37 = vld [vmem:[#allocation7 + $0x378] sm:$0xff]  ;;  %v4842_v0 = vld [vmem:[#allocation7 + $0x330] sm:$0xff] }
 0x62f   :  { %5266 = vmatpush.msrb.mxu1 %v4914_v23  ;;  %5306 = vmatpush.msrb.mxu3 %v4915_v9  ;;  %v4843_v23 = vld [vmem:[#allocation7 + $0x338] sm:$0xff]  ;;  %v4834_v9 = vld [vmem:[#allocation7 + $0x2f0] sm:$0xff] }
 0x630   :  { %5012 = vmatmul.f32.vlgmr.msrb.gmra.mxu0 %v7393_v46  ;;  %5052 = vmatmul.f32.vlgmr.msra.gmra.mxu2 %v7393_v46  ;;  %v4835_v29 = vld [vmem:[#allocation7 + $0x2f8] sm:$0xff]  ;;  %v4826_v15 = vld [vmem:[#allocation7 + $0x2b0] sm:$0xff] }
 0x631   :  { %5156 = vmatpush.msrb.mxu0 %v4864_v14  ;;  %5196 = vmatpush.msra.mxu2 %v4865_v39  ;;  %v4827_v14 = vld [vmem:[#allocation7 + $0x2b8] sm:$0xff]  ;;  %v4818_v39 = vld [vmem:[#allocation7 + $0x270] sm:$0xff] }
 0x632   :  { %5267 = vmatpush.msrb.mxu1 %v4906_v62  ;;  %5307 = vmatpush.msrb.mxu3 %v4907_v45  ;;  %v4819_v62 = vld [vmem:[#allocation7 + $0x278] sm:$0xff]  ;;  %v4810_v45 = vld [vmem:[#allocation7 + $0x230] sm:$0xff] }
 0x633   :  { %5157 = vmatpush.msrb.mxu0 %v4856_v40  ;;  %5197 = vmatpush.msra.mxu2 %v4857_v27  ;;  %v4811_v40 = vld [vmem:[#allocation7 + $0x238] sm:$0xff]  ;;  %v4802_v27 = vld [vmem:[#allocation7 + $0x1f0] sm:$0xff] }
 0x634   :  { %5268 = vmatpush.msrb.mxu1 %v4898_v16  ;;  %5308 = vmatpush.msrb.mxu3 %v4899_v38  ;;  %v4803_v16 = vld [vmem:[#allocation7 + $0x1f8] sm:$0xff]  ;;  %v4794_v38 = vld [vmem:[#allocation7 + $0x1b0] sm:$0xff] }
 0x635   :  { %5158 = vmatpush.msrb.mxu0 %v4848_v13  ;;  %5198 = vmatpush.msra.mxu2 %v4849_v58  ;;  %v4795_v13 = vld [vmem:[#allocation7 + $0x1b8] sm:$0xff]  ;;  %v4786_v58 = vld [vmem:[#allocation7 + $0x170] sm:$0xff] }
 0x636   :  { %5269 = vmatpush.msrb.mxu1 %v4890_v20  ;;  %5309 = vmatpush.msrb.mxu3 %v4891_v4  ;;  %v4787_v20 = vld [vmem:[#allocation7 + $0x178] sm:$0xff]  ;;  %v4778_v4 = vld [vmem:[#allocation7 + $0x130] sm:$0xff] }
 0x637   :  { %5159 = vmatpush.msrb.mxu0 %v4840_v21  ;;  %5199 = vmatpush.msra.mxu2 %v4841_v17  ;;  %v4779_v21 = vld [vmem:[#allocation7 + $0x138] sm:$0xff]  ;;  %v4770_v17 = vld [vmem:[#allocation7 + $0xf0] sm:$0xff] }
 0x638   :  { %5092 = vmatmul.f32.vlgmr.msra.gmra.mxu0 %v7393_v46  ;;  %5132 = vmatmul.f32.vlgmr.msrb.gmra.mxu2 %v7393_v46 }
 0x639   :  { %5160 = vmatpush.msrb.mxu0 %v4832_v60  ;;  %5200 = vmatpush.msra.mxu2 %v4833_v8  ;;  %v4771_v60 = vld [vmem:[#allocation7 + $0xf8] sm:$0xff]  ;;  %v4762_v8 = vld [vmem:[#allocation7 + $0xb0] sm:$0xff] }
 0x63a   :  { %5270 = vmatpush.msrb.mxu1 %v4882_v2  ;;  %5310 = vmatpush.msrb.mxu3 %v4883_v52  ;;  %v4763_v2 = vld [vmem:[#allocation7 + $0xb8] sm:$0xff]  ;;  %v4754_v52 = vld [vmem:[#allocation7 + $0x70] sm:$0xff] }
 0x63b   :  { %5161 = vmatpush.msrb.mxu0 %v4824_v22  ;;  %5201 = vmatpush.msra.mxu2 %v4825_v57  ;;  %v4755_v22 = vld [vmem:[#allocation7 + $0x78] sm:$0xff]  ;;  %v4746_v57 = vld [vmem:[#allocation7 + $0x30] sm:$0xff] }
 0x63c   :  { %5271 = vmatpush.msrb.mxu1 %v4874_v42  ;;  %5311 = vmatpush.msrb.mxu3 %v4875_v3  ;;  %v4747_v42 = vld [vmem:[#allocation7 + $0x38] sm:$0xff]  ;;  %v5585_v3 = vld [vmem:[#allocation7 + $0x7c0] sm:$0xff] }
 0x63d   :  { %5272 = vmatmul.f32.vlgmr.msrb.gmra.mxu1 %v7335_v26  ;;  %5312 = vmatmul.f32.vlgmr.msrb.gmra.mxu3 %v7335_v26  ;;  %v4768_v26 = vld [vmem:[#allocation7 + $0xe0] sm:$0xff] }
 0x63e   :  { %5162 = vmatpush.msrb.mxu0 %v4816_v63  ;;  %5202 = vmatpush.msra.mxu2 %v4817_v11  ;;  %v5586_v63 = vld [vmem:[#allocation7 + $0x7c8] sm:$0xff]  ;;  %v5581_v11 = vld [vmem:[#allocation7 + $0x780] sm:$0xff] }
 0x63f   :  { %5609 = vmatpush.msra.mxu1 %v5585_v3  ;;  %5649 = vmatpush.msra.mxu3 %v5586_v63  ;;  %v5563_v3 = vld [vmem:[#allocation7 + $0x650] sm:$0xff]  ;;  %v5564_v63 = vld [vmem:[#allocation7 + $0x658] sm:$0xff] }
 0x640   :  { %5163 = vmatpush.msrb.mxu0 %v4808_v44  ;;  %5203 = vmatpush.msra.mxu2 %v4809_v61  ;;  %v5582_v44 = vld [vmem:[#allocation7 + $0x788] sm:$0xff]  ;;  %v5577_v61 = vld [vmem:[#allocation7 + $0x740] sm:$0xff] }
 0x641   :  { %5610 = vmatpush.msra.mxu1 %v5581_v11  ;;  %5650 = vmatpush.msra.mxu3 %v5582_v44  ;;  %v5559_v44 = vld [vmem:[#allocation7 + $0x610] sm:$0xff] }
 0x642   :  { %5164 = vmatpush.msrb.mxu0 %v4800_v25  ;;  %5204 = vmatpush.msra.mxu2 %v4801_v35  ;;  %v5578_v25 = vld [vmem:[#allocation7 + $0x748] sm:$0xff]  ;;  %v5573_v35 = vld [vmem:[#allocation7 + $0x700] sm:$0xff] }
 0x643   :  { %5611 = vmatpush.msra.mxu1 %v5577_v61  ;;  %5651 = vmatpush.msra.mxu3 %v5578_v25  ;;  %v5560_v61 = vld [vmem:[#allocation7 + $0x618] sm:$0xff] }
 0x644   :  { %5165 = vmatpush.msrb.mxu0 %v4792_v7  ;;  %5205 = vmatpush.msra.mxu2 %v4793_v18  ;;  %v5574_v7 = vld [vmem:[#allocation7 + $0x708] sm:$0xff]  ;;  %v5569_v18 = vld [vmem:[#allocation7 + $0x6c0] sm:$0xff] }
 0x645   :  { %5612 = vmatpush.msra.mxu1 %v5573_v35  ;;  %5652 = vmatpush.msra.mxu3 %v5574_v7 }
 0x646   :  { %5166 = vmatpush.msrb.mxu0 %v4784_v50  ;;  %5206 = vmatpush.msra.mxu2 %v4785_v32  ;;  %v5570_v50 = vld [vmem:[#allocation7 + $0x6c8] sm:$0xff] }
 0x647   :  { %5613 = vmatpush.msra.mxu1 %v5569_v18  ;;  %5653 = vmatpush.msra.mxu3 %v5570_v50  ;;  %v5566_v32 = vld [vmem:[#allocation7 + $0x688] sm:$0xff]  ;;  %v5555_v50 = vld [vmem:[#allocation7 + $0x5d0] sm:$0xff] }
 0x648   :  { %5167 = vmatpush.msrb.mxu0 %v4776_v51  ;;  %5207 = vmatpush.msra.mxu2 %v4777_v47  ;;  %v5561_v51 = vld [vmem:[#allocation7 + $0x640] sm:$0xff]  ;;  %v5562_v47 = vld [vmem:[#allocation7 + $0x648] sm:$0xff] }
 0x649   :  { %5654 = vmatpush.msra.mxu3 %v5566_v32 }
 0x64a   :  { %5168 = vmatpush.msrb.mxu0 %v4768_v26  ;;  %5208 = vmatpush.msra.mxu2 %v4769_v54  ;;  %v5557_v26 = vld [vmem:[#allocation7 + $0x600] sm:$0xff]  ;;  %v5558_v54 = vld [vmem:[#allocation7 + $0x608] sm:$0xff] }
 0x64b   :  { %5655 = vmatpush.msra.mxu3 %v5562_v47  ;;  %v5552_v47 = vld [vmem:[#allocation7 + $0x598] sm:$0xff] }
 0x64c   :  { %5169 = vmatpush.msrb.mxu0 %v4760_v1  ;;  %5209 = vmatpush.msra.mxu2 %v4761_v56  ;;  %v5553_v1 = vld [vmem:[#allocation7 + $0x5c0] sm:$0xff]  ;;  %v5554_v56 = vld [vmem:[#allocation7 + $0x5c8] sm:$0xff] }
 0x64d   :  { %5656 = vmatpush.msra.mxu3 %v5558_v54 }
 0x64e   :  { %5170 = vmatpush.msrb.mxu0 %v4752_v12  ;;  %5210 = vmatpush.msra.mxu2 %v4753_v49  ;;  %v5549_v12 = vld [vmem:[#allocation7 + $0x580] sm:$0xff]  ;;  %v5550_v49 = vld [vmem:[#allocation7 + $0x588] sm:$0xff] }
 0x64f   :  { %5657 = vmatpush.msra.mxu3 %v5554_v56  ;;  %v5522_v56 = vld [vmem:[#allocation7 + $0x3c8] sm:$0xff] }
 0x650   :  { %5171 = vmatpush.msrb.mxu0 %v4744_v43  ;;  %5211 = vmatpush.msra.mxu2 %v4745_v5  ;;  %v5545_v43 = vld [vmem:[#allocation7 + $0x540] sm:$0xff]  ;;  %v5546_v5 = vld [vmem:[#allocation7 + $0x548] sm:$0xff] }
 0x651   :  { %5172 = vmatmul.f32.vlgmr.msrb.gmra.mxu0 %v7393_v46  ;;  %5212 = vmatmul.f32.vlgmr.msra.gmra.mxu2 %v7393_v46 }
 0x652   :  { %5236 = vmatpush.msra.mxu0 %v4866_v10  ;;  %5276 = vmatpush.msrb.mxu2 %v4867_v31  ;;  %v5541_v10 = vld [vmem:[#allocation7 + $0x500] sm:$0xff]  ;;  %v5542_v31 = vld [vmem:[#allocation7 + $0x508] sm:$0xff] }
 0x653   :  { %5658 = vmatpush.msra.mxu3 %v5550_v49 }
 0x654   :  { %5237 = vmatpush.msra.mxu0 %v4858_v59  ;;  %5277 = vmatpush.msrb.mxu2 %v4859_v24  ;;  %v5537_v59 = vld [vmem:[#allocation7 + $0x4c0] sm:$0xff]  ;;  %v5538_v24 = vld [vmem:[#allocation7 + $0x4c8] sm:$0xff] }
 0x655   :  { %5659 = vmatpush.msra.mxu3 %v5546_v5 }
 0x656   :  { %5238 = vmatpush.msra.mxu0 %v4850_v30  ;;  %5278 = vmatpush.msrb.mxu2 %v4851_v37  ;;  %v5533_v30 = vld [vmem:[#allocation7 + $0x480] sm:$0xff]  ;;  %v5534_v37 = vld [vmem:[#allocation7 + $0x488] sm:$0xff] }
 0x657   :  { %5660 = vmatpush.msra.mxu3 %v5542_v31  ;;  %v5518_v31 = vld [vmem:[#allocation7 + $0x388] sm:$0xff] }
 0x658   :  { %5239 = vmatpush.msra.mxu0 %v4842_v0  ;;  %5279 = vmatpush.msrb.mxu2 %v4843_v23  ;;  %v5529_v0 = vld [vmem:[#allocation7 + $0x440] sm:$0xff]  ;;  %v5530_v23 = vld [vmem:[#allocation7 + $0x448] sm:$0xff] }
 0x659   :  { %5661 = vmatpush.msra.mxu3 %v5538_v24 }
 0x65a   :  { %5240 = vmatpush.msra.mxu0 %v4834_v9  ;;  %5280 = vmatpush.msrb.mxu2 %v4835_v29  ;;  %v5525_v9 = vld [vmem:[#allocation7 + $0x400] sm:$0xff]  ;;  %v5526_v29 = vld [vmem:[#allocation7 + $0x408] sm:$0xff] }
 0x65b   :  { %5662 = vmatpush.msra.mxu3 %v5534_v37 }
 0x65c   :  { %5241 = vmatpush.msra.mxu0 %v4826_v15  ;;  %5281 = vmatpush.msrb.mxu2 %v4827_v14  ;;  %v5587_v15 = vld [vmem:[#allocation7 + $0x7d0] sm:$0xff]  ;;  %v5588_v14 = vld [vmem:[#allocation7 + $0x7d8] sm:$0xff] }
 0x65d   :  { %5663 = vmatpush.msra.mxu3 %v5530_v23  ;;  %v5513_v23 = vld [vmem:[#allocation7 + $0x340] sm:$0xff] }
 0x65e   :  { %5242 = vmatpush.msra.mxu0 %v4818_v39  ;;  %5282 = vmatpush.msrb.mxu2 %v4819_v62 }
 0x65f   :  { %5664 = vmatpush.msra.mxu3 %v5526_v29  ;;  %v5539_v29 = vld [vmem:[#allocation7 + $0x4d0] sm:$0xff] }
 0x660   :  { %5243 = vmatpush.msra.mxu0 %v4810_v45  ;;  %5283 = vmatpush.msrb.mxu2 %v4811_v40  ;;  %v5583_v40 = vld [vmem:[#allocation7 + $0x790] sm:$0xff] }
 0x661   :  { %5729 = vmatpush.msrb.mxu3 %v5588_v14  ;;  %v5540_v14 = vld [vmem:[#allocation7 + $0x4d8] sm:$0xff] }
 0x662   :  { %5244 = vmatpush.msra.mxu0 %v4802_v27  ;;  %5284 = vmatpush.msrb.mxu2 %v4803_v16  ;;  %v5584_v27 = vld [vmem:[#allocation7 + $0x798] sm:$0xff] }
 0x663   :  { %5730 = vmatpush.msrb.mxu3 %v5584_v27  ;;  %v5536_v27 = vld [vmem:[#allocation7 + $0x498] sm:$0xff] }
 0x664   :  { %5245 = vmatpush.msra.mxu0 %v4794_v38  ;;  %5285 = vmatpush.msrb.mxu2 %v4795_v13  ;;  %v5579_v38 = vld [vmem:[#allocation7 + $0x750] sm:$0xff]  ;;  %v5580_v13 = vld [vmem:[#allocation7 + $0x758] sm:$0xff] }
 0x665   :  { %5731 = vmatpush.msrb.mxu3 %v5580_v13  ;;  %v5505_v13 = vld [vmem:[#allocation7 + $0x2c0] sm:$0xff] }
 0x666   :  { %5246 = vmatpush.msra.mxu0 %v4786_v58  ;;  %5286 = vmatpush.msrb.mxu2 %v4787_v20 }
 0x668   :  { %5247 = vmatpush.msra.mxu0 %v4778_v4  ;;  %5287 = vmatpush.msrb.mxu2 %v4779_v21  ;;  %v5575_v4 = vld [vmem:[#allocation7 + $0x710] sm:$0xff]  ;;  %v5576_v21 = vld [vmem:[#allocation7 + $0x718] sm:$0xff] }
 0x669   :  { %5732 = vmatpush.msrb.mxu3 %v5576_v21 }
 0x66a   :  { %5248 = vmatpush.msra.mxu0 %v4770_v17  ;;  %5288 = vmatpush.msrb.mxu2 %v4771_v60 }
 0x66c   :  { %5249 = vmatpush.msra.mxu0 %v4762_v8  ;;  %5289 = vmatpush.msrb.mxu2 %v4763_v2  ;;  %v5571_v8 = vld [vmem:[#allocation7 + $0x6d0] sm:$0xff]  ;;  %v5572_v2 = vld [vmem:[#allocation7 + $0x6d8] sm:$0xff] }
 0x66d   :  { %5733 = vmatpush.msrb.mxu3 %v5572_v2 }
 0x66e   :  { %5250 = vmatpush.msra.mxu0 %v4754_v52  ;;  %5290 = vmatpush.msrb.mxu2 %v4755_v22  ;;  %v5567_v22 = vld [vmem:[#allocation7 + $0x690] sm:$0xff] }
 0x670   :  { %5251 = vmatpush.msra.mxu0 %v4746_v57  ;;  %5291 = vmatpush.msrb.mxu2 %v4747_v42  ;;  %v5568_v57 = vld [vmem:[#allocation7 + $0x698] sm:$0xff] }
 0x671   :  { %5252 = vmatmul.f32.vlgmr.msra.gmra.mxu0 %v7393_v46  ;;  %5292 = vmatmul.f32.vlgmr.msrb.gmra.mxu2 %v7393_v46  ;;  %v5565_v46 = vld [vmem:[#allocation7 + $0x680] sm:$0xff] }
 0x672   :  { %5614 = vmatpush.msra.mxu1 %v5565_v46  ;;  %5734 = vmatpush.msrb.mxu3 %v5568_v57  ;;  %v5556_v46 = vld [vmem:[#allocation7 + $0x5d8] sm:$0xff]  ;;  %v5527_v57 = vld [vmem:[#allocation7 + $0x410] sm:$0xff] }
 0x673   :  { %5629 = vmatpush.msra.mxu2 %v5522_v56  ;;  %v5489_v56 = vld [vmem:[#allocation7 + $0x1c0] sm:$0xff] }
 0x674   :  { %5615 = vmatpush.msra.mxu1 %v5561_v51  ;;  %5735 = vmatpush.msrb.mxu3 %v5564_v63  ;;  %v5551_v51 = vld [vmem:[#allocation7 + $0x590] sm:$0xff] }
 0x675   :  { %5630 = vmatpush.msra.mxu2 %v5518_v31 }
 0x676   :  { %5616 = vmatpush.msra.mxu1 %v5557_v26  ;;  %5736 = vmatpush.msrb.mxu3 %v5560_v61  ;;  %v5498_v61 = vld [vmem:[#allocation7 + $0x248] sm:$0xff] }
 0x677   :  { %v5033_v39 = vpop.f32.mrf.mxu1 }
 0x678   :  { %5617 = vmatpush.msra.mxu1 %v5553_v1  ;;  %5737 = vmatpush.msrb.mxu3 %v5556_v46  ;;  %v5521_v1 = vld [vmem:[#allocation7 + $0x3c0] sm:$0xff] }
 0x679   :  { %5589 = vmatpush.msrb.mxu0 %v5521_v1 }
 0x67a   :  { %5618 = vmatpush.msra.mxu1 %v5549_v12  ;;  %5738 = vmatpush.msrb.mxu3 %v5552_v47  ;;  %v5547_v12 = vld [vmem:[#allocation7 + $0x550] sm:$0xff]  ;;  %v5494_v47 = vld [vmem:[#allocation7 + $0x208] sm:$0xff] }
 0x67c   :  { %5619 = vmatpush.msra.mxu1 %v5545_v43  ;;  %v5548_v43 = vld [vmem:[#allocation7 + $0x558] sm:$0xff] }
 0x67d   :  { %v5073_v58 = vpop.f32.mrf.mxu3  ;;  %5739 = vmatpush.msrb.mxu3 %v5548_v43 }
 0x67e   :  { %5620 = vmatpush.msra.mxu1 %v5541_v10  ;;  %v5517_v10 = vld [vmem:[#allocation7 + $0x380] sm:$0xff] }
 0x67f   :  { %5590 = vmatpush.msrb.mxu0 %v5517_v10  ;;  %v5113_v37 = vpop.f32.mrf.mxu1 }
 0x680   :  { %5621 = vmatpush.msra.mxu1 %v5537_v59  ;;  %v5543_v59 = vld [vmem:[#allocation7 + $0x510] sm:$0xff] }
 0x681   :  { %5591 = vmatpush.msrb.mxu0 %v5513_v23 }
 0x682   :  { %5622 = vmatpush.msra.mxu1 %v5533_v30  ;;  %v5544_v30 = vld [vmem:[#allocation7 + $0x518] sm:$0xff] }
 0x683   :  { %5740 = vmatpush.msrb.mxu3 %v5544_v30  ;;  %v5486_v30 = vld [vmem:[#allocation7 + $0x188] sm:$0xff] }
 0x684   :  { %5623 = vmatpush.msra.mxu1 %v5529_v0 }
 0x685   :  { %v5153_v25 = vpop.f32.mrf.mxu3  ;;  %5741 = vmatpush.msrb.mxu3 %v5540_v14 }
 0x686   :  { %5624 = vmatpush.msra.mxu1 %v5525_v9  ;;  %v5514_v9 = vld [vmem:[#allocation7 + $0x348] sm:$0xff] }
 0x687   :  { %5631 = vmatpush.msra.mxu2 %v5514_v9  ;;  %5742 = vmatpush.msrb.mxu3 %v5536_v27 }
 0x688   :  { %5689 = vmatpush.msrb.mxu1 %v5587_v15 }
 0x68a   :  { %5690 = vmatpush.msrb.mxu1 %v5583_v40  ;;  %v5535_v40 = vld [vmem:[#allocation7 + $0x490] sm:$0xff] }
 0x68c   :  { %5691 = vmatpush.msrb.mxu1 %v5579_v38 }
 0x68e   :  { %5692 = vmatpush.msrb.mxu1 %v5575_v4 }
 0x690   :  { %5693 = vmatpush.msrb.mxu1 %v5571_v8 }
 0x692   :  { %5694 = vmatpush.msrb.mxu1 %v5567_v22  ;;  %v5502_v22 = vld [vmem:[#allocation7 + $0x288] sm:$0xff] }
 0x694   :  { %5695 = vmatpush.msrb.mxu1 %v5563_v3  ;;  %v5528_v3 = vld [vmem:[#allocation7 + $0x418] sm:$0xff] }
 0x696   :  { %5696 = vmatpush.msrb.mxu1 %v5559_v44  ;;  %v5497_v44 = vld [vmem:[#allocation7 + $0x240] sm:$0xff] }
 0x698   :  { %5697 = vmatpush.msrb.mxu1 %v5555_v50 }
 0x69a   :  { %5698 = vmatpush.msrb.mxu1 %v5551_v51  ;;  %v5493_v51 = vld [vmem:[#allocation7 + $0x200] sm:$0xff] }
 0x69c   :  { %5699 = vmatpush.msrb.mxu1 %v5547_v12  ;;  %v5490_v12 = vld [vmem:[#allocation7 + $0x1c8] sm:$0xff] }
 0x69d   :  { %v5233_v23 = vpop.f32.mrf.mxu3 }
 0x69e   :  { %5700 = vmatpush.msrb.mxu1 %v5543_v59 }
 0x6a0   :  { %5701 = vmatpush.msrb.mxu1 %v5539_v29 }
 0x6a2   :  { %5702 = vmatpush.msrb.mxu1 %v5535_v40 }
 0x6ad   :  { %v5013_v62 = vpop.f32.mrf.mxu0 }
 0x6ae   :  { %v5034_v45 = vadd.f32 %v5033_v39, %v5013_v62  ;;  %v5509_v62 = vld [vmem:[#allocation7 + $0x300] sm:$0xff] }
 0x6af   :  { %5592 = vmatpush.msrb.mxu0 %v5509_v62  ;;  %v5482_v62 = vld [vmem:[#allocation7 + $0x148] sm:$0xff] }
 0x6b0   :  { %v5316_v16 = vadd.f32 %v5034_v45, %v6629_v41  ;;  %v5510_v45 = vld [vmem:[#allocation7 + $0x308] sm:$0xff] }
 0x6b1   :  { %5632 = vmatpush.msra.mxu2 %v5510_v45  ;;  %5593 = vmatpush.msrb.mxu0 %v5505_v13 }
 0x6b2   :  { %v5958_v20 = vmul.f32 -1.442695, %v5316_v16 }
 0x6b3   :  { %v5053_v17 = vpop.f32.mrf.mxu2 }
 0x6b4   :  { %6196 = vpow2.f32 %v5958_v20  ;;  %v5074_v60 = vadd.f32 %v5073_v58, %v5053_v17  ;;  %v5506_v58 = vld [vmem:[#allocation7 + $0x2c8] sm:$0xff]  ;;  %v5531_v20 = vld [vmem:[#allocation7 + $0x450] sm:$0xff] }
 0x6b5   :  { %v5093_v5 = vpop.f32.mrf.mxu0  ;;  %5633 = vmatpush.msra.mxu2 %v5506_v58  ;;  %5703 = vmatpush.msrb.mxu1 %v5531_v20  ;;  %v5473_v20 = vld [vmem:[#allocation7 + $0xc0] sm:$0xff] }
 0x6b6   :  { %v5317_v52 = vadd.f32 %v5074_v60, %v6633_v6  ;;  %v5114_v15 = vadd.f32 %v5113_v37, %v5093_v5  ;;  %v5532_v60 = vld [vmem:[#allocation7 + $0x458] sm:$0xff] }
 0x6b7   :  { %5743 = vmatpush.msrb.mxu3 %v5532_v60  ;;  %5634 = vmatpush.msra.mxu2 %v5502_v22 }
 0x6b8   :  { %v5959_v42 = vmul.f32 -1.442695, %v5317_v52  ;;  %v5318_v21 = vadd.f32 %v5114_v15, %v6651_v36  ;;  %v5501_v52 = vld [vmem:[#allocation7 + $0x280] sm:$0xff]  ;;  %5704 = vmatpush.msrb.mxu1 %v5527_v57 }
 0x6b9   :  { %5594 = vmatpush.msrb.mxu0 %v5501_v52  ;;  %5744 = vmatpush.msrb.mxu3 %v5528_v3  ;;  %v5465_v57 = vld [vmem:[#allocation7 + $0x40] sm:$0xff] }
 0x6ba   :  { %v6197_v11 = vpop.eup %6196  ;;  %6198 = vpow2.f32 %v5959_v42  ;;  %5635 = vmatpush.msra.mxu2 %v5498_v61  ;;  %v5523_v61 = vld [vmem:[#allocation7 + $0x3d0] sm:$0xff] }
 0x6bb   :  { %v7407_v35 = vadd.f32 1.0, %v6197_v11  ;;  %v5133_v7 = vpop.f32.mrf.mxu2  ;;  %5595 = vmatpush.msrb.mxu0 %v5497_v44 }
 0x6bc   :  { %v5154_v18 = vadd.f32 %v5153_v25, %v5133_v7  ;;  %5636 = vmatpush.msra.mxu2 %v5494_v47 }
 0x6bd   :  { %6200 = vrcp.f32 %v7407_v35  ;;  %v5335_v42 = vand.u32 2147483648, %v7407_v35  ;;  %vm5329_vm15 = vweird.f32 %v7407_v35  ;;  %v5333_v11 = vand.u32 2147483647, %v7407_v35  ;;  %5596 = vmatpush.msrb.mxu0 %v5493_v51 }
 0x6be   :  { %v5319_v32 = vadd.f32 %v5154_v18, %v6637_v34  ;;  %v5193_v18 = vpop.f32.mrf.mxu1  ;;  %5637 = vmatpush.msra.mxu2 %v5490_v12  ;;  %v5503_v12 = vld [vmem:[#allocation7 + $0x290] sm:$0xff] }
 0x6bf   :  { %vm5334_vm3 = vcmp.eq.f32.partialorder %v5333_v11, 8.507059e+37  ;;  %5597 = vmatpush.msrb.mxu0 %v5489_v56  ;;  %v5462_v11 = vld [vmem:[#allocation7 + $0x8] sm:$0xff]  ;;  %v5508_v56 = vld [vmem:[#allocation7 + $0x2d8] sm:$0xff] }
 0x6c0   :  { %v6199_v26 = vpop.eup %6198  ;;  %v5960_v54 = vmul.f32 -1.442695, %v5319_v32  ;;  %5638 = vmatpush.msra.mxu2 %v5486_v30 }
 0x6c1   :  { %v7411_v49 = vadd.f32 1.0, %v6199_v26  ;;  %v5336_v26 = vor.u32 1.1754944e-38, %v5335_v42  ;;  %v5466_v42 = vld [vmem:[#allocation7 + $0x48] sm:$0xff] }
 0x6c2   :  { %6202 = vpow2.f32 %v5960_v54  ;;  %5639 = vmatpush.msra.mxu2 %v5482_v62 }
 0x6c3   :  { %v7413_v24 = vpop.eup %6200  ;;  %6204 = vrcp.f32 %v7411_v49  ;;  %v5354_v25 = vand.u32 2147483648, %v7411_v49  ;;  %v5352_v46 = vand.u32 2147483647, %v7411_v49  ;;  %vm5348_vm2 = vweird.f32 %v7411_v49 }
 0x6c4   :  { %v5325_v0 = vmul.f32 %v7413_v24, %v7407_v35  ;;  %vm5330_vm14 = vweird.f32 %v7413_v24 }
 0x6c5   :  { %vm7432_vm0 = vmor %vm5329_vm15, %vm5330_vm14  ;;  %v5355_v5 = vor.u32 1.1754944e-38, %v5354_v25  ;;  %vm5353_vm5 = vcmp.eq.f32.partialorder %v5352_v46, 8.507059e+37  ;;  %v5524_v25 = vld [vmem:[#allocation7 + $0x3d8] sm:$0xff]  ;;  %v5515_v46 = vld [vmem:[#allocation7 + $0x350] sm:$0xff] }
 0x6c6   :  { %v5326_v39 = vsub.f32 1.0, %v5325_v0  ;;  %v5273_v62 = vpop.f32.mrf.mxu1 }
 0x6c8   :  { %v6203_v16 = vpop.eup %6202  ;;  %v5327_v38 = vmul.f32 %v7413_v24, %v5326_v39  ;;  %v5481_v39 = vld [vmem:[#allocation7 + $0x140] sm:$0xff] }
 0x6c9   :  { %v6205_v4 = vpop.eup %6204  ;;  %v7420_v17 = vadd.f32 1.0, %v6203_v16  ;;  %v5477_v16 = vld [vmem:[#allocation7 + $0x100] sm:$0xff] }
 0x6ca   :  { %v5344_v8 = vmul.f32 %v6205_v4, %v7411_v49  ;;  %v5328_v2 = vadd.f32 %v7413_v24, %v5327_v38  ;;  %vm5349_vm1 = vweird.f32 %v6205_v4  ;;  %v5478_v38 = vld [vmem:[#allocation7 + $0x108] sm:$0xff] }
 0x6cb   :  { %6206 = vrcp.f32 %v7420_v17  ;;  %vm5350_vm4 = vmor %vm5348_vm2, %vm5349_vm1  ;;  %5640 = vmatpush.msra.mxu2 %v5478_v38  ;;  %vm5368_vm7 = vweird.f32 %v7420_v17  ;;  %v5372_v60 = vand.u32 2147483647, %v7420_v17 }
 0x6cc   :  { %v5345_v63 = vsub.f32 1.0, %v5344_v8  ;;  %6208 = vtanh.f32 %v5318_v21  ;;  %v5332_v35 = vsel %vm7432_vm0, %v7413_v24, %v5328_v2  ;;  %v5485_v24 = vld [vmem:[#allocation7 + $0x180] sm:$0xff]  ;;  %v5470_v2 = vld [vmem:[#allocation7 + $0x88] sm:$0xff]  ;;  %v5472_v8 = vld [vmem:[#allocation7 + $0x98] sm:$0xff] }
 0x6cd   :  { %v5337_v10 = vsel %vm5334_vm3, %v5336_v26, %v5332_v35  ;;  %5598 = vmatpush.msrb.mxu0 %v5485_v24  ;;  %vm5373_vm9 = vcmp.eq.f32.partialorder %v5372_v60, 8.507059e+37  ;;  %v5511_v26 = vld [vmem:[#allocation7 + $0x310] sm:$0xff] }
 0x6ce   :  { %v5346_v50 = vmul.f32 %v6205_v4, %v5345_v63  ;;  %v5173_v32 = vpop.f32.mrf.mxu0  ;;  %v5461_v63 = vld [vmem:[#allocation7] sm:$0xff]  ;;  %v5471_v60 = vld [vmem:[#allocation7 + $0x90] sm:$0xff] }
 0x6cf   :  { %v5194_v54 = vadd.f32 %v5193_v18, %v5173_v32  ;;  %5599 = vmatpush.msrb.mxu0 %v5481_v39  ;;  %v5519_v18 = vld [vmem:[#allocation7 + $0x390] sm:$0xff]  ;;  %v5516_v32 = vld [vmem:[#allocation7 + $0x358] sm:$0xff] }
 0x6d0   :  { %v5347_v1 = vadd.f32 %v6205_v4, %v5346_v50  ;;  %v5520_v50 = vld [vmem:[#allocation7 + $0x398] sm:$0xff] }
 0x6d1   :  { %v6207_v43 = vpop.eup %6206  ;;  %v5391_v49 = vadd.f32 %v5194_v54, %v6486_v55  ;;  %5600 = vmatpush.msrb.mxu0 %v5477_v16  ;;  %v5512_v54 = vld [vmem:[#allocation7 + $0x318] sm:$0xff]  ;;  %v5313_v16 = vpop.f32.mrf.mxu3 }
 0x6d2   :  { %v5351_v31 = vsel %vm5350_vm4, %v6205_v4, %v5347_v1  ;;  %v5364_v59 = vmul.f32 %v6207_v43, %v7420_v17  ;;  %v6209_v37 = vpop.eup %6208  ;;  %vm5369_vm6 = vweird.f32 %v6207_v43  ;;  %v5474_v4 = vld [vmem:[#allocation7 + $0xc8] sm:$0xff]  ;;  %v5507_v1 = vld [vmem:[#allocation7 + $0x2d0] sm:$0xff] }
 0x6d3   :  { %v5356_v0 = vsel %vm5353_vm5, %v5355_v5, %v5351_v31  ;;  %v5379_v29 = vmul.f32 %v6209_v37, %v5337_v10  ;;  %v5961_v13 = vmul.f32 -1.442695, %v5391_v49  ;;  %5601 = vmatpush.msrb.mxu0 %v5473_v20  ;;  %5641 = vmatpush.msra.mxu2 %v5474_v4  ;;  %vm7452_vm8 = vmor %vm5368_vm7, %vm5369_vm6  ;;  %v5499_v5 = vld [vmem:[#allocation7 + $0x250] sm:$0xff]  ;;  %v5500_v10 = vld [vmem:[#allocation7 + $0x258] sm:$0xff] }
 0x6d4   :  { %v5378_v9 = vmul.f32 %v5356_v0, %v7316_v53  ;;  %v5365_v15 = vsub.f32 1.0, %v5364_v59  ;;  %v5213_v14 = vpop.f32.mrf.mxu2  ;;  %v5374_v53 = vand.u32 2147483648, %v7420_v17  ;;  %v5495_v31 = vld [vmem:[#allocation7 + $0x210] sm:$0xff]  ;;  %v5496_v59 = vld [vmem:[#allocation7 + $0x218] sm:$0xff] }
 0x6d5   :  { %v5234_v45 = vadd.f32 %v5233_v23, %v5213_v14  ;;  %5642 = vmatpush.msra.mxu2 %v5470_v2  ;;  %v5491_v37 = vld [vmem:[#allocation7 + $0x1d0] sm:$0xff]  ;;  %v5492_v0 = vld [vmem:[#allocation7 + $0x1d8] sm:$0xff] }
 0x6d6   :  { %v7445_v40 = vadd.f32 %v5379_v29, %v5378_v9  ;;  %v5366_v27 = vmul.f32 %v6207_v43, %v5365_v15  ;;  %v5375_v22 = vor.u32 1.1754944e-38, %v5374_v53  ;;  %v5487_v49 = vld [vmem:[#allocation7 + $0x190] sm:$0xff]  ;;  %v5488_v23 = vld [vmem:[#allocation7 + $0x198] sm:$0xff] }
 0x6d7   :  { %v5392_v55 = vadd.f32 %v5234_v45, %v6615_v19  ;;  %v5469_v19 = vld [vmem:[#allocation7 + $0x80] sm:$0xff]  ;;  %5643 = vmatpush.msra.mxu2 %v5466_v42  ;;  %v5483_v9 = vld [vmem:[#allocation7 + $0x150] sm:$0xff]  ;;  %v5484_v29 = vld [vmem:[#allocation7 + $0x158] sm:$0xff] }
 0x6d8   :  { %6210 = vtanh.f32 %v7445_v40  ;;  %v5367_v58 = vadd.f32 %v6207_v43, %v5366_v27  ;;  %5602 = vmatpush.msrb.mxu0 %v5469_v19  ;;  %v5479_v45 = vld [vmem:[#allocation7 + $0x110] sm:$0xff]  ;;  %v5480_v27 = vld [vmem:[#allocation7 + $0x118] sm:$0xff] }
 0x6d9   :  { %v5962_v21 = vmul.f32 -1.442695, %v5392_v55  ;;  %6212 = vpow2.f32 %v5961_v13  ;;  %5644 = vmatpush.msra.mxu2 %v5462_v11  ;;  %v5475_v4 = vld [vmem:[#allocation7 + $0xd0] sm:$0xff] }
 0x6da   :  { %v5371_v52 = vsel %vm7452_vm8, %v6207_v43, %v5367_v58  ;;  %5603 = vmatpush.msrb.mxu0 %v5465_v57  ;;  %v5504_v43 = vld [vmem:[#allocation7 + $0x298] sm:$0xff] }
 0x6db   :  { %6214 = vpow2.f32 %v5962_v21  ;;  %v5376_v3 = vsel %vm5373_vm9, %v5375_v22, %v5371_v52  ;;  %5709 = vmatpush.msrb.mxu2 %v5524_v25  ;;  %v5476_v21 = vld [vmem:[#allocation7 + $0xd8] sm:$0xff]  ;;  %v5467_v52 = vld [vmem:[#allocation7 + $0x50] sm:$0xff] }
 0x6dc   :  { %5604 = vmatpush.msrb.mxu0 %v5461_v63  ;;  %v5468_v22 = vld [vmem:[#allocation7 + $0x58] sm:$0xff] }
 0x6dd   :  { %5710 = vmatpush.msrb.mxu2 %v5520_v50 }
 0x6de   :  { %v6211_v17 = vpop.eup %6210  ;;  %5669 = vmatpush.msra.mxu0 %v5523_v61 }
 0x6df   :  { %v5382_v44 = vmul.f32 %v6211_v17, %v5376_v3  ;;  %v6213_v7 = vpop.eup %6212  ;;  %5711 = vmatpush.msrb.mxu2 %v5516_v32  ;;  %v5463_v17 = vld [vmem:[#allocation7 + $0x10] sm:$0xff] }
 0x6e0   :  { %5670 = vmatpush.msra.mxu0 %v5519_v18  ;;  %v7458_v51 = vadd.f32 1.0, %v6213_v7 }
 0x6e1   :  { %5625 = vmatmul.f32.vlgmr.msra.gmra.mxu1 %v5382_v44  ;;  %5665 = vmatmul.f32.vlgmr.msra.gmra.mxu3 %v5382_v44  ;;  %v6215_v35 = vpop.eup %6214 }
 0x6e2   :  { %5671 = vmatpush.msra.mxu0 %v5515_v46  ;;  %v7460_v47 = vadd.f32 1.0, %v6215_v35  ;;  %5712 = vmatpush.msrb.mxu2 %v5512_v54  ;;  %6216 = vrcp.f32 %v7458_v51  ;;  %vm5404_vm12 = vweird.f32 %v7458_v51  ;;  %v5410_v11 = vand.u32 2147483648, %v7458_v51 }
 0x6e4   :  { %5672 = vmatpush.msra.mxu0 %v5511_v26  ;;  %5713 = vmatpush.msrb.mxu2 %v5508_v56  ;;  %6218 = vrcp.f32 %v7460_v47  ;;  %v5429_v63 = vand.u32 2147483648, %v7460_v47  ;;  %vm5423_vm13 = vweird.f32 %v7460_v47  ;;  %v5427_v61 = vand.u32 2147483647, %v7460_v47 }
 0x6e5   :  { %v5411_v32 = vor.u32 1.1754944e-38, %v5410_v11 }
 0x6e6   :  { %5673 = vmatpush.msra.mxu0 %v5507_v1  ;;  %5714 = vmatpush.msrb.mxu2 %v5504_v43  ;;  %v5430_v46 = vor.u32 1.1754944e-38, %v5429_v63  ;;  %vm5428_vm1 = vcmp.eq.f32.partialorder %v5427_v61, 8.507059e+37 }
 0x6e8   :  { %5674 = vmatpush.msra.mxu0 %v5503_v12  ;;  %5715 = vmatpush.msrb.mxu2 %v5500_v10  ;;  %v7464_v24 = vpop.eup %6216 }
 0x6e9   :  { %5705 = vmatmul.f32.vlgmr.msrb.gmra.mxu1 %v5382_v44  ;;  %5745 = vmatmul.f32.vlgmr.msrb.gmra.mxu3 %v5382_v44  ;;  %v5400_v15 = vmul.f32 %v7464_v24, %v7458_v51  ;;  %vm5405_vm10 = vweird.f32 %v7464_v24  ;;  %v5408_v44 = vand.u32 2147483647, %v7458_v51 }
 0x6ea   :  { %5675 = vmatpush.msra.mxu0 %v5499_v5  ;;  %5716 = vmatpush.msrb.mxu2 %v5496_v59  ;;  %v7466_v30 = vpop.eup %6218  ;;  %vm5406_vm14 = vmor %vm5404_vm12, %vm5405_vm10 }
 0x6eb   :  { %v5419_v14 = vmul.f32 %v7466_v30, %v7460_v47  ;;  %v5401_v53 = vsub.f32 1.0, %v5400_v15  ;;  %vm5424_vm11 = vweird.f32 %v7466_v30  ;;  %vm5409_vm0 = vcmp.eq.f32.partialorder %v5408_v44, 8.507059e+37  ;;  %v5828_v15 = vld [vmem:[#allocation9 + $0x58] sm:$0xff] }
 0x6ec   :  { %5676 = vmatpush.msra.mxu0 %v5495_v31  ;;  %5717 = vmatpush.msrb.mxu2 %v5492_v0  ;;  %vm5425_vm15 = vmor %vm5423_vm13, %vm5424_vm11 }
 0x6ed   :  { %v5420_v58 = vsub.f32 1.0, %v5419_v14  ;;  %v5402_v42 = vmul.f32 %v7464_v24, %v5401_v53  ;;  %v5827_v14 = vld [vmem:[#allocation9 + $0x50] sm:$0xff]  ;;  %v5824_v53 = vld [vmem:[#allocation9 + $0x38] sm:$0xff] }
 0x6ee   :  { %5677 = vmatpush.msra.mxu0 %v5491_v37  ;;  %v5253_v39 = vpop.f32.mrf.mxu0  ;;  %5718 = vmatpush.msrb.mxu2 %v5488_v23  ;;  %v5831_v23 = vld [vmem:[#allocation9 + $0x70] sm:$0xff] }
 0x6ef   :  { %v5274_v13 = vadd.f32 %v5273_v62, %v5253_v39  ;;  %v5421_v57 = vmul.f32 %v7466_v30, %v5420_v58 }
 0x6f0   :  { %5678 = vmatpush.msra.mxu0 %v5487_v49  ;;  %5719 = vmatpush.msrb.mxu2 %v5484_v29  ;;  %v5829_v29 = vld [vmem:[#allocation9 + $0x60] sm:$0xff] }
 0x6f1   :  { %v5393_v19 = vadd.f32 %v5274_v13, %v6621_v33  ;;  %v5403_v33 = vadd.f32 %v7464_v24, %v5402_v42  ;;  %v5422_v3 = vadd.f32 %v7466_v30, %v5421_v57 }
 0x6f2   :  { %5679 = vmatpush.msra.mxu0 %v5483_v9  ;;  %5720 = vmatpush.msrb.mxu2 %v5480_v27  ;;  %v5830_v9 = vld [vmem:[#allocation9 + $0x68] sm:$0xff] }
 0x6f3   :  { %v5407_v7 = vsel %vm5406_vm14, %v7464_v24, %v5403_v33  ;;  %v5426_v18 = vsel %vm5425_vm15, %v7466_v30, %v5422_v3  ;;  %v5826_v27 = vld [vmem:[#allocation9 + $0x48] sm:$0xff] }
 0x6f4   :  { %v5293_v38 = vpop.f32.mrf.mxu2  ;;  %5680 = vmatpush.msra.mxu0 %v5479_v45  ;;  %5721 = vmatpush.msrb.mxu2 %v5476_v21  ;;  %v5412_v26 = vsel %vm5409_vm0, %v5411_v32, %v5407_v7  ;;  %v5431_v54 = vsel %vm5428_vm1, %v5430_v46, %v5426_v18 }
 0x6f5   :  { %v5314_v55 = vadd.f32 %v5313_v16, %v5293_v38  ;;  %v5453_v51 = vmul.f32 %v5431_v54, %v7390_v48  ;;  %v5832_v48 = vld [vmem:[#allocation9 + $0x78] sm:$0xff]  ;;  %v5825_v38 = vld [vmem:[#allocation9 + $0x40] sm:$0xff] }
 0x6f6   :  { %5681 = vmatpush.msra.mxu0 %v5475_v4  ;;  %5722 = vmatpush.msrb.mxu2 %v5472_v8  ;;  %v5823_v4 = vld [vmem:[#allocation9 + $0x30] sm:$0xff] }
 0x6f7   :  { %v5394_v20 = vadd.f32 %v5314_v55, %v6619_v28  ;;  %v5464_v28 = vld [vmem:[#allocation7 + $0x18] sm:$0xff] }
 0x6f8   :  { %5682 = vmatpush.msra.mxu0 %v5471_v60  ;;  %5723 = vmatpush.msrb.mxu2 %v5468_v22  ;;  %v5822_v60 = vld [vmem:[#allocation9 + $0x28] sm:$0xff] }
 0x6f9   :  { %v5963_v2 = vmul.f32 -1.442695, %v5394_v20 }
 0x6fa   :  { %5683 = vmatpush.msra.mxu0 %v5467_v52  ;;  %5724 = vmatpush.msrb.mxu2 %v5464_v28  ;;  %v5819_v52 = vld [vmem:[#allocation9 + $0x10] sm:$0xff]  ;;  %v5818_v28 = vld [vmem:[#allocation9 + $0x8] sm:$0xff] }
 0x6fb   :  { %6220 = vpow2.f32 %v5963_v2  ;;  %v5820_v2 = vld [vmem:[#allocation9 + $0x18] sm:$0xff] }
 0x6fc   :  { %6222 = vtanh.f32 %v5393_v19  ;;  %5684 = vmatpush.msra.mxu0 %v5463_v17  ;;  %v5821_v19 = vld [vmem:[#allocation9 + $0x20] sm:$0xff] }
 0x701   :  { %v6221_v25 = vpop.eup %6220 }
 0x702   :  { %v5437_v50 = vadd.f32 1.0, %v6221_v25  ;;  %v6223_v35 = vpop.eup %6222 }
 0x703   :  { %v5454_v1 = vmul.f32 %v6223_v35, %v5412_v26 }
 0x704   :  { %6224 = vrcp.f32 %v5437_v50  ;;  %v5449_v5 = vand.u32 2147483648, %v5437_v50  ;;  %v5447_v31 = vand.u32 2147483647, %v5437_v50  ;;  %vm5443_vm3 = vweird.f32 %v5437_v50 }
 0x705   :  { %v5455_v47 = vadd.f32 %v5454_v1, %v5453_v51 }
 0x706   :  { %v5450_v24 = vor.u32 1.1754944e-38, %v5449_v5  ;;  %vm5448_vm5 = vcmp.eq.f32.partialorder %v5447_v31, 8.507059e+37 }
 0x707   :  { %6226 = vtanh.f32 %v5455_v47 }
 0x70a   :  { %v6225_v56 = vpop.eup %6224 }
 0x70b   :  { %v5439_v12 = vmul.f32 %v6225_v56, %v5437_v50  ;;  %vm5444_vm2 = vweird.f32 %v6225_v56 }
 0x70c   :  { %vm5445_vm4 = vmor %vm5443_vm3, %vm5444_vm2 }
 0x70d   :  { %v5440_v43 = vsub.f32 1.0, %v5439_v12  ;;  %v6227_v37 = vpop.eup %6226 }
 0x70f   :  { %v5441_v10 = vmul.f32 %v6225_v56, %v5440_v43 }
 0x711   :  { %v5442_v59 = vadd.f32 %v6225_v56, %v5441_v10 }
 0x713   :  { %v5446_v30 = vsel %vm5445_vm4, %v6225_v56, %v5442_v59 }
 0x714   :  { %v5451_v0 = vsel %vm5448_vm5, %v5450_v24, %v5446_v30 }
 0x715   :  { %v5457_v49 = vmul.f32 %v6227_v37, %v5451_v0 }
 0x717   :  { %5605 = vmatmul.f32.vlgmr.msrb.gmra.mxu0 %v5457_v49  ;;  %5645 = vmatmul.f32.vlgmr.msra.gmra.mxu2 %v5457_v49 }
 0x718   :  { %5837 = vmatpush.msrb.mxu0 %v5832_v48 }
 0x71a   :  { %5838 = vmatpush.msrb.mxu0 %v5831_v23 }
 0x71c   :  { %5839 = vmatpush.msrb.mxu0 %v5830_v9 }
 0x71e   :  { %5840 = vmatpush.msrb.mxu0 %v5829_v29 }
 0x71f   :  { %5685 = vmatmul.f32.vlgmr.msra.gmra.mxu0 %v5457_v49  ;;  %5725 = vmatmul.f32.vlgmr.msrb.gmra.mxu2 %v5457_v49 }
 0x720   :  { %5841 = vmatpush.msrb.mxu0 %v5828_v15 }
 0x722   :  { %5842 = vmatpush.msrb.mxu0 %v5827_v14 }
 0x724   :  { %5843 = vmatpush.msrb.mxu0 %v5826_v27 }
 0x726   :  { %5844 = vmatpush.msrb.mxu0 %v5825_v38 }
 0x728   :  { %5845 = vmatpush.msrb.mxu0 %v5824_v53 }
 0x72a   :  { %5846 = vmatpush.msrb.mxu0 %v5823_v4 }
 0x72c   :  { %5847 = vmatpush.msrb.mxu0 %v5822_v60 }
 0x72e   :  { %5848 = vmatpush.msrb.mxu0 %v5821_v19 }
 0x730   :  { %5849 = vmatpush.msrb.mxu0 %v5820_v2 }
 0x732   :  { %5850 = vmatpush.msrb.mxu0 %v5819_v52 }
 0x734   :  { %5851 = vmatpush.msrb.mxu0 %v5818_v28 }
 0x75e   :  { %v5626_v39 = vpop.f32.mrf.mxu1 }
 0x764   :  { %v5666_v13 = vpop.f32.mrf.mxu3 }
 0x766   :  { %v5706_v25 = vpop.f32.mrf.mxu1 }
 0x76c   :  { %v5746_v22 = vpop.f32.mrf.mxu3 }
 0x794   :  { %v5606_v62 = vpop.f32.mrf.mxu0 }
 0x795   :  { %v5627_v45 = vadd.f32 %v5626_v39, %v5606_v62 }
 0x797   :  { %v5749_v16 = vadd.f32 %v5627_v45, %v6629_v41 }
 0x799   :  { %v5964_v55 = vmul.f32 -1.442695, %v5749_v16 }
 0x79a   :  { %v5646_v58 = vpop.f32.mrf.mxu2 }
 0x79b   :  { %6228 = vpow2.f32 %v5964_v55  ;;  %v5667_v20 = vadd.f32 %v5666_v13, %v5646_v58 }
 0x79c   :  { %v5686_v44 = vpop.f32.mrf.mxu0 }
 0x79d   :  { %v5750_v21 = vadd.f32 %v5667_v20, %v6633_v6  ;;  %v5817_v6 = vld [vmem:[#allocation9] sm:$0xff]  ;;  %v5707_v18 = vadd.f32 %v5706_v25, %v5686_v44 }
 0x79e   :  { %5852 = vmatpush.msrb.mxu0 %v5817_v6 }
 0x79f   :  { %v5965_v8 = vmul.f32 -1.442695, %v5750_v21  ;;  %v5751_v26 = vadd.f32 %v5707_v18, %v6651_v36 }
 0x7a1   :  { %v6229_v41 = vpop.eup %6228  ;;  %6230 = vpow2.f32 %v5965_v8 }
 0x7a2   :  { %v5756_v57 = vadd.f32 1.0, %v6229_v41  ;;  %v5726_v42 = vpop.f32.mrf.mxu2 }
 0x7a3   :  { %v5747_v17 = vadd.f32 %v5746_v22, %v5726_v42 }
 0x7a4   :  { %6232 = vrcp.f32 %v5756_v57  ;;  %v5768_v51 = vand.u32 2147483648, %v5756_v57  ;;  %vm5762_vm7 = vweird.f32 %v5756_v57  ;;  %v5766_v47 = vand.u32 2147483647, %v5756_v57 }
 0x7a5   :  { %v5752_v33 = vadd.f32 %v5747_v17, %v6637_v34 }
 0x7a6   :  { %v5769_v31 = vor.u32 1.1754944e-38, %v5768_v51  ;;  %vm5767_vm11 = vcmp.eq.f32.partialorder %v5766_v47, 8.507059e+37 }
 0x7a7   :  { %v6231_v3 = vpop.eup %6230  ;;  %v5966_v63 = vmul.f32 -1.442695, %v5752_v33 }
 0x7a8   :  { %v5775_v11 = vadd.f32 1.0, %v6231_v3 }
 0x7a9   :  { %6234 = vpow2.f32 %v5966_v63 }
 0x7aa   :  { %v6233_v61 = vpop.eup %6232  ;;  %6236 = vrcp.f32 %v5775_v11  ;;  %v5787_v12 = vand.u32 2147483648, %v5775_v11  ;;  %v5785_v10 = vand.u32 2147483647, %v5775_v11  ;;  %vm5781_vm10 = vweird.f32 %v5775_v11 }
 0x7ab   :  { %v5758_v7 = vmul.f32 %v6233_v61, %v5756_v57  ;;  %vm5763_vm6 = vweird.f32 %v6233_v61 }
 0x7ac   :  { %vm5764_vm8 = vmor %vm5762_vm7, %vm5763_vm6  ;;  %v5788_v24 = vor.u32 1.1754944e-38, %v5787_v12  ;;  %vm5786_vm13 = vcmp.eq.f32.partialorder %v5785_v10, 8.507059e+37 }
 0x7ad   :  { %v5759_v50 = vsub.f32 1.0, %v5758_v7 }
 0x7af   :  { %v6235_v35 = vpop.eup %6234  ;;  %v5760_v46 = vmul.f32 %v6233_v61, %v5759_v50 }
 0x7b0   :  { %v6237_v32 = vpop.eup %6236  ;;  %v5795_v34 = vadd.f32 1.0, %v6235_v35 }
 0x7b1   :  { %v5777_v54 = vmul.f32 %v6237_v32, %v5775_v11  ;;  %v5761_v1 = vadd.f32 %v6233_v61, %v5760_v46  ;;  %vm5782_vm9 = vweird.f32 %v6237_v32 }
 0x7b2   :  { %6238 = vrcp.f32 %v5795_v34  ;;  %vm5783_vm12 = vmor %vm5781_vm10, %vm5782_vm9  ;;  %v5807_v39 = vand.u32 2147483648, %v5795_v34  ;;  %vm5801_vm15 = vweird.f32 %v5795_v34  ;;  %v5805_v45 = vand.u32 2147483647, %v5795_v34 }
 0x7b3   :  { %v5778_v56 = vsub.f32 1.0, %v5777_v54  ;;  %6240 = vtanh.f32 %v5751_v26  ;;  %v5765_v5 = vsel %vm5764_vm8, %v6233_v61, %v5761_v1 }
 0x7b4   :  { %v5770_v30 = vsel %vm5767_vm11, %v5769_v31, %v5765_v5  ;;  %v5808_v16 = vor.u32 1.1754944e-38, %v5807_v39  ;;  %vm5806_vm1 = vcmp.eq.f32.partialorder %v5805_v45, 8.507059e+37 }
 0x7b5   :  { %v5779_v43 = vmul.f32 %v6237_v32, %v5778_v56 }
 0x7b7   :  { %v5780_v36 = vadd.f32 %v6237_v32, %v5779_v43 }
 0x7b8   :  { %v6239_v59 = vpop.eup %6238 }
 0x7b9   :  { %v5784_v37 = vsel %vm5783_vm12, %v6237_v32, %v5780_v36  ;;  %v5797_v0 = vmul.f32 %v6239_v59, %v5795_v34  ;;  %v6241_v49 = vpop.eup %6240  ;;  %vm5802_vm14 = vweird.f32 %v6239_v59 }
 0x7ba   :  { %v5789_v48 = vsel %vm5786_vm13, %v5788_v24, %v5784_v37  ;;  %v5812_v9 = vmul.f32 %v6241_v49, %v5770_v30  ;;  %vm5803_vm0 = vmor %vm5801_vm15, %vm5802_vm14 }
 0x7bb   :  { %v5811_v23 = vmul.f32 %v5789_v48, %v7445_v40  ;;  %v5798_v29 = vsub.f32 1.0, %v5797_v0  ;;  %v5987_v40 = vld [vmem:[%s7505_s5] ss:$0 sm:$0xff] }
 0x7bd   :  { %v5813_v15 = vadd.f32 %v5812_v9, %v5811_v23  ;;  %v5799_v14 = vmul.f32 %v6239_v59, %v5798_v29 }
 0x7bf   :  { %6242 = vtanh.f32 %v5813_v15  ;;  %v5800_v62 = vadd.f32 %v6239_v59, %v5799_v14 }
 0x7c1   :  { %v5804_v27 = vsel %vm5803_vm0, %v6239_v59, %v5800_v62 }
 0x7c2   :  { %v5809_v13 = vsel %vm5806_vm1, %v5808_v16, %v5804_v27 }
 0x7c5   :  { %v6243_v38 = vpop.eup %6242 }
 0x7c6   :  { %v5815_v55 = vmul.f32 %v6243_v38, %v5809_v13 }
 0x7c8   :  { %5853 = vmatmul.f32.vlgmr.msrb.gmra.mxu0 %v5815_v55 }
 0x845   :  { %v5854_v53 = vpop.f32.mrf.mxu0 }
 0x846   :  { %v5855_v58 = vadd.f32 %v5987_v40, %v5854_v53 }
 0x848   :  { %5857 = vst [vmem:[#allocation10] sm:$0xff] %v5855_v58 }
 0x849   :  { %5868 = dma.vmem_to_hbm [thread:$0]  %s5864_s10, 128, %s5866_s12, [#allocation6]  }
 0x84a   :  { %6344 = dma.done.wait [#allocation6], 128  }
 0x84b   :  { %6345 = vsyncadd [#allocation6], 4294967168 }
 0x84c   :  { %5873 = vsyncpa [#allocation5], 1 }
 0x84d   :  { %5874 = vsyncpa [#allocation8], 1 }
 0x84e   :  { %5875 = vsyncpa [#allocation6], 1 }

</bundles_post_ra>
